<compile_context>
chip_gen: v7x
topology: tpu7x:2x2x1
jax: 0.10.0
libtpu: 0.0.40
codegen_flags: <defaults>
</compile_context>

<pallas_src>
from functools import partial

import jax
import jax.numpy as jnp
from jax import lax
from jax.experimental import pallas as pl
from jax.experimental.pallas import tpu as pltpu

# ------------------------------ configuration ------------------------------
B = 2          # batch
N_MELS = 8     # spectrogram height (mel bins)
FRAMES = 8     # spectrogram frames -> output width 256 * FRAMES = 2048
UP = 16        # per-stage width upsampling factor (stride)
KW = 32        # width kernel taps


# ------------------------------ Pallas kernel ------------------------------
def _convt_stage(x, spread, w_ref, bias, leaky_slope=0.4):
    """One ConvTranspose2d(1,1,[3,32],stride=[1,16],pad=[1,8]) + bias + leaky_relu.

    x:      (M, W)    input plane (height on sublanes, width on lanes)
    spread: (W, 16W)  0/1 matrix, spread[a, 16a+r] = 1  ("repeat each column x16")
    w_ref:  (9, 16W)  lane-tiled weights; row 3*kh + (delta+1) holds Wmat[kh, delta, r]
    bias:   (1, 1)
    returns (M, 16W) in the final interleaved (lane-dense) layout.
    """
    m = x.shape[0]
    l = spread.shape[-1]

    # r0[m, 16a+r] = x[m, a]; 0/1 matrix + HIGHEST precision keeps this exact in f32.
    r0 = jnp.dot(x, spread, preferred_element_type=jnp.float32,
                 precision=lax.Precision.HIGHEST)

    col = lax.broadcasted_iota(jnp.int32, (m, l), 1)
    row = lax.broadcasted_iota(jnp.int32, (m, l), 0)

    # Width neighbours (delta = -1 / +1): non-negative roll shifts + zero-fill masks.
    r_m = jnp.where(col >= UP, pltpu.roll(r0, UP, axis=1), 0.0)          # x[m, a-1]
    r_p = jnp.where(col < l - UP, pltpu.roll(r0, l - UP, axis=1), 0.0)   # x[m, a+1]

    w = w_ref[...]                                   # (9, 16W)
    t0 = r_m * w[0:1] + r0 * w[1:2] + r_p * w[2:3]   # kh = 0 (pairs with x[m+1, .])
    t1 = r_m * w[3:4] + r0 * w[4:5] + r_p * w[5:6]   # kh = 1 (pairs with x[m,   .])
    t2 = r_m * w[6:7] + r0 * w[7:8] + r_p * w[8:9]   # kh = 2 (pairs with x[m-1, .])

    # Height shifts (zero padding of 1 row on each side), non-negative rolls + masks.
    up = jnp.where(row < m - 1, pltpu.roll(t0, m - 1, axis=0), 0.0)      # t0[m+1]
    dn = jnp.where(row >= 1, pltpu.roll(t2, 1, axis=0), 0.0)             # t2[m-1]

    acc = up + t1 + dn + bias
    return jnp.where(acc >= 0.0, acc, leaky_slope * acc)                 # leaky_relu(0.4)


def _upsampler_kernel(x_ref, s1_ref, w1_ref, s2_ref, w2_ref, b_ref, o_ref):
    x = x_ref[0, 0]                                              # (M, F)
    y = _convt_stage(x, s1_ref[...], w1_ref, b_ref[0:1, 0:1])    # (M, 16F)   stays in VMEM
    z = _convt_stage(y, s2_ref[...], w2_ref, b_ref[1:2, 0:1])    # (M, 256F)
    o_ref[0] = z.astype(o_ref.dtype)


# --------------------- one-time parameter preprocessing ---------------------
def prepare_upsampler_params(conv1_w, conv1_b, conv2_w, conv2_b, frames):
    """Hoisted weight prep (runs once, NOT per forward step).

    conv*_w: (1, 1, 3, 32) torch ConvTranspose2d weight layout; conv*_b: (1,).
    """
    def wmat_rows(weight, width):
        wk = weight[0, 0]                                                   # (3, 32)
        r = jnp.arange(UP)
        # delta = a_index_offset of the contributing input column for output phase r:
        w_dm1 = jnp.where(r < 8, wk[:, jnp.clip(r + 24, 0, KW - 1)], 0.0)   # delta = -1
        w_d0 = wk[:, r + 8]                                                 # delta =  0
        w_dp1 = jnp.where(r >= 8, wk[:, jnp.clip(r - 8, 0, KW - 1)], 0.0)   # delta = +1
        wmat = jnp.stack([w_dm1, w_d0, w_dp1], axis=1)                      # (3, 3, 16)
        # Lane-tile the 16-phase pattern across the whole output width.
        return jnp.tile(wmat, (1, 1, width)).reshape(9, UP * width).astype(jnp.float32)

    def spread(width):
        return (jnp.arange(UP * width)[None, :] // UP
                == jnp.arange(width)[:, None]).astype(jnp.float32)          # (W, 16W)

    return {
        "s1": spread(frames),
        "w1": wmat_rows(conv1_w, frames),
        "s2": spread(UP * frames),
        "w2": wmat_rows(conv2_w, UP * frames),
        "b": jnp.stack([conv1_b[0], conv2_b[0]]).reshape(2, 1).astype(jnp.float32),
    }


# ------------------------------ forward wrapper ------------------------------
def spectrogram_upsampler(spec, prep):
    """spec: (B, 1, M, F) NCHW float32 -> (B, M, 256*F)  (channel squeezed, as in torch)."""
    b, c, m_rows, f = spec.shape
    assert c == 1
    l1 = UP * f
    l2 = UP * UP * f
    return pl.pallas_call(
        _upsampler_kernel,
        out_shape=jax.ShapeDtypeStruct((b, m_rows, l2), spec.dtype),
        grid=(b,),
        in_specs=[
            pl.BlockSpec((1, 1, m_rows, f), lambda i: (i, 0, 0, 0)),   # spectrogram
            pl.BlockSpec((f, l1), lambda i: (0, 0)),                   # spread matrix, stage 1
            pl.BlockSpec((9, l1), lambda i: (0, 0)),                   # tiled weights, stage 1
            pl.BlockSpec((l1, l2), lambda i: (0, 0)),                  # spread matrix, stage 2
            pl.BlockSpec((9, l2), lambda i: (0, 0)),                   # tiled weights, stage 2
            pl.BlockSpec((2, 1), lambda i: (0, 0)),                    # biases [b1, b2]
        ],
        out_specs=pl.BlockSpec((1, m_rows, l2), lambda i: (i, 0, 0)),  # lane-dense (2048 lanes)
        compiler_params=pltpu.CompilerParams(dimension_semantics=("parallel",)),
    )(spec, prep["s1"], prep["w1"], prep["s2"], prep["w2"], prep["b"])


# ----------------------- plain-JAX reference (self-check) -----------------------
def _reference_upsampler(spec, conv1_w, conv1_b, conv2_w, conv2_b):
    """Reference via explicit im2col (same transposed-conv derivation, no Pallas)."""
    def stage(x, weight, bias):
        b, h, w = x.shape
        wk = weight[0, 0]
        r = jnp.arange(UP)
        w_dm1 = jnp.where(r < 8, wk[:, jnp.clip(r + 24, 0, KW - 1)], 0.0)
        w_d0 = wk[:, r + 8]
        w_dp1 = jnp.where(r >= 8, wk[:, jnp.clip(r - 8, 0, KW - 1)], 0.0)
        wmat = jnp.stack([w_dm1, w_d0, w_dp1], axis=1).reshape(9, UP)
        xp = jnp.pad(x, ((0, 0), (1, 1), (1, 1)))
        cols = [xp[:, 2 - kh:2 - kh + h, dj:dj + w]
                for kh in range(3) for dj in range(3)]
        patches = jnp.stack(cols, axis=-1).reshape(b * h * w, 9)
        y = jnp.dot(patches, wmat, precision=lax.Precision.HIGHEST) + bias[0]
        y = jnp.where(y >= 0.0, y, 0.4 * y)
        return y.reshape(b, h, w, UP).reshape(b, h, w * UP)

    x = spec[:, 0]
    x = stage(x, conv1_w, conv1_b)
    x = stage(x, conv2_w, conv2_b)
    return x


if __name__ == "__main__":
    key = jax.random.PRNGKey(0)
    k_spec, k_w1, k_b1, k_w2, k_b2 = jax.random.split(key, 5)
    spec = jax.random.normal(k_spec, (B, 1, N_MELS, FRAMES), dtype=jnp.float32)
    conv1_w = 0.1 * jax.random.normal(k_w1, (1, 1, 3, KW), dtype=jnp.float32)
    conv1_b = 0.05 * jax.random.normal(k_b1, (1,), dtype=jnp.float32)
    conv2_w = 0.1 * jax.random.normal(k_w2, (1, 1, 3, KW), dtype=jnp.float32)
    conv2_b = 0.05 * jax.random.normal(k_b2, (1,), dtype=jnp.float32)

    # One-time weight preprocessing, kept out of the jitted per-step forward.
    prep = jax.block_until_ready(
        prepare_upsampler_params(conv1_w, conv1_b, conv2_w, conv2_b, FRAMES))

    fwd = jax.jit(spectrogram_upsampler)
    out = jax.block_until_ready(fwd(spec, prep))
    assert out.shape == (B, N_MELS, 256 * FRAMES) and out.dtype == jnp.float32

    ref = jax.block_until_ready(
        jax.jit(_reference_upsampler)(spec, conv1_w, conv1_b, conv2_w, conv2_b))
    assert jnp.allclose(out, ref, rtol=1e-3, atol=1e-4), float(jnp.max(jnp.abs(out - ref)))

    print("KERNEL_OK")
</pallas_src>

<mosaic_0001>
module attributes {stable_mosaic.version = 11 : i64} {
  func.func @_upsampler_kernel(%arg0: i32, %arg1: memref<1x1x8x8xf32, #tpu.memory_space<vmem>>, %arg2: memref<8x128xf32, #tpu.memory_space<vmem>>, %arg3: memref<9x128xf32, #tpu.memory_space<vmem>>, %arg4: memref<128x2048xf32, #tpu.memory_space<vmem>>, %arg5: memref<9x2048xf32, #tpu.memory_space<vmem>>, %arg6: memref<2x1xf32, #tpu.memory_space<vmem>>, %arg7: memref<1x8x2048xf32, #tpu.memory_space<vmem>>) attributes {dimension_semantics = [#tpu.dimension_semantics<parallel>], iteration_bounds = array<i64: 2>, scalar_prefetch = 0 : i64, scratch_operands = 0 : i64, tpu.core_type = #tpu.core_type<tc>, window_params = [{transform_indices = @transform_0, window_bounds = array<i64: 1, 1, 8, 8>}, {pipeline_mode = #tpu.pipeline_mode<synchronous>, transform_indices = @transform_1, window_bounds = array<i64: 8, 128>}, {pipeline_mode = #tpu.pipeline_mode<synchronous>, transform_indices = @transform_2, window_bounds = array<i64: 9, 128>}, {pipeline_mode = #tpu.pipeline_mode<synchronous>, transform_indices = @transform_3, window_bounds = array<i64: 128, 2048>}, {pipeline_mode = #tpu.pipeline_mode<synchronous>, transform_indices = @transform_4, window_bounds = array<i64: 9, 2048>}, {pipeline_mode = #tpu.pipeline_mode<synchronous>, transform_indices = @transform_5, window_bounds = array<i64: 2, 1>}, {transform_indices = @transform_6, window_bounds = array<i64: 1, 8, 2048>}]} {
    %c0 = arith.constant 0 : index
    %c0_0 = arith.constant 0 : index
    %c0_1 = arith.constant 0 : index
    %c0_2 = arith.constant 0 : index
    %0 = vector.load %arg1[%c0, %c0_0, %c0_1, %c0_2] : memref<1x1x8x8xf32, #tpu.memory_space<vmem>>, vector<1x1x8x8xf32>
    %1 = vector.shape_cast %0 : vector<1x1x8x8xf32> to vector<8x8xf32>
    %c0_3 = arith.constant 0 : index
    %c0_4 = arith.constant 0 : index
    %2 = vector.load %arg2[%c0_3, %c0_4] : memref<8x128xf32, #tpu.memory_space<vmem>>, vector<8x128xf32>
    %c0_5 = arith.constant 0 : index
    %c0_6 = arith.constant 0 : index
    %3 = vector.load %arg6[%c0_5, %c0_6] : memref<2x1xf32, #tpu.memory_space<vmem>>, vector<1x1xf32>
    %cst = arith.constant dense<0.000000e+00> : vector<8x128xf32>
    %4 = tpu.matmul %1, %2, %cst {dimension_numbers = #tpu.dot_dimension_numbers<[1], [0], [0], [1], [0, 0, 1, 1], [], []>, precision = #tpu.contract_precision<fp32>} : vector<8x8xf32>, vector<8x128xf32>, vector<8x128xf32> -> vector<8x128xf32>
    %5 = tpu.iota {dimensions = array<i32: 1>} : vector<8x128xi32>
    %6 = tpu.iota {dimensions = array<i32: 0>} : vector<8x128xi32>
    %c16_i32 = arith.constant 16 : i32
    %7 = vector.broadcast %c16_i32 : i32 to vector<8x128xi32>
    %8 = arith.cmpi sge, %5, %7 : vector<8x128xi32>
    %c16_i32_7 = arith.constant 16 : i32
    %9 = tpu.dynamic_rotate %4 by %c16_i32_7 dim 1 : vector<8x128xf32>, i32 -> vector<8x128xf32>
    %cst_8 = arith.constant 0.000000e+00 : f32
    %10 = vector.broadcast %cst_8 : f32 to vector<8x128xf32>
    %11 = arith.select %8, %9, %10 : vector<8x128xi1>, vector<8x128xf32>
    %c112_i32 = arith.constant 112 : i32
    %12 = vector.broadcast %c112_i32 : i32 to vector<8x128xi32>
    %13 = arith.cmpi slt, %5, %12 : vector<8x128xi32>
    %c112_i32_9 = arith.constant 112 : i32
    %14 = tpu.dynamic_rotate %4 by %c112_i32_9 dim 1 : vector<8x128xf32>, i32 -> vector<8x128xf32>
    %cst_10 = arith.constant 0.000000e+00 : f32
    %15 = vector.broadcast %cst_10 : f32 to vector<8x128xf32>
    %16 = arith.select %13, %14, %15 : vector<8x128xi1>, vector<8x128xf32>
    %c0_11 = arith.constant 0 : index
    %c0_12 = arith.constant 0 : index
    %17 = vector.load %arg3[%c0_11, %c0_12] : memref<9x128xf32, #tpu.memory_space<vmem>>, vector<9x128xf32>
    %18 = vector.extract_strided_slice %17 {offsets = [0, 0], sizes = [1, 128], strides = [1, 1]} : vector<9x128xf32> to vector<1x128xf32>
    %19 = vector.broadcast %18 : vector<1x128xf32> to vector<8x128xf32>
    %20 = arith.mulf %11, %19 : vector<8x128xf32>
    %21 = vector.extract_strided_slice %17 {offsets = [1, 0], sizes = [1, 128], strides = [1, 1]} : vector<9x128xf32> to vector<1x128xf32>
    %22 = vector.broadcast %21 : vector<1x128xf32> to vector<8x128xf32>
    %23 = arith.mulf %4, %22 : vector<8x128xf32>
    %24 = arith.addf %20, %23 : vector<8x128xf32>
    %25 = vector.extract_strided_slice %17 {offsets = [2, 0], sizes = [1, 128], strides = [1, 1]} : vector<9x128xf32> to vector<1x128xf32>
    %26 = vector.broadcast %25 : vector<1x128xf32> to vector<8x128xf32>
    %27 = arith.mulf %16, %26 : vector<8x128xf32>
    %28 = arith.addf %24, %27 : vector<8x128xf32>
    %29 = vector.extract_strided_slice %17 {offsets = [3, 0], sizes = [1, 128], strides = [1, 1]} : vector<9x128xf32> to vector<1x128xf32>
    %30 = vector.broadcast %29 : vector<1x128xf32> to vector<8x128xf32>
    %31 = arith.mulf %11, %30 : vector<8x128xf32>
    %32 = vector.extract_strided_slice %17 {offsets = [4, 0], sizes = [1, 128], strides = [1, 1]} : vector<9x128xf32> to vector<1x128xf32>
    %33 = vector.broadcast %32 : vector<1x128xf32> to vector<8x128xf32>
    %34 = arith.mulf %4, %33 : vector<8x128xf32>
    %35 = arith.addf %31, %34 : vector<8x128xf32>
    %36 = vector.extract_strided_slice %17 {offsets = [5, 0], sizes = [1, 128], strides = [1, 1]} : vector<9x128xf32> to vector<1x128xf32>
    %37 = vector.broadcast %36 : vector<1x128xf32> to vector<8x128xf32>
    %38 = arith.mulf %16, %37 : vector<8x128xf32>
    %39 = arith.addf %35, %38 : vector<8x128xf32>
    %40 = vector.extract_strided_slice %17 {offsets = [6, 0], sizes = [1, 128], strides = [1, 1]} : vector<9x128xf32> to vector<1x128xf32>
    %41 = vector.broadcast %40 : vector<1x128xf32> to vector<8x128xf32>
    %42 = arith.mulf %11, %41 : vector<8x128xf32>
    %43 = vector.extract_strided_slice %17 {offsets = [7, 0], sizes = [1, 128], strides = [1, 1]} : vector<9x128xf32> to vector<1x128xf32>
    %44 = vector.broadcast %43 : vector<1x128xf32> to vector<8x128xf32>
    %45 = arith.mulf %4, %44 : vector<8x128xf32>
    %46 = arith.addf %42, %45 : vector<8x128xf32>
    %47 = vector.extract_strided_slice %17 {offsets = [8, 0], sizes = [1, 128], strides = [1, 1]} : vector<9x128xf32> to vector<1x128xf32>
    %48 = vector.broadcast %47 : vector<1x128xf32> to vector<8x128xf32>
    %49 = arith.mulf %16, %48 : vector<8x128xf32>
    %50 = arith.addf %46, %49 : vector<8x128xf32>
    %c7_i32 = arith.constant 7 : i32
    %51 = vector.broadcast %c7_i32 : i32 to vector<8x128xi32>
    %52 = arith.cmpi slt, %6, %51 : vector<8x128xi32>
    %c7_i32_13 = arith.constant 7 : i32
    %53 = tpu.dynamic_rotate %28 by %c7_i32_13 dim 0 : vector<8x128xf32>, i32 -> vector<8x128xf32>
    %cst_14 = arith.constant 0.000000e+00 : f32
    %54 = vector.broadcast %cst_14 : f32 to vector<8x128xf32>
    %55 = arith.select %52, %53, %54 : vector<8x128xi1>, vector<8x128xf32>
    %c1_i32 = arith.constant 1 : i32
    %56 = vector.broadcast %c1_i32 : i32 to vector<8x128xi32>
    %57 = arith.cmpi sge, %6, %56 : vector<8x128xi32>
    %c1_i32_15 = arith.constant 1 : i32
    %58 = tpu.dynamic_rotate %50 by %c1_i32_15 dim 0 : vector<8x128xf32>, i32 -> vector<8x128xf32>
    %cst_16 = arith.constant 0.000000e+00 : f32
    %59 = vector.broadcast %cst_16 : f32 to vector<8x128xf32>
    %60 = arith.select %57, %58, %59 : vector<8x128xi1>, vector<8x128xf32>
    %61 = arith.addf %55, %39 : vector<8x128xf32>
    %62 = arith.addf %61, %60 : vector<8x128xf32>
    %63 = vector.broadcast %3 : vector<1x1xf32> to vector<8x128xf32>
    %64 = arith.addf %62, %63 : vector<8x128xf32>
    %cst_17 = arith.constant 0.000000e+00 : f32
    %65 = vector.broadcast %cst_17 : f32 to vector<8x128xf32>
    %66 = arith.cmpf oge, %64, %65 : vector<8x128xf32>
    %cst_18 = arith.constant 4.000000e-01 : f32
    %67 = vector.broadcast %cst_18 : f32 to vector<8x128xf32>
    %68 = arith.mulf %67, %64 : vector<8x128xf32>
    %69 = arith.select %66, %64, %68 : vector<8x128xi1>, vector<8x128xf32>
    %c0_19 = arith.constant 0 : index
    %c0_20 = arith.constant 0 : index
    %70 = vector.load %arg4[%c0_19, %c0_20] : memref<128x2048xf32, #tpu.memory_space<vmem>>, vector<128x2048xf32>
    %c1 = arith.constant 1 : index
    %c0_21 = arith.constant 0 : index
    %71 = vector.load %arg6[%c1, %c0_21] : memref<2x1xf32, #tpu.memory_space<vmem>>, vector<1x1xf32>
    %cst_22 = arith.constant dense<0.000000e+00> : vector<8x2048xf32>
    %72 = tpu.matmul %69, %70, %cst_22 {dimension_numbers = #tpu.dot_dimension_numbers<[1], [0], [0], [1], [0, 0, 1, 1], [], []>, precision = #tpu.contract_precision<fp32>} : vector<8x128xf32>, vector<128x2048xf32>, vector<8x2048xf32> -> vector<8x2048xf32>
    %73 = tpu.iota {dimensions = array<i32: 1>} : vector<8x2048xi32>
    %74 = tpu.iota {dimensions = array<i32: 0>} : vector<8x2048xi32>
    %c16_i32_23 = arith.constant 16 : i32
    %75 = vector.broadcast %c16_i32_23 : i32 to vector<8x2048xi32>
    %76 = arith.cmpi sge, %73, %75 : vector<8x2048xi32>
    %c16_i32_24 = arith.constant 16 : i32
    %77 = tpu.dynamic_rotate %72 by %c16_i32_24 dim 1 : vector<8x2048xf32>, i32 -> vector<8x2048xf32>
    %cst_25 = arith.constant 0.000000e+00 : f32
    %78 = vector.broadcast %cst_25 : f32 to vector<8x2048xf32>
    %79 = arith.select %76, %77, %78 : vector<8x2048xi1>, vector<8x2048xf32>
    %c2032_i32 = arith.constant 2032 : i32
    %80 = vector.broadcast %c2032_i32 : i32 to vector<8x2048xi32>
    %81 = arith.cmpi slt, %73, %80 : vector<8x2048xi32>
    %c2032_i32_26 = arith.constant 2032 : i32
    %82 = tpu.dynamic_rotate %72 by %c2032_i32_26 dim 1 : vector<8x2048xf32>, i32 -> vector<8x2048xf32>
    %cst_27 = arith.constant 0.000000e+00 : f32
    %83 = vector.broadcast %cst_27 : f32 to vector<8x2048xf32>
    %84 = arith.select %81, %82, %83 : vector<8x2048xi1>, vector<8x2048xf32>
    %c0_28 = arith.constant 0 : index
    %c0_29 = arith.constant 0 : index
    %85 = vector.load %arg5[%c0_28, %c0_29] : memref<9x2048xf32, #tpu.memory_space<vmem>>, vector<9x2048xf32>
    %86 = vector.extract_strided_slice %85 {offsets = [0, 0], sizes = [1, 2048], strides = [1, 1]} : vector<9x2048xf32> to vector<1x2048xf32>
    %87 = vector.broadcast %86 : vector<1x2048xf32> to vector<8x2048xf32>
    %88 = arith.mulf %79, %87 : vector<8x2048xf32>
    %89 = vector.extract_strided_slice %85 {offsets = [1, 0], sizes = [1, 2048], strides = [1, 1]} : vector<9x2048xf32> to vector<1x2048xf32>
    %90 = vector.broadcast %89 : vector<1x2048xf32> to vector<8x2048xf32>
    %91 = arith.mulf %72, %90 : vector<8x2048xf32>
    %92 = arith.addf %88, %91 : vector<8x2048xf32>
    %93 = vector.extract_strided_slice %85 {offsets = [2, 0], sizes = [1, 2048], strides = [1, 1]} : vector<9x2048xf32> to vector<1x2048xf32>
    %94 = vector.broadcast %93 : vector<1x2048xf32> to vector<8x2048xf32>
    %95 = arith.mulf %84, %94 : vector<8x2048xf32>
    %96 = arith.addf %92, %95 : vector<8x2048xf32>
    %97 = vector.extract_strided_slice %85 {offsets = [3, 0], sizes = [1, 2048], strides = [1, 1]} : vector<9x2048xf32> to vector<1x2048xf32>
    %98 = vector.broadcast %97 : vector<1x2048xf32> to vector<8x2048xf32>
    %99 = arith.mulf %79, %98 : vector<8x2048xf32>
    %100 = vector.extract_strided_slice %85 {offsets = [4, 0], sizes = [1, 2048], strides = [1, 1]} : vector<9x2048xf32> to vector<1x2048xf32>
    %101 = vector.broadcast %100 : vector<1x2048xf32> to vector<8x2048xf32>
    %102 = arith.mulf %72, %101 : vector<8x2048xf32>
    %103 = arith.addf %99, %102 : vector<8x2048xf32>
    %104 = vector.extract_strided_slice %85 {offsets = [5, 0], sizes = [1, 2048], strides = [1, 1]} : vector<9x2048xf32> to vector<1x2048xf32>
    %105 = vector.broadcast %104 : vector<1x2048xf32> to vector<8x2048xf32>
    %106 = arith.mulf %84, %105 : vector<8x2048xf32>
    %107 = arith.addf %103, %106 : vector<8x2048xf32>
    %108 = vector.extract_strided_slice %85 {offsets = [6, 0], sizes = [1, 2048], strides = [1, 1]} : vector<9x2048xf32> to vector<1x2048xf32>
    %109 = vector.broadcast %108 : vector<1x2048xf32> to vector<8x2048xf32>
    %110 = arith.mulf %79, %109 : vector<8x2048xf32>
    %111 = vector.extract_strided_slice %85 {offsets = [7, 0], sizes = [1, 2048], strides = [1, 1]} : vector<9x2048xf32> to vector<1x2048xf32>
    %112 = vector.broadcast %111 : vector<1x2048xf32> to vector<8x2048xf32>
    %113 = arith.mulf %72, %112 : vector<8x2048xf32>
    %114 = arith.addf %110, %113 : vector<8x2048xf32>
    %115 = vector.extract_strided_slice %85 {offsets = [8, 0], sizes = [1, 2048], strides = [1, 1]} : vector<9x2048xf32> to vector<1x2048xf32>
    %116 = vector.broadcast %115 : vector<1x2048xf32> to vector<8x2048xf32>
    %117 = arith.mulf %84, %116 : vector<8x2048xf32>
    %118 = arith.addf %114, %117 : vector<8x2048xf32>
    %c7_i32_30 = arith.constant 7 : i32
    %119 = vector.broadcast %c7_i32_30 : i32 to vector<8x2048xi32>
    %120 = arith.cmpi slt, %74, %119 : vector<8x2048xi32>
    %c7_i32_31 = arith.constant 7 : i32
    %121 = tpu.dynamic_rotate %96 by %c7_i32_31 dim 0 : vector<8x2048xf32>, i32 -> vector<8x2048xf32>
    %cst_32 = arith.constant 0.000000e+00 : f32
    %122 = vector.broadcast %cst_32 : f32 to vector<8x2048xf32>
    %123 = arith.select %120, %121, %122 : vector<8x2048xi1>, vector<8x2048xf32>
    %c1_i32_33 = arith.constant 1 : i32
    %124 = vector.broadcast %c1_i32_33 : i32 to vector<8x2048xi32>
    %125 = arith.cmpi sge, %74, %124 : vector<8x2048xi32>
    %c1_i32_34 = arith.constant 1 : i32
    %126 = tpu.dynamic_rotate %118 by %c1_i32_34 dim 0 : vector<8x2048xf32>, i32 -> vector<8x2048xf32>
    %cst_35 = arith.constant 0.000000e+00 : f32
    %127 = vector.broadcast %cst_35 : f32 to vector<8x2048xf32>
    %128 = arith.select %125, %126, %127 : vector<8x2048xi1>, vector<8x2048xf32>
    %129 = arith.addf %123, %107 : vector<8x2048xf32>
    %130 = arith.addf %129, %128 : vector<8x2048xf32>
    %131 = vector.broadcast %71 : vector<1x1xf32> to vector<8x2048xf32>
    %132 = arith.addf %130, %131 : vector<8x2048xf32>
    %cst_36 = arith.constant 0.000000e+00 : f32
    %133 = vector.broadcast %cst_36 : f32 to vector<8x2048xf32>
    %134 = arith.cmpf oge, %132, %133 : vector<8x2048xf32>
    %cst_37 = arith.constant 4.000000e-01 : f32
    %135 = vector.broadcast %cst_37 : f32 to vector<8x2048xf32>
    %136 = arith.mulf %135, %132 : vector<8x2048xf32>
    %137 = arith.select %134, %132, %136 : vector<8x2048xi1>, vector<8x2048xf32>
    %c0_38 = arith.constant 0 : index
    %c0_39 = arith.constant 0 : index
    %c0_40 = arith.constant 0 : index
    %138 = vector.load %arg7[%c0_38, %c0_39, %c0_40] : memref<1x8x2048xf32, #tpu.memory_space<vmem>>, vector<1x8x2048xf32>
    %139 = vector.shape_cast %138 : vector<1x8x2048xf32> to vector<8x2048xf32>
    %140 = vector.shape_cast %137 : vector<8x2048xf32> to vector<1x8x2048xf32>
    tpu.vector_store %arg7[%c0_38, %c0_39, %c0_40], %140 {strides = array<i32>} : memref<1x8x2048xf32, #tpu.memory_space<vmem>>, vector<1x8x2048xf32>,
    return
  }
  func.func @transform_0(%arg0: i32) -> (i32, i32, i32, i32) {
    %c0_i32 = arith.constant 0 : i32
    %c0_i32_0 = arith.constant 0 : i32
    %c0_i32_1 = arith.constant 0 : i32
    %c0_i32_2 = arith.constant 0 : i32
    return %arg0, %c0_i32, %c0_i32_0, %c0_i32_1 : i32, i32, i32, i32
  }
  func.func @transform_1(%arg0: i32) -> (i32, i32) {
    %c0_i32 = arith.constant 0 : i32
    %c0_i32_0 = arith.constant 0 : i32
    %c0_i32_1 = arith.constant 0 : i32
    return %c0_i32, %c0_i32_0 : i32, i32
  }
  func.func @transform_2(%arg0: i32) -> (i32, i32) {
    %c0_i32 = arith.constant 0 : i32
    %c0_i32_0 = arith.constant 0 : i32
    %c0_i32_1 = arith.constant 0 : i32
    return %c0_i32, %c0_i32_0 : i32, i32
  }
  func.func @transform_3(%arg0: i32) -> (i32, i32) {
    %c0_i32 = arith.constant 0 : i32
    %c0_i32_0 = arith.constant 0 : i32
    %c0_i32_1 = arith.constant 0 : i32
    return %c0_i32, %c0_i32_0 : i32, i32
  }
  func.func @transform_4(%arg0: i32) -> (i32, i32) {
    %c0_i32 = arith.constant 0 : i32
    %c0_i32_0 = arith.constant 0 : i32
    %c0_i32_1 = arith.constant 0 : i32
    return %c0_i32, %c0_i32_0 : i32, i32
  }
  func.func @transform_5(%arg0: i32) -> (i32, i32) {
    %c0_i32 = arith.constant 0 : i32
    %c0_i32_0 = arith.constant 0 : i32
    %c0_i32_1 = arith.constant 0 : i32
    return %c0_i32, %c0_i32_0 : i32, i32
  }
  func.func @transform_6(%arg0: i32) -> (i32, i32, i32) {
    %c0_i32 = arith.constant 0 : i32
    %c0_i32_0 = arith.constant 0 : i32
    %c0_i32_1 = arith.constant 0 : i32
    return %arg0, %c0_i32, %c0_i32_0 : i32, i32, i32
  }
}

</mosaic_0001>

<bundles_post_ra>
// kernel: spectrogram_upsampler.1
= control target key start
LH: loop header
LB: loop body
LE: loop exit
PB: predicated region body
PF: predicated region fallthrough
CT: control target
= control target key end

     0   :  { %11 = vsyncpa [#allocation3], 0  ;;  %s16136_s0 = inlined_call_operand.hbm [shape: f32[2,1,8,8], index: 0, kind: input, shape index: {}]   ;;  %s16137_s1 = inlined_call_operand.hbm [shape: f32[8,128], index: 1, kind: input, shape index: {}]   ;;  %s16138_s2 = inlined_call_operand.vmem [shape: f32[9,128], index: 2, kind: input, shape index: {}]   ;;  %s16139_s3 = inlined_call_operand.hbm [shape: f32[128,2048], index: 3, kind: input, shape index: {}]   ;;  %s16140_s4 = inlined_call_operand.hbm [shape: f32[9,2048], index: 4, kind: input, shape index: {}]   ;;  %s16141_s5 = inlined_call_operand.vmem [shape: f32[2,1], index: 5, kind: input, shape index: {}]   ;;  %s16142_s6 = inlined_call_operand.hbm [shape: f32[2,8,2048], index: 6, kind: output, shape index: {}]  }
   0x1   :  { %13 = vsyncpa [#allocation3 + $0x1], 0 }
   0x2   :  { %14 = vsyncpa [#allocation6], 0 }
   0x3   :  { %15 = vsyncpa [#allocation9], 0 }
   0x4   :  { %16 = vsyncpa [#allocation4], 0 }
   0x5   :  { %18 = vsyncpa [#allocation4 + $0x1], 0  ;;  %s11285_s21 = smov 0   ;;  %s11287_s22 = smov 0  }
   0x6   :  { %s11289_s23 = smov 0   ;;  %s11291_s24 = smov 0  }
   0x7 LB: > { %s11306_s25 = sadd.s32 4294967295, %s11237_s24   ;;  %s9257_s26 = sadd.s32 4294967294, %s11237_s24   ;;  %s11237_s24 = sphi %s11291_s24, %s18625_s24   ;;  %s11233_s23 = sphi %s11289_s23, %s18624_s23   ;;  %s11229_s22 = sphi %s11287_s22, %s18623_s22   ;;  %s11225_s21 = sphi %s11285_s21, %s18622_s21  }
   0x8   : > { %p44_p0 = scmp.ne.s32.totalorder %s11229_s22, %s11225_s21  ;;  %p16143_p1 = scmp.eq.s32.totalorder %s11306_s25, 0 }
   0x9   : > { %p179_p3 = scmp.eq.s32.totalorder %s9257_s26, 1  ;;  %p9258_p5 = scmp.ge.s32.totalorder %s11237_s24, 1 }
   0xa   : > { %p11315_p4 = por %p16143_p1, %p44_p0  ;;  %p186_p7 = scmp.lt.s32.totalorder %s11237_s24, 3 }
   0xb   : > { %p11320_p6 = por %p179_p3, %p44_p0  ;;  %s11239_s30 = smov [#allocation5]  }
   0xc   : > { %s16935_s27 = scalar_select %p11315_p4, 1, 0 }
   0xd   : > { %s16936_s28 = scalar_select %p11320_p6, 1, 0 }
   0xe   : > { %p11325_p8 = pnand %p9258_p5, %p186_p7  ;;  %s199_s7 = sshll.u32 %s11239_s30, 4  ;;  %s200_s7 = int_to_ptr.vmem [resolvable:$true] %s199_s7 }
   0xf   : > { %s11240_s8 = smov [#allocation7]   ;;  %s11241_s11 = smov [#allocation8]  }
  0x10   : > { %s16937_s29 = scalar_select %p11325_p8, 1, 0 }
  0x11   : > { %p10981_p10 = pneg %p11325_p8  ;;  %s212_s9 = sshll.u32 %s11240_s8, 4  ;;  %s11338_s9 = int_to_ptr.vmem [resolvable:$true] %s212_s9 }
  0x12   : > { %s11340_s12 = sshll.u32 %s11241_s11, 4  ;;  %s11049_s15 = scalar_lea.hbm %s16137_s1, 128  ;;  %s226_s12 = int_to_ptr.vmem [resolvable:$true] %s11340_s12 }
  0x13   : > { %p11334_p11 = pnand %p10981_p10, %p16143_p1  ;;  %p11050_p12 = scmp.ne.s32.totalorder %s16137_s1, %s11049_s15 }
  0x14   : > { %p11056_p5 = scmp.lt.u32.totalorder %s11049_s15, %s16137_s1 }
  0x15   : > { %p11350_p13 = pneg %p11334_p11 }
  0x17   : > { %p11052_p0 = pnand %p11350_p13, %p11050_p12 }
  0x19   : > { %p11053_p3 = pneg %p11052_p0 }
  0x1b   : > { %p11058_p7 = pnand %p11056_p5, %p11053_p3 }
  0x1d   : > { %11061 = shalt.err (!%p11058_p7)
}
  0x1e   : > { %s11062_s26 = scalar_lea.vmem %s200_s7, 128  ;;  %p11070_p2 = scmp.lt.s32.totalorder %s200_s7, %s200_s7 }
  0x1f   : > { %p11063_p10 = scmp.ne.s32.totalorder %s200_s7, %s11062_s26  ;;  %p11071_p6 = scmp.lt.s32.totalorder %s11062_s26, %s11062_s26 }
  0x21   : > { %p11065_p9 = pnand %p11063_p10, %p11350_p13  ;;  %p11072_p4 = por %p11071_p6, %p11070_p2 }
  0x23   : > { %p11066_p1 = pneg %p11065_p9 }
  0x25   : > { %p11073_p8 = pnand %p11072_p4, %p11066_p1 }
  0x27   : > { %11076 = shalt.err (!%p11073_p8)
}
  0x28   : > { %10984 = dma.hbm_to_vmem [thread:$0]  (!%p11334_p11), %s16137_s1, 128, %s200_s7, [#allocation6]  }
  0x29   : > { %s11077_s14 = scalar_lea.hbm %s16139_s3, 32768 }
  0x2a   : > { %p11078_p9 = scmp.ne.s32.totalorder %s16139_s3, %s11077_s14  ;;  %p11084_p1 = scmp.lt.u32.totalorder %s11077_s14, %s16139_s3 }
  0x2c   : > { %p11080_p12 = pnand %p11078_p9, %p11350_p13 }
  0x2e   : > { %p11081_p2 = pneg %p11080_p12 }
  0x30   : > { %p11086_p4 = pnand %p11084_p1, %p11081_p2 }
  0x32   : > { %11089 = shalt.err (!%p11086_p4)
}
  0x33   : > { %s11090_s7 = scalar_lea.vmem %s11338_s9, 32768  ;;  %p11098_p3 = scmp.lt.s32.totalorder %s11338_s9, %s11338_s9 }
  0x34   : > { %p11091_p6 = scmp.ne.s32.totalorder %s11338_s9, %s11090_s7  ;;  %p11099_p5 = scmp.lt.s32.totalorder %s11090_s7, %s11090_s7 }
  0x36   : > { %p11093_p8 = pnand %p11091_p6, %p11350_p13  ;;  %p11100_p7 = por %p11099_p5, %p11098_p3 }
  0x38   : > { %p11094_p0 = pneg %p11093_p8 }
  0x3a   : > { %p11101_p10 = pnand %p11100_p7, %p11094_p0 }
  0x3c   : > { %11104 = shalt.err (!%p11101_p10)
}
  0x3d   : > { %s11242_s20 = smov 2048   ;;  %s11243_s26 = smov 128  }
  0x3e   : > { %10987 = dma.hbm_to_vmem [thread:$0]  (!%p11334_p11), %s16139_s3, 32768, %s11338_s9, [#allocation6], %s11242_s20, %s11242_s20, %s11243_s26  }
  0x3f   : > { %s11105_s14 = scalar_lea.hbm %s16140_s4, 4096 }
  0x40   : > { %p11106_p9 = scmp.ne.s32.totalorder %s16140_s4, %s11105_s14  ;;  %p11112_p1 = scmp.lt.u32.totalorder %s11105_s14, %s16140_s4 }
  0x42   : > { %p11108_p12 = pnand %p11106_p9, %p11350_p13 }
  0x44   : > { %p11109_p2 = pneg %p11108_p12 }
  0x46   : > { %p11114_p4 = pnand %p11112_p1, %p11109_p2 }
  0x48   : > { %11117 = shalt.err (!%p11114_p4)
}
  0x49   : > { %s11118_s7 = scalar_lea.vmem %s226_s12, 4096  ;;  %p11126_p3 = scmp.lt.s32.totalorder %s226_s12, %s226_s12 }
  0x4a   : > { %p11119_p6 = scmp.ne.s32.totalorder %s226_s12, %s11118_s7  ;;  %p11127_p5 = scmp.lt.s32.totalorder %s11118_s7, %s11118_s7 }
  0x4c   : > { %p11121_p8 = pnand %p11119_p6, %p11350_p13  ;;  %p11128_p7 = por %p11127_p5, %p11126_p3 }
  0x4e   : > { %p11122_p0 = pneg %p11121_p8 }
  0x50   : > { %p11129_p10 = pnand %p11128_p7, %p11122_p0 }
  0x52   : > { %11132 = shalt.err (!%p11129_p10)
}
  0x53   : > { %10990 = dma.hbm_to_vmem [thread:$0]  (!%p11334_p11), %s16140_s4, 4096, %s226_s12, [#allocation9], %s11242_s20, %s11242_s20, %s11243_s26  }
  0x54   : > { %s11409_s18 = sadd.s32 1, %s11237_s24   ;;  %s31_s10 = sadd.s32 1, %s11233_s23 }
  0x55   : > { %s28_s8 = ssub.s32 %s11237_s24, %s11409_s18  ;;  %p38_p9 = scmp.ne.s32.totalorder %s11233_s23, %s11229_s22 }
  0x56   : > { %p29_p13 = scmp.eq.s32.totalorder %s28_s8, 0  ;;  %p39_p12 = scmp.eq.s32.totalorder %s11237_s24, 0 }
  0x57   : > { %p11002_p2 = scmp.lt.s32.totalorder %s11237_s24, 2  ;;  %p16940_p4 = scmp.eq.s32.totalorder %s11306_s25, 1 }
  0x58   : > { %s11419_s11 = scalar_select %p29_p13, %s11233_s23, %s31_s10  }
  0x59   : > { %p40_p1 = por %p39_p12, %p38_p9  ;;  %p11423_p6 = por %p16940_p4, %p38_p9 }
  0x5a   : > { %s242_s14 = sand.u32 1, %s11233_s23   ;;  %s9264_s15 = sshll.u32 %s11237_s24, 7 }
  0x5b   : > { %s9263_s12 = sshll.u32 %s242_s14, 3  ;;  %s11432_s16 = scalar_lea.hbm %s16136_s0, %s9264_s15 }
  0x5c   : > { %s246_s17 = scalar_lea.vmem [#allocation2], %s9263_s12  ;;  %p11434_p11 = pnand %p11002_p2, %p40_p1 }
  0x5d   : > { %s253_s19 = sshll.u32 %s246_s17, 4  ;;  %s243_s9 = scalar_lea.sflag [#allocation3], %s242_s14  ;;  %s11438_s19 = int_to_ptr.vmem [resolvable:$true] %s253_s19 }
  0x5e   : > { %s11133_s30 = scalar_lea.hbm %s11432_s16, 128  ;;  %p11135_p0 = pneg %p11434_p11 }
  0x5f   : > { %p11134_p8 = scmp.ne.s32.totalorder %s11432_s16, %s11133_s30  ;;  %s11138_s15 = scalar_lea.hbm %s16136_s0, 256 }
  0x60   : > { %p11139_p7 = scmp.lt.u32.totalorder %s11432_s16, %s16136_s0  ;;  %p11140_p10 = scmp.lt.u32.totalorder %s11138_s15, %s11133_s30 }
  0x61   : > { %p11136_p3 = pnand %p11135_p0, %p11134_p8  ;;  %p11142_p9 = scmp.lt.u32.totalorder %s11133_s30, %s11432_s16 }
  0x62   : > { %p11141_p13 = por %p11140_p10, %p11139_p7 }
  0x63   : > { %p11137_p5 = pneg %p11136_p3 }
  0x64   : > { %p11143_p12 = por %p11142_p9, %p11141_p13 }
  0x66   : > { %p11144_p2 = pnand %p11143_p12, %p11137_p5 }
  0x68   : > { %11147 = shalt.err (!%p11144_p2)
}
  0x69   : > { %s11148_s14 = scalar_lea.vmem %s11438_s19, 128  ;;  %s11244_s26 = smov [#allocation2]  }
  0x6a   : > { %p11149_p1 = scmp.ne.s32.totalorder %s11438_s19, %s11148_s14  ;;  %s11153_s17 = sshll.u32 %s11244_s26, 4  ;;  %s11154_s17 = int_to_ptr.vmem [resolvable:$false] %s11153_s17 }
  0x6b   : > { %s11155_s8 = scalar_lea.vmem %s11154_s17, 256  ;;  %p11156_p3 = scmp.lt.s32.totalorder %s11438_s19, %s11154_s17 }
  0x6c   : > { %p11151_p4 = pnand %p11149_p1, %p11135_p0  ;;  %p11157_p7 = scmp.lt.s32.totalorder %s11155_s8, %s11148_s14 }
  0x6e   : > { %p11152_p8 = pneg %p11151_p4  ;;  %p11158_p10 = por %p11157_p7, %p11156_p3 }
  0x70   : > { %p11159_p13 = pnand %p11158_p10, %p11152_p8 }
  0x72   : > { %11162 = shalt.err (!%p11159_p13)
}
  0x73   : > { %10994 = dma.hbm_to_vmem [thread:$0]  (!%p11434_p11), %s11432_s16, 128, %s11438_s19, %s243_s9  }
  0x74   : > { %p16943_p5 = scmp.ne.s32.totalorder %s16937_s29, 0 }
  0x76   : > { %262 = sbr.rel (%p16943_p5) target bundleno = 1678 (0x68e), region = 44 }
  0x7d   : > { %s11468_s30 = sand.u32 1, %s11229_s22   ;;  %p16944_p0 = scmp.ne.s32.totalorder %s16935_s27, 0 }
  0x7e   : > { %s9266_s10 = sshll.u32 %s11468_s30, 3  ;;  %s265_s15 = scalar_lea.sflag [#allocation3], %s11468_s30 }
  0x7f   : > { %s268_s12 = scalar_lea.vmem [#allocation2], %s9266_s10 }
  0x80   : > { %11208 = dma.done.wait (%p16944_p0), %s265_s15, 128  }
  0x81   : > { %11210 = vsyncadd (%p16944_p0), %s265_s15, 4294967168  ;;  %p16945_p9 = scmp.eq.s32.totalorder %s11306_s25, 0 }
  0x83   : > { %11212 = dma.done.wait (%p16945_p9), [#allocation6], 32896   ;;  %p16946_p11 = pmov %p16945_p9 }
  0x84   : > { %p16947_p12 = pmov %p16945_p9 }
  0x85   : > { %11214 = vsyncadd (%p16946_p11), [#allocation6], 4294934400 }
  0x86   : > { %11216 = dma.done.wait (%p16947_p12), [#allocation9], 4096   ;;  %p16948_p2 = pmov %p16945_p9 }
  0x87   : > { %v16146_v0 = vmov 0.0   ;;  %vm11246_vm0 = vmmov 0   ;;  %vm312_vm1 = vcmask 64512   ;;  %v310_v1 = vld [vmem:[#allocation5] sm:$0xff]  ;;  %v309_v2 = vld [vmem:[%s268_s12] sm:$0xff]  ;;  %v843_v21 = vld [vmem:[#allocation7] sm:$0xff] }
  0x88   : > { %11218 = vsyncadd (%p16948_p2), [#allocation9], 4294963200  ;;  %9321 = vmatprep.subr.mxu0 %v16146_v0  ;;  %9323 = vmatprep.mubr.msk.f32.mxu0 %vm11246_vm0, %v16146_v0  ;;  %v317_v3 = vand.u32 4294901760, %v310_v1  ;;  %v314_v4 = vsel %vm312_vm1, %v309_v2, 0  ;;  %v311_v14 = vld [vmem:[%s16141_s5] sm:$0x1] }
  0x89   : > { %9306 = vmatprep.subr.mxu1 %v16146_v0  ;;  %9308 = vmatprep.mubr.msk.f32.mxu1 %vm11246_vm0, %v16146_v0  ;;  %v382_v5 = vand.u32 4294901760, %v314_v4  ;;  %v844_v15 = vld [vmem:[#allocation7 + $0x8] sm:$0xff]  ;;  %10961 = vpush %v311_v14  ;;  %v846_v19 = vld [vmem:[#allocation7 + $0x18] sm:$0xff]  ;;  %v859_v24 = vld [vmem:[#allocation7 + $0x80] sm:$0xff]  ;;  %v1102_v25 = vand.u32 4294901760, %v843_v21  ;;  %s11247_s16 = smov 16  }
  0x8a   : > { %v394_v6 = vsub.f32 %v310_v1, %v317_v3  ;;  %9322 = vmatpush3.msra.mxu0 %v317_v3  ;;  %9307 = vmatpush3.msra.mxu1 %v317_v3  ;;  %v860_v16 = vld [vmem:[#allocation7 + $0x88] sm:$0xff]  ;;  %v1100_v17 = vand.u32 4294901760, %v844_v15  ;;  %v862_v20 = vld [vmem:[#allocation7 + $0x98] sm:$0xff]  ;;  %v1955_v22 = vand.u32 4294901760, %v846_v19  ;;  %v845_v26 = vld [vmem:[#allocation7 + $0x10] sm:$0xff]  ;;  %v1106_v31 = vand.u32 4294901760, %v859_v24 }
  0x8b   : > { %v383_v7 = vsub.f32 %v314_v4, %v382_v5  ;;  %9311 = vmatprep.subr.mxu1 %v16146_v0  ;;  %9326 = vmatprep.subr.mxu0 %v16146_v0  ;;  %v1104_v18 = vand.u32 4294901760, %v860_v16  ;;  %v1959_v23 = vand.u32 4294901760, %v862_v20  ;;  %v861_v27 = vld [vmem:[#allocation7 + $0x90] sm:$0xff]  ;;  %v11519_v35 = vsub.f32 %v843_v21, %v1102_v25  ;;  %v876_v43 = vld [vmem:[#allocation7 + $0x108] sm:$0xff]  ;;  %v878_v45 = vld [vmem:[#allocation7 + $0x118] sm:$0xff]  ;;  %s11248_s19 = smov 112  }
  0x8c   : > { %v395_v8 = vand.u32 4294901760, %v394_v6  ;;  %v11509_v29 = vsub.f32 %v844_v15, %v1100_v17  ;;  %v11515_v33 = vsub.f32 %v846_v19, %v1955_v22  ;;  %v11522_v36 = vpack.c.bf16 %v1106_v31, %v1102_v25  ;;  %v892_v44 = vld [vmem:[#allocation7 + $0x188] sm:$0xff]  ;;  %v894_v48 = vld [vmem:[#allocation7 + $0x198] sm:$0xff]  ;;  %v875_v50 = vld [vmem:[#allocation7 + $0x100] sm:$0xff]  ;;  %s9270_s15 = sshll.u32 %s11468_s30, 7  ;;  %s9293_s27 = sshll.u32 %s11306_s25, 11 }
  0x8d   : > { %v384_v9 = vand.u32 4294901760, %v383_v7  ;;  %v11507_v28 = vpack.c.bf16 %v1104_v18, %v1100_v17  ;;  %v11511_v30 = vsub.f32 %v860_v16, %v1104_v18  ;;  %v11513_v32 = vpack.c.bf16 %v1959_v23, %v1955_v22  ;;  %16955 = vst [vmem:[#allocation21_spill] sm:$0xff] %v11519_v35  ;;  %v891_v51 = vld [vmem:[#allocation7 + $0x180] sm:$0xff]  ;;  %v877_v55 = vld [vmem:[#allocation7 + $0x110] sm:$0xff]  ;;  %v908_v62 = vld [vmem:[#allocation7 + $0x208] sm:$0xff]  ;;  %s14585_s12 = scalar_lea.vmem [#allocation10], %s9270_s15  ;;  %s16090_s7 = scalar_lea.hbm %s16142_s6, %s9293_s27 }
  0x8e   : > { %v396_v10 = vsub.f32 %v394_v6, %v395_v8  ;;  %16950 = vst [vmem:[#allocation16_spill] sm:$0xff] %v11509_v29  ;;  %16953 = vst [vmem:[#allocation19_spill] sm:$0xff] %v11515_v33  ;;  %v11517_v34 = vsub.f32 %v862_v20, %v1959_v23  ;;  %v11524_v37 = vsub.f32 %v859_v24, %v1106_v31  ;;  %v1957_v38 = vand.u32 4294901760, %v845_v26  ;;  %v893_v56 = vld [vmem:[#allocation7 + $0x190] sm:$0xff]  ;;  %v924_v63 = vld [vmem:[#allocation7 + $0x288] sm:$0xff]  ;;  %s9158_s29 = sshll.u32 %s14585_s12, 4  ;;  %s16092_s29 = int_to_ptr.vmem [resolvable:$true] %s9158_s29 }
  0x8f   : > { %9324 = vmatmul.mubr.f32.vlgmr.msra.gmra.mrb[0].mxu0 %v384_v9  ;;  %v385_v11 = vsub.f32 %v383_v7, %v384_v9  ;;  %16949 = vst [vmem:[#allocation15_spill] sm:$0xff] %v11507_v28  ;;  %16951 = vst [vmem:[#allocation17_spill] sm:$0xff] %v11511_v30  ;;  %v1961_v39 = vand.u32 4294901760, %v861_v27  ;;  %v1108_v46 = vand.u32 4294901760, %v876_v43  ;;  %v1112_v47 = vand.u32 4294901760, %v892_v44  ;;  %v910_v1 = vld [vmem:[#allocation7 + $0x218] sm:$0xff] }
  0x90   : > { %v397_v12 = vand.u32 4294901760, %v396_v10  ;;  %9327 = vmatpush3.msra.mxu0 %v395_v8  ;;  %9328 = vmatprep.mubr.msk.f32.mxu0 %vm11246_vm0, %v16146_v0  ;;  %16952 = vst [vmem:[#allocation18_spill] sm:$0xff] %v11513_v32  ;;  %16954 = vst [vmem:[#allocation20_spill] sm:$0xff] %v11517_v34  ;;  %v11530_v41 = vsub.f32 %v845_v26, %v1957_v38  ;;  %v1963_v49 = vand.u32 4294901760, %v878_v45  ;;  %v1967_v52 = vand.u32 4294901760, %v894_v48  ;;  %v925_v18 = vld [vmem:[#allocation7 + $0x290] sm:$0xff] }
  0x91   : > { %v386_v13 = vand.u32 4294901760, %v385_v11  ;;  %9331 = vmatprep.subr.mxu0 %v16146_v0  ;;  %16956 = vst [vmem:[#allocation22_spill] sm:$0xff] %v11522_v36  ;;  %16957 = vst [vmem:[#allocation23_spill] sm:$0xff] %v11524_v37  ;;  %v11528_v40 = vpack.c.bf16 %v1961_v39, %v1957_v38  ;;  %v11532_v42 = vsub.f32 %v861_v27, %v1961_v39  ;;  %v1110_v53 = vand.u32 4294901760, %v875_v50  ;;  %v907_v11 = vld [vmem:[#allocation7 + $0x200] sm:$0xff]  ;;  %v940_v21 = vld [vmem:[#allocation7 + $0x308] sm:$0xff] }
  0x92   : > { %16959 = vst [vmem:[#allocation25_spill] sm:$0xff] %v11530_v41  ;;  %v1114_v54 = vand.u32 4294901760, %v891_v51  ;;  %v11535_v57 = vpack.c.bf16 %v1112_v47, %v1108_v46  ;;  %v1965_v58 = vand.u32 4294901760, %v877_v55  ;;  %v1969_v59 = vand.u32 4294901760, %v893_v56  ;;  %v956_v22 = vld [vmem:[#allocation7 + $0x388] sm:$0xff]  ;;  %v942_v23 = vld [vmem:[#allocation7 + $0x318] sm:$0xff] }
  0x93   : > { %9309 = vmatmul.mubr.f32.vlgmr.msra.gmra.mrb[0].mxu1 %v386_v13  ;;  %16958 = vst [vmem:[#allocation24_spill] sm:$0xff] %v11528_v40  ;;  %16960 = vst [vmem:[#allocation26_spill] sm:$0xff] %v11532_v42  ;;  %v11537_v60 = vpack.c.bf16 %v1967_v52, %v1963_v49  ;;  %v1120_v4 = vand.u32 4294901760, %v924_v63  ;;  %v11546_v8 = vsub.f32 %v892_v44, %v1112_v47  ;;  %v909_v13 = vld [vmem:[#allocation7 + $0x210] sm:$0xff]  ;;  %v1118_v26 = vand.u32 4294901760, %v907_v11  ;;  %v958_v38 = vld [vmem:[#allocation7 + $0x398] sm:$0xff] }
  0x94   : > { %9312 = vmatpush3.msra.mxu1 %v397_v12  ;;  %9313 = vmatprep.mubr.msk.f32.mxu1 %vm11246_vm0, %v16146_v0  ;;  %16961 = vst [vmem:[#allocation27_spill] sm:$0xff] %v11535_v57  ;;  %v11539_v61 = vpack.c.bf16 %v1114_v54, %v1110_v53  ;;  %v11542_v2 = vpack.c.bf16 %v1969_v59, %v1965_v58  ;;  %v923_v12 = vld [vmem:[#allocation7 + $0x280] sm:$0xff]  ;;  %v1973_v31 = vand.u32 4294901760, %v909_v13  ;;  %v1977_v44 = vand.u32 4294901760, %v925_v18  ;;  %s9144_s25 = scalar_lea.sflag [#allocation4], %s11468_s30  ;;  %s11163_s9 = scalar_lea.vmem %s16092_s29, 2048 }
  0x95   : > { %9316 = vmatprep.subr.mxu1 %v16146_v0  ;;  %16962 = vst [vmem:[#allocation28_spill] sm:$0xff] %v11537_v60  ;;  %16966 = vst [vmem:[#allocation32_spill] sm:$0xff] %v11546_v8  ;;  %v11549_v9 = vsub.f32 %v878_v45, %v1963_v49  ;;  %v11551_v10 = vsub.f32 %v894_v48, %v1967_v52  ;;  %v11554_v14 = vsub.f32 %v875_v50, %v1110_v53  ;;  %v939_v39 = vld [vmem:[#allocation7 + $0x300] sm:$0xff]  ;;  %p11164_p1 = scmp.ne.s32.totalorder %s16092_s29, %s11163_s9  ;;  %s11249_s20 = smov [#allocation10]  }
  0x96   : > { %16963 = vst [vmem:[#allocation29_spill] sm:$0xff] %v11539_v61  ;;  %16964 = vst [vmem:[#allocation30_spill] sm:$0xff] %v11542_v2  ;;  %v11556_v15 = vsub.f32 %v891_v51, %v1114_v54  ;;  %v11559_v16 = vsub.f32 %v877_v55, %v1965_v58  ;;  %v11561_v19 = vsub.f32 %v893_v56, %v1969_v59  ;;  %v1122_v27 = vand.u32 4294901760, %v923_v12  ;;  %v955_v48 = vld [vmem:[#allocation7 + $0x380] sm:$0xff]  ;;  %s11167_s14 = sshll.u32 %s11249_s20, 4  ;;  %s11168_s14 = int_to_ptr.vmem [resolvable:$false] %s11167_s14 }
  0x97   : > { %9329 = vmatmul.mubr.f32.vlgmr.msra.gmra.mrb[0].mxu0 %v382_v5  ;;  %16967 = vst [vmem:[#allocation33_spill] sm:$0xff] %v11549_v9  ;;  %16968 = vst [vmem:[#allocation34_spill] sm:$0xff] %v11551_v10  ;;  %v1124_v45 = vand.u32 4294901760, %v940_v21  ;;  %v1979_v47 = vand.u32 4294901760, %v942_v23  ;;  %v1983_v50 = vand.u32 4294901760, %v958_v38  ;;  %v1126_v51 = vand.u32 4294901760, %v939_v39  ;;  %p11165_p4 = pnand %p11164_p1, %p11423_p6  ;;  %p11170_p3 = scmp.lt.s32.totalorder %s16092_s29, %s11168_s14 }
  0x98   : > { %9332 = vmatpush3.msra.mxu0 %v317_v3  ;;  %9333 = vmatprep.mubr.msk.f32.mxu0 %vm11246_vm0, %v16146_v0  ;;  %v1116_v3 = vand.u32 4294901760, %v908_v62  ;;  %16969 = vst [vmem:[#allocation35_spill] sm:$0xff] %v11554_v14  ;;  %16970 = vst [vmem:[#allocation36_spill] sm:$0xff] %v11556_v15  ;;  %v11569_v49 = vpack.c.bf16 %v1122_v27, %v1118_v26  ;;  %v1130_v52 = vand.u32 4294901760, %v955_v48 }
  0x99   : > { %9529 = vmatprep.subr.bf16.mxu0 %v11513_v32  ;;  %16971 = vst [vmem:[#allocation37_spill] sm:$0xff] %v11559_v16  ;;  %16972 = vst [vmem:[#allocation38_spill] sm:$0xff] %v11561_v19  ;;  %v11573_v54 = vsub.f32 %v924_v63, %v1120_v4  ;;  %v11580_v59 = vsub.f32 %v907_v11, %v1118_v26  ;;  %v11599_v11 = vpack.c.bf16 %v1983_v50, %v1979_v47  ;;  %p11166_p8 = pneg %p11165_p4 }
  0x9a   : > { %v11563_v20 = vpack.c.bf16 %v1120_v4, %v1116_v3  ;;  %16975 = vst [vmem:[#allocation41_spill] sm:$0xff] %v11569_v49  ;;  %v11571_v53 = vsub.f32 %v908_v62, %v1116_v3  ;;  %v11590_v3 = vsub.f32 %v925_v18, %v1977_v44  ;;  %v11594_v4 = vsub.f32 %v940_v21, %v1124_v45  ;;  %v11612_v21 = vld [vmem:[#allocation7 + $0x418] sm:$0xff] }
  0x9b   : > { %9314 = vmatmul.mubr.f32.vlgmr.msra.gmra.mrb[0].mxu1 %v382_v5  ;;  %16977 = vst [vmem:[#allocation43_spill] sm:$0xff] %v11573_v54  ;;  %16980 = vst [vmem:[#allocation46_spill] sm:$0xff] %v11580_v59  ;;  %v11619_v26 = vsub.f32 %v939_v39, %v1126_v51  ;;  %v11637_v39 = vld [vmem:[#allocation7 + $0x588] sm:$0xff] }
  0x9c   : > { %9317 = vmatpush3.msra.mxu1 %v394_v6  ;;  %9318 = vmatprep.mubr.msk.f32.mxu1 %vm11246_vm0, %v16146_v0  ;;  %v1971_v6 = vand.u32 4294901760, %v910_v1  ;;  %16973 = vst [vmem:[#allocation39_spill] sm:$0xff] %v11563_v20  ;;  %16976 = vst [vmem:[#allocation42_spill] sm:$0xff] %v11571_v53 }
  0x9d   : > { %9337 = vmatprep.subr.bf16.mxu1 %v11507_v28  ;;  %16985 = vst [vmem:[#allocation51_spill] sm:$0xff] %v11590_v3  ;;  %16987 = vst [vmem:[#allocation53_spill] sm:$0xff] %v11594_v4  ;;  %v1037_v4 = vld [vmem:[#allocation7 + $0x610] sm:$0xff] }
  0x9e   : > { %v11575_v55 = vsub.f32 %v910_v1, %v1971_v6  ;;  %16989 = vst [vmem:[#allocation55_spill] sm:$0xff] %v11599_v11  ;;  %16993 = vst [vmem:[#allocation59_spill] sm:$0xff] %v11619_v26  ;;  %v2005_v10 = vand.u32 4294901760, %v1037_v4 }
  0x9f   : > { %9334 = vmatmul.mubr.f32.vlgmr.msra.gmra.mrb[0].mxu0 %v382_v5  ;;  %v926_v5 = vld [vmem:[#allocation7 + $0x298] sm:$0xff] }
  0xa0   : > { %2051 = vmatprep.mubr.f32.mxu0 %v16146_v0  ;;  %9531 = vmatpush1.bf16.msra.mxu0 %v11528_v40  ;;  %v1975_v17 = vand.u32 4294901760, %v926_v5  ;;  %16978 = vst [vmem:[#allocation44_spill] sm:$0xff] %v11575_v55  ;;  %v1036_v40 = vld [vmem:[#allocation7 + $0x608] sm:$0xff] }
  0xa1   : > { %9533 = vmatprep.subr.bf16.mxu0 %v11537_v60  ;;  %v1068_v55 = vld [vmem:[#allocation7 + $0x708] sm:$0xff] }
  0xa2   : > { %v11565_v25 = vpack.c.bf16 %v1975_v17, %v1971_v6  ;;  %v11577_v56 = vsub.f32 %v926_v5, %v1975_v17  ;;  %v957_v5 = vld [vmem:[#allocation7 + $0x390] sm:$0xff]  ;;  %v11605_v17 = vld [vmem:[#allocation7 + $0x408] sm:$0xff] }
  0xa3   : > { %9319 = vmatmul.mubr.f32.vlgmr.msra.gmra.mrb[0].mxu1 %v383_v7  ;;  %v11544_v7 = vsub.f32 %v876_v43, %v1108_v46  ;;  %v1128_v46 = vand.u32 4294901760, %v956_v22 }
  0xa4   : > { %1196 = vmatprep.mubr.f32.mxu1 %v16146_v0  ;;  %9339 = vmatpush1.bf16.msra.mxu1 %v11522_v36  ;;  %16974 = vst [vmem:[#allocation40_spill] sm:$0xff] %v11565_v25  ;;  %16979 = vst [vmem:[#allocation45_spill] sm:$0xff] %v11577_v56  ;;  %v11584_v0 = vpack.c.bf16 %v1977_v44, %v1973_v31  ;;  %v11625_v44 = vld [vmem:[#allocation7 + $0x480] sm:$0xff]  ;;  %v1052_v36 = vld [vmem:[#allocation7 + $0x688] sm:$0xff] }
  0xa5   : > { %9341 = vmatprep.subr.bf16.mxu1 %v11535_v57  ;;  %16965 = vst [vmem:[#allocation31_spill] sm:$0xff] %v11544_v7  ;;  %9535 = vmatpush1.bf16.msra.mxu0 %v11542_v2  ;;  %v11592_v1 = vpack.c.bf16 %v1128_v46, %v1124_v45  ;;  %v11597_v6 = vsub.f32 %v956_v22, %v1128_v46  ;;  %v11614_v22 = vld [vmem:[#allocation7 + $0x498] sm:$0xff]  ;;  %v11627_v45 = vld [vmem:[#allocation7 + $0x410] sm:$0xff]  ;;  %v1152_v59 = vand.u32 4294901760, %v1052_v36  ;;  %v1156_v7 = vand.u32 4294901760, %v1068_v55 }
  0xa6   : > { %9537 = vmatprep.subr.bf16.mxu0 %v11565_v25  ;;  %16982 = vst [vmem:[#allocation48_spill] sm:$0xff] %v11584_v0  ;;  %v11586_v25 = vsub.f32 %v909_v13, %v1973_v31  ;;  %v11603_v13 = vsub.f32 %v958_v38, %v1983_v50  ;;  %v1985_v31 = vand.u32 4294901760, %v957_v5  ;;  %v11623_v38 = vld [vmem:[#allocation7 + $0x400] sm:$0xff]  ;;  %v11665_v2 = vld [vmem:[#allocation7 + $0x510] sm:$0xff] }
  0xa7   : > { %16986 = vst [vmem:[#allocation52_spill] sm:$0xff] %v11592_v1  ;;  %16988 = vst [vmem:[#allocation54_spill] sm:$0xff] %v11597_v6  ;;  %v11650_v50 = vld [vmem:[#allocation7 + $0x500] sm:$0xff]  ;;  %v1053_v56 = vld [vmem:[#allocation7 + $0x690] sm:$0xff] }
  0xa8   : > { %9343 = vmatpush1.bf16.msra.mxu1 %v11539_v61  ;;  %16983 = vst [vmem:[#allocation49_spill] sm:$0xff] %v11586_v25  ;;  %16991 = vst [vmem:[#allocation57_spill] sm:$0xff] %v11603_v13  ;;  %v1051_v6 = vld [vmem:[#allocation7 + $0x680] sm:$0xff]  ;;  %v2009_v8 = vand.u32 4294901760, %v1053_v56 }
  0xa9   : > { %9345 = vmatprep.subr.bf16.mxu1 %v11563_v20  ;;  %v941_v20 = vld [vmem:[#allocation7 + $0x310] sm:$0xff]  ;;  %9539 = vmatpush1.bf16.msra.mxu0 %v11584_v0  ;;  %v1989_v0 = vand.u32 4294901760, %v11627_v45  ;;  %v1154_v14 = vand.u32 4294901760, %v1051_v6 }
  0xaa   : > { %v1981_v18 = vand.u32 4294901760, %v941_v20  ;;  %9541 = vmatprep.subr.bf16.mxu0 %v11599_v11  ;;  %v11646_v11 = vld [vmem:[#allocation7 + $0x518] sm:$0xff] }
  0xab   : > { %v1995_v28 = vand.u32 4294901760, %v11646_v11 }
  0xac   : > { %9347 = vmatpush1.bf16.msra.mxu1 %v11569_v49  ;;  %v11629_v46 = vsub.f32 %v941_v20, %v1981_v18  ;;  %v1991_v20 = vand.u32 4294901760, %v11614_v22  ;;  %v11663_v49 = vld [vmem:[#allocation7 + $0x580] sm:$0xff] }
  0xad   : > { %9349 = vmatprep.subr.bf16.mxu1 %v11592_v1  ;;  %v1138_v1 = vand.u32 4294901760, %v11625_v44 }
  0xae   : > { %16995 = vst [vmem:[#allocation61_spill] sm:$0xff] %v11629_v46  ;;  %v1054_v46 = vld [vmem:[#allocation7 + $0x698] sm:$0xff]  ;;  %v11714_v35 = vsub.f32 %v11614_v22, %v1991_v20 }
  0xaf   : > { %v2007_v19 = vand.u32 4294901760, %v1054_v46  ;;  %v11721_v33 = vsub.f32 %v11625_v44, %v1138_v1  ;;  %v1070_v44 = vld [vmem:[#allocation7 + $0x718] sm:$0xff] }
  0xba   : > { %s10962_s26 = spop %10961 }
 0x172   : > { %v758_v24 = vpop.f32.mrb[0].mxu0 }
 0x173   : > { %v9335_v43 = vpop.f32.mrb[1].mxu0 }
 0x174   : > { %v11582_v43 = vsub.f32 %v923_v12, %v1122_v27  ;;  %v11601_v12 = vsub.f32 %v942_v23, %v1979_v47  ;;  %v11617_v23 = vpack.c.bf16 %v1130_v52, %v1126_v51  ;;  %v11621_v27 = vsub.f32 %v955_v48, %v1130_v52  ;;  %v11648_v47 = vld [vmem:[#allocation7 + $0x598] sm:$0xff] }
 0x175   : > { %v11640_v48 = vpack.c.bf16 %v1985_v31, %v1981_v18  ;;  %v11642_v51 = vsub.f32 %v957_v5, %v1985_v31  ;;  %v1987_v52 = vand.u32 4294901760, %v11612_v21  ;;  %v1134_v31 = vand.u32 4294901760, %v11623_v38 }
 0x176   : > { %v538_v58 = vpop.f32.mrb[0].mxu1  ;;  %16981 = vst [vmem:[#allocation47_spill] sm:$0xff] %v11582_v43  ;;  %16990 = vst [vmem:[#allocation56_spill] sm:$0xff] %v11601_v12  ;;  %9351 = vmatpush1.bf16.msra.mxu1 %v11617_v23  ;;  %v1146_v12 = vand.u32 4294901760, %v11663_v49  ;;  %v1148_v43 = vand.u32 4294901760, %v1036_v40 }
 0x177   : > { %v11588_v62 = vadd.f32 %v758_v24, %v538_v58  ;;  %v9320_v63 = vpop.f32.mrb[1].mxu1  ;;  %v11607_v24 = vld [vmem:[#allocation7 + $0x488] sm:$0xff]  ;;  %16992 = vst [vmem:[#allocation58_spill] sm:$0xff] %v11617_v23  ;;  %16994 = vst [vmem:[#allocation60_spill] sm:$0xff] %v11621_v27  ;;  %v11633_v58 = vld [vmem:[#allocation7 + $0x490] sm:$0xff]  ;;  %v16998_v23 = vand.u32 4294901760, %v11605_v17  ;;  %9543 = vmatpush1.bf16.msra.mxu0 %v11640_v48  ;;  %v11668_v61 = vpack.c.bf16 %v1991_v20, %v1987_v52 }
 0x178   : > { %v11635_v63 = vld [vmem:[#allocation7 + $0x508] sm:$0xff]  ;;  %16996 = vst [vmem:[#allocation62_spill] sm:$0xff] %v11640_v48  ;;  %16997 = vst [vmem:[#allocation63_spill] sm:$0xff] %v11642_v51  ;;  %v16999_v18 = vand.u32 4294901760, %v11607_v24  ;;  %v1993_v60 = vand.u32 4294901760, %v11633_v58  ;;  %v11674_v32 = vpack.c.bf16 %v1138_v1, %v1134_v31  ;;  %v1142_v48 = vand.u32 4294901760, %v11650_v50 }
 0x179   : > { %16984 = vst [vmem:[#allocation50_spill] sm:$0xff] %v11588_v62  ;;  %767 = vrot.lane.b32.xlu0 %v11588_v62, %s11247_s16  ;;  %17001 = vst [vmem:[#allocation65_spill] sm:$0xff] %v11668_v61  ;;  %v1140_v57 = vand.u32 4294901760, %v11635_v63  ;;  %v1038_v51 = vld [vmem:[#allocation7 + $0x618] sm:$0xff]  ;;  %v1035_v27 = vld [vmem:[#allocation7 + $0x600] sm:$0xff]  ;;  %9545 = vmatprep.subr.bf16.mxu0 %v11668_v61  ;;  %v11696_v15 = vpack.c.bf16 %v1152_v59, %v1148_v43  ;;  %v17011_v41 = vand.u32 4294901760, %v11607_v24 }
 0x17a   : > { %v11658_v5 = vpack.c.bf16 %v16999_v18, %v16998_v23  ;;  %v1144_v23 = vand.u32 4294901760, %v11637_v39  ;;  %v1021_v18 = vld [vmem:[#allocation7 + $0x590] sm:$0xff]  ;;  %17002 = vst [vmem:[#allocation66_spill] sm:$0xff] %v11674_v32  ;;  %v11680_v26 = vpack.c.bf16 %v1993_v60, %v1989_v0  ;;  %v1084_v61 = vld [vmem:[#allocation7 + $0x788] sm:$0xff]  ;;  %v11691_v54 = vpack.c.bf16 %v1146_v12, %v1142_v48  ;;  %v17039_v20 = vld [vmem:[#allocation19_spill] sm:$0xff] }
 0x17b   : > { %v2001_v25 = vand.u32 4294901760, %v1021_v18  ;;  %v2003_v53 = vand.u32 4294901760, %v1038_v51  ;;  %v1150_v16 = vand.u32 4294901760, %v1035_v27  ;;  %17008 = vst [vmem:[#allocation72_spill] sm:$0xff] %v11696_v15  ;;  %v11711_v37 = vsub.f32 %v11612_v21, %v1987_v52 }
 0x17c   : > { %17000 = vst [vmem:[#allocation64_spill] sm:$0xff] %v11658_v5  ;;  %9353 = vmatprep.subr.bf16.mxu1 %v11658_v5  ;;  %17003 = vst [vmem:[#allocation67_spill] sm:$0xff] %v11680_v26  ;;  %v11682_v13 = vpack.c.bf16 %v1144_v23, %v1140_v57  ;;  %v1997_v5 = vand.u32 4294901760, %v11665_v2  ;;  %9547 = vmatpush1.bf16.msra.mxu0 %v11680_v26  ;;  %v1160_v26 = vand.u32 4294901760, %v1084_v61  ;;  %v16224_v52 = vand.u32 4294901760, %v11511_v30 }
 0x17d   : > { %771 = vrot.lane.b32.xlu0 %v11588_v62, %s11248_s19  ;;  %v1999_v62 = vand.u32 4294901760, %v11648_v47  ;;  %9355 = vmatpush1.bf16.msra.mxu1 %v11674_v32  ;;  %17006 = vst [vmem:[#allocation70_spill] sm:$0xff] %v11691_v54  ;;  %v11698_v9 = vpack.c.bf16 %v2007_v19, %v2003_v53  ;;  %v11718_v34 = vsub.f32 %v11623_v38, %v1134_v31  ;;  %v17040_v31 = vld [vmem:[#allocation20_spill] sm:$0xff] }
 0x17e   : > { %17004 = vst [vmem:[#allocation68_spill] sm:$0xff] %v11682_v13  ;;  %9357 = vmatprep.subr.bf16.mxu1 %v11682_v13  ;;  %v11694_v32 = vpack.c.bf16 %v2001_v25, %v1997_v5  ;;  %v17010_v13 = vand.u32 4294901760, %v11605_v17  ;;  %v11737_v21 = vsub.f32 %v11646_v11, %v1995_v28  ;;  %v11752_v22 = vsub.f32 %v1021_v18, %v2001_v25  ;;  %v17041_v18 = vld [vmem:[#allocation21_spill] sm:$0xff] }
 0x17f   : > { %v11687_v3 = vpack.c.bf16 %v1999_v62, %v1995_v28  ;;  %17009 = vst [vmem:[#allocation73_spill] sm:$0xff] %v11698_v9  ;;  %v11740_v1 = vsub.f32 %v11648_v47, %v1999_v62  ;;  %v11755_v28 = vsub.f32 %v1036_v40, %v1148_v43  ;;  %v11757_v11 = vsub.f32 %v1052_v36, %v1152_v59  ;;  %v1067_v47 = vld [vmem:[#allocation7 + $0x700] sm:$0xff]  ;;  %v1069_v40 = vld [vmem:[#allocation7 + $0x710] sm:$0xff] }
 0x180   : > { %17007 = vst [vmem:[#allocation71_spill] sm:$0xff] %v11694_v32  ;;  %v11703_v42 = vsub.f32 %v11605_v17, %v17010_v13  ;;  %v11724_v13 = vsub.f32 %v11627_v45, %v1989_v0  ;;  %v11731_v17 = vsub.f32 %v11635_v63, %v1140_v57  ;;  %17012 = vst [vmem:[#allocation74_spill] sm:$0xff] %v11737_v21  ;;  %v1086_v45 = vld [vmem:[#allocation7 + $0x798] sm:$0xff]  ;;  %v1085_v43 = vld [vmem:[#allocation7 + $0x790] sm:$0xff] }
 0x181   : > { %17005 = vst [vmem:[#allocation69_spill] sm:$0xff] %v11687_v3  ;;  %9549 = vmatprep.subr.bf16.mxu0 %v11687_v3  ;;  %v11708_v3 = vsub.f32 %v11607_v24, %v17011_v41  ;;  %9359 = vmatpush1.bf16.msra.mxu1 %v11691_v54  ;;  %v11727_v41 = vsub.f32 %v11633_v58, %v1993_v60  ;;  %17016 = vst [vmem:[#allocation78_spill] sm:$0xff] %v11752_v22 }
 0x182   : > { %9551 = vmatpush1.bf16.msra.mxu0 %v11694_v32  ;;  %v11734_v24 = vsub.f32 %v11637_v39, %v1144_v23  ;;  %9361 = vmatprep.subr.bf16.mxu1 %v11696_v15  ;;  %v11744_v0 = vsub.f32 %v11650_v50, %v1142_v48  ;;  %v11747_v60 = vsub.f32 %v11663_v49, %v1146_v12  ;;  %v1083_v50 = vld [vmem:[#allocation7 + $0x780] sm:$0xff]  ;;  %v16231_v23 = vand.u32 4294901760, %v17040_v31  ;;  %v17046_v15 = vld [vmem:[#allocation32_spill] sm:$0xff]  ;;  %v17048_v32 = vld [vmem:[#allocation33_spill] sm:$0xff] }
 0x183   : > { %v11750_v57 = vsub.f32 %v11665_v2, %v1997_v5  ;;  %9553 = vmatprep.subr.bf16.mxu0 %v11698_v9  ;;  %17017 = vst [vmem:[#allocation79_spill] sm:$0xff] %v11755_v28  ;;  %17018 = vst [vmem:[#allocation80_spill] sm:$0xff] %v11757_v11  ;;  %v11759_v62 = vsub.f32 %v1038_v51, %v2003_v53  ;;  %v11761_v38 = vsub.f32 %v1054_v46, %v2007_v19 }
 0x184   : > { %17013 = vst [vmem:[#allocation75_spill] sm:$0xff] %v11744_v0  ;;  %17014 = vst [vmem:[#allocation76_spill] sm:$0xff] %v11747_v60  ;;  %v11763_v49 = vpack.c.bf16 %v1154_v14, %v1150_v16  ;;  %v11765_v12 = vsub.f32 %v1035_v27, %v1150_v16  ;;  %v11767_v2 = vsub.f32 %v1051_v6, %v1154_v14  ;;  %v2011_v14 = vand.u32 4294901760, %v1070_v44 }
 0x185   : > { %17015 = vst [vmem:[#allocation77_spill] sm:$0xff] %v11750_v57  ;;  %17019 = vst [vmem:[#allocation81_spill] sm:$0xff] %v11759_v62  ;;  %v11769_v25 = vpack.c.bf16 %v2009_v8, %v2005_v10  ;;  %v11771_v36 = vsub.f32 %v1037_v4, %v2005_v10  ;;  %v11773_v53 = vsub.f32 %v1053_v56, %v2009_v8  ;;  %v2015_v6 = vand.u32 4294901760, %v1086_v45 }
 0x186   : > { %17020 = vst [vmem:[#allocation82_spill] sm:$0xff] %v11761_v38  ;;  %17021 = vst [vmem:[#allocation83_spill] sm:$0xff] %v11763_v49  ;;  %v11775_v19 = vpack.c.bf16 %v1160_v26, %v1156_v7  ;;  %v11777_v59 = vsub.f32 %v1068_v55, %v1156_v7  ;;  %9363 = vmatpush1.bf16.msra.mxu1 %v11763_v49  ;;  %v11781_v16 = vsub.f32 %v1084_v61, %v1160_v26 }
 0x187   : > { %17022 = vst [vmem:[#allocation84_spill] sm:$0xff] %v11765_v12  ;;  %17023 = vst [vmem:[#allocation85_spill] sm:$0xff] %v11767_v2  ;;  %9555 = vmatpush1.bf16.msra.mxu0 %v11769_v25  ;;  %v1158_v27 = vand.u32 4294901760, %v1067_v47  ;;  %v1162_v46 = vand.u32 4294901760, %v1083_v50  ;;  %v2013_v10 = vand.u32 4294901760, %v1069_v40  ;;  %v2017_v4 = vand.u32 4294901760, %v1085_v43 }
 0x188   : > { %17024 = vst [vmem:[#allocation86_spill] sm:$0xff] %v11769_v25  ;;  %17025 = vst [vmem:[#allocation87_spill] sm:$0xff] %v11771_v36  ;;  %9365 = vmatprep.subr.bf16.mxu1 %v11775_v19  ;;  %v16225_v8 = vand.u32 4294901760, %v11509_v29  ;;  %v11785_v56 = vpack.c.bf16 %v2015_v6, %v2011_v14  ;;  %v11787_v7 = vsub.f32 %v1070_v44, %v2011_v14  ;;  %v16226_v5 = vand.u32 4294901760, %v17039_v20 }
 0x189   : > { %17026 = vst [vmem:[#allocation88_spill] sm:$0xff] %v11773_v53  ;;  %17027 = vst [vmem:[#allocation89_spill] sm:$0xff] %v11775_v19  ;;  %v11789_v55 = vsub.f32 %v1086_v45, %v2015_v6  ;;  %v11791_v58 = vsub.f32 %v1067_v47, %v1158_v27  ;;  %v11793_v61 = vpack.c.bf16 %v1162_v46, %v1158_v27  ;;  %v16238_v44 = vand.u32 4294901760, %v17041_v18  ;;  %v17042_v45 = vld [vmem:[#allocation23_spill] sm:$0xff]  ;;  %v17044_v27 = vld [vmem:[#allocation26_spill] sm:$0xff] }
 0x18a   : > { %17028 = vst [vmem:[#allocation90_spill] sm:$0xff] %v11777_v59  ;;  %17029 = vst [vmem:[#allocation91_spill] sm:$0xff] %v11781_v16  ;;  %v11795_v26 = vsub.f32 %v1083_v50, %v1162_v46  ;;  %v11797_v63 = vpack.c.bf16 %v2017_v4, %v2013_v10  ;;  %v11799_v39 = vsub.f32 %v1069_v40, %v2013_v10  ;;  %9557 = vmatprep.subr.bf16.mxu0 %v11785_v56  ;;  %v17043_v50 = vld [vmem:[#allocation25_spill] sm:$0xff] }
 0x18b   : > { %17030 = vst [vmem:[#allocation92_spill] sm:$0xff] %v11785_v56  ;;  %17031 = vst [vmem:[#allocation93_spill] sm:$0xff] %v11787_v7  ;;  %v11802_v48 = vsub.f32 %v1085_v43, %v2017_v4  ;;  %v1211_v51 = vsub.f32 %v11509_v29, %v16225_v8  ;;  %9367 = vmatpush1.bf16.msra.mxu1 %v11793_v61  ;;  %v16243_v47 = vand.u32 4294901760, %v17042_v45  ;;  %v16246_v40 = vand.u32 4294901760, %v17043_v50  ;;  %v17108_v29 = vld [vmem:[#allocation54_spill] sm:$0xff] }
 0x18c   : > { %17032 = vst [vmem:[#allocation94_spill] sm:$0xff] %v11789_v55  ;;  %17033 = vst [vmem:[#allocation95_spill] sm:$0xff] %v11791_v58  ;;  %9559 = vmatpush1.bf16.msra.mxu0 %v11797_v63  ;;  %v1223_v14 = vsub.f32 %v11511_v30, %v16224_v52  ;;  %v2066_v6 = vsub.f32 %v17039_v20, %v16226_v5  ;;  %v16251_v46 = vand.u32 4294901760, %v17044_v27  ;;  %v16255_v54 = vand.u32 4294901760, %v17048_v32 }
 0x18d   : > { %17034 = vst [vmem:[#allocation96_spill] sm:$0xff] %v11793_v61  ;;  %17035 = vst [vmem:[#allocation97_spill] sm:$0xff] %v11795_v26  ;;  %v1212_v43 = vand.u32 4294901760, %v1211_v51  ;;  %v2078_v10 = vsub.f32 %v17040_v31, %v16231_v23  ;;  %v1217_v4 = vsub.f32 %v17041_v18, %v16238_v44  ;;  %v1229_v51 = vsub.f32 %v17042_v45, %v16243_v47  ;;  %v17045_v61 = vld [vmem:[#allocation31_spill] sm:$0xff]  ;;  %v17103_v18 = vld [vmem:[#allocation45_spill] sm:$0xff] }
 0x18e   : > { %17036 = vst [vmem:[#allocation98_spill] sm:$0xff] %v11797_v63  ;;  %17037 = vst [vmem:[#allocation99_spill] sm:$0xff] %v11799_v39  ;;  %v2072_v52 = vsub.f32 %v17043_v50, %v16246_v40  ;;  %v1224_v8 = vand.u32 4294901760, %v1223_v14  ;;  %v2067_v5 = vand.u32 4294901760, %v2066_v6  ;;  %v2084_v63 = vsub.f32 %v17044_v27, %v16251_v46  ;;  %v17049_v46 = vld [vmem:[#allocation34_spill] sm:$0xff] }
 0x18f   : > { %17038 = vst [vmem:[#allocation100_spill] sm:$0xff] %v11802_v48  ;;  %v16254_v23 = vand.u32 4294901760, %v17045_v61  ;;  %v2079_v56 = vand.u32 4294901760, %v2078_v10  ;;  %v1218_v19 = vand.u32 4294901760, %v1217_v4  ;;  %v1230_v25 = vand.u32 4294901760, %v1229_v51  ;;  %v17104_v50 = vld [vmem:[#allocation46_spill] sm:$0xff] }
 0x190   : > { %v2073_v44 = vand.u32 4294901760, %v2072_v52  ;;  %v9368_v49 = vpack.c.bf16 %v1224_v8, %v1212_v43  ;;  %v2085_v9 = vand.u32 4294901760, %v2084_v63  ;;  %v16253_v40 = vand.u32 4294901760, %v17046_v15  ;;  %v17051_v63 = vld [vmem:[#allocation35_spill] sm:$0xff]  ;;  %v17054_v43 = vld [vmem:[#allocation38_spill] sm:$0xff] }
 0x191   : > { %v1235_v47 = vsub.f32 %v17045_v61, %v16254_v23  ;;  %v9560_v14 = vpack.c.bf16 %v2079_v56, %v2067_v5  ;;  %v11842_v6 = vpack.c.bf16 %v1230_v25, %v1218_v19  ;;  %v16256_v27 = vand.u32 4294901760, %v17049_v46  ;;  %v17052_v56 = vld [vmem:[#allocation36_spill] sm:$0xff]  ;;  %v17106_v61 = vld [vmem:[#allocation49_spill] sm:$0xff] }
 0x192   : > { %9369 = vmatprep.subr.bf16.mxu1 %v9368_v49  ;;  %v11846_v10 = vpack.c.bf16 %v2085_v9, %v2073_v44  ;;  %v1247_v8 = vsub.f32 %v17046_v15, %v16253_v40  ;;  %v16257_v52 = vand.u32 4294901760, %v17051_v63  ;;  %v2090_v25 = vsub.f32 %v17048_v32, %v16255_v54  ;;  %v17053_v9 = vld [vmem:[#allocation37_spill] sm:$0xff] }
 0x193   : > { %17047 = vst [vmem:[#allocation20_spill] sm:$0xff] %v11842_v6  ;;  %v1236_v4 = vand.u32 4294901760, %v1235_v47  ;;  %9561 = vmatprep.subr.bf16.mxu0 %v9560_v14  ;;  %v2102_v19 = vsub.f32 %v17049_v46, %v16256_v27  ;;  %v16260_v49 = vand.u32 4294901760, %v17052_v56  ;;  %v16264_v5 = vand.u32 4294901760, %v17053_v9  ;;  %v17055_v14 = vld [vmem:[#allocation42_spill] sm:$0xff] }
 0x194   : > { %17050 = vst [vmem:[#allocation23_spill] sm:$0xff] %v11846_v10  ;;  %v1248_v44 = vand.u32 4294901760, %v1247_v8  ;;  %v1241_v47 = vsub.f32 %v17051_v63, %v16257_v52  ;;  %v16265_v51 = vand.u32 4294901760, %v17054_v43  ;;  %v16267_v40 = vand.u32 4294901760, %v17055_v14 }
 0x195   : > { %v2091_v23 = vand.u32 4294901760, %v2090_v25  ;;  %v2103_v10 = vand.u32 4294901760, %v2102_v19  ;;  %v1253_v54 = vsub.f32 %v17052_v56, %v16260_v49  ;;  %v2096_v27 = vsub.f32 %v17053_v9, %v16264_v5  ;;  %v17058_v49 = vld [vmem:[#allocation43_spill] sm:$0xff]  ;;  %v17059_v5 = vld [vmem:[#allocation44_spill] sm:$0xff] }
 0x196   : > { %v11871_v6 = vpack.c.bf16 %v1248_v44, %v1236_v4  ;;  %v1242_v8 = vand.u32 4294901760, %v1241_v47  ;;  %v2108_v52 = vsub.f32 %v17054_v43, %v16265_v51  ;;  %v1259_v25 = vsub.f32 %v17055_v14, %v16267_v40  ;;  %v17060_v44 = vld [vmem:[#allocation45_spill] sm:$0xff]  ;;  %v17062_v43 = vld [vmem:[#allocation46_spill] sm:$0xff]  ;;  %v17111_v9 = vld [vmem:[#allocation59_spill] sm:$0xff] }
 0x197   : > { %v11879_v19 = vpack.c.bf16 %v2103_v10, %v2091_v23  ;;  %v1254_v63 = vand.u32 4294901760, %v1253_v54  ;;  %v2097_v46 = vand.u32 4294901760, %v2096_v27  ;;  %v16268_v56 = vand.u32 4294901760, %v17058_v49  ;;  %v17063_v23 = vld [vmem:[#allocation47_spill] sm:$0xff] }
 0x198   : > { %17056 = vst [vmem:[#allocation42_spill] sm:$0xff] %v11871_v6  ;;  %v2109_v32 = vand.u32 4294901760, %v2108_v52  ;;  %v1260_v15 = vand.u32 4294901760, %v1259_v25  ;;  %v16269_v4 = vand.u32 4294901760, %v17059_v5  ;;  %v16270_v47 = vand.u32 4294901760, %v17060_v44 }
 0x199   : > { %17057 = vst [vmem:[#allocation101_spill] sm:$0xff] %v11879_v19  ;;  %v11884_v6 = vpack.c.bf16 %v1254_v63, %v1242_v8  ;;  %v1271_v51 = vsub.f32 %v17058_v49, %v16268_v56  ;;  %v16274_v40 = vand.u32 4294901760, %v17062_v43  ;;  %v16276_v10 = vand.u32 4294901760, %v17063_v23  ;;  %v17065_v63 = vld [vmem:[#allocation49_spill] sm:$0xff] }
 0x19a   : > { %v11891_v54 = vpack.c.bf16 %v2109_v32, %v2097_v46  ;;  %v2114_v27 = vsub.f32 %v17059_v5, %v16269_v4  ;;  %v2126_v52 = vsub.f32 %v17060_v44, %v16270_v47  ;;  %v16278_v8 = vand.u32 4294901760, %v17065_v63  ;;  %v17066_v46 = vld [vmem:[#allocation51_spill] sm:$0xff]  ;;  %v17067_v47 = vld [vmem:[#allocation53_spill] sm:$0xff] }
 0x19b   : > { %17061 = vst [vmem:[#allocation102_spill] sm:$0xff] %v11884_v6  ;;  %v1272_v25 = vand.u32 4294901760, %v1271_v51  ;;  %v1265_v56 = vsub.f32 %v17062_v43, %v16274_v40  ;;  %v1277_v32 = vsub.f32 %v17063_v23, %v16276_v10  ;;  %v16282_v44 = vand.u32 4294901760, %v17067_v47 }
 0x19c   : > { %17064 = vst [vmem:[#allocation103_spill] sm:$0xff] %v11891_v54  ;;  %v16280_v54 = vand.u32 4294901760, %v17066_v46  ;;  %v2115_v6 = vand.u32 4294901760, %v2114_v27  ;;  %v2127_v19 = vand.u32 4294901760, %v2126_v52  ;;  %v2120_v4 = vsub.f32 %v17065_v63, %v16278_v8  ;;  %v17070_v52 = vld [vmem:[#allocation54_spill] sm:$0xff] }
 0x19d   : > { %v11911_v5 = vpack.c.bf16 %v1272_v25, %v1260_v15  ;;  %v1266_v51 = vand.u32 4294901760, %v1265_v56  ;;  %v1278_v49 = vand.u32 4294901760, %v1277_v32  ;;  %v1283_v27 = vsub.f32 %v17067_v47, %v16282_v44  ;;  %v17072_v15 = vld [vmem:[#allocation56_spill] sm:$0xff]  ;;  %v17073_v56 = vld [vmem:[#allocation57_spill] sm:$0xff] }
 0x19e   : > { %v2132_v40 = vsub.f32 %v17066_v46, %v16280_v54  ;;  %v11916_v43 = vpack.c.bf16 %v2127_v19, %v2115_v6  ;;  %v2121_v10 = vand.u32 4294901760, %v2120_v4  ;;  %v16283_v23 = vand.u32 4294901760, %v17070_v52  ;;  %v17074_v19 = vld [vmem:[#allocation59_spill] sm:$0xff]  ;;  %v17075_v54 = vld [vmem:[#allocation60_spill] sm:$0xff] }
 0x19f   : > { %17068 = vst [vmem:[#allocation53_spill] sm:$0xff] %v11911_v5  ;;  %v11922_v8 = vpack.c.bf16 %v1278_v49, %v1266_v51  ;;  %v16285_v25 = vand.u32 4294901760, %v17072_v15  ;;  %v16286_v32 = vand.u32 4294901760, %v17073_v56  ;;  %v1284_v5 = vand.u32 4294901760, %v1283_v27  ;;  %v17077_v51 = vld [vmem:[#allocation61_spill] sm:$0xff] }
 0x1a0   : > { %17069 = vst [vmem:[#allocation104_spill] sm:$0xff] %v11916_v43  ;;  %v2133_v63 = vand.u32 4294901760, %v2132_v40  ;;  %v1295_v6 = vsub.f32 %v17070_v52, %v16283_v23  ;;  %v16289_v4 = vand.u32 4294901760, %v17074_v19  ;;  %v16291_v43 = vand.u32 4294901760, %v17075_v54 }
 0x1a1   : > { %17071 = vst [vmem:[#allocation105_spill] sm:$0xff] %v11922_v8  ;;  %v2138_v49 = vsub.f32 %v17072_v15, %v16285_v25  ;;  %v2150_v40 = vsub.f32 %v17073_v56, %v16286_v32  ;;  %v16292_v27 = vand.u32 4294901760, %v17077_v51  ;;  %v16295_v32 = vand.u32 4294901760, %v11703_v42 }
 0x1a2   : > { %v11931_v46 = vpack.c.bf16 %v2133_v63, %v2121_v10  ;;  %v1296_v44 = vand.u32 4294901760, %v1295_v6  ;;  %v1289_v23 = vsub.f32 %v17074_v19, %v16289_v4  ;;  %v1301_v10 = vsub.f32 %v17075_v54, %v16291_v43  ;;  %v17078_v63 = vld [vmem:[#allocation63_spill] sm:$0xff] }
 0x1a3   : > { %v2139_v8 = vand.u32 4294901760, %v2138_v49  ;;  %v2151_v52 = vand.u32 4294901760, %v2150_v40  ;;  %v2144_v25 = vsub.f32 %v17077_v51, %v16292_v27  ;;  %v1307_v49 = vsub.f32 %v11703_v42, %v16295_v32 }
 0x1a4   : > { %17076 = vst [vmem:[#allocation60_spill] sm:$0xff] %v11931_v46  ;;  %v16296_v46 = vand.u32 4294901760, %v17078_v63  ;;  %v11951_v56 = vpack.c.bf16 %v1296_v44, %v1284_v5  ;;  %v1290_v6 = vand.u32 4294901760, %v1289_v23  ;;  %v1302_v15 = vand.u32 4294901760, %v1301_v10 }
 0x1a5   : > { %v11956_v19 = vpack.c.bf16 %v2151_v52, %v2139_v8  ;;  %v2145_v43 = vand.u32 4294901760, %v2144_v25  ;;  %v16294_v40 = vand.u32 4294901760, %v11708_v3  ;;  %v16297_v5 = vand.u32 4294901760, %v11711_v37 }
 0x1a6   : > { %17079 = vst [vmem:[#allocation63_spill] sm:$0xff] %v11951_v56  ;;  %v2156_v4 = vsub.f32 %v17078_v63, %v16296_v46  ;;  %v11962_v27 = vpack.c.bf16 %v1302_v15, %v1290_v6  ;;  %v16298_v44 = vand.u32 4294901760, %v11714_v35  ;;  %v1308_v23 = vand.u32 4294901760, %v1307_v49 }
 0x1a7   : > { %17080 = vst [vmem:[#allocation106_spill] sm:$0xff] %v11956_v19  ;;  %v1319_v8 = vsub.f32 %v11708_v3, %v16294_v40  ;;  %v16299_v52 = vand.u32 4294901760, %v11718_v34  ;;  %v16300_v25 = vand.u32 4294901760, %v11721_v33  ;;  %v2162_v15 = vsub.f32 %v11711_v37, %v16297_v5 }
 0x1a8   : > { %17081 = vst [vmem:[#allocation107_spill] sm:$0xff] %v11962_v27  ;;  %v2157_v51 = vand.u32 4294901760, %v2156_v4  ;;  %v2174_v4 = vsub.f32 %v11714_v35, %v16298_v44  ;;  %v16301_v6 = vand.u32 4294901760, %v11724_v13  ;;  %v16303_v44 = vand.u32 4294901760, %v11731_v17 }
 0x1a9   : > { %v1320_v49 = vand.u32 4294901760, %v1319_v8  ;;  %v1313_v40 = vsub.f32 %v11718_v34, %v16299_v52  ;;  %v2163_v32 = vand.u32 4294901760, %v2162_v15 }
 0x1aa   : > { %v11971_v10 = vpack.c.bf16 %v2157_v51, %v2145_v43  ;;  %v1325_v43 = vsub.f32 %v11721_v33, %v16300_v25  ;;  %v16304_v51 = vand.u32 4294901760, %v11727_v41  ;;  %v2175_v46 = vand.u32 4294901760, %v2174_v4 }
 0x1ab   : > { %v2168_v5 = vsub.f32 %v11724_v13, %v16301_v6  ;;  %v1314_v8 = vand.u32 4294901760, %v1313_v40  ;;  %v1331_v15 = vsub.f32 %v11731_v17, %v16303_v44  ;;  %v16302_v4 = vand.u32 4294901760, %v11734_v24 }
 0x1ac   : > { %17082 = vst [vmem:[#allocation108_spill] sm:$0xff] %v11971_v10  ;;  %v11991_v10 = vpack.c.bf16 %v1320_v49, %v1308_v23  ;;  %v1326_v27 = vand.u32 4294901760, %v1325_v43  ;;  %v2180_v52 = vsub.f32 %v11727_v41, %v16304_v51  ;;  %v11996_v19 = vpack.c.bf16 %v2175_v46, %v2163_v32 }
 0x1ad   : > { %v2169_v25 = vand.u32 4294901760, %v2168_v5  ;;  %v16305_v23 = vand.u32 4294901760, %v11737_v21  ;;  %v16306_v40 = vand.u32 4294901760, %v11740_v1  ;;  %v1332_v49 = vand.u32 4294901760, %v1331_v15 }
 0x1ae   : > { %17083 = vst [vmem:[#allocation109_spill] sm:$0xff] %v11991_v10  ;;  %17084 = vst [vmem:[#allocation110_spill] sm:$0xff] %v11996_v19  ;;  %v12002_v6 = vpack.c.bf16 %v1326_v27, %v1314_v8  ;;  %v2181_v56 = vand.u32 4294901760, %v2180_v52  ;;  %v1343_v46 = vsub.f32 %v11734_v24, %v16302_v4  ;;  %v16307_v32 = vand.u32 4294901760, %v11744_v0 }
 0x1af   : > { %v16308_v5 = vand.u32 4294901760, %v11747_v60  ;;  %v2186_v27 = vsub.f32 %v11737_v21, %v16305_v23  ;;  %v2198_v52 = vsub.f32 %v11740_v1, %v16306_v40  ;;  %v16309_v8 = vand.u32 4294901760, %v11750_v57 }
 0x1b0   : > { %17085 = vst [vmem:[#allocation111_spill] sm:$0xff] %v12002_v6  ;;  %v12011_v43 = vpack.c.bf16 %v2181_v56, %v2169_v25  ;;  %v1344_v15 = vand.u32 4294901760, %v1343_v46  ;;  %v1337_v4 = vsub.f32 %v11744_v0, %v16307_v32  ;;  %v16312_v25 = vand.u32 4294901760, %v11752_v22 }
 0x1b1   : > { %v1349_v56 = vsub.f32 %v11747_v60, %v16308_v5  ;;  %v2187_v44 = vand.u32 4294901760, %v2186_v27  ;;  %v2199_v51 = vand.u32 4294901760, %v2198_v52  ;;  %v2192_v23 = vsub.f32 %v11750_v57, %v16309_v8 }
 0x1b2   : > { %17086 = vst [vmem:[#allocation112_spill] sm:$0xff] %v12011_v43  ;;  %v16311_v40 = vand.u32 4294901760, %v11755_v28  ;;  %v12031_v43 = vpack.c.bf16 %v1344_v15, %v1332_v49  ;;  %v1338_v46 = vand.u32 4294901760, %v1337_v4  ;;  %v2204_v32 = vsub.f32 %v11752_v22, %v16312_v25 }
 0x1b3   : > { %v1350_v6 = vand.u32 4294901760, %v1349_v56  ;;  %v12036_v19 = vpack.c.bf16 %v2199_v51, %v2187_v44  ;;  %v2193_v5 = vand.u32 4294901760, %v2192_v23  ;;  %v16310_v52 = vand.u32 4294901760, %v11757_v11 }
 0x1b4   : > { %17087 = vst [vmem:[#allocation113_spill] sm:$0xff] %v12031_v43  ;;  %v1355_v27 = vsub.f32 %v11755_v28, %v16311_v40  ;;  %v2205_v10 = vand.u32 4294901760, %v2204_v32  ;;  %v16313_v49 = vand.u32 4294901760, %v11759_v62  ;;  %v16314_v4 = vand.u32 4294901760, %v11761_v38 }
 0x1b5   : > { %17088 = vst [vmem:[#allocation114_spill] sm:$0xff] %v12036_v19  ;;  %v12042_v8 = vpack.c.bf16 %v1350_v6, %v1338_v46  ;;  %v1367_v44 = vsub.f32 %v11757_v11, %v16310_v52  ;;  %v16315_v51 = vand.u32 4294901760, %v11765_v12  ;;  %v16316_v23 = vand.u32 4294901760, %v11767_v2 }
 0x1b6   : > { %v1356_v15 = vand.u32 4294901760, %v1355_v27  ;;  %v12051_v56 = vpack.c.bf16 %v2205_v10, %v2193_v5  ;;  %v2210_v6 = vsub.f32 %v11759_v62, %v16313_v49  ;;  %v2222_v32 = vsub.f32 %v11761_v38, %v16314_v4 }
 0x1b7   : > { %17089 = vst [vmem:[#allocation115_spill] sm:$0xff] %v12042_v8  ;;  %v16317_v46 = vand.u32 4294901760, %v11771_v36  ;;  %v1368_v27 = vand.u32 4294901760, %v1367_v44  ;;  %v1361_v52 = vsub.f32 %v11765_v12, %v16315_v51  ;;  %v1373_v10 = vsub.f32 %v11767_v2, %v16316_v23  ;;  %v17123_v2 = vld [vmem:[#allocation50_spill] sm:$0xff] }
 0x1b8   : > { %17090 = vst [vmem:[#allocation116_spill] sm:$0xff] %v12051_v56  ;;  %v16320_v5 = vand.u32 4294901760, %v11773_v53  ;;  %v2211_v40 = vand.u32 4294901760, %v2210_v6  ;;  %v2223_v25 = vand.u32 4294901760, %v2222_v32  ;;  %v16319_v4 = vand.u32 4294901760, %v11777_v59 }
 0x1b9   : > { %v2216_v49 = vsub.f32 %v11771_v36, %v16317_v46  ;;  %v12071_v56 = vpack.c.bf16 %v1368_v27, %v1356_v15  ;;  %v1362_v44 = vand.u32 4294901760, %v1361_v52  ;;  %v1374_v8 = vand.u32 4294901760, %v1373_v10 }
 0x1ba   : > { %v2228_v51 = vsub.f32 %v11773_v53, %v16320_v5  ;;  %v12076_v19 = vpack.c.bf16 %v2223_v25, %v2211_v40  ;;  %v1379_v6 = vsub.f32 %v11777_v59, %v16319_v4  ;;  %v16318_v32 = vand.u32 4294901760, %v11781_v16 }
 0x1bb   : > { %v2217_v23 = vand.u32 4294901760, %v2216_v49  ;;  %v12082_v46 = vpack.c.bf16 %v1374_v8, %v1362_v44  ;;  %v16321_v15 = vand.u32 4294901760, %v11787_v7  ;;  %v16322_v52 = vand.u32 4294901760, %v11789_v55 }
 0x1bc   : > { %17091 = vst [vmem:[#allocation117_spill] sm:$0xff] %v12076_v19  ;;  %v2229_v43 = vand.u32 4294901760, %v2228_v51  ;;  %v1380_v27 = vand.u32 4294901760, %v1379_v6  ;;  %v1391_v40 = vsub.f32 %v11781_v16, %v16318_v32  ;;  %v16323_v25 = vand.u32 4294901760, %v11791_v58 }
 0x1bd   : > { %17092 = vst [vmem:[#allocation118_spill] sm:$0xff] %v12082_v46  ;;  %v16324_v49 = vand.u32 4294901760, %v11795_v26  ;;  %v2234_v8 = vsub.f32 %v11787_v7, %v16321_v15  ;;  %v2246_v51 = vsub.f32 %v11789_v55, %v16322_v52  ;;  %v16325_v44 = vand.u32 4294901760, %v11799_v39 }
 0x1be   : > { %v12091_v10 = vpack.c.bf16 %v2229_v43, %v2217_v23  ;;  %v1392_v6 = vand.u32 4294901760, %v1391_v40  ;;  %v1385_v32 = vsub.f32 %v11791_v58, %v16323_v25  ;;  %v16328_v23 = vand.u32 4294901760, %v11802_v48 }
 0x1bf   : > { %v1397_v43 = vsub.f32 %v11795_v26, %v16324_v49  ;;  %v2235_v4 = vand.u32 4294901760, %v2234_v8  ;;  %v2247_v5 = vand.u32 4294901760, %v2246_v51  ;;  %v2240_v15 = vsub.f32 %v11799_v39, %v16325_v44  ;;  %v17100_v8 = vld [vmem:[#allocation38_spill] sm:$0xff]  ;;  %v17101_v51 = vld [vmem:[#allocation43_spill] sm:$0xff] }
 0x1c0   : > { %17093 = vst [vmem:[#allocation119_spill] sm:$0xff] %v12091_v10  ;;  %v12112_v40 = vpack.c.bf16 %v1392_v6, %v1380_v27  ;;  %v1386_v10 = vand.u32 4294901760, %v1385_v32  ;;  %v2252_v25 = vsub.f32 %v11802_v48, %v16328_v23  ;;  %v17097_v23 = vld [vmem:[#allocation34_spill] sm:$0xff]  ;;  %v17105_v27 = vld [vmem:[#allocation47_spill] sm:$0xff]  ;;  %v762_v28 = vlaneseq }
 0x1c1   : > { %v1398_v46 = vand.u32 4294901760, %v1397_v43  ;;  %v12117_v49 = vpack.c.bf16 %v2247_v5, %v2235_v4  ;;  %v2241_v19 = vand.u32 4294901760, %v2240_v15  ;;  %v17107_v6 = vld [vmem:[#allocation51_spill] sm:$0xff]  ;;  %v17109_v5 = vld [vmem:[#allocation56_spill] sm:$0xff]  ;;  %v17110_v15 = vld [vmem:[#allocation57_spill] sm:$0xff] }
 0x1c2   : > { %v2253_v52 = vand.u32 4294901760, %v2252_v25  ;;  %v17102_v25 = vld [vmem:[#allocation44_spill] sm:$0xff]  ;;  %v12185_v4 = vshrl.u32 %v762_v28, 7  ;;  %v12187_v62 = vand.u32 127, %v762_v28 }
 0x1c3   : > { %v12123_v44 = vpack.c.bf16 %v1398_v46, %v1386_v10  ;;  %v774_v43 = vld [vmem:[%s16138_s2] sm:$0xff] }
 0x1c4   : > { %v12137_v10 = vpack.c.bf16 %v2253_v52, %v2241_v19  ;;  %v17112_v19 = vld [vmem:[#allocation61_spill] sm:$0xff]  ;;  %17113 = vst [vmem:[#allocation34_spill] sm:$0xff] %v12185_v4  ;;  %17114 = vst [vmem:[#allocation38_spill] sm:$0xff] %v12187_v62  ;;  %v12190_v30 = vsub.s32 0, %v12185_v4  ;;  %v12193_v20 = vsub.s32 6, %v12185_v4  ;;  %v12196_v46 = vsub.s32 1, %v12185_v4 }
 0x1c5   : > { %v12199_v52 = vsub.s32 7, %v12185_v4  ;;  %v12205_v32 = vsub.s32 3, %v12185_v4  ;;  %vm766_vm2 = vcmp.ge.s32.totalorder %v12187_v62, 16  ;;  %v12210_v39 = vsub.s32 2, %v12185_v4 }
 0x1c6   : > { %17115 = vst [vmem:[#allocation43_spill] sm:$0xff] %v12190_v30  ;;  %17116 = vst [vmem:[#allocation44_spill] sm:$0xff] %v12193_v20  ;;  %v779_v28 = vrot.slane %v774_v43, %v12190_v30  ;;  %v813_v48 = vrot.slane %v774_v43, %v12193_v20  ;;  %v12214_v58 = vsub.s32 4, %v12185_v4  ;;  %v12217_v26 = vsub.s32 5, %v12185_v4 }
 0x1c7   : > { %17117 = vst [vmem:[#allocation45_spill] sm:$0xff] %v12196_v46  ;;  %17118 = vst [vmem:[#allocation46_spill] sm:$0xff] %v12199_v52  ;;  %v784_v7 = vrot.slane %v774_v43, %v12196_v46  ;;  %v818_v55 = vrot.slane %v774_v43, %v12199_v52  ;;  %v796_v16 = vrot.slane %v774_v43, %v12205_v32  ;;  %vm770_vm3 = vcmp.lt.s32.totalorder %v12187_v62, 112  ;;  %v9271_v46 = vld [vmem:[%s16138_s2 + $0x8] ss:$0 sm:$0xff]  ;;  %v17202_v62 = vld [vmem:[#allocation84_spill] sm:$0xff] }
 0x1c8   : > { %17119 = vst [vmem:[#allocation47_spill] sm:$0xff] %v12205_v32  ;;  %17120 = vst [vmem:[#allocation49_spill] sm:$0xff] %v12210_v39  ;;  %v790_v53 = vrot.slane %v774_v43, %v12210_v39  ;;  %v801_v12 = vrot.slane %v774_v43, %v12214_v58  ;;  %v807_v52 = vrot.slane %v774_v43, %v12217_v26  ;;  %vm827_vm4 = vcmp.lt.s32.totalorder %v12185_v4, 7 }
 0x1c9   : > { %17121 = vst [vmem:[#allocation51_spill] sm:$0xff] %v12214_v58  ;;  %17122 = vst [vmem:[#allocation54_spill] sm:$0xff] %v12217_v26  ;;  %v785_v38 = vmul.f32 %v17123_v2, %v784_v7  ;;  %v819_v32 = vmul.f32 %v17123_v2, %v818_v55  ;;  %vm830_vm5 = vcmp.ge.s32.totalorder %v12185_v4, 1 }
 0x1ca   : > { %v802_v58 = vmul.f32 %v17123_v2, %v801_v12  ;;  %v837_v12 = vstv %s10962_s26  ;;  %s11169_s26 = scalar_lea.vmem %s11168_s14, 4096 }
 0x1cb   : > { %p11171_p7 = scmp.lt.s32.totalorder %s11169_s26, %s11163_s9 }
 0x1cd   : > { %p11172_p10 = por %p11171_p7, %p11170_p3 }
 0x1cf   : > { %p11173_p13 = pnand %p11172_p10, %p11166_p8 }
 0x1eb   : > { %v768_v59 = vpop.permute.xlu0 %767 }
 0x1ec   : > { %v769_v30 = vsel %vm766_vm2, %v768_v59, 0.0 }
 0x1ed   : > { %v780_v36 = vmul.f32 %v779_v28, %v769_v30  ;;  %v814_v20 = vmul.f32 %v813_v48, %v769_v30  ;;  %v797_v59 = vmul.f32 %v796_v16, %v769_v30 }
 0x1ef   : > { %v772_v11 = vpop.permute.xlu0 %771  ;;  %v786_v48 = vadd.f32 %v785_v38, %v780_v36  ;;  %v820_v57 = vadd.f32 %v819_v32, %v814_v20  ;;  %v803_v43 = vadd.f32 %v802_v58, %v797_v59  ;;  %v17128_v58 = vld [vmem:[#allocation20_spill] sm:$0xff]  ;;  %v17131_v20 = vld [vmem:[#allocation101_spill] sm:$0xff]  ;;  %v17132_v32 = vmov 0.0  }
 0x1f0   : > { %v773_v28 = vsel %vm770_vm3, %v772_v11, 0.0  ;;  %v17135_v59 = vld [vmem:[#allocation53_spill] sm:$0xff] }
 0x1f1   : > { %v791_v39 = vmul.f32 %v790_v53, %v773_v28  ;;  %v825_v22 = vmul.f32 %v9271_v46, %v773_v28  ;;  %v808_v0 = vmul.f32 %v807_v52, %v773_v28  ;;  %v17133_v46 = vld [vmem:[#allocation102_spill] sm:$0xff]  ;;  %v17134_v52 = vld [vmem:[#allocation103_spill] sm:$0xff]  ;;  %v17136_v28 = vld [vmem:[#allocation104_spill] sm:$0xff] }
 0x1f3   : > { %v792_v60 = vadd.f32 %v791_v39, %v786_v48  ;;  %v826_v21 = vadd.f32 %v825_v22, %v820_v57  ;;  %v809_v30 = vadd.f32 %v808_v0, %v803_v43  ;;  %v17130_v39 = vld [vmem:[#allocation42_spill] sm:$0xff]  ;;  %v17137_v48 = vld [vmem:[#allocation105_spill] sm:$0xff]  ;;  %v17138_v43 = vld [vmem:[#allocation60_spill] sm:$0xff] }
 0x1f5   : > { %v828_v7 = vrot.slane %v792_v60, 1  ;;  %v831_v26 = vrot.slane %v826_v21, 7 }
 0x1f7   : > { %v829_v11 = vsel %vm827_vm4, %v828_v7, 0.0  ;;  %v832_v36 = vsel %vm830_vm5, %v831_v26, 0.0  ;;  %v17129_v26 = vld [vmem:[#allocation23_spill] sm:$0xff] }
 0x1f8   : > { %v833_v38 = vadd.f32 %v829_v11, %v809_v30  ;;  %v17139_v7 = vld [vmem:[#allocation63_spill] sm:$0xff]  ;;  %v17140_v30 = vld [vmem:[#allocation106_spill] sm:$0xff] }
 0x1f9   : > { %v17141_v11 = vld [vmem:[#allocation107_spill] sm:$0xff] }
 0x1fa   : > { %v834_v2 = vadd.f32 %v833_v38, %v832_v36  ;;  %v17142_v38 = vld [vmem:[#allocation108_spill] sm:$0xff]  ;;  %v17143_v36 = vld [vmem:[#allocation109_spill] sm:$0xff] }
 0x1fc   : > { %v839_v53 = vadd.f32 %v837_v12, %v834_v2  ;;  %v17144_v12 = vld [vmem:[#allocation110_spill] sm:$0xff]  ;;  %v17145_v2 = vld [vmem:[#allocation111_spill] sm:$0xff] }
 0x1fe   : > { %vm840_vm6 = vcmp.ge.f32.partialorder %v839_v53, 0.0  ;;  %v841_v57 = vmul.f32 0.4, %v839_v53 }
 0x200   : > { %v842_v22 = vsel %vm840_vm6, %v839_v53, %v841_v57  ;;  %v17146_v53 = vld [vmem:[#allocation112_spill] sm:$0xff]  ;;  %v17147_v57 = vld [vmem:[#allocation113_spill] sm:$0xff] }
 0x201   : > { %v12242_v16 = vand.u32 4294901760, %v842_v22 }
 0x203   : > { %17124 = vst [vmem:[#allocation56_spill] sm:$0xff] %v12242_v16  ;;  %v12245_v21 = vsub.f32 %v842_v22, %v12242_v16  ;;  %v17148_v22 = vld [vmem:[#allocation114_spill] sm:$0xff] }
 0x205   : > { %17125 = vst [vmem:[#allocation57_spill] sm:$0xff] %v12245_v21  ;;  %v12248_v0 = vand.u32 4294901760, %v12245_v21 }
 0x207   : > { %17126 = vst [vmem:[#allocation59_spill] sm:$0xff] %v12248_v0  ;;  %v1200_v60 = vsub.f32 %v12245_v21, %v12248_v0 }
 0x209   : > { %v12252_v55 = vand.u32 4294901760, %v1200_v60  ;;  %v17149_v60 = vld [vmem:[#allocation115_spill] sm:$0xff] }
 0x20b   : > { %17127 = vst [vmem:[#allocation61_spill] sm:$0xff] %v12252_v55  ;;  %1202 = vmatmul.mubr.f32.vlgmr.msra.gmra.mrb[2].mxu1 %v12252_v55  ;;  %2057 = vmatmul.mubr.f32.vlgmr.msra.gmra.mrb[2].mxu0 %v12252_v55 }
 0x20c   : > { %9371 = vmatpush1.bf16.msra.mxu1 %v17128_v58  ;;  %9563 = vmatpush1.bf16.msra.mxu0 %v17129_v26  ;;  %v17150_v58 = vld [vmem:[#allocation116_spill] sm:$0xff]  ;;  %v17151_v26 = vld [vmem:[#allocation117_spill] sm:$0xff] }
 0x20d   : > { %9373 = vmatprep.subr.bf16.mxu1 %v17130_v39  ;;  %9565 = vmatprep.subr.bf16.mxu0 %v17131_v20  ;;  %v17152_v39 = vld [vmem:[#allocation118_spill] sm:$0xff]  ;;  %v17153_v20 = vld [vmem:[#allocation119_spill] sm:$0xff] }
 0x20e   : > { %1432 = vmatprep.mubr.f32.mxu1 %v17132_v32  ;;  %2287 = vmatprep.mubr.f32.mxu0 %v17132_v32 }
 0x210   : > { %9375 = vmatpush1.bf16.msra.mxu1 %v17133_v46  ;;  %9567 = vmatpush1.bf16.msra.mxu0 %v17134_v52  ;;  %v17154_v46 = vld [vmem:[#allocation17_spill] sm:$0xff]  ;;  %v17155_v52 = vld [vmem:[#allocation16_spill] sm:$0xff] }
 0x211   : > { %9377 = vmatprep.subr.bf16.mxu1 %v17135_v59  ;;  %9569 = vmatprep.subr.bf16.mxu0 %v17136_v28  ;;  %v17156_v59 = vpack.c.bf16 %v17154_v46, %v17155_v52 }
 0x214   : > { %9379 = vmatpush1.bf16.msra.mxu1 %v17137_v48  ;;  %9571 = vmatpush1.bf16.msra.mxu0 %v17138_v43 }
 0x215   : > { %9381 = vmatprep.subr.bf16.mxu1 %v17139_v7  ;;  %9573 = vmatprep.subr.bf16.mxu0 %v17140_v30  ;;  %v17165_v7 = vld [vmem:[#allocation31_spill] sm:$0xff] }
 0x218   : > { %9383 = vmatpush1.bf16.msra.mxu1 %v17141_v11  ;;  %9575 = vmatpush1.bf16.msra.mxu0 %v17142_v38  ;;  %v17167_v11 = vld [vmem:[#allocation33_spill] sm:$0xff] }
 0x219   : > { %9385 = vmatprep.subr.bf16.mxu1 %v17143_v36  ;;  %9577 = vmatprep.subr.bf16.mxu0 %v17144_v12  ;;  %v17168_v38 = vpack.c.bf16 %v17097_v23, %v17167_v11  ;;  %v17169_v36 = vld [vmem:[#allocation36_spill] sm:$0xff]  ;;  %v17170_v12 = vld [vmem:[#allocation35_spill] sm:$0xff] }
 0x21c   : > { %9387 = vmatpush1.bf16.msra.mxu1 %v17145_v2  ;;  %9579 = vmatpush1.bf16.msra.mxu0 %v17146_v53  ;;  %v17171_v2 = vpack.c.bf16 %v17169_v36, %v17170_v12  ;;  %v17172_v53 = vld [vmem:[#allocation37_spill] sm:$0xff] }
 0x21d   : > { %9389 = vmatprep.subr.bf16.mxu1 %v17147_v57  ;;  %9581 = vmatprep.subr.bf16.mxu0 %v17148_v22  ;;  %v17173_v57 = vpack.c.bf16 %v17100_v8, %v17172_v53  ;;  %v17174_v22 = vpack.c.bf16 %v17101_v51, %v17055_v14 }
 0x220   : > { %9391 = vmatpush1.bf16.msra.mxu1 %v17149_v60  ;;  %9583 = vmatpush1.bf16.msra.mxu0 %v17150_v58  ;;  %v17175_v60 = vpack.c.bf16 %v17103_v18, %v17102_v25  ;;  %v17176_v58 = vpack.c.bf16 %v17105_v27, %v17104_v50 }
 0x221   : > { %9393 = vmatprep.subr.bf16.mxu1 %v12071_v56  ;;  %9585 = vmatprep.subr.bf16.mxu0 %v17151_v26  ;;  %v17157_v56 = vld [vmem:[#allocation19_spill] sm:$0xff]  ;;  %v17177_v26 = vpack.c.bf16 %v17107_v6, %v17106_v61 }
 0x222   : > { %v17158_v28 = vpack.c.bf16 %v17040_v31, %v17157_v56 }
 0x224   : > { %9395 = vmatpush1.bf16.msra.mxu1 %v17152_v39  ;;  %9587 = vmatpush1.bf16.msra.mxu0 %v17153_v20  ;;  %v17178_v39 = vpack.c.bf16 %v17108_v29, %v17067_v47  ;;  %v17179_v20 = vpack.c.bf16 %v17110_v15, %v17109_v5 }
 0x225   : > { %9397 = vmatprep.subr.bf16.mxu1 %v12112_v40  ;;  %9589 = vmatprep.subr.bf16.mxu0 %v12117_v49  ;;  %v17159_v40 = vld [vmem:[#allocation21_spill] sm:$0xff]  ;;  %v17161_v49 = vld [vmem:[#allocation26_spill] sm:$0xff] }
 0x226   : > { %v17160_v48 = vpack.c.bf16 %v17042_v45, %v17159_v40 }
 0x228   : > { %9399 = vmatpush1.bf16.msra.mxu1 %v12123_v44  ;;  %9591 = vmatpush1.bf16.msra.mxu0 %v12137_v10  ;;  %v17162_v44 = vld [vmem:[#allocation25_spill] sm:$0xff]  ;;  %v17164_v10 = vld [vmem:[#allocation32_spill] sm:$0xff] }
 0x229   : > { %9401 = vmatprep.subr.bf16.mxu1 %v17156_v59  ;;  %9593 = vmatprep.subr.bf16.mxu0 %v17158_v28  ;;  %v17163_v43 = vpack.c.bf16 %v17161_v49, %v17162_v44  ;;  %v17166_v30 = vpack.c.bf16 %v17164_v10, %v17165_v7  ;;  %v17180_v59 = vpack.c.bf16 %v17075_v54, %v17111_v9 }
 0x22a   : > { %v17181_v28 = vpack.c.bf16 %v17078_v63, %v17112_v19 }
 0x22b   : > { %1434 = vmatmul.mubr.f32.vlgmr.msra.gmra.mrb[2].mxu1 %v12242_v16  ;;  %2289 = vmatmul.mubr.f32.vlgmr.msra.gmra.mrb[2].mxu0 %v12242_v16  ;;  %v17205_v16 = vld [vmem:[#allocation87_spill] sm:$0xff] }
 0x22c   : > { %9403 = vmatpush1.bf16.msra.mxu1 %v17160_v48  ;;  %9595 = vmatpush1.bf16.msra.mxu0 %v17163_v43  ;;  %v17182_v48 = vpack.c.bf16 %v11708_v3, %v11703_v42  ;;  %v17183_v43 = vpack.c.bf16 %v11714_v35, %v11711_v37 }
 0x22d   : > { %9405 = vmatprep.subr.bf16.mxu1 %v17166_v30  ;;  %9597 = vmatprep.subr.bf16.mxu0 %v17168_v38  ;;  %v17184_v30 = vpack.c.bf16 %v11721_v33, %v11718_v34  ;;  %v17185_v38 = vpack.c.bf16 %v11727_v41, %v11724_v13 }
 0x22e   : > { %1568 = vmatprep.mubr.f32.mxu1 %v17132_v32  ;;  %2423 = vmatprep.mubr.f32.mxu0 %v17132_v32 }
 0x230   : > { %9407 = vmatpush1.bf16.msra.mxu1 %v17171_v2  ;;  %9599 = vmatpush1.bf16.msra.mxu0 %v17173_v57  ;;  %v17186_v2 = vpack.c.bf16 %v11734_v24, %v11731_v17  ;;  %v17187_v57 = vld [vmem:[#allocation74_spill] sm:$0xff] }
 0x231   : > { %9409 = vmatprep.subr.bf16.mxu1 %v17174_v22  ;;  %9601 = vmatprep.subr.bf16.mxu0 %v17175_v60  ;;  %v17188_v22 = vpack.c.bf16 %v11740_v1, %v17187_v57  ;;  %v17189_v60 = vld [vmem:[#allocation76_spill] sm:$0xff] }
 0x234   : > { %9411 = vmatpush1.bf16.msra.mxu1 %v17176_v58  ;;  %9603 = vmatpush1.bf16.msra.mxu0 %v17177_v26  ;;  %v17190_v58 = vld [vmem:[#allocation75_spill] sm:$0xff] }
 0x235   : > { %9413 = vmatprep.subr.bf16.mxu1 %v17178_v39  ;;  %9605 = vmatprep.subr.bf16.mxu0 %v17179_v20  ;;  %v17191_v26 = vpack.c.bf16 %v17189_v60, %v17190_v58  ;;  %v17192_v39 = vld [vmem:[#allocation78_spill] sm:$0xff]  ;;  %v17193_v20 = vld [vmem:[#allocation77_spill] sm:$0xff] }
 0x236   : > { %v17208_v58 = vld [vmem:[#allocation90_spill] sm:$0xff] }
 0x238   : > { %9415 = vmatpush1.bf16.msra.mxu1 %v17180_v59  ;;  %9607 = vmatpush1.bf16.msra.mxu0 %v17181_v28  ;;  %v17194_v59 = vpack.c.bf16 %v17192_v39, %v17193_v20  ;;  %v17195_v28 = vld [vmem:[#allocation80_spill] sm:$0xff]  ;;  %v17211_v20 = vld [vmem:[#allocation93_spill] sm:$0xff] }
 0x239   : > { %9417 = vmatprep.subr.bf16.mxu1 %v17182_v48  ;;  %9609 = vmatprep.subr.bf16.mxu0 %v17183_v43  ;;  %v17196_v48 = vld [vmem:[#allocation79_spill] sm:$0xff] }
 0x23a   : > { %v17197_v43 = vpack.c.bf16 %v17195_v28, %v17196_v48  ;;  %v17214_v48 = vld [vmem:[#allocation95_spill] sm:$0xff] }
 0x23c   : > { %9419 = vmatpush1.bf16.msra.mxu1 %v17184_v30  ;;  %9611 = vmatpush1.bf16.msra.mxu0 %v17185_v38  ;;  %v17198_v30 = vld [vmem:[#allocation82_spill] sm:$0xff]  ;;  %v17199_v38 = vld [vmem:[#allocation81_spill] sm:$0xff] }
 0x23d   : > { %9421 = vmatprep.subr.bf16.mxu1 %v17186_v2  ;;  %9613 = vmatprep.subr.bf16.mxu0 %v17188_v22  ;;  %v17200_v4 = vpack.c.bf16 %v17198_v30, %v17199_v38  ;;  %v17201_v2 = vld [vmem:[#allocation85_spill] sm:$0xff]  ;;  %v17204_v22 = vld [vmem:[#allocation88_spill] sm:$0xff]  ;;  %v17217_v38 = vld [vmem:[#allocation99_spill] sm:$0xff] }
 0x23e   : > { %v17203_v55 = vpack.c.bf16 %v17201_v2, %v17202_v62  ;;  %v17206_v60 = vpack.c.bf16 %v17204_v22, %v17205_v16  ;;  %v17220_v22 = vld [vmem:[#allocation18_spill] sm:$0xff] }
 0x240   : > { %9423 = vmatpush1.bf16.msra.mxu1 %v17191_v26  ;;  %9615 = vmatpush1.bf16.msra.mxu0 %v17194_v59  ;;  %v17207_v26 = vld [vmem:[#allocation91_spill] sm:$0xff]  ;;  %v17210_v59 = vld [vmem:[#allocation94_spill] sm:$0xff] }
 0x241   : > { %9425 = vmatprep.subr.bf16.mxu1 %v17197_v43  ;;  %9617 = vmatprep.subr.bf16.mxu0 %v17200_v4  ;;  %v17209_v39 = vpack.c.bf16 %v17207_v26, %v17208_v58  ;;  %v17212_v28 = vpack.c.bf16 %v17210_v59, %v17211_v20  ;;  %v17213_v43 = vld [vmem:[#allocation97_spill] sm:$0xff]  ;;  %v17216_v4 = vld [vmem:[#allocation100_spill] sm:$0xff] }
 0x242   : > { %v17215_v30 = vpack.c.bf16 %v17213_v43, %v17214_v48  ;;  %v17218_v2 = vpack.c.bf16 %v17216_v4, %v17217_v38  ;;  %v17224_v43 = vld [vmem:[#allocation28_spill] sm:$0xff]  ;;  %v17234_v4 = vld [vmem:[#allocation62_spill] sm:$0xff] }
 0x243   : > { %v17235_v38 = vld [vmem:[#allocation64_spill] sm:$0xff] }
 0x244   : > { %9427 = vmatpush1.bf16.msra.mxu1 %v17203_v55  ;;  %9619 = vmatpush1.bf16.msra.mxu0 %v17206_v60  ;;  %v17219_v55 = vld [vmem:[#allocation15_spill] sm:$0xff]  ;;  %v17221_v60 = vld [vmem:[#allocation22_spill] sm:$0xff]  ;;  %v17253_v48 = vld [vmem:[#allocation96_spill] sm:$0xff] }
 0x245   : > { %9429 = vmatprep.subr.bf16.mxu1 %v17209_v39  ;;  %9621 = vmatprep.subr.bf16.mxu0 %v17212_v28  ;;  %v17222_v39 = vld [vmem:[#allocation24_spill] sm:$0xff]  ;;  %v17223_v28 = vld [vmem:[#allocation27_spill] sm:$0xff] }
 0x248   : > { %9431 = vmatpush1.bf16.msra.mxu1 %v17215_v30  ;;  %9623 = vmatpush1.bf16.msra.mxu0 %v17218_v2  ;;  %v17225_v30 = vld [vmem:[#allocation29_spill] sm:$0xff]  ;;  %v17226_v2 = vld [vmem:[#allocation30_spill] sm:$0xff] }
 0x249   : > { %9433 = vmatprep.subr.bf16.mxu1 %v17219_v55  ;;  %9625 = vmatprep.subr.bf16.mxu0 %v17220_v22  ;;  %v17227_v22 = vld [vmem:[#allocation39_spill] sm:$0xff]  ;;  %v17228_v55 = vld [vmem:[#allocation40_spill] sm:$0xff] }
 0x24b   : > { %1571 = vmatmul.mubr.f32.vlgmr.msra.gmra.mrb[2].mxu1 %v12245_v21  ;;  %2426 = vmatmul.mubr.f32.vlgmr.msra.gmra.mrb[2].mxu0 %v12245_v21  ;;  %v17229_v21 = vld [vmem:[#allocation41_spill] sm:$0xff] }
 0x24c   : > { %9435 = vmatpush1.bf16.msra.mxu1 %v17221_v60  ;;  %9627 = vmatpush1.bf16.msra.mxu0 %v17222_v39  ;;  %v17230_v60 = vld [vmem:[#allocation48_spill] sm:$0xff] }
 0x24d   : > { %9437 = vmatprep.subr.bf16.mxu1 %v17223_v28  ;;  %9629 = vmatprep.subr.bf16.mxu0 %v17224_v43  ;;  %v17231_v39 = vld [vmem:[#allocation52_spill] sm:$0xff]  ;;  %v17232_v28 = vld [vmem:[#allocation55_spill] sm:$0xff]  ;;  %v17233_v43 = vld [vmem:[#allocation58_spill] sm:$0xff] }
 0x24e   : > { %1673 = vmatprep.mubr.f32.mxu1 %v17132_v32  ;;  %2528 = vmatprep.mubr.f32.mxu0 %v17132_v32 }
 0x250   : > { %9439 = vmatpush1.bf16.msra.mxu1 %v17225_v30  ;;  %9631 = vmatpush1.bf16.msra.mxu0 %v17226_v2  ;;  %v17236_v30 = vld [vmem:[#allocation65_spill] sm:$0xff]  ;;  %v17237_v2 = vld [vmem:[#allocation66_spill] sm:$0xff] }
 0x251   : > { %9441 = vmatprep.subr.bf16.mxu1 %v17227_v22  ;;  %9633 = vmatprep.subr.bf16.mxu0 %v17228_v55  ;;  %v17238_v22 = vld [vmem:[#allocation67_spill] sm:$0xff]  ;;  %v17239_v55 = vld [vmem:[#allocation68_spill] sm:$0xff] }
 0x254   : > { %9443 = vmatpush1.bf16.msra.mxu1 %v17229_v21  ;;  %9635 = vmatpush1.bf16.msra.mxu0 %v17230_v60  ;;  %v17240_v21 = vld [vmem:[#allocation69_spill] sm:$0xff]  ;;  %v17241_v60 = vld [vmem:[#allocation70_spill] sm:$0xff] }
 0x255   : > { %9445 = vmatprep.subr.bf16.mxu1 %v17231_v39  ;;  %9637 = vmatprep.subr.bf16.mxu0 %v17232_v28  ;;  %v17242_v39 = vld [vmem:[#allocation71_spill] sm:$0xff]  ;;  %v17243_v28 = vld [vmem:[#allocation72_spill] sm:$0xff] }
 0x258   : > { %9447 = vmatpush1.bf16.msra.mxu1 %v17233_v43  ;;  %9639 = vmatpush1.bf16.msra.mxu0 %v17234_v4  ;;  %v17244_v43 = vld [vmem:[#allocation73_spill] sm:$0xff]  ;;  %v17245_v4 = vld [vmem:[#allocation83_spill] sm:$0xff] }
 0x259   : > { %9449 = vmatprep.subr.bf16.mxu1 %v17235_v38  ;;  %9641 = vmatprep.subr.bf16.mxu0 %v17236_v30  ;;  %v17246_v38 = vld [vmem:[#allocation86_spill] sm:$0xff]  ;;  %v17247_v30 = vld [vmem:[#allocation89_spill] sm:$0xff] }
 0x25c   : > { %9451 = vmatpush1.bf16.msra.mxu1 %v17237_v2  ;;  %9643 = vmatpush1.bf16.msra.mxu0 %v17238_v22  ;;  %v17248_v2 = vld [vmem:[#allocation92_spill] sm:$0xff] }
 0x25d   : > { %9453 = vmatprep.subr.bf16.mxu1 %v17239_v55  ;;  %9645 = vmatprep.subr.bf16.mxu0 %v17240_v21  ;;  %v17249_v55 = vand.u32 4294901760, %v17155_v52  ;;  %v17250_v21 = vand.u32 4294901760, %v17154_v46  ;;  %v17258_v52 = vand.u32 4294901760, %v17161_v49  ;;  %v17264_v49 = vand.u32 4294901760, %v17169_v36 }
 0x25e   : > { %v17272_v36 = vand.u32 4294901760, %v17105_v27  ;;  %v17279_v27 = vand.u32 4294901760, %v17111_v9 }
 0x25f   : > { %v9464_v22 = vpack.c.bf16 %v17250_v21, %v17249_v55  ;;  %v17259_v21 = vand.u32 4294901760, %v17165_v7  ;;  %v17261_v55 = vand.u32 4294901760, %v17167_v11  ;;  %v17265_v7 = vand.u32 4294901760, %v17172_v53 }
 0x260   : > { %9455 = vmatpush1.bf16.msra.mxu1 %v17241_v60  ;;  %9647 = vmatpush1.bf16.msra.mxu0 %v17242_v39  ;;  %v17251_v60 = vand.u32 4294901760, %v17157_v56  ;;  %v17252_v39 = vand.u32 4294901760, %v17040_v31  ;;  %v17260_v31 = vand.u32 4294901760, %v17164_v10  ;;  %v17266_v10 = vand.u32 4294901760, %v17100_v8 }
 0x261   : > { %9457 = vmatprep.subr.bf16.mxu1 %v17243_v28  ;;  %9649 = vmatprep.subr.bf16.mxu0 %v17244_v43  ;;  %v17254_v43 = vld [vmem:[#allocation98_spill] sm:$0xff]  ;;  %v17268_v11 = vand.u32 4294901760, %v17101_v51  ;;  %v17271_v8 = vand.u32 4294901760, %v17104_v50  ;;  %v17274_v51 = vand.u32 4294901760, %v17107_v6 }
 0x262   : > { %v9656_v28 = vpack.c.bf16 %v17252_v39, %v17251_v60  ;;  %v9468_v56 = vpack.c.bf16 %v17260_v31, %v17259_v21  ;;  %v17262_v60 = vand.u32 4294901760, %v17097_v23  ;;  %v17267_v23 = vand.u32 4294901760, %v17055_v14 }
 0x263   : > { %v17270_v39 = vand.u32 4294901760, %v17103_v18  ;;  %v9474_v53 = vpack.c.bf16 %v17272_v36, %v17271_v8  ;;  %v17273_v14 = vand.u32 4294901760, %v17106_v61  ;;  %v17275_v18 = vand.u32 4294901760, %v17067_v47  ;;  %v17301_v36 = vld [vmem:[#allocation78_spill] sm:$0xff] }
 0x264   : > { %9459 = vmatpush1.bf16.msra.mxu1 %v17245_v4  ;;  %9651 = vmatpush1.bf16.msra.mxu0 %v17246_v38  ;;  %v17255_v38 = vand.u32 4294901760, %v17159_v40  ;;  %v9660_v40 = vpack.c.bf16 %v17262_v60, %v17261_v55  ;;  %v17280_v61 = vand.u32 4294901760, %v17075_v54  ;;  %v17282_v21 = vand.u32 4294901760, %v17078_v63  ;;  %v848_v55 = vld [vmem:[#allocation7 + $0x28] sm:$0xff] }
 0x265   : > { %9461 = vmatprep.subr.bf16.mxu1 %v17247_v30  ;;  %9653 = vmatprep.subr.bf16.mxu0 %v17248_v2  ;;  %v17256_v30 = vand.u32 4294901760, %v17042_v45  ;;  %v17257_v2 = vand.u32 4294901760, %v17162_v44  ;;  %v17263_v45 = vand.u32 4294901760, %v17170_v12  ;;  %v17285_v31 = vand.u32 4294901760, %v11711_v37 }
 0x266   : > { %v9478_v6 = vpack.c.bf16 %v17280_v61, %v17279_v27  ;;  %v17287_v54 = vand.u32 4294901760, %v11718_v34  ;;  %v17288_v63 = vand.u32 4294901760, %v11721_v33  ;;  %v17289_v60 = vand.u32 4294901760, %v11724_v13  ;;  %v863_v13 = vld [vmem:[#allocation7 + $0xa0] sm:$0xff]  ;;  %v17309_v61 = vld [vmem:[#allocation82_spill] sm:$0xff] }
 0x267   : > { %v9466_v4 = vpack.c.bf16 %v17256_v30, %v17255_v38  ;;  %v9658_v46 = vpack.c.bf16 %v17258_v52, %v17257_v2  ;;  %v9470_v44 = vpack.c.bf16 %v17264_v49, %v17263_v45  ;;  %v9662_v38 = vpack.c.bf16 %v17266_v10, %v17265_v7  ;;  %v850_v45 = vld [vmem:[#allocation7 + $0x38] sm:$0xff]  ;;  %v847_v10 = vld [vmem:[#allocation7 + $0x20] sm:$0xff] }
 0x268   : > { %9463 = vmatpush1.bf16.msra.mxu1 %v17253_v48  ;;  %9655 = vmatpush1.bf16.msra.mxu0 %v17254_v43  ;;  %v17277_v2 = vand.u32 4294901760, %v17109_v5  ;;  %v17278_v52 = vand.u32 4294901760, %v17110_v15  ;;  %v17284_v5 = vand.u32 4294901760, %v11708_v3  ;;  %v864_v3 = vld [vmem:[#allocation7 + $0xa8] sm:$0xff]  ;;  %v866_v49 = vld [vmem:[#allocation7 + $0xb8] sm:$0xff]  ;;  %v17292_v37 = vand.u32 4294901760, %v11734_v24 }
 0x269   : > { %9465 = vmatprep.subr.bf16.mxu1 %v9464_v22  ;;  %9657 = vmatprep.subr.bf16.mxu0 %v9656_v28  ;;  %v9472_v22 = vpack.c.bf16 %v17268_v11, %v17267_v23  ;;  %v9666_v28 = vpack.c.bf16 %v17274_v51, %v17273_v14  ;;  %v17293_v34 = vand.u32 4294901760, %v17187_v57  ;;  %v17294_v33 = vand.u32 4294901760, %v11740_v1  ;;  %v17297_v23 = vld [vmem:[#allocation76_spill] sm:$0xff]  ;;  %v17303_v1 = vld [vmem:[#allocation79_spill] sm:$0xff] }
 0x26a   : > { %v9668_v50 = vpack.c.bf16 %v17278_v52, %v17277_v2  ;;  %v17298_v11 = vand.u32 4294901760, %v17297_v23  ;;  %v3669_v8 = vand.u32 4294901760, %v866_v49  ;;  %v17302_v57 = vand.u32 4294901760, %v17301_v36  ;;  %v17305_v51 = vld [vmem:[#allocation80_spill] sm:$0xff]  ;;  %v849_v2 = vld [vmem:[#allocation7 + $0x30] sm:$0xff]  ;;  %v898_v36 = vld [vmem:[#allocation7 + $0x1b8] sm:$0xff] }
 0x26b   : > { %1677 = vmatmul.mubr.f32.vlgmr.msra.gmra.mrb[2].mxu1 %v12248_v0  ;;  %2532 = vmatmul.mubr.f32.vlgmr.msra.gmra.mrb[2].mxu0 %v12248_v0  ;;  %v9676_v7 = vpack.c.bf16 %v17294_v33, %v17293_v34  ;;  %v17304_v14 = vand.u32 4294901760, %v17303_v1  ;;  %v865_v52 = vld [vmem:[#allocation7 + $0xb0] sm:$0xff] }
 0x26c   : > { %9467 = vmatpush1.bf16.msra.mxu1 %v9466_v4  ;;  %9659 = vmatpush1.bf16.msra.mxu0 %v9658_v46  ;;  %v17269_v4 = vand.u32 4294901760, %v17102_v25  ;;  %v17276_v25 = vand.u32 4294901760, %v17108_v29  ;;  %v17281_v46 = vand.u32 4294901760, %v17112_v19  ;;  %v17283_v29 = vand.u32 4294901760, %v11703_v42  ;;  %v17323_v34 = vld [vmem:[#allocation97_spill] sm:$0xff] }
 0x26d   : > { %9469 = vmatprep.subr.bf16.mxu1 %v9468_v56  ;;  %9661 = vmatprep.subr.bf16.mxu0 %v9660_v40  ;;  %v17286_v56 = vand.u32 4294901760, %v11714_v35  ;;  %v9482_v19 = vpack.c.bf16 %v17288_v63, %v17287_v54  ;;  %v17290_v42 = vand.u32 4294901760, %v11727_v41  ;;  %v17291_v35 = vand.u32 4294901760, %v11731_v17  ;;  %v17299_v17 = vld [vmem:[#allocation77_spill] sm:$0xff]  ;;  %v880_v54 = vld [vmem:[#allocation7 + $0x128] sm:$0xff] }
 0x26e   : > { %v9664_v12 = vpack.c.bf16 %v17270_v39, %v17269_v4  ;;  %1843 = vmatprep.mubr.f32.mxu1 %v17132_v32  ;;  %2698 = vmatprep.mubr.f32.mxu0 %v17132_v32  ;;  %v9476_v30 = vpack.c.bf16 %v17276_v25, %v17275_v18  ;;  %v9670_v47 = vpack.c.bf16 %v17282_v21, %v17281_v46  ;;  %v2810_v4 = vand.u32 4294901760, %v848_v55  ;;  %v896_v63 = vld [vmem:[#allocation7 + $0x1a8] sm:$0xff] }
 0x26f   : > { %v9480_v15 = vpack.c.bf16 %v17284_v5, %v17283_v29  ;;  %v9672_v9 = vpack.c.bf16 %v17286_v56, %v17285_v31  ;;  %v9674_v40 = vpack.c.bf16 %v17290_v42, %v17289_v60  ;;  %v2814_v39 = vand.u32 4294901760, %v864_v3  ;;  %v17315_v31 = vld [vmem:[#allocation88_spill] sm:$0xff] }
 0x270   : > { %9471 = vmatpush1.bf16.msra.mxu1 %v9470_v44  ;;  %9663 = vmatpush1.bf16.msra.mxu0 %v9662_v38  ;;  %v9484_v44 = vpack.c.bf16 %v17292_v37, %v17291_v35  ;;  %v17295_v38 = vld [vmem:[#allocation75_spill] sm:$0xff]  ;;  %v17300_v24 = vand.u32 4294901760, %v17299_v17  ;;  %v2812_v25 = vand.u32 4294901760, %v847_v10  ;;  %v17311_v21 = vand.u32 4294901760, %v17202_v62 }
 0x271   : > { %9473 = vmatprep.subr.bf16.mxu1 %v9472_v22  ;;  %9665 = vmatprep.subr.bf16.mxu0 %v9664_v12  ;;  %v17296_v41 = vand.u32 4294901760, %v17295_v38  ;;  %v3665_v12 = vand.u32 4294901760, %v850_v45  ;;  %v17316_v56 = vand.u32 4294901760, %v17315_v31  ;;  %v17318_v60 = vand.u32 4294901760, %v17207_v26  ;;  %v17321_v37 = vld [vmem:[#allocation95_spill] sm:$0xff] }
 0x272   : > { %v17320_v35 = vand.u32 4294901760, %v17210_v59  ;;  %v17324_v33 = vand.u32 4294901760, %v17323_v34  ;;  %v12556_v17 = vpack.c.bf16 %v2814_v39, %v2810_v4  ;;  %v3667_v26 = vand.u32 4294901760, %v849_v2  ;;  %v927_v31 = vld [vmem:[#allocation7 + $0x2a0] sm:$0xff]  ;;  %v944_v34 = vld [vmem:[#allocation7 + $0x328] sm:$0xff] }
 0x273   : > { %v9486_v22 = vpack.c.bf16 %v17298_v11, %v17296_v41  ;;  %v17327_v41 = vld [vmem:[#allocation100_spill] sm:$0xff]  ;;  %v12560_v59 = vsub.f32 %v848_v55, %v2810_v4  ;;  %v2818_v1 = vand.u32 4294901760, %v880_v54 }
 0x274   : > { %9475 = vmatpush1.bf16.msra.mxu1 %v9474_v53  ;;  %9667 = vmatpush1.bf16.msra.mxu0 %v9666_v28  ;;  %v9678_v53 = vpack.c.bf16 %v17302_v57, %v17300_v24  ;;  %v17306_v28 = vand.u32 4294901760, %v17305_v51  ;;  %v17328_v23 = vand.u32 4294901760, %v17327_v41  ;;  %17329 = vst [vmem:[#allocation50_spill] sm:$0xff] %v12556_v17  ;;  %v3671_v24 = vand.u32 4294901760, %v865_v52  ;;  %v879_v51 = vld [vmem:[#allocation7 + $0x120] sm:$0xff] }
 0x275   : > { %9477 = vmatprep.subr.bf16.mxu1 %v9476_v30  ;;  %9669 = vmatprep.subr.bf16.mxu0 %v9668_v50  ;;  %v2816_v30 = vand.u32 4294901760, %v863_v13  ;;  %v17307_v50 = vld [vmem:[#allocation81_spill] sm:$0xff]  ;;  %17331 = vst [vmem:[#allocation23_spill] sm:$0xff] %v12560_v59 }
 0x276   : > { %v9488_v18 = vpack.c.bf16 %v17306_v28, %v17304_v14  ;;  %v17308_v27 = vand.u32 4294901760, %v17307_v50  ;;  %v2822_v14 = vand.u32 4294901760, %v896_v63  ;;  %v895_v28 = vld [vmem:[#allocation7 + $0x1a0] sm:$0xff]  ;;  %v12564_v50 = vsub.f32 %v864_v3, %v2814_v39  ;;  %v912_v3 = vld [vmem:[#allocation7 + $0x228] sm:$0xff] }
 0x277   : > { %v12562_v57 = vpack.c.bf16 %v2816_v30, %v2812_v25  ;;  %v12572_v55 = vsub.f32 %v863_v13, %v2816_v30  ;;  %v928_v39 = vld [vmem:[#allocation7 + $0x2a8] sm:$0xff]  ;;  %v914_v13 = vld [vmem:[#allocation7 + $0x238] sm:$0xff] }
 0x278   : > { %9479 = vmatpush1.bf16.msra.mxu1 %v9478_v6  ;;  %9671 = vmatpush1.bf16.msra.mxu0 %v9670_v47  ;;  %v17310_v6 = vand.u32 4294901760, %v17309_v61  ;;  %v17312_v47 = vld [vmem:[#allocation85_spill] sm:$0xff]  ;;  %17333 = vst [vmem:[#allocation101_spill] sm:$0xff] %v12564_v50  ;;  %v12568_v61 = vsub.f32 %v866_v49, %v3669_v8  ;;  %v12580_v49 = vpack.c.bf16 %v2822_v14, %v2818_v1 }
 0x279   : > { %9481 = vmatprep.subr.bf16.mxu1 %v9480_v15  ;;  %9673 = vmatprep.subr.bf16.mxu0 %v9672_v9  ;;  %v17313_v29 = vand.u32 4294901760, %v17312_v47  ;;  %v17314_v15 = vand.u32 4294901760, %v17205_v16  ;;  %17332 = vst [vmem:[#allocation42_spill] sm:$0xff] %v12562_v57  ;;  %17337 = vst [vmem:[#allocation104_spill] sm:$0xff] %v12572_v55  ;;  %v12574_v47 = vpack.c.bf16 %v3671_v24, %v3667_v26 }
 0x27a   : > { %v9680_v46 = vpack.c.bf16 %v17310_v6, %v17308_v27  ;;  %v12566_v27 = vsub.f32 %v850_v45, %v3665_v12  ;;  %17335 = vst [vmem:[#allocation103_spill] sm:$0xff] %v12568_v61  ;;  %v881_v6 = vld [vmem:[#allocation7 + $0x130] sm:$0xff]  ;;  %v12578_v45 = vsub.f32 %v865_v52, %v3671_v24  ;;  %17341 = vst [vmem:[#allocation106_spill] sm:$0xff] %v12580_v49 }
 0x27b   : > { %v9490_v5 = vpack.c.bf16 %v17313_v29, %v17311_v21  ;;  %v9682_v9 = vpack.c.bf16 %v17316_v56, %v17314_v15  ;;  %v897_v21 = vld [vmem:[#allocation7 + $0x1b0] sm:$0xff]  ;;  %17338 = vst [vmem:[#allocation105_spill] sm:$0xff] %v12574_v47  ;;  %v12576_v29 = vsub.f32 %v849_v2, %v3667_v26  ;;  %v12584_v30 = vsub.f32 %v896_v63, %v2822_v14  ;;  %v911_v15 = vld [vmem:[#allocation7 + $0x220] sm:$0xff] }
 0x27c   : > { %9483 = vmatpush1.bf16.msra.mxu1 %v9482_v19  ;;  %9675 = vmatpush1.bf16.msra.mxu0 %v9674_v40  ;;  %v17317_v19 = vand.u32 4294901760, %v17208_v58  ;;  %v17319_v40 = vand.u32 4294901760, %v17211_v20  ;;  %v12558_v58 = vpack.c.bf16 %v3669_v8, %v3665_v12  ;;  %v882_v20 = vld [vmem:[#allocation7 + $0x138] sm:$0xff]  ;;  %17334 = vst [vmem:[#allocation102_spill] sm:$0xff] %v12566_v27  ;;  %17340 = vst [vmem:[#allocation63_spill] sm:$0xff] %v12578_v45  ;;  %v3679_v12 = vand.u32 4294901760, %v897_v21 }
 0x27d   : > { %9485 = vmatprep.subr.bf16.mxu1 %v9484_v44  ;;  %9677 = vmatprep.subr.bf16.mxu0 %v9676_v7  ;;  %v17322_v44 = vand.u32 4294901760, %v17321_v37  ;;  %v17325_v7 = vld [vmem:[#allocation99_spill] sm:$0xff]  ;;  %v3673_v4 = vand.u32 4294901760, %v882_v20  ;;  %17339 = vst [vmem:[#allocation60_spill] sm:$0xff] %v12576_v29  ;;  %v930_v8 = vld [vmem:[#allocation7 + $0x2b8] sm:$0xff]  ;;  %17343 = vst [vmem:[#allocation108_spill] sm:$0xff] %v12584_v30 }
 0x27e   : > { %v9492_v42 = vpack.c.bf16 %v17318_v60, %v17317_v19  ;;  %v9684_v62 = vpack.c.bf16 %v17320_v35, %v17319_v40  ;;  %v17326_v38 = vand.u32 4294901760, %v17325_v7  ;;  %17330 = vst [vmem:[#allocation20_spill] sm:$0xff] %v12558_v58  ;;  %v2826_v56 = vand.u32 4294901760, %v912_v3  ;;  %v929_v35 = vld [vmem:[#allocation7 + $0x2b0] sm:$0xff]  ;;  %v17351_v7 = vld [vmem:[#allocation15_spill] sm:$0xff] }
 0x27f   : > { %v9494_v16 = vpack.c.bf16 %v17324_v33, %v17322_v44  ;;  %v12586_v2 = vsub.f32 %v882_v20, %v3673_v4  ;;  %v3685_v40 = vand.u32 4294901760, %v930_v8  ;;  %v2828_v37 = vand.u32 4294901760, %v911_v15  ;;  %v960_v33 = vld [vmem:[#allocation7 + $0x3a8] sm:$0xff]  ;;  %v943_v14 = vld [vmem:[#allocation7 + $0x320] sm:$0xff] }
 0x280   : > { %v9686_v11 = vpack.c.bf16 %v17328_v23, %v17326_v38  ;;  %9487 = vmatpush1.bf16.msra.mxu1 %v9486_v22  ;;  %9679 = vmatpush1.bf16.msra.mxu0 %v9678_v53  ;;  %v12570_v22 = vsub.f32 %v847_v10, %v2812_v25  ;;  %v3677_v53 = vand.u32 4294901760, %v898_v36  ;;  %v3675_v10 = vand.u32 4294901760, %v881_v6  ;;  %v17352_v38 = vld [vmem:[#allocation18_spill] sm:$0xff] }
 0x281   : > { %9489 = vmatprep.subr.bf16.mxu1 %v9488_v18  ;;  %9681 = vmatprep.subr.bf16.mxu0 %v9680_v46  ;;  %v2820_v18 = vand.u32 4294901760, %v879_v51  ;;  %v2824_v46 = vand.u32 4294901760, %v895_v28  ;;  %v12582_v25 = vsub.f32 %v880_v54, %v2818_v1  ;;  %17344 = vst [vmem:[#allocation109_spill] sm:$0xff] %v12586_v2  ;;  %v913_v54 = vld [vmem:[#allocation7 + $0x230] sm:$0xff]  ;;  %v2832_v44 = vand.u32 4294901760, %v927_v31 }
 0x282   : > { %17336 = vst [vmem:[#allocation53_spill] sm:$0xff] %v12570_v22  ;;  %v12590_v52 = vsub.f32 %v898_v36, %v3677_v53  ;;  %v12602_v41 = vsub.f32 %v881_v6, %v3675_v10  ;;  %v12604_v23 = vsub.f32 %v897_v21, %v3679_v12  ;;  %v12606_v26 = vsub.f32 %v912_v3, %v2826_v56  ;;  %v17361_v3 = vld [vmem:[#allocation22_spill] sm:$0xff] }
 0x283   : > { %17342 = vst [vmem:[#allocation107_spill] sm:$0xff] %v12582_v25  ;;  %v12592_v19 = vpack.c.bf16 %v2824_v46, %v2820_v18  ;;  %v12594_v60 = vsub.f32 %v879_v51, %v2820_v18  ;;  %v12596_v63 = vsub.f32 %v895_v28, %v2824_v46  ;;  %v3683_v36 = vand.u32 4294901760, %v913_v54  ;;  %v959_v51 = vld [vmem:[#allocation7 + $0x3a0] sm:$0xff]  ;;  %v17358_v28 = vld [vmem:[#allocation56_spill] sm:$0xff]  ;;  %v945_v18 = vld [vmem:[#allocation7 + $0x330] sm:$0xff] }
 0x284   : > { %9491 = vmatpush1.bf16.msra.mxu1 %v9490_v5  ;;  %9683 = vmatpush1.bf16.msra.mxu0 %v9682_v9  ;;  %v12588_v5 = vpack.c.bf16 %v3677_v53, %v3673_v4  ;;  %17346 = vst [vmem:[#allocation111_spill] sm:$0xff] %v12590_v52  ;;  %v2830_v9 = vand.u32 4294901760, %v928_v39  ;;  %17353 = vst [vmem:[#allocation116_spill] sm:$0xff] %v12602_v41  ;;  %v3687_v1 = vand.u32 4294901760, %v929_v35  ;;  %v2834_v4 = vand.u32 4294901760, %v944_v34  ;;  %v961_v46 = vld [vmem:[#allocation7 + $0x3b0] sm:$0xff] }
 0x285   : > { %9493 = vmatprep.subr.bf16.mxu1 %v9492_v42  ;;  %9685 = vmatprep.subr.bf16.mxu0 %v9684_v62  ;;  %17347 = vst [vmem:[#allocation112_spill] sm:$0xff] %v12592_v19  ;;  %17348 = vst [vmem:[#allocation113_spill] sm:$0xff] %v12594_v60  ;;  %v3681_v42 = vand.u32 4294901760, %v914_v13  ;;  %v12598_v62 = vpack.c.bf16 %v3679_v12, %v3675_v10  ;;  %v2838_v53 = vand.u32 4294901760, %v960_v33  ;;  %v2836_v0 = vand.u32 4294901760, %v943_v14 }
 0x286   : > { %17345 = vst [vmem:[#allocation110_spill] sm:$0xff] %v12588_v5  ;;  %17349 = vst [vmem:[#allocation114_spill] sm:$0xff] %v12596_v63  ;;  %v12608_v24 = vpack.c.bf16 %v2830_v9, %v2826_v56  ;;  %v12610_v20 = vsub.f32 %v928_v39, %v2830_v9  ;;  %v17362_v39 = vld [vmem:[#allocation24_spill] sm:$0xff]  ;;  %v12620_v10 = vsub.f32 %v930_v8, %v3685_v40 }
 0x287   : > { %17350 = vst [vmem:[#allocation115_spill] sm:$0xff] %v12598_v62  ;;  %17354 = vst [vmem:[#allocation117_spill] sm:$0xff] %v12604_v23  ;;  %v12614_v6 = vpack.c.bf16 %v3685_v40, %v3681_v42  ;;  %v12616_v21 = vsub.f32 %v914_v13, %v3681_v42  ;;  %v12622_v12 = vpack.c.bf16 %v2832_v44, %v2828_v37 }
 0x288   : > { %9495 = vmatpush1.bf16.msra.mxu1 %v9494_v16  ;;  %9687 = vmatpush1.bf16.msra.mxu0 %v9686_v11  ;;  %17355 = vst [vmem:[#allocation118_spill] sm:$0xff] %v12606_v26  ;;  %v946_v16 = vld [vmem:[#allocation7 + $0x338] sm:$0xff]  ;;  %17356 = vst [vmem:[#allocation119_spill] sm:$0xff] %v12608_v24  ;;  %v12626_v13 = vsub.f32 %v911_v15, %v2828_v37  ;;  %v12628_v42 = vsub.f32 %v927_v31, %v2832_v44 }
 0x289   : > { %9497 = vmatprep.subr.bf16.mxu1 %v17351_v7  ;;  %9689 = vmatprep.subr.bf16.mxu0 %v17352_v38  ;;  %v962_v11 = vld [vmem:[#allocation7 + $0x3b8] sm:$0xff]  ;;  %17357 = vst [vmem:[#allocation17_spill] sm:$0xff] %v12610_v20  ;;  %17359 = vst [vmem:[#allocation16_spill] sm:$0xff] %v12614_v6  ;;  %v3689_v56 = vand.u32 4294901760, %v946_v16  ;;  %v17365_v7 = vld [vmem:[#allocation27_spill] sm:$0xff]  ;;  %v12632_v8 = vpack.c.bf16 %v3687_v1, %v3683_v36  ;;  %v12634_v40 = vsub.f32 %v913_v54, %v3683_v36 }
 0x28a   : > { %17360 = vst [vmem:[#allocation19_spill] sm:$0xff] %v12616_v21  ;;  %17363 = vst [vmem:[#allocation21_spill] sm:$0xff] %v12620_v10  ;;  %v3693_v9 = vand.u32 4294901760, %v962_v11  ;;  %v17366_v38 = vld [vmem:[#allocation28_spill] sm:$0xff]  ;;  %v2840_v21 = vand.u32 4294901760, %v959_v51  ;;  %v12638_v15 = vpack.c.bf16 %v2838_v53, %v2834_v4  ;;  %v12640_v31 = vsub.f32 %v944_v34, %v2834_v4  ;;  %v978_v44 = vld [vmem:[#allocation7 + $0x438] sm:$0xff] }
 0x28b   : > { %1845 = vmatmul.mubr.f32.vlgmr.msra.gmra.mrb[2].mxu1 %v17358_v28  ;;  %2700 = vmatmul.mubr.f32.vlgmr.msra.gmra.mrb[2].mxu0 %v17358_v28  ;;  %17364 = vst [vmem:[#allocation26_spill] sm:$0xff] %v12622_v12  ;;  %17367 = vst [vmem:[#allocation25_spill] sm:$0xff] %v12626_v13  ;;  %v976_v20 = vld [vmem:[#allocation7 + $0x428] sm:$0xff]  ;;  %v12636_v12 = vsub.f32 %v929_v35, %v3687_v1  ;;  %v12642_v37 = vsub.f32 %v960_v33, %v2838_v53  ;;  %v17376_v13 = vld [vmem:[#allocation30_spill] sm:$0xff] }
 0x28c   : > { %9499 = vmatpush1.bf16.msra.mxu1 %v17361_v3  ;;  %9691 = vmatpush1.bf16.msra.mxu0 %v17362_v39  ;;  %17368 = vst [vmem:[#allocation32_spill] sm:$0xff] %v12628_v42  ;;  %v992_v3 = vld [vmem:[#allocation7 + $0x4a8] sm:$0xff]  ;;  %17369 = vst [vmem:[#allocation31_spill] sm:$0xff] %v12632_v8  ;;  %v3691_v39 = vand.u32 4294901760, %v945_v18  ;;  %v17375_v42 = vld [vmem:[#allocation29_spill] sm:$0xff]  ;;  %v12646_v10 = vpack.c.bf16 %v3693_v9, %v3689_v56  ;;  %v12648_v54 = vsub.f32 %v946_v16, %v3689_v56 }
 0x28d   : > { %9501 = vmatprep.subr.bf16.mxu1 %v17365_v7  ;;  %9693 = vmatprep.subr.bf16.mxu0 %v17366_v38  ;;  %17370 = vst [vmem:[#allocation33_spill] sm:$0xff] %v12634_v40  ;;  %v3695_v7 = vand.u32 4294901760, %v961_v46  ;;  %17371 = vst [vmem:[#allocation36_spill] sm:$0xff] %v12636_v12  ;;  %v994_v38 = vld [vmem:[#allocation7 + $0x4b8] sm:$0xff]  ;;  %v2842_v36 = vand.u32 4294901760, %v976_v20  ;;  %v2846_v40 = vand.u32 4294901760, %v992_v3  ;;  %v12652_v33 = vsub.f32 %v962_v11, %v3693_v9 }
 0x28e   : > { %1947 = vmatprep.mubr.f32.mxu1 %v17132_v32  ;;  %2802 = vmatprep.mubr.f32.mxu0 %v17132_v32  ;;  %17372 = vst [vmem:[#allocation35_spill] sm:$0xff] %v12638_v15  ;;  %17373 = vst [vmem:[#allocation37_spill] sm:$0xff] %v12640_v31  ;;  %v975_v35 = vld [vmem:[#allocation7 + $0x420] sm:$0xff]  ;;  %v17380_v34 = vld [vmem:[#allocation40_spill] sm:$0xff]  ;;  %v12654_v4 = vpack.c.bf16 %v2840_v21, %v2836_v0  ;;  %v12656_v53 = vsub.f32 %v943_v14, %v2836_v0  ;;  %v3697_v56 = vand.u32 4294901760, %v978_v44 }
 0x28f   : > { %17374 = vst [vmem:[#allocation74_spill] sm:$0xff] %v12642_v37  ;;  %17377 = vst [vmem:[#allocation84_spill] sm:$0xff] %v12646_v10  ;;  %v991_v1 = vld [vmem:[#allocation7 + $0x4a0] sm:$0xff]  ;;  %v12658_v37 = vsub.f32 %v959_v51, %v2840_v21  ;;  %v12660_v16 = vpack.c.bf16 %v3695_v7, %v3691_v39  ;;  %v1008_v31 = vld [vmem:[#allocation7 + $0x528] sm:$0xff]  ;;  %v12662_v15 = vsub.f32 %v945_v18, %v3691_v39  ;;  %v2844_v11 = vand.u32 4294901760, %v975_v35 }
 0x290   : > { %9503 = vmatpush1.bf16.msra.mxu1 %v17375_v42  ;;  %9695 = vmatpush1.bf16.msra.mxu0 %v17376_v13  ;;  %17378 = vst [vmem:[#allocation87_spill] sm:$0xff] %v12648_v54  ;;  %v17379_v12 = vld [vmem:[#allocation39_spill] sm:$0xff]  ;;  %17381 = vst [vmem:[#allocation91_spill] sm:$0xff] %v12652_v33  ;;  %v977_v42 = vld [vmem:[#allocation7 + $0x430] sm:$0xff]  ;;  %v3701_v54 = vand.u32 4294901760, %v994_v38  ;;  %v2848_v9 = vand.u32 4294901760, %v991_v1  ;;  %v12668_v51 = vpack.c.bf16 %v2846_v40, %v2842_v36 }
 0x291   : > { %9505 = vmatprep.subr.bf16.mxu1 %v17379_v12  ;;  %9697 = vmatprep.subr.bf16.mxu0 %v17380_v34  ;;  %17382 = vst [vmem:[#allocation90_spill] sm:$0xff] %v12654_v4  ;;  %17383 = vst [vmem:[#allocation94_spill] sm:$0xff] %v12656_v53  ;;  %v993_v13 = vld [vmem:[#allocation7 + $0x4b0] sm:$0xff]  ;;  %v1024_v10 = vld [vmem:[#allocation7 + $0x5a8] sm:$0xff]  ;;  %v12664_v12 = vsub.f32 %v961_v46, %v3695_v7  ;;  %v12670_v21 = vsub.f32 %v976_v20, %v2842_v36  ;;  %v2850_v7 = vand.u32 4294901760, %v1008_v31 }
 0x292   : > { %17384 = vst [vmem:[#allocation93_spill] sm:$0xff] %v12658_v37  ;;  %17385 = vst [vmem:[#allocation96_spill] sm:$0xff] %v12660_v16  ;;  %v1010_v34 = vld [vmem:[#allocation7 + $0x538] sm:$0xff]  ;;  %v17388_v0 = vld [vmem:[#allocation41_spill] sm:$0xff]  ;;  %v3699_v37 = vand.u32 4294901760, %v977_v42  ;;  %v3703_v53 = vand.u32 4294901760, %v993_v13  ;;  %v12674_v46 = vsub.f32 %v992_v3, %v2846_v40  ;;  %v12676_v39 = vsub.f32 %v978_v44, %v3697_v56 }
 0x293   : > { %17386 = vst [vmem:[#allocation98_spill] sm:$0xff] %v12662_v15  ;;  %17387 = vst [vmem:[#allocation75_spill] sm:$0xff] %v12664_v12  ;;  %v1026_v33 = vld [vmem:[#allocation7 + $0x5b8] sm:$0xff]  ;;  %v17389_v14 = vld [vmem:[#allocation48_spill] sm:$0xff]  ;;  %v2854_v12 = vand.u32 4294901760, %v1024_v10  ;;  %v12678_v4 = vpack.c.bf16 %v3701_v54, %v3697_v56  ;;  %v3705_v20 = vand.u32 4294901760, %v1010_v34 }
 0x294   : > { %9507 = vmatpush1.bf16.msra.mxu1 %v17388_v0  ;;  %9699 = vmatpush1.bf16.msra.mxu0 %v17389_v14  ;;  %17390 = vst [vmem:[#allocation76_spill] sm:$0xff] %v12668_v51  ;;  %17391 = vst [vmem:[#allocation77_spill] sm:$0xff] %v12670_v21  ;;  %v17392_v16 = vld [vmem:[#allocation52_spill] sm:$0xff]  ;;  %v17393_v18 = vld [vmem:[#allocation55_spill] sm:$0xff]  ;;  %v12680_v14 = vsub.f32 %v994_v38, %v3701_v54  ;;  %v3709_v36 = vand.u32 4294901760, %v1026_v33  ;;  %v12682_v21 = vpack.c.bf16 %v2848_v9, %v2844_v11 }
 0x295   : > { %9509 = vmatprep.subr.bf16.mxu1 %v17392_v16  ;;  %9701 = vmatprep.subr.bf16.mxu0 %v17393_v18  ;;  %17394 = vst [vmem:[#allocation78_spill] sm:$0xff] %v12674_v46  ;;  %17395 = vst [vmem:[#allocation79_spill] sm:$0xff] %v12676_v39  ;;  %v1007_v15 = vld [vmem:[#allocation7 + $0x520] sm:$0xff]  ;;  %v12684_v51 = vsub.f32 %v975_v35, %v2844_v11  ;;  %v12686_v16 = vsub.f32 %v991_v1, %v2848_v9  ;;  %v1009_v40 = vld [vmem:[#allocation7 + $0x530] sm:$0xff] }
 0x296   : > { %v1023_v0 = vld [vmem:[#allocation7 + $0x5a0] sm:$0xff]  ;;  %17396 = vst [vmem:[#allocation80_spill] sm:$0xff] %v12678_v4  ;;  %17397 = vst [vmem:[#allocation81_spill] sm:$0xff] %v12680_v14  ;;  %v12688_v3 = vsub.f32 %v977_v42, %v3699_v37  ;;  %v1025_v44 = vld [vmem:[#allocation7 + $0x5b0] sm:$0xff]  ;;  %v12692_v56 = vpack.c.bf16 %v3703_v53, %v3699_v37  ;;  %v12694_v38 = vsub.f32 %v993_v13, %v3703_v53  ;;  %v2852_v54 = vand.u32 4294901760, %v1007_v15 }
 0x297   : > { %17398 = vst [vmem:[#allocation82_spill] sm:$0xff] %v12682_v21  ;;  %17399 = vst [vmem:[#allocation85_spill] sm:$0xff] %v12684_v51  ;;  %v1040_v18 = vld [vmem:[#allocation7 + $0x628] sm:$0xff]  ;;  %v17402_v39 = vld [vmem:[#allocation58_spill] sm:$0xff]  ;;  %v2856_v14 = vand.u32 4294901760, %v1023_v0  ;;  %v12698_v9 = vpack.c.bf16 %v2854_v12, %v2850_v7  ;;  %v12706_v37 = vsub.f32 %v1010_v34, %v3705_v20  ;;  %v3707_v53 = vand.u32 4294901760, %v1009_v40 }
 0x298   : > { %17400 = vst [vmem:[#allocation88_spill] sm:$0xff] %v12686_v16  ;;  %17401 = vst [vmem:[#allocation95_spill] sm:$0xff] %v12688_v3  ;;  %9511 = vmatpush1.bf16.msra.mxu1 %v17402_v39  ;;  %v17403_v46 = vld [vmem:[#allocation62_spill] sm:$0xff]  ;;  %v1056_v21 = vld [vmem:[#allocation7 + $0x6a8] sm:$0xff]  ;;  %v12700_v3 = vsub.f32 %v1008_v31, %v2850_v7  ;;  %v12702_v39 = vsub.f32 %v1024_v10, %v2854_v12  ;;  %v3711_v13 = vand.u32 4294901760, %v1025_v44  ;;  %v2858_v51 = vand.u32 4294901760, %v1040_v18 }
 0x299   : > { %9703 = vmatpush1.bf16.msra.mxu0 %v17403_v46  ;;  %17404 = vst [vmem:[#allocation97_spill] sm:$0xff] %v12692_v56  ;;  %17405 = vst [vmem:[#allocation99_spill] sm:$0xff] %v12694_v38  ;;  %v1042_v35 = vld [vmem:[#allocation7 + $0x638] sm:$0xff]  ;;  %v17406_v1 = vld [vmem:[#allocation64_spill] sm:$0xff]  ;;  %v12704_v46 = vpack.c.bf16 %v3709_v36, %v3705_v20  ;;  %v2862_v56 = vand.u32 4294901760, %v1056_v21  ;;  %v12710_v10 = vsub.f32 %v1026_v33, %v3709_v36 }
 0x29a   : > { %v1058_v11 = vld [vmem:[#allocation7 + $0x6b8] sm:$0xff]  ;;  %9513 = vmatprep.subr.bf16.mxu1 %v17406_v1  ;;  %v17407_v42 = vld [vmem:[#allocation65_spill] sm:$0xff]  ;;  %17408 = vst [vmem:[#allocation100_spill] sm:$0xff] %v12698_v9  ;;  %17409 = vst [vmem:[#allocation15_spill] sm:$0xff] %v12700_v3  ;;  %v3713_v4 = vand.u32 4294901760, %v1042_v35  ;;  %v12712_v12 = vpack.c.bf16 %v2856_v14, %v2852_v54  ;;  %v12714_v34 = vsub.f32 %v1007_v15, %v2852_v54 }
 0x29b   : > { %9705 = vmatprep.subr.bf16.mxu0 %v17407_v42  ;;  %17410 = vst [vmem:[#allocation18_spill] sm:$0xff] %v12702_v39  ;;  %17411 = vst [vmem:[#allocation22_spill] sm:$0xff] %v12704_v46  ;;  %v1039_v38 = vld [vmem:[#allocation7 + $0x620] sm:$0xff]  ;;  %v3717_v1 = vand.u32 4294901760, %v1058_v11  ;;  %v1041_v8 = vld [vmem:[#allocation7 + $0x630] sm:$0xff]  ;;  %v12720_v39 = vsub.f32 %v1009_v40, %v3707_v53  ;;  %v12722_v23 = vpack.c.bf16 %v3711_v13, %v3707_v53 }
 0x29c   : > { %17412 = vst [vmem:[#allocation24_spill] sm:$0xff] %v12706_v37  ;;  %v1055_v16 = vld [vmem:[#allocation7 + $0x6a0] sm:$0xff]  ;;  %v1057_v42 = vld [vmem:[#allocation7 + $0x6b0] sm:$0xff]  ;;  %v17413_v26 = vld [vmem:[#allocation66_spill] sm:$0xff]  ;;  %v12718_v37 = vsub.f32 %v1023_v0, %v2856_v14  ;;  %v2860_v3 = vand.u32 4294901760, %v1039_v38  ;;  %v12724_v33 = vsub.f32 %v1025_v44, %v3711_v13  ;;  %v3715_v36 = vand.u32 4294901760, %v1041_v8 }
 0x29d   : > { %9515 = vmatpush1.bf16.msra.mxu1 %v17413_v26  ;;  %v17414_v31 = vld [vmem:[#allocation67_spill] sm:$0xff]  ;;  %17415 = vst [vmem:[#allocation27_spill] sm:$0xff] %v12712_v12  ;;  %v17416_v7 = vld [vmem:[#allocation68_spill] sm:$0xff]  ;;  %v17417_v20 = vld [vmem:[#allocation69_spill] sm:$0xff]  ;;  %v2864_v46 = vand.u32 4294901760, %v1055_v16  ;;  %v12726_v15 = vpack.c.bf16 %v2862_v56, %v2858_v51  ;;  %v12728_v54 = vsub.f32 %v1040_v18, %v2858_v51  ;;  %v12732_v0 = vpack.c.bf16 %v3717_v1, %v3713_v4 }
 0x29e   : > { %9707 = vmatpush1.bf16.msra.mxu0 %v17414_v31  ;;  %9517 = vmatprep.subr.bf16.mxu1 %v17416_v7  ;;  %17418 = vst [vmem:[#allocation28_spill] sm:$0xff] %v12718_v37  ;;  %17419 = vst [vmem:[#allocation29_spill] sm:$0xff] %v12720_v39  ;;  %v1072_v9 = vld [vmem:[#allocation7 + $0x728] sm:$0xff]  ;;  %v3719_v31 = vand.u32 4294901760, %v1057_v42  ;;  %v12730_v7 = vsub.f32 %v1056_v21, %v2862_v56  ;;  %v17425_v14 = vld [vmem:[#allocation70_spill] sm:$0xff]  ;;  %v12738_v53 = vsub.f32 %v1058_v11, %v3717_v1 }
 0x29f   : > { %9709 = vmatprep.subr.bf16.mxu0 %v17417_v20  ;;  %v1088_v26 = vld [vmem:[#allocation7 + $0x7a8] sm:$0xff]  ;;  %17420 = vst [vmem:[#allocation30_spill] sm:$0xff] %v12722_v23  ;;  %17421 = vst [vmem:[#allocation39_spill] sm:$0xff] %v12724_v33  ;;  %v17426_v40 = vld [vmem:[#allocation71_spill] sm:$0xff]  ;;  %v12736_v20 = vsub.f32 %v1042_v35, %v3713_v4  ;;  %v2866_v44 = vand.u32 4294901760, %v1072_v9  ;;  %v12742_v51 = vpack.c.bf16 %v2864_v46, %v2860_v3  ;;  %v17445_v1 = vand.u32 4294901760, %v12564_v50 }
 0x2a0   : > { %17422 = vst [vmem:[#allocation40_spill] sm:$0xff] %v12726_v15  ;;  %17423 = vst [vmem:[#allocation41_spill] sm:$0xff] %v12730_v7  ;;  %v2870_v13 = vand.u32 4294901760, %v1088_v26  ;;  %v1074_v33 = vld [vmem:[#allocation7 + $0x738] sm:$0xff]  ;;  %v17429_v39 = vld [vmem:[#allocation72_spill] sm:$0xff]  ;;  %v12744_v21 = vsub.f32 %v1039_v38, %v2860_v3  ;;  %v12746_v18 = vsub.f32 %v1055_v16, %v2864_v46  ;;  %v12750_v4 = vsub.f32 %v1041_v8, %v3715_v36 }
 0x2a1   : > { %17424 = vst [vmem:[#allocation48_spill] sm:$0xff] %v12732_v0  ;;  %9519 = vmatpush1.bf16.msra.mxu1 %v17425_v14  ;;  %17427 = vst [vmem:[#allocation52_spill] sm:$0xff] %v12736_v20  ;;  %v17430_v37 = vld [vmem:[#allocation73_spill] sm:$0xff]  ;;  %v1090_v56 = vld [vmem:[#allocation7 + $0x7b8] sm:$0xff]  ;;  %v12748_v14 = vpack.c.bf16 %v3719_v31, %v3715_v36 }
 0x2a2   : > { %9711 = vmatpush1.bf16.msra.mxu0 %v17426_v40  ;;  %17428 = vst [vmem:[#allocation55_spill] sm:$0xff] %v12738_v53  ;;  %9521 = vmatprep.subr.bf16.mxu1 %v17429_v39  ;;  %17431 = vst [vmem:[#allocation58_spill] sm:$0xff] %v12742_v51  ;;  %v1071_v35 = vld [vmem:[#allocation7 + $0x720] sm:$0xff]  ;;  %v12754_v39 = vsub.f32 %v1057_v42, %v3719_v31  ;;  %v1073_v53 = vld [vmem:[#allocation7 + $0x730] sm:$0xff]  ;;  %v12760_v8 = vpack.c.bf16 %v2870_v13, %v2866_v44  ;;  %v3725_v36 = vand.u32 4294901760, %v1090_v56 }
 0x2a3   : > { %9713 = vmatprep.subr.bf16.mxu0 %v17430_v37  ;;  %17432 = vst [vmem:[#allocation62_spill] sm:$0xff] %v12744_v21  ;;  %17433 = vst [vmem:[#allocation64_spill] sm:$0xff] %v12746_v18  ;;  %v1087_v11 = vld [vmem:[#allocation7 + $0x7a0] sm:$0xff]  ;;  %v3721_v37 = vand.u32 4294901760, %v1074_v33  ;;  %v17438_v46 = vld [vmem:[#allocation86_spill] sm:$0xff]  ;;  %v12766_v31 = vsub.f32 %v1072_v9, %v2866_v44  ;;  %v12768_v3 = vsub.f32 %v1088_v26, %v2870_v13  ;;  %v2868_v16 = vand.u32 4294901760, %v1071_v35 }
 0x2a4   : > { %17434 = vst [vmem:[#allocation65_spill] sm:$0xff] %v12748_v14  ;;  %17435 = vst [vmem:[#allocation66_spill] sm:$0xff] %v12750_v4  ;;  %v17437_v38 = vld [vmem:[#allocation83_spill] sm:$0xff]  ;;  %v17440_v40 = vld [vmem:[#allocation89_spill] sm:$0xff]  ;;  %v3723_v18 = vand.u32 4294901760, %v1073_v53  ;;  %v17444_v21 = vand.u32 4294901760, %v12560_v59  ;;  %v12799_v13 = vsub.f32 %v1090_v56, %v3725_v36 }
 0x2a5   : > { %17436 = vst [vmem:[#allocation67_spill] sm:$0xff] %v12754_v39  ;;  %9523 = vmatpush1.bf16.msra.mxu1 %v17437_v38  ;;  %17439 = vst [vmem:[#allocation68_spill] sm:$0xff] %v12760_v8  ;;  %v17441_v42 = vld [vmem:[#allocation92_spill] sm:$0xff]  ;;  %v2872_v39 = vand.u32 4294901760, %v1087_v11  ;;  %v12770_v38 = vsub.f32 %v1074_v33, %v3721_v37  ;;  %v17447_v26 = vand.u32 4294901760, %v12568_v61  ;;  %v17454_v56 = vand.u32 4294901760, %v12576_v29 }
 0x2a6   : > { %9715 = vmatpush1.bf16.msra.mxu0 %v17438_v46  ;;  %9525 = vmatprep.subr.bf16.mxu1 %v17440_v40  ;;  %17442 = vst [vmem:[#allocation69_spill] sm:$0xff] %v12768_v3  ;;  %v1089_v46 = vld [vmem:[#allocation7 + $0x7b0] sm:$0xff]  ;;  %v2921_v4 = vsub.f32 %v12560_v59, %v17444_v21  ;;  %v2933_v40 = vsub.f32 %v12564_v50, %v17445_v1  ;;  %v17449_v1 = vand.u32 4294901760, %v12570_v22  ;;  %v17496_v59 = vld [vmem:[#allocation82_spill] sm:$0xff] }
 0x2a7   : > { %9717 = vmatprep.subr.bf16.mxu0 %v17441_v42  ;;  %17443 = vst [vmem:[#allocation70_spill] sm:$0xff] %v12770_v38  ;;  %v17446_v42 = vand.u32 4294901760, %v12566_v27  ;;  %v3788_v44 = vsub.f32 %v12568_v61, %v17447_v26  ;;  %v12788_v21 = vpack.c.bf16 %v3725_v36, %v3721_v37  ;;  %v3727_v37 = vand.u32 4294901760, %v1089_v46 }
 0x2a8   : > { %v2927_v50 = vsub.f32 %v12570_v22, %v17449_v1  ;;  %v12805_v33 = vsub.f32 %v1087_v11, %v2872_v39  ;;  %v2922_v1 = vand.u32 4294901760, %v2921_v4  ;;  %v2934_v22 = vand.u32 4294901760, %v2933_v40 }
 0x2a9   : > { %v3776_v9 = vsub.f32 %v12566_v27, %v17446_v42  ;;  %9527 = vmatpush1.bf16.msra.mxu1 %v17253_v48  ;;  %17448 = vst [vmem:[#allocation71_spill] sm:$0xff] %v12788_v21  ;;  %v17450_v42 = vand.u32 4294901760, %v12572_v55  ;;  %v12801_v48 = vpack.c.bf16 %v2872_v39, %v2868_v16  ;;  %v3789_v26 = vand.u32 4294901760, %v3788_v44 }
 0x2aa   : > { %9719 = vmatpush1.bf16.msra.mxu0 %v17254_v43  ;;  %9721 = vmatprep.subr.bf16.mxu1 %v12556_v17  ;;  %v12803_v43 = vsub.f32 %v1071_v35, %v2868_v16  ;;  %17453 = vst [vmem:[#allocation83_spill] sm:$0xff] %v12805_v33  ;;  %v3782_v36 = vsub.f32 %v12576_v29, %v17454_v56  ;;  %v17455_v35 = vand.u32 4294901760, %v12578_v45  ;;  %v2928_v4 = vand.u32 4294901760, %v2927_v50  ;;  %v17501_v29 = vld [vmem:[#allocation22_spill] sm:$0xff] }
 0x2ab   : > { %v2939_v27 = vsub.f32 %v12572_v55, %v17450_v42  ;;  %9913 = vmatprep.subr.bf16.mxu0 %v12558_v58  ;;  %17451 = vst [vmem:[#allocation72_spill] sm:$0xff] %v12801_v48  ;;  %v3777_v42 = vand.u32 4294901760, %v3776_v9  ;;  %v17456_v39 = vand.u32 4294901760, %v12582_v25  ;;  %v12824_v44 = vpack.c.bf16 %v3727_v37, %v3723_v18  ;;  %v17468_v58 = vld [vmem:[#allocation32_spill] sm:$0xff] }
 0x2ac   : > { %17452 = vst [vmem:[#allocation73_spill] sm:$0xff] %v12803_v43  ;;  %1949 = vmatmul.mubr.f32.vlgmr.msra.gmra.mrb[2].mxu1 %v17358_v28  ;;  %v3794_v16 = vsub.f32 %v12578_v45, %v17455_v35  ;;  %v12826_v56 = vsub.f32 %v1073_v53, %v3723_v18  ;;  %v16478_v61 = vand.u32 4294901760, %v12594_v60  ;;  %v12830_v50 = vsub.f32 %v1089_v46, %v3727_v37  ;;  %v17463_v35 = vld [vmem:[#allocation17_spill] sm:$0xff] }
 0x2ad   : > { %2804 = vmatmul.mubr.f32.vlgmr.msra.gmra.mrb[2].mxu0 %v17358_v28  ;;  %9723 = vmatpush1.bf16.msra.mxu1 %v12562_v57  ;;  %v2940_v11 = vand.u32 4294901760, %v2939_v27  ;;  %v2945_v40 = vsub.f32 %v12582_v25, %v17456_v39  ;;  %17457 = vst [vmem:[#allocation86_spill] sm:$0xff] %v12824_v44  ;;  %v12834_v27 = vpack.c.bf16 %v2934_v22, %v2922_v1  ;;  %v17458_v39 = vand.u32 4294901760, %v12584_v30  ;;  %v17467_v57 = vld [vmem:[#allocation25_spill] sm:$0xff]  ;;  %v17474_v28 = vld [vmem:[#allocation35_spill] sm:$0xff] }
 0x2ae   : > { %9915 = vmatpush1.bf16.msra.mxu0 %v12574_v47  ;;  %9725 = vmatprep.subr.bf16.mxu1 %v12580_v49  ;;  %v3783_v53 = vand.u32 4294901760, %v3782_v36  ;;  %v3795_v18 = vand.u32 4294901760, %v3794_v16  ;;  %v17459_v22 = vand.u32 4294901760, %v12586_v2  ;;  %v12860_v36 = vsub.f32 %v12594_v60, %v16478_v61  ;;  %v17461_v16 = vld [vmem:[#allocation117_spill] sm:$0xff] }
 0x2af   : > { %9917 = vmatprep.subr.bf16.mxu0 %v12588_v5  ;;  %2906 = vmatprep.mubr.f32.mxu1 %v17132_v32  ;;  %v2957_v9 = vsub.f32 %v12584_v30, %v17458_v39  ;;  %v12839_v5 = vpack.c.bf16 %v3789_v26, %v3777_v42  ;;  %v12844_v46 = vpack.c.bf16 %v2940_v11, %v2928_v4  ;;  %v2946_v37 = vand.u32 4294901760, %v2945_v40  ;;  %v17462_v11 = vld [vmem:[#allocation118_spill] sm:$0xff]  ;;  %v17470_v40 = vld [vmem:[#allocation31_spill] sm:$0xff]  ;;  %v17473_v39 = vld [vmem:[#allocation36_spill] sm:$0xff] }
 0x2b0   : > { %3761 = vmatprep.mubr.f32.mxu0 %v17132_v32  ;;  %v12849_v1 = vsub.f32 %v12586_v2, %v17459_v22  ;;  %v17460_v26 = vand.u32 4294901760, %v12590_v52  ;;  %v12867_v49 = vpack.c.bf16 %v3795_v18, %v3783_v53  ;;  %v17469_v4 = vld [vmem:[#allocation26_spill] sm:$0xff]  ;;  %v17472_v53 = vld [vmem:[#allocation33_spill] sm:$0xff]  ;;  %v2952_v17 = vand.u32 4294901760, %v12860_v36  ;;  %v17490_v2 = vld [vmem:[#allocation76_spill] sm:$0xff] }
 0x2b1   : > { %9727 = vmatpush1.bf16.msra.mxu1 %v12592_v19  ;;  %v2958_v22 = vand.u32 4294901760, %v2957_v9  ;;  %v17465_v19 = vld [vmem:[#allocation21_spill] sm:$0xff]  ;;  %v17478_v18 = vand.u32 4294901760, %v17463_v35 }
 0x2b2   : > { %9919 = vmatpush1.bf16.msra.mxu0 %v12598_v62  ;;  %9729 = vmatprep.subr.bf16.mxu1 %v12608_v24  ;;  %v3812_v42 = vsub.f32 %v12590_v52, %v17460_v26  ;;  %v17464_v62 = vld [vmem:[#allocation19_spill] sm:$0xff]  ;;  %v17466_v26 = vand.u32 4294901760, %v12596_v63  ;;  %v3801_v9 = vand.u32 4294901760, %v12849_v1  ;;  %v17471_v24 = vand.u32 4294901760, %v12602_v41 }
 0x2b3   : > { %9921 = vmatprep.subr.bf16.mxu0 %v12614_v6  ;;  %v17477_v1 = vand.u32 4294901760, %v17462_v11  ;;  %v2981_v60 = vsub.f32 %v17463_v35, %v17478_v18  ;;  %v17480_v36 = vand.u32 4294901760, %v17465_v19  ;;  %v17484_v18 = vld [vmem:[#allocation90_spill] sm:$0xff]  ;;  %v17485_v35 = vld [vmem:[#allocation96_spill] sm:$0xff] }
 0x2b4   : > { %v2963_v47 = vsub.f32 %v12596_v63, %v17466_v26  ;;  %v3806_v6 = vsub.f32 %v12602_v41, %v17471_v24  ;;  %v17475_v26 = vld [vmem:[#allocation84_spill] sm:$0xff]  ;;  %v3813_v61 = vand.u32 4294901760, %v3812_v42  ;;  %v12891_v24 = vpack.c.bf16 %v2958_v22, %v2946_v37 }
 0x2b5   : > { %9731 = vmatpush1.bf16.msra.mxu1 %v17469_v4  ;;  %v17476_v4 = vand.u32 4294901760, %v17461_v16  ;;  %v2969_v63 = vsub.f32 %v17462_v11, %v17477_v1  ;;  %v17482_v37 = vand.u32 4294901760, %v17468_v58  ;;  %v17483_v1 = vld [vmem:[#allocation37_spill] sm:$0xff]  ;;  %v2982_v25 = vand.u32 4294901760, %v2981_v60 }
 0x2b6   : > { %9923 = vmatpush1.bf16.msra.mxu0 %v17470_v40  ;;  %9733 = vmatprep.subr.bf16.mxu1 %v17474_v28  ;;  %v17479_v28 = vand.u32 4294901760, %v17464_v62  ;;  %v2964_v41 = vand.u32 4294901760, %v2963_v47  ;;  %v17487_v47 = vand.u32 4294901760, %v17473_v39  ;;  %v3807_v11 = vand.u32 4294901760, %v3806_v6  ;;  %v17497_v6 = vld [vmem:[#allocation97_spill] sm:$0xff] }
 0x2b7   : > { %9925 = vmatprep.subr.bf16.mxu0 %v17475_v26  ;;  %v3818_v40 = vsub.f32 %v17461_v16, %v17476_v4  ;;  %v3836_v26 = vsub.f32 %v17465_v19, %v17480_v36  ;;  %v17481_v4 = vand.u32 4294901760, %v17467_v57  ;;  %v2987_v22 = vsub.f32 %v17468_v58, %v17482_v37  ;;  %v17488_v19 = vld [vmem:[#allocation74_spill] sm:$0xff]  ;;  %v17491_v37 = vld [vmem:[#allocation80_spill] sm:$0xff] }
 0x2b8   : > { %v3824_v42 = vsub.f32 %v17464_v62, %v17479_v28  ;;  %v17486_v28 = vand.u32 4294901760, %v17472_v53  ;;  %v3842_v36 = vsub.f32 %v17473_v39, %v17487_v47  ;;  %v2970_v58 = vand.u32 4294901760, %v2969_v63  ;;  %v17495_v39 = vld [vmem:[#allocation93_spill] sm:$0xff] }
 0x2b9   : > { %v2975_v16 = vsub.f32 %v17467_v57, %v17481_v4  ;;  %9735 = vmatpush1.bf16.msra.mxu1 %v17484_v18  ;;  %v17489_v57 = vld [vmem:[#allocation87_spill] sm:$0xff]  ;;  %v3819_v18 = vand.u32 4294901760, %v3818_v40  ;;  %v2988_v47 = vand.u32 4294901760, %v2987_v22  ;;  %v17494_v4 = vand.u32 4294901760, %v17483_v1  ;;  %v17500_v22 = vld [vmem:[#allocation100_spill] sm:$0xff] }
 0x2ba   : > { %9927 = vmatpush1.bf16.msra.mxu0 %v17485_v35  ;;  %v3830_v62 = vsub.f32 %v17472_v53, %v17486_v28  ;;  %9737 = vmatprep.subr.bf16.mxu1 %v17490_v2  ;;  %v17492_v35 = vld [vmem:[#allocation91_spill] sm:$0xff]  ;;  %v3825_v45 = vand.u32 4294901760, %v3824_v42  ;;  %v3837_v28 = vand.u32 4294901760, %v3836_v26  ;;  %v17493_v53 = vld [vmem:[#allocation94_spill] sm:$0xff]  ;;  %v3843_v40 = vand.u32 4294901760, %v3842_v36 }
 0x2bb   : > { %9929 = vmatprep.subr.bf16.mxu0 %v17491_v37  ;;  %v16516_v30 = vand.u32 4294901760, %v17492_v35  ;;  %v2976_v55 = vand.u32 4294901760, %v2975_v16  ;;  %v2993_v52 = vsub.f32 %v17483_v1, %v17494_v4  ;;  %v17498_v60 = vand.u32 4294901760, %v17488_v19 }
 0x2bc   : > { %v3831_v63 = vand.u32 4294901760, %v3830_v62  ;;  %v17499_v42 = vand.u32 4294901760, %v17489_v57  ;;  %v12937_v4 = vpack.c.bf16 %v3813_v61, %v3801_v9  ;;  %v17502_v62 = vld [vmem:[#allocation98_spill] sm:$0xff]  ;;  %v12944_v37 = vpack.c.bf16 %v2964_v41, %v2952_v17  ;;  %v17506_v41 = vld [vmem:[#allocation77_spill] sm:$0xff] }
 0x2bd   : > { %9739 = vmatpush1.bf16.msra.mxu1 %v17496_v59  ;;  %v3005_v26 = vsub.f32 %v17488_v19, %v17498_v60  ;;  %v3860_v2 = vsub.f32 %v17492_v35, %v16516_v30  ;;  %v12946_v60 = vpack.c.bf16 %v3819_v18, %v3807_v11  ;;  %v12948_v19 = vpack.c.bf16 %v2982_v25, %v2970_v58  ;;  %v17508_v18 = vld [vmem:[#allocation78_spill] sm:$0xff] }
 0x2be   : > { %9931 = vmatpush1.bf16.msra.mxu0 %v17497_v6  ;;  %v3848_v16 = vsub.f32 %v17489_v57, %v17499_v42  ;;  %9741 = vmatprep.subr.bf16.mxu1 %v17500_v22  ;;  %v17503_v6 = vld [vmem:[#allocation75_spill] sm:$0xff]  ;;  %v17504_v42 = vand.u32 4294901760, %v17493_v53  ;;  %v12953_v61 = vpack.c.bf16 %v3837_v28, %v3825_v45  ;;  %v12955_v9 = vpack.c.bf16 %v2988_v47, %v2976_v55 }
 0x2bf   : > { %9933 = vmatprep.subr.bf16.mxu0 %v17501_v29  ;;  %v16526_v59 = vand.u32 4294901760, %v17503_v6  ;;  %v2994_v22 = vand.u32 4294901760, %v2993_v52  ;;  %v17505_v30 = vand.u32 4294901760, %v17495_v39  ;;  %v12962_v17 = vpack.c.bf16 %v3843_v40, %v3831_v63  ;;  %v17509_v63 = vld [vmem:[#allocation79_spill] sm:$0xff] }
 0x2c0   : > { %v2999_v29 = vsub.f32 %v17493_v53, %v17504_v42  ;;  %v3006_v58 = vand.u32 4294901760, %v3005_v26  ;;  %v3849_v25 = vand.u32 4294901760, %v3848_v16  ;;  %v3861_v55 = vand.u32 4294901760, %v3860_v2  ;;  %v17510_v26 = vld [vmem:[#allocation81_spill] sm:$0xff]  ;;  %v17516_v40 = vld [vmem:[#allocation15_spill] sm:$0xff] }
 0x2c1   : > { %v3011_v36 = vsub.f32 %v17495_v39, %v17505_v30  ;;  %9743 = vmatpush1.bf16.msra.mxu1 %v12712_v12  ;;  %v17507_v45 = vand.u32 4294901760, %v17502_v62  ;;  %v3866_v30 = vsub.f32 %v17503_v6, %v16526_v59  ;;  %v17511_v42 = vld [vmem:[#allocation85_spill] sm:$0xff]  ;;  %v17514_v39 = vld [vmem:[#allocation99_spill] sm:$0xff]  ;;  %v17515_v59 = vand.u32 4294901760, %v17506_v41 }
 0x2c2   : > { %9935 = vmatpush1.bf16.msra.mxu0 %v12722_v23  ;;  %9745 = vmatprep.subr.bf16.mxu1 %v12726_v15  ;;  %v3000_v47 = vand.u32 4294901760, %v2999_v29  ;;  %v17513_v23 = vld [vmem:[#allocation95_spill] sm:$0xff]  ;;  %v17517_v2 = vand.u32 4294901760, %v17508_v18  ;;  %v17520_v16 = vand.u32 4294901760, %v17510_v26 }
 0x2c3   : > { %9937 = vmatprep.subr.bf16.mxu0 %v12732_v0  ;;  %v3854_v52 = vsub.f32 %v17502_v62, %v17507_v45  ;;  %v3012_v15 = vand.u32 4294901760, %v3011_v36  ;;  %v17512_v0 = vld [vmem:[#allocation88_spill] sm:$0xff]  ;;  %v3017_v29 = vsub.f32 %v17506_v41, %v17515_v59  ;;  %v3867_v45 = vand.u32 4294901760, %v3866_v30 }
 0x2c4   : > { %v3029_v11 = vsub.f32 %v17508_v18, %v17517_v2  ;;  %v17519_v59 = vand.u32 4294901760, %v17509_v63  ;;  %v3884_v36 = vsub.f32 %v17510_v26, %v17520_v16  ;;  %v17523_v30 = vand.u32 4294901760, %v12830_v50 }
 0x2c5   : > { %9747 = vmatpush1.bf16.msra.mxu1 %v12742_v51  ;;  %v3855_v12 = vand.u32 4294901760, %v3854_v52  ;;  %v17522_v52 = vand.u32 4294901760, %v12826_v56  ;;  %v13009_v2 = vpack.c.bf16 %v3006_v58, %v2994_v22  ;;  %v17525_v51 = vand.u32 4294901760, %v17512_v0 }
 0x2c6   : > { %9939 = vmatpush1.bf16.msra.mxu0 %v12748_v14  ;;  %9749 = vmatprep.subr.bf16.mxu1 %v12760_v8  ;;  %v17518_v14 = vld [vmem:[#allocation18_spill] sm:$0xff]  ;;  %v3872_v28 = vsub.f32 %v17509_v63, %v17519_v59  ;;  %v17521_v8 = vand.u32 4294901760, %v17511_v42  ;;  %v17526_v63 = vand.u32 4294901760, %v17513_v23  ;;  %v17527_v26 = vand.u32 4294901760, %v17514_v39 }
 0x2c7   : > { %9941 = vmatprep.subr.bf16.mxu0 %v12788_v21  ;;  %v13007_v41 = vpack.c.bf16 %v17523_v30, %v17522_v52  ;;  %v3035_v59 = vsub.f32 %v17512_v0, %v17525_v51  ;;  %v13022_v52 = vpack.c.bf16 %v3861_v55, %v3849_v25  ;;  %v13024_v22 = vpack.c.bf16 %v3012_v15, %v3000_v47  ;;  %v17536_v15 = vld [vmem:[#allocation55_spill] sm:$0xff] }
 0x2c8   : > { %v3023_v21 = vsub.f32 %v17511_v42, %v17521_v8  ;;  %v3878_v16 = vsub.f32 %v17513_v23, %v17526_v63  ;;  %v3890_v8 = vsub.f32 %v17514_v39, %v17527_v26  ;;  %v3018_v58 = vand.u32 4294901760, %v3017_v29  ;;  %v17531_v39 = vld [vmem:[#allocation61_spill] sm:$0xff] }
 0x2c9   : > { %17524 = vst [vmem:[#allocation89_spill] sm:$0xff] %v13007_v41  ;;  %9751 = vmatpush1.bf16.msra.mxu1 %v12801_v48  ;;  %v17528_v30 = vand.u32 4294901760, %v17516_v40  ;;  %v13031_v63 = vpack.c.bf16 %v3867_v45, %v3855_v12  ;;  %v17529_v26 = vand.u32 4294901760, %v17518_v14  ;;  %v3030_v55 = vand.u32 4294901760, %v3029_v11  ;;  %v17533_v11 = vld [vmem:[#allocation29_spill] sm:$0xff] }
 0x2ca   : > { %9943 = vmatpush1.bf16.msra.mxu0 %v12824_v44  ;;  %9753 = vmatprep.subr.bf16.mxu1 %v12834_v27  ;;  %v17530_v44 = vld [vmem:[#allocation24_spill] sm:$0xff]  ;;  %v3873_v47 = vand.u32 4294901760, %v3872_v28  ;;  %v3885_v29 = vand.u32 4294901760, %v3884_v36  ;;  %v3024_v48 = vand.u32 4294901760, %v3023_v21  ;;  %v3036_v27 = vand.u32 4294901760, %v3035_v59  ;;  %v17534_v36 = vld [vmem:[#allocation39_spill] sm:$0xff] }
 0x2cb   : > { %v3041_v51 = vsub.f32 %v17516_v40, %v17528_v30  ;;  %9945 = vmatprep.subr.bf16.mxu0 %v12839_v5  ;;  %v3053_v41 = vsub.f32 %v17518_v14, %v17529_v26  ;;  %v16543_v25 = vand.u32 4294901760, %v17530_v44  ;;  %v3879_v5 = vand.u32 4294901760, %v3878_v16  ;;  %v17532_v26 = vld [vmem:[#allocation28_spill] sm:$0xff] }
 0x2cc   : > { %2912 = vmatmul.mubr.f32.vlgmr.msra.gmra.mrb[4].mxu1 %v17531_v39  ;;  %v3891_v12 = vand.u32 4294901760, %v3890_v8  ;;  %v16544_v45 = vand.u32 4294901760, %v12714_v34  ;;  %v16545_v8 = vand.u32 4294901760, %v12728_v54  ;;  %v16547_v28 = vand.u32 4294901760, %v12730_v7 }
 0x2cd   : > { %3767 = vmatmul.mubr.f32.vlgmr.msra.gmra.mrb[4].mxu0 %v17531_v39  ;;  %9755 = vmatpush1.bf16.msra.mxu1 %v12844_v46  ;;  %v3042_v30 = vand.u32 4294901760, %v3041_v51  ;;  %v3054_v59 = vand.u32 4294901760, %v3053_v41  ;;  %v3896_v16 = vsub.f32 %v17530_v44, %v16543_v25  ;;  %v17535_v46 = vand.u32 4294901760, %v12710_v10 }
 0x2ce   : > { %9947 = vmatpush1.bf16.msra.mxu0 %v12867_v49  ;;  %9757 = vmatprep.subr.bf16.mxu1 %v12891_v24  ;;  %v9768_v51 = vpack.c.bf16 %v3030_v55, %v3018_v58  ;;  %v9770_v41 = vpack.c.bf16 %v3036_v27, %v3024_v48  ;;  %v9962_v25 = vpack.c.bf16 %v3891_v12, %v3879_v5  ;;  %v17537_v58 = vand.u32 4294901760, %v17532_v26 }
 0x2cf   : > { %9949 = vmatprep.subr.bf16.mxu0 %v12937_v4  ;;  %v3908_v49 = vsub.f32 %v12710_v10, %v17535_v46  ;;  %3142 = vmatprep.mubr.f32.mxu1 %v17132_v32  ;;  %v9960_v4 = vpack.c.bf16 %v3885_v29, %v3873_v47  ;;  %v3047_v46 = vsub.f32 %v12714_v34, %v16544_v45  ;;  %v17538_v24 = vand.u32 4294901760, %v17533_v11 }
 0x2d0   : > { %3997 = vmatprep.mubr.f32.mxu0 %v17132_v32  ;;  %v3059_v55 = vsub.f32 %v17532_v26, %v17537_v58  ;;  %v17539_v47 = vand.u32 4294901760, %v17534_v36  ;;  %v9772_v29 = vpack.c.bf16 %v3054_v59, %v3042_v30  ;;  %v3077_v5 = vsub.f32 %v12730_v7, %v16547_v28 }
 0x2d1   : > { %9759 = vmatpush1.bf16.msra.mxu1 %v12944_v37  ;;  %v3902_v21 = vsub.f32 %v17533_v11, %v17538_v24  ;;  %v3897_v37 = vand.u32 4294901760, %v3896_v16  ;;  %v3909_v27 = vand.u32 4294901760, %v3908_v49  ;;  %v17540_v12 = vand.u32 4294901760, %v12736_v20  ;;  %v17543_v16 = vld [vmem:[#allocation64_spill] sm:$0xff] }
 0x2d2   : > { %9951 = vmatpush1.bf16.msra.mxu0 %v12946_v60  ;;  %v3914_v48 = vsub.f32 %v17534_v36, %v17539_v47  ;;  %9761 = vmatprep.subr.bf16.mxu1 %v12948_v19  ;;  %v3065_v60 = vsub.f32 %v12728_v54, %v16545_v8  ;;  %v17541_v58 = vand.u32 4294901760, %v17536_v15  ;;  %v3048_v59 = vand.u32 4294901760, %v3047_v46  ;;  %v17544_v47 = vld [vmem:[#allocation66_spill] sm:$0xff]  ;;  %v17545_v8 = vld [vmem:[#allocation67_spill] sm:$0xff] }
 0x2d3   : > { %9953 = vmatprep.subr.bf16.mxu0 %v12953_v61  ;;  %v3920_v24 = vsub.f32 %v12736_v20, %v17540_v12  ;;  %v17542_v61 = vld [vmem:[#allocation62_spill] sm:$0xff]  ;;  %v3060_v28 = vand.u32 4294901760, %v3059_v55  ;;  %v3903_v7 = vand.u32 4294901760, %v3902_v21  ;;  %v16552_v20 = vand.u32 4294901760, %v12766_v31 }
 0x2d4   : > { %v3932_v19 = vsub.f32 %v17536_v15, %v17541_v58  ;;  %v3915_v12 = vand.u32 4294901760, %v3914_v48  ;;  %v3066_v46 = vand.u32 4294901760, %v3065_v60  ;;  %v16553_v58 = vand.u32 4294901760, %v12768_v3 }
 0x2d5   : > { %9763 = vmatpush1.bf16.msra.mxu1 %v12955_v9  ;;  %v16557_v39 = vand.u32 4294901760, %v12799_v13  ;;  %v3078_v49 = vand.u32 4294901760, %v3077_v5  ;;  %v3921_v9 = vand.u32 4294901760, %v3920_v24  ;;  %v17547_v55 = vand.u32 4294901760, %v17543_v16 }
 0x2d6   : > { %9955 = vmatpush1.bf16.msra.mxu0 %v12962_v17  ;;  %9765 = vmatprep.subr.bf16.mxu1 %v13009_v2  ;;  %v3933_v30 = vand.u32 4294901760, %v3932_v19  ;;  %v17546_v17 = vand.u32 4294901760, %v17542_v61  ;;  %v17549_v60 = vand.u32 4294901760, %v17545_v8  ;;  %v16556_v5 = vand.u32 4294901760, %v12803_v43 }
 0x2d7   : > { %9957 = vmatprep.subr.bf16.mxu0 %v13022_v52  ;;  %v3083_v2 = vsub.f32 %v17543_v16, %v17547_v55  ;;  %v17548_v52 = vand.u32 4294901760, %v17544_v47  ;;  %v9964_v24 = vpack.c.bf16 %v3909_v27, %v3897_v37  ;;  %v9774_v19 = vpack.c.bf16 %v3060_v28, %v3048_v59 }
 0x2d8   : > { %v3071_v21 = vsub.f32 %v17542_v61, %v17546_v17  ;;  %v3938_v45 = vsub.f32 %v17545_v8, %v17549_v60  ;;  %v3089_v17 = vsub.f32 %v12766_v31, %v16552_v20  ;;  %v17550_v60 = vand.u32 4294901760, %v12770_v38 }
 0x2d9   : > { %v3926_v48 = vsub.f32 %v17544_v47, %v17548_v52  ;;  %9767 = vmatpush1.bf16.msra.mxu1 %v13024_v22  ;;  %v3101_v52 = vsub.f32 %v12768_v3, %v16553_v58  ;;  %v9966_v28 = vpack.c.bf16 %v3915_v12, %v3903_v7  ;;  %v9776_v37 = vpack.c.bf16 %v3078_v49, %v3066_v46 }
 0x2da   : > { %9959 = vmatpush1.bf16.msra.mxu0 %v13031_v63  ;;  %9769 = vmatprep.subr.bf16.mxu1 %v9768_v51  ;;  %v3944_v22 = vsub.f32 %v12770_v38, %v17550_v60  ;;  %v3956_v63 = vsub.f32 %v12799_v13, %v16557_v39  ;;  %v9968_v27 = vpack.c.bf16 %v3933_v30, %v3921_v9  ;;  %v3072_v59 = vand.u32 4294901760, %v3071_v21  ;;  %v17578_v39 = vld [vmem:[#allocation36_spill] sm:$0xff] }
 0x2db   : > { %9961 = vmatprep.subr.bf16.mxu0 %v9960_v4  ;;  %v3084_v20 = vand.u32 4294901760, %v3083_v2  ;;  %v3927_v55 = vand.u32 4294901760, %v3926_v48  ;;  %v3939_v51 = vand.u32 4294901760, %v3938_v45  ;;  %v3095_v4 = vsub.f32 %v12803_v43, %v16556_v5 }
 0x2dc   : > { %v17551_v58 = vand.u32 4294901760, %v12805_v33  ;;  %v17552_v38 = vand.u32 4294901760, %v12826_v56  ;;  %v17553_v30 = vand.u32 4294901760, %v12830_v50  ;;  %v3090_v45 = vand.u32 4294901760, %v3089_v17  ;;  %v17554_v17 = vld [vmem:[#allocation23_spill] sm:$0xff] }
 0x2dd   : > { %9771 = vmatpush1.bf16.msra.mxu1 %v9770_v41  ;;  %v3102_v12 = vand.u32 4294901760, %v3101_v52  ;;  %v3945_v46 = vand.u32 4294901760, %v3944_v22  ;;  %v3957_v9 = vand.u32 4294901760, %v3956_v63  ;;  %v9778_v41 = vpack.c.bf16 %v3084_v20, %v3072_v59  ;;  %v17555_v52 = vld [vmem:[#allocation101_spill] sm:$0xff]  ;;  %v17561_v59 = vld [vmem:[#allocation63_spill] sm:$0xff] }
 0x2de   : > { %9963 = vmatpush1.bf16.msra.mxu0 %v9962_v25  ;;  %v3107_v60 = vsub.f32 %v12805_v33, %v17551_v58  ;;  %v3950_v7 = vsub.f32 %v12826_v56, %v17552_v38  ;;  %v3962_v49 = vsub.f32 %v12830_v50, %v17553_v30  ;;  %9773 = vmatprep.subr.bf16.mxu1 %v9772_v29  ;;  %v3096_v21 = vand.u32 4294901760, %v3095_v4  ;;  %v17558_v63 = vld [vmem:[#allocation53_spill] sm:$0xff]  ;;  %v17562_v4 = vld [vmem:[#allocation107_spill] sm:$0xff] }
 0x2df   : > { %9965 = vmatprep.subr.bf16.mxu0 %v9964_v24  ;;  %v9970_v25 = vpack.c.bf16 %v3939_v51, %v3927_v55  ;;  %v9780_v38 = vpack.c.bf16 %v3102_v12, %v3090_v45  ;;  %v9972_v5 = vpack.c.bf16 %v3957_v9, %v3945_v46  ;;  %v9784_v20 = vpack.c.bf16 %v17555_v52, %v17554_v17  ;;  %v17556_v55 = vld [vmem:[#allocation102_spill] sm:$0xff]  ;;  %v17565_v30 = vld [vmem:[#allocation111_spill] sm:$0xff]  ;;  %v17566_v45 = vld [vmem:[#allocation56_spill] sm:$0xff] }
 0x2e0   : > { %v3108_v58 = vand.u32 4294901760, %v3107_v60  ;;  %v3951_v2 = vand.u32 4294901760, %v3950_v7  ;;  %v3963_v48 = vand.u32 4294901760, %v3962_v49  ;;  %v17563_v60 = vld [vmem:[#allocation108_spill] sm:$0xff]  ;;  %v17567_v12 = vld [vmem:[#allocation113_spill] sm:$0xff]  ;;  %v17568_v46 = vld [vmem:[#allocation114_spill] sm:$0xff] }
 0x2e1   : > { %9775 = vmatpush1.bf16.msra.mxu1 %v9774_v19  ;;  %v17557_v19 = vld [vmem:[#allocation103_spill] sm:$0xff]  ;;  %v9788_v7 = vpack.c.bf16 %v17563_v60, %v17562_v4  ;;  %v9790_v9 = vpack.c.bf16 %v17568_v46, %v17567_v12 }
 0x2e2   : > { %9967 = vmatpush1.bf16.msra.mxu0 %v9966_v28  ;;  %9777 = vmatprep.subr.bf16.mxu1 %v9776_v37  ;;  %v9782_v29 = vpack.c.bf16 %v3108_v58, %v3096_v21  ;;  %v9974_v24 = vpack.c.bf16 %v3963_v48, %v3951_v2  ;;  %v9976_v22 = vpack.c.bf16 %v17557_v19, %v17556_v55  ;;  %v17559_v28 = vld [vmem:[#allocation104_spill] sm:$0xff]  ;;  %v17571_v58 = vld [vmem:[#allocation118_spill] sm:$0xff]  ;;  %v17572_v2 = vld [vmem:[#allocation17_spill] sm:$0xff] }
 0x2e3   : > { %9969 = vmatprep.subr.bf16.mxu0 %v9968_v27  ;;  %v9786_v37 = vpack.c.bf16 %v17559_v28, %v17558_v63  ;;  %v17560_v27 = vld [vmem:[#allocation60_spill] sm:$0xff]  ;;  %v9792_v48 = vpack.c.bf16 %v17572_v2, %v17571_v58 }
 0x2e4   : > { %v9978_v51 = vpack.c.bf16 %v17561_v59, %v17560_v27 }
 0x2e5   : > { %9779 = vmatpush1.bf16.msra.mxu1 %v9778_v41  ;;  %v17569_v41 = vld [vmem:[#allocation116_spill] sm:$0xff] }
 0x2e6   : > { %9971 = vmatpush1.bf16.msra.mxu0 %v9970_v25  ;;  %9781 = vmatprep.subr.bf16.mxu1 %v9780_v38  ;;  %v17570_v25 = vld [vmem:[#allocation117_spill] sm:$0xff]  ;;  %v17573_v38 = vld [vmem:[#allocation19_spill] sm:$0xff] }
 0x2e7   : > { %9973 = vmatprep.subr.bf16.mxu0 %v9972_v5  ;;  %v17564_v5 = vld [vmem:[#allocation109_spill] sm:$0xff]  ;;  %v9982_v21 = vpack.c.bf16 %v17570_v25, %v17569_v41 }
 0x2e8   : > { %v9980_v49 = vpack.c.bf16 %v17565_v30, %v17564_v5 }
 0x2e9   : > { %9783 = vmatpush1.bf16.msra.mxu1 %v9782_v29  ;;  %v17574_v29 = vld [vmem:[#allocation21_spill] sm:$0xff] }
 0x2ea   : > { %9975 = vmatpush1.bf16.msra.mxu0 %v9974_v24  ;;  %9785 = vmatprep.subr.bf16.mxu1 %v9784_v20  ;;  %v9984_v24 = vpack.c.bf16 %v17574_v29, %v17573_v38  ;;  %v17575_v20 = vld [vmem:[#allocation25_spill] sm:$0xff]  ;;  %v9988_v29 = vpack.c.bf16 %v17492_v35, %v17489_v57 }
 0x2eb   : > { %9977 = vmatprep.subr.bf16.mxu0 %v9976_v22  ;;  %v17576_v22 = vld [vmem:[#allocation32_spill] sm:$0xff]  ;;  %v17580_v38 = vld [vmem:[#allocation93_spill] sm:$0xff] }
 0x2ec   : > { %3144 = vmatmul.mubr.f32.vlgmr.msra.gmra.mrb[4].mxu1 %v17566_v45 }
 0x2ed   : > { %3999 = vmatmul.mubr.f32.vlgmr.msra.gmra.mrb[4].mxu0 %v17566_v45  ;;  %9787 = vmatpush1.bf16.msra.mxu1 %v9786_v37  ;;  %v9794_v37 = vpack.c.bf16 %v17576_v22, %v17575_v20  ;;  %v17581_v22 = vld [vmem:[#allocation77_spill] sm:$0xff] }
 0x2ee   : > { %9979 = vmatpush1.bf16.msra.mxu0 %v9978_v51  ;;  %9789 = vmatprep.subr.bf16.mxu1 %v9788_v7  ;;  %v17577_v51 = vld [vmem:[#allocation33_spill] sm:$0xff]  ;;  %v17579_v7 = vld [vmem:[#allocation74_spill] sm:$0xff] }
 0x2ef   : > { %9981 = vmatprep.subr.bf16.mxu0 %v9980_v49  ;;  %3278 = vmatprep.mubr.f32.mxu1 %v17132_v32  ;;  %v9986_v45 = vpack.c.bf16 %v17578_v39, %v17577_v51  ;;  %v9796_v49 = vpack.c.bf16 %v17579_v7, %v17483_v1  ;;  %v17583_v39 = vld [vmem:[#allocation81_spill] sm:$0xff] }
 0x2f0   : > { %4133 = vmatprep.mubr.f32.mxu0 %v17132_v32 }
 0x2f1   : > { %9791 = vmatpush1.bf16.msra.mxu1 %v9790_v9  ;;  %v9798_v9 = vpack.c.bf16 %v17580_v38, %v17493_v53 }
 0x2f2   : > { %9983 = vmatpush1.bf16.msra.mxu0 %v9982_v21  ;;  %9793 = vmatprep.subr.bf16.mxu1 %v9792_v48  ;;  %v9990_v21 = vpack.c.bf16 %v17503_v6, %v17502_v62  ;;  %v9800_v48 = vpack.c.bf16 %v17508_v18, %v17581_v22 }
 0x2f3   : > { %9985 = vmatprep.subr.bf16.mxu0 %v9984_v24  ;;  %v17582_v24 = vld [vmem:[#allocation79_spill] sm:$0xff] }
 0x2f4   : > { %v9992_v51 = vpack.c.bf16 %v17583_v39, %v17582_v24 }
 0x2f5   : > { %9795 = vmatpush1.bf16.msra.mxu1 %v9794_v37  ;;  %v9802_v37 = vpack.c.bf16 %v17512_v0, %v17511_v42 }
 0x2f6   : > { %9987 = vmatpush1.bf16.msra.mxu0 %v9986_v45  ;;  %9797 = vmatprep.subr.bf16.mxu1 %v9796_v49  ;;  %v17584_v45 = vld [vmem:[#allocation99_spill] sm:$0xff]  ;;  %v9804_v49 = vpack.c.bf16 %v17518_v14, %v17516_v40 }
 0x2f7   : > { %9989 = vmatprep.subr.bf16.mxu0 %v9988_v29  ;;  %v9994_v35 = vpack.c.bf16 %v17584_v45, %v17513_v23  ;;  %v9996_v29 = vpack.c.bf16 %v12710_v10, %v17530_v44  ;;  %v17585_v45 = vld [vmem:[#allocation41_spill] sm:$0xff] }
 0x2f9   : > { %9799 = vmatpush1.bf16.msra.mxu1 %v9798_v9  ;;  %v9806_v9 = vpack.c.bf16 %v17532_v26, %v12714_v34 }
 0x2fa   : > { %9991 = vmatpush1.bf16.msra.mxu0 %v9990_v21  ;;  %9801 = vmatprep.subr.bf16.mxu1 %v9800_v48  ;;  %v9998_v21 = vpack.c.bf16 %v17534_v36, %v17533_v11  ;;  %v9808_v48 = vpack.c.bf16 %v17585_v45, %v12728_v54 }
 0x2fb   : > { %9993 = vmatprep.subr.bf16.mxu0 %v9992_v51  ;;  %v17586_v51 = vld [vmem:[#allocation52_spill] sm:$0xff] }
 0x2fc   : > { %v10000_v23 = vpack.c.bf16 %v17536_v15, %v17586_v51 }
 0x2fd   : > { %9803 = vmatpush1.bf16.msra.mxu1 %v9802_v37  ;;  %v9810_v37 = vpack.c.bf16 %v17543_v16, %v17542_v61 }
 0x2fe   : > { %9995 = vmatpush1.bf16.msra.mxu0 %v9994_v35  ;;  %9805 = vmatprep.subr.bf16.mxu1 %v9804_v49  ;;  %v10002_v35 = vpack.c.bf16 %v17545_v8, %v17544_v47  ;;  %v9812_v49 = vpack.c.bf16 %v12768_v3, %v12766_v31  ;;  %v17590_v3 = vld [vmem:[#allocation57_spill] sm:$0xff] }
 0x2ff   : > { %9997 = vmatprep.subr.bf16.mxu0 %v9996_v29  ;;  %v17587_v29 = vld [vmem:[#allocation70_spill] sm:$0xff] }
 0x300   : > { %v10004_v36 = vpack.c.bf16 %v12799_v13, %v17587_v29 }
 0x301   : > { %9807 = vmatpush1.bf16.msra.mxu1 %v9806_v9  ;;  %v9814_v9 = vpack.c.bf16 %v12805_v33, %v12803_v43  ;;  %v17593_v33 = vld [vmem:[#allocation106_spill] sm:$0xff] }
 0x302   : > { %9999 = vmatpush1.bf16.msra.mxu0 %v9998_v21  ;;  %9809 = vmatprep.subr.bf16.mxu1 %v9808_v48  ;;  %v10006_v21 = vpack.c.bf16 %v12830_v50, %v12826_v56  ;;  %v17588_v48 = vld [vmem:[#allocation50_spill] sm:$0xff]  ;;  %v17595_v56 = vld [vmem:[#allocation112_spill] sm:$0xff]  ;;  %v17596_v50 = vld [vmem:[#allocation115_spill] sm:$0xff] }
 0x303   : > { %10001 = vmatprep.subr.bf16.mxu0 %v10000_v23  ;;  %v17589_v23 = vld [vmem:[#allocation20_spill] sm:$0xff]  ;;  %v17594_v43 = vld [vmem:[#allocation110_spill] sm:$0xff] }
 0x305   : > { %9811 = vmatpush1.bf16.msra.mxu1 %v9810_v37  ;;  %v17591_v37 = vld [vmem:[#allocation42_spill] sm:$0xff] }
 0x306   : > { %10003 = vmatpush1.bf16.msra.mxu0 %v10002_v35  ;;  %9813 = vmatprep.subr.bf16.mxu1 %v9812_v49  ;;  %v17592_v35 = vld [vmem:[#allocation105_spill] sm:$0xff]  ;;  %v17598_v49 = vld [vmem:[#allocation16_spill] sm:$0xff] }
 0x307   : > { %10005 = vmatprep.subr.bf16.mxu0 %v10004_v36  ;;  %v17597_v36 = vld [vmem:[#allocation119_spill] sm:$0xff] }
 0x309   : > { %9815 = vmatpush1.bf16.msra.mxu1 %v9814_v9  ;;  %v17599_v9 = vld [vmem:[#allocation26_spill] sm:$0xff] }
 0x30a   : > { %10007 = vmatpush1.bf16.msra.mxu0 %v10006_v21  ;;  %9817 = vmatprep.subr.bf16.mxu1 %v17588_v48  ;;  %v17600_v21 = vld [vmem:[#allocation31_spill] sm:$0xff] }
 0x30b   : > { %10009 = vmatprep.subr.bf16.mxu0 %v17589_v23  ;;  %v17623_v23 = vld [vmem:[#allocation72_spill] sm:$0xff] }
 0x30c   : > { %3281 = vmatmul.mubr.f32.vlgmr.msra.gmra.mrb[4].mxu1 %v17590_v3 }
 0x30d   : > { %4136 = vmatmul.mubr.f32.vlgmr.msra.gmra.mrb[4].mxu0 %v17590_v3  ;;  %9819 = vmatpush1.bf16.msra.mxu1 %v17591_v37  ;;  %v17601_v3 = vld [vmem:[#allocation35_spill] sm:$0xff]  ;;  %v17605_v37 = vld [vmem:[#allocation76_spill] sm:$0xff] }
 0x30e   : > { %10011 = vmatpush1.bf16.msra.mxu0 %v17592_v35  ;;  %9821 = vmatprep.subr.bf16.mxu1 %v17593_v33  ;;  %v17602_v33 = vld [vmem:[#allocation84_spill] sm:$0xff] }
 0x30f   : > { %10013 = vmatprep.subr.bf16.mxu0 %v17594_v43  ;;  %3383 = vmatprep.mubr.f32.mxu1 %v17132_v32  ;;  %v17603_v43 = vld [vmem:[#allocation90_spill] sm:$0xff]  ;;  %v17604_v35 = vld [vmem:[#allocation96_spill] sm:$0xff] }
 0x310   : > { %4238 = vmatprep.mubr.f32.mxu0 %v17132_v32 }
 0x311   : > { %9823 = vmatpush1.bf16.msra.mxu1 %v17595_v56  ;;  %v17606_v56 = vld [vmem:[#allocation80_spill] sm:$0xff] }
 0x312   : > { %10015 = vmatpush1.bf16.msra.mxu0 %v17596_v50  ;;  %9825 = vmatprep.subr.bf16.mxu1 %v17597_v36  ;;  %v17607_v50 = vld [vmem:[#allocation82_spill] sm:$0xff]  ;;  %v17608_v36 = vld [vmem:[#allocation97_spill] sm:$0xff] }
 0x313   : > { %10017 = vmatprep.subr.bf16.mxu0 %v17598_v49  ;;  %v17609_v49 = vld [vmem:[#allocation100_spill] sm:$0xff] }
 0x315   : > { %9827 = vmatpush1.bf16.msra.mxu1 %v17599_v9  ;;  %v17610_v9 = vld [vmem:[#allocation22_spill] sm:$0xff] }
 0x316   : > { %10019 = vmatpush1.bf16.msra.mxu0 %v17600_v21  ;;  %9829 = vmatprep.subr.bf16.mxu1 %v17601_v3  ;;  %v17611_v21 = vld [vmem:[#allocation27_spill] sm:$0xff]  ;;  %v17612_v3 = vld [vmem:[#allocation30_spill] sm:$0xff] }
 0x317   : > { %10021 = vmatprep.subr.bf16.mxu0 %v17602_v33  ;;  %v17613_v33 = vld [vmem:[#allocation40_spill] sm:$0xff] }
 0x319   : > { %9831 = vmatpush1.bf16.msra.mxu1 %v17603_v43  ;;  %v17614_v43 = vld [vmem:[#allocation48_spill] sm:$0xff] }
 0x31a   : > { %10023 = vmatpush1.bf16.msra.mxu0 %v17604_v35  ;;  %9833 = vmatprep.subr.bf16.mxu1 %v17605_v37  ;;  %v17615_v35 = vld [vmem:[#allocation58_spill] sm:$0xff]  ;;  %v17616_v37 = vld [vmem:[#allocation65_spill] sm:$0xff] }
 0x31b   : > { %10025 = vmatprep.subr.bf16.mxu0 %v17606_v56  ;;  %v17617_v56 = vld [vmem:[#allocation68_spill] sm:$0xff] }
 0x31d   : > { %9835 = vmatpush1.bf16.msra.mxu1 %v17607_v50  ;;  %v17618_v50 = vld [vmem:[#allocation71_spill] sm:$0xff] }
 0x31e   : > { %10027 = vmatpush1.bf16.msra.mxu0 %v17608_v36  ;;  %9837 = vmatprep.subr.bf16.mxu1 %v17609_v49  ;;  %v17619_v49 = vand.u32 4294901760, %v17554_v17  ;;  %v17628_v17 = vand.u32 4294901760, %v17561_v59  ;;  %v17636_v59 = vand.u32 4294901760, %v17569_v41  ;;  %v17645_v41 = vld [vmem:[#allocation32_spill] sm:$0xff] }
 0x31f   : > { %10029 = vmatprep.subr.bf16.mxu0 %v17610_v9  ;;  %v17620_v9 = vand.u32 4294901760, %v17555_v52 }
 0x321   : > { %9839 = vmatpush1.bf16.msra.mxu1 %v17611_v21  ;;  %v9848_v36 = vpack.c.bf16 %v17620_v9, %v17619_v49  ;;  %v17621_v21 = vand.u32 4294901760, %v17556_v55  ;;  %v17629_v55 = vand.u32 4294901760, %v17562_v4  ;;  %v17631_v49 = vand.u32 4294901760, %v17564_v5 }
 0x322   : > { %10031 = vmatpush1.bf16.msra.mxu0 %v17612_v3  ;;  %9841 = vmatprep.subr.bf16.mxu1 %v17613_v33  ;;  %v17622_v3 = vand.u32 4294901760, %v17557_v19  ;;  %v17632_v9 = vand.u32 4294901760, %v17565_v30  ;;  %v17637_v4 = vand.u32 4294901760, %v17570_v25  ;;  %v17638_v5 = vand.u32 4294901760, %v17571_v58  ;;  %v17647_v58 = vld [vmem:[#allocation33_spill] sm:$0xff] }
 0x323   : > { %10033 = vmatprep.subr.bf16.mxu0 %v17614_v43  ;;  %v17624_v43 = vld [vmem:[#allocation86_spill] sm:$0xff]  ;;  %v17639_v30 = vand.u32 4294901760, %v17572_v2  ;;  %v17646_v25 = vand.u32 4294901760, %v17645_v41  ;;  %v17649_v2 = vld [vmem:[#allocation36_spill] sm:$0xff]  ;;  %v17673_v41 = vand.u32 4294901760, %v12710_v10  ;;  %v17679_v10 = vand.u32 4294901760, %v12728_v54 }
 0x324   : > { %v10040_v33 = vpack.c.bf16 %v17622_v3, %v17621_v21  ;;  %v17630_v3 = vand.u32 4294901760, %v17563_v60  ;;  %v17633_v21 = vld [vmem:[#allocation59_spill] sm:$0xff]  ;;  %v10046_v60 = vpack.c.bf16 %v17637_v4, %v17636_v59  ;;  %v17657_v59 = vand.u32 4294901760, %v17580_v38  ;;  %v900_v54 = vld [vmem:[#allocation7 + $0x1c8] sm:$0xff] }
 0x325   : > { %9843 = vmatpush1.bf16.msra.mxu1 %v17615_v35  ;;  %v17664_v38 = vand.u32 4294901760, %v17511_v42 }
 0x326   : > { %10035 = vmatpush1.bf16.msra.mxu0 %v17616_v37  ;;  %9845 = vmatprep.subr.bf16.mxu1 %v17617_v56  ;;  %v17625_v37 = vand.u32 4294901760, %v17558_v63  ;;  %v17626_v56 = vand.u32 4294901760, %v17559_v28  ;;  %v9852_v19 = vpack.c.bf16 %v17630_v3, %v17629_v55  ;;  %v10044_v63 = vpack.c.bf16 %v17632_v9, %v17631_v49 }
 0x327   : > { %10037 = vmatprep.subr.bf16.mxu0 %v17618_v50  ;;  %v17627_v50 = vand.u32 4294901760, %v17560_v27  ;;  %v17634_v28 = vand.u32 4294901760, %v17567_v12  ;;  %v17650_v55 = vand.u32 4294901760, %v17649_v2  ;;  %v17652_v49 = vand.u32 4294901760, %v17579_v7 }
 0x328   : > { %v9850_v35 = vpack.c.bf16 %v17626_v56, %v17625_v37  ;;  %v9856_v37 = vpack.c.bf16 %v17639_v30, %v17638_v5  ;;  %v17640_v56 = vld [vmem:[#allocation19_spill] sm:$0xff]  ;;  %v17659_v5 = vand.u32 4294901760, %v17503_v6  ;;  %v17660_v7 = vand.u32 4294901760, %v17581_v22 }
 0x329   : > { %9847 = vmatpush1.bf16.msra.mxu1 %v17623_v23  ;;  %v10042_v52 = vpack.c.bf16 %v17628_v17, %v17627_v50  ;;  %v17642_v50 = vld [vmem:[#allocation21_spill] sm:$0xff]  ;;  %v17675_v2 = vand.u32 4294901760, %v17532_v26 }
 0x32a   : > { %10039 = vmatpush1.bf16.msra.mxu0 %v17624_v43  ;;  %9849 = vmatprep.subr.bf16.mxu1 %v9848_v36  ;;  %v17643_v36 = vand.u32 4294901760, %v17642_v50 }
 0x32b   : > { %10041 = vmatprep.subr.bf16.mxu0 %v10040_v33  ;;  %v17635_v33 = vand.u32 4294901760, %v17568_v46  ;;  %v17644_v46 = vand.u32 4294901760, %v17575_v20 }
 0x32c   : > { %3387 = vmatmul.mubr.f32.vlgmr.msra.gmra.mrb[4].mxu1 %v17633_v21 }
 0x32d   : > { %4242 = vmatmul.mubr.f32.vlgmr.msra.gmra.mrb[4].mxu0 %v17633_v21  ;;  %9851 = vmatpush1.bf16.msra.mxu1 %v9850_v35  ;;  %v9854_v27 = vpack.c.bf16 %v17635_v33, %v17634_v28  ;;  %v17641_v35 = vand.u32 4294901760, %v17640_v56  ;;  %v9858_v17 = vpack.c.bf16 %v17646_v25, %v17644_v46  ;;  %v17654_v28 = vld [vmem:[#allocation91_spill] sm:$0xff]  ;;  %v17663_v56 = vand.u32 4294901760, %v17583_v39  ;;  %v852_v25 = vld [vmem:[#allocation7 + $0x48] sm:$0xff] }
 0x32e   : > { %10043 = vmatpush1.bf16.msra.mxu0 %v10042_v52  ;;  %9853 = vmatprep.subr.bf16.mxu1 %v9852_v19  ;;  %v17648_v52 = vand.u32 4294901760, %v17647_v58  ;;  %v17651_v19 = vand.u32 4294901760, %v17483_v1  ;;  %v17655_v33 = vand.u32 4294901760, %v17654_v28  ;;  %v17672_v46 = vand.u32 4294901760, %v17530_v44  ;;  %v870_v58 = vld [vmem:[#allocation7 + $0xd8] sm:$0xff]  ;;  %v980_v21 = vld [vmem:[#allocation7 + $0x448] sm:$0xff] }
 0x32f   : > { %10045 = vmatprep.subr.bf16.mxu0 %v10044_v63  ;;  %v10048_v12 = vpack.c.bf16 %v17643_v36, %v17641_v35  ;;  %3553 = vmatprep.mubr.f32.mxu1 %v17132_v32  ;;  %v17653_v63 = vand.u32 4294901760, %v17489_v57  ;;  %v17661_v57 = vand.u32 4294901760, %v17508_v18  ;;  %v17666_v35 = vld [vmem:[#allocation95_spill] sm:$0xff]  ;;  %v17670_v18 = vand.u32 4294901760, %v17516_v40 }
 0x330   : > { %4408 = vmatprep.mubr.f32.mxu0 %v17132_v32  ;;  %v10050_v3 = vpack.c.bf16 %v17650_v55, %v17648_v52  ;;  %v9860_v9 = vpack.c.bf16 %v17652_v49, %v17651_v19  ;;  %v17667_v50 = vand.u32 4294901760, %v17666_v35  ;;  %v17668_v36 = vld [vmem:[#allocation99_spill] sm:$0xff]  ;;  %v10060_v42 = vpack.c.bf16 %v17673_v41, %v17672_v46  ;;  %v17692_v35 = vld [vmem:[#allocation73_spill] sm:$0xff] }
 0x331   : > { %9855 = vmatpush1.bf16.msra.mxu1 %v9854_v27  ;;  %v10052_v20 = vpack.c.bf16 %v17655_v33, %v17653_v63  ;;  %v17656_v27 = vand.u32 4294901760, %v17493_v53  ;;  %v9864_v30 = vpack.c.bf16 %v17661_v57, %v17660_v7  ;;  %v17674_v52 = vand.u32 4294901760, %v12714_v34  ;;  %v867_v19 = vld [vmem:[#allocation7 + $0xc0] sm:$0xff] }
 0x332   : > { %10047 = vmatpush1.bf16.msra.mxu0 %v10046_v60  ;;  %9857 = vmatprep.subr.bf16.mxu1 %v9856_v37  ;;  %v17658_v60 = vand.u32 4294901760, %v17502_v62  ;;  %v17662_v37 = vand.u32 4294901760, %v17582_v24  ;;  %v17665_v62 = vand.u32 4294901760, %v17512_v0  ;;  %v17671_v24 = vand.u32 4294901760, %v17518_v14  ;;  %v868_v0 = vld [vmem:[#allocation7 + $0xc8] sm:$0xff]  ;;  %v17677_v40 = vld [vmem:[#allocation39_spill] sm:$0xff] }
 0x333   : > { %10049 = vmatprep.subr.bf16.mxu0 %v10048_v12  ;;  %v9862_v4 = vpack.c.bf16 %v17657_v59, %v17656_v27  ;;  %v17669_v12 = vand.u32 4294901760, %v17668_v36  ;;  %v9870_v55 = vpack.c.bf16 %v17675_v2, %v17674_v52  ;;  %v17676_v14 = vand.u32 4294901760, %v17533_v11  ;;  %v853_v11 = vld [vmem:[#allocation7 + $0x50] sm:$0xff]  ;;  %v883_v46 = vld [vmem:[#allocation7 + $0x140] sm:$0xff] }
 0x334   : > { %v10054_v1 = vpack.c.bf16 %v17659_v5, %v17658_v60  ;;  %v10056_v53 = vpack.c.bf16 %v17663_v56, %v17662_v37  ;;  %v9866_v6 = vpack.c.bf16 %v17665_v62, %v17664_v38  ;;  %v9868_v39 = vpack.c.bf16 %v17671_v24, %v17670_v18  ;;  %v17688_v56 = vld [vmem:[#allocation69_spill] sm:$0xff]  ;;  %v902_v18 = vld [vmem:[#allocation7 + $0x1d8] sm:$0xff] }
 0x335   : > { %9859 = vmatpush1.bf16.msra.mxu1 %v9858_v17  ;;  %v10058_v22 = vpack.c.bf16 %v17669_v12, %v17667_v50  ;;  %v854_v17 = vld [vmem:[#allocation7 + $0x58] sm:$0xff]  ;;  %v17678_v44 = vand.u32 4294901760, %v17677_v40  ;;  %v17681_v28 = vand.u32 4294901760, %v17586_v51  ;;  %v17682_v34 = vand.u32 4294901760, %v17536_v15  ;;  %v17694_v50 = vld [vmem:[#allocation83_spill] sm:$0xff] }
 0x336   : > { %10051 = vmatpush1.bf16.msra.mxu0 %v10050_v3  ;;  %9861 = vmatprep.subr.bf16.mxu1 %v9860_v9  ;;  %v851_v3 = vld [vmem:[#allocation7 + $0x40] sm:$0xff]  ;;  %v17680_v9 = vand.u32 4294901760, %v17585_v45  ;;  %v4520_v33 = vand.u32 4294901760, %v852_v25  ;;  %v5375_v27 = vand.u32 4294901760, %v854_v17  ;;  %v5379_v59 = vand.u32 4294901760, %v870_v58 }
 0x337   : > { %10053 = vmatprep.subr.bf16.mxu0 %v10052_v20  ;;  %v10062_v49 = vpack.c.bf16 %v17678_v44, %v17676_v14  ;;  %v10064_v26 = vpack.c.bf16 %v17682_v34, %v17681_v28  ;;  %v4524_v20 = vand.u32 4294901760, %v868_v0  ;;  %v4522_v60 = vand.u32 4294901760, %v851_v3  ;;  %v932_v28 = vld [vmem:[#allocation7 + $0x2c8] sm:$0xff] }
 0x338   : > { %v9872_v63 = vpack.c.bf16 %v17680_v9, %v17679_v10  ;;  %v4526_v5 = vand.u32 4294901760, %v867_v19  ;;  %v17683_v45 = vand.u32 4294901760, %v17542_v61  ;;  %v17684_v7 = vand.u32 4294901760, %v17543_v16  ;;  %v901_v10 = vld [vmem:[#allocation7 + $0x1d0] sm:$0xff] }
 0x339   : > { %9863 = vmatpush1.bf16.msra.mxu1 %v9862_v4  ;;  %v869_v4 = vld [vmem:[#allocation7 + $0xd0] sm:$0xff]  ;;  %v17685_v15 = vand.u32 4294901760, %v17544_v47  ;;  %v17686_v57 = vand.u32 4294901760, %v17545_v8  ;;  %v17687_v37 = vand.u32 4294901760, %v12766_v31  ;;  %v17690_v62 = vand.u32 4294901760, %v17587_v29 }
 0x33a   : > { %10055 = vmatpush1.bf16.msra.mxu0 %v10054_v1  ;;  %9865 = vmatprep.subr.bf16.mxu1 %v9864_v30  ;;  %v884_v1 = vld [vmem:[#allocation7 + $0x148] sm:$0xff]  ;;  %v9874_v51 = vpack.c.bf16 %v17684_v7, %v17683_v45  ;;  %v17693_v16 = vand.u32 4294901760, %v17692_v35  ;;  %v17695_v36 = vand.u32 4294901760, %v17694_v50  ;;  %v5377_v12 = vand.u32 4294901760, %v853_v11 }
 0x33b   : > { %10057 = vmatprep.subr.bf16.mxu0 %v10056_v53  ;;  %v10066_v30 = vpack.c.bf16 %v17686_v57, %v17685_v15  ;;  %v17689_v53 = vand.u32 4294901760, %v17688_v56  ;;  %v5381_v8 = vand.u32 4294901760, %v869_v4  ;;  %v13372_v31 = vpack.c.bf16 %v4524_v20, %v4520_v33  ;;  %v17716_v56 = vld [vmem:[#allocation20_spill] sm:$0xff] }
 0x33c   : > { %v9878_v47 = vpack.c.bf16 %v17695_v36, %v17693_v16  ;;  %v13374_v24 = vpack.c.bf16 %v5379_v59, %v5375_v27  ;;  %v4532_v29 = vand.u32 4294901760, %v900_v54  ;;  %v13376_v41 = vsub.f32 %v852_v25, %v4520_v33  ;;  %v934_v33 = vld [vmem:[#allocation7 + $0x2d8] sm:$0xff]  ;;  %v964_v35 = vld [vmem:[#allocation7 + $0x3c8] sm:$0xff] }
 0x33d   : > { %9867 = vmatpush1.bf16.msra.mxu1 %v9866_v6  ;;  %v9876_v38 = vpack.c.bf16 %v17689_v53, %v17687_v37  ;;  %v17691_v6 = vand.u32 4294901760, %v12799_v13  ;;  %17696 = vst [vmem:[#allocation92_spill] sm:$0xff] %v13372_v31  ;;  %v899_v13 = vld [vmem:[#allocation7 + $0x1c0] sm:$0xff]  ;;  %v13380_v52 = vsub.f32 %v854_v17, %v5375_v27  ;;  %v13382_v2 = vpack.c.bf16 %v4526_v5, %v4522_v60  ;;  %v916_v17 = vld [vmem:[#allocation7 + $0x248] sm:$0xff]  ;;  %v933_v37 = vld [vmem:[#allocation7 + $0x2d0] sm:$0xff] }
 0x33e   : > { %10059 = vmatpush1.bf16.msra.mxu0 %v10058_v22  ;;  %9869 = vmatprep.subr.bf16.mxu1 %v9868_v39  ;;  %v886_v22 = vld [vmem:[#allocation7 + $0x158] sm:$0xff]  ;;  %17697 = vst [vmem:[#allocation37_spill] sm:$0xff] %v13374_v24  ;;  %v4528_v39 = vand.u32 4294901760, %v884_v1  ;;  %17698 = vst [vmem:[#allocation87_spill] sm:$0xff] %v13376_v41  ;;  %v13386_v14 = vsub.f32 %v851_v3, %v4522_v60  ;;  %v5387_v44 = vand.u32 4294901760, %v902_v18  ;;  %v915_v60 = vld [vmem:[#allocation7 + $0x240] sm:$0xff] }
 0x33f   : > { %10061 = vmatprep.subr.bf16.mxu0 %v10060_v42  ;;  %v10068_v61 = vpack.c.bf16 %v17691_v6, %v17690_v62  ;;  %v13378_v42 = vsub.f32 %v868_v0, %v4524_v20  ;;  %17700 = vst [vmem:[#allocation98_spill] sm:$0xff] %v13380_v52  ;;  %17701 = vst [vmem:[#allocation75_spill] sm:$0xff] %v13382_v2  ;;  %v5383_v40 = vand.u32 4294901760, %v886_v22  ;;  %v4530_v0 = vand.u32 4294901760, %v883_v46 }
 0x340   : > { %17703 = vst [vmem:[#allocation85_spill] sm:$0xff] %v13386_v14  ;;  %v13388_v9 = vsub.f32 %v867_v19, %v4526_v5  ;;  %v13390_v25 = vpack.c.bf16 %v5381_v8, %v5377_v12  ;;  %v13394_v3 = vsub.f32 %v869_v4, %v5381_v8  ;;  %v13396_v34 = vpack.c.bf16 %v4532_v29, %v4528_v39  ;;  %v931_v5 = vld [vmem:[#allocation7 + $0x2c0] sm:$0xff]  ;;  %v17713_v4 = vld [vmem:[#allocation89_spill] sm:$0xff]  ;;  %v17723_v8 = vld [vmem:[#allocation56_spill] sm:$0xff] }
 0x341   : > { %9871 = vmatpush1.bf16.msra.mxu1 %v9870_v55  ;;  %17699 = vst [vmem:[#allocation94_spill] sm:$0xff] %v13378_v42  ;;  %v13384_v55 = vsub.f32 %v870_v58, %v5379_v59  ;;  %v13392_v58 = vsub.f32 %v853_v11, %v5377_v12  ;;  %v13398_v20 = vsub.f32 %v884_v1, %v4528_v39  ;;  %v5389_v59 = vand.u32 4294901760, %v901_v10  ;;  %v950_v12 = vld [vmem:[#allocation7 + $0x358] sm:$0xff] }
 0x342   : > { %10063 = vmatpush1.bf16.msra.mxu0 %v10062_v49  ;;  %9873 = vmatprep.subr.bf16.mxu1 %v9872_v63  ;;  %v885_v49 = vld [vmem:[#allocation7 + $0x150] sm:$0xff]  ;;  %17704 = vst [vmem:[#allocation88_spill] sm:$0xff] %v13388_v9  ;;  %17705 = vst [vmem:[#allocation15_spill] sm:$0xff] %v13390_v25  ;;  %v4534_v63 = vand.u32 4294901760, %v899_v13  ;;  %v13400_v19 = vsub.f32 %v900_v54, %v4532_v29  ;;  %v13402_v45 = vpack.c.bf16 %v5387_v44, %v5383_v40 }
 0x343   : > { %10065 = vmatprep.subr.bf16.mxu0 %v10064_v26  ;;  %17702 = vst [vmem:[#allocation78_spill] sm:$0xff] %v13384_v55  ;;  %17706 = vst [vmem:[#allocation18_spill] sm:$0xff] %v13392_v58  ;;  %v918_v26 = vld [vmem:[#allocation7 + $0x258] sm:$0xff]  ;;  %v5385_v27 = vand.u32 4294901760, %v885_v49  ;;  %v13404_v7 = vsub.f32 %v886_v22, %v5383_v40  ;;  %v4536_v11 = vand.u32 4294901760, %v916_v17  ;;  %v13407_v15 = vsub.f32 %v902_v18, %v5387_v44  ;;  %v17727_v44 = vld [vmem:[#allocation105_spill] sm:$0xff] }
 0x344   : > { %17707 = vst [vmem:[#allocation24_spill] sm:$0xff] %v13394_v3  ;;  %17708 = vst [vmem:[#allocation28_spill] sm:$0xff] %v13396_v34  ;;  %v13409_v57 = vpack.c.bf16 %v4534_v63, %v4530_v0  ;;  %v5391_v1 = vand.u32 4294901760, %v918_v26  ;;  %v5395_v54 = vand.u32 4294901760, %v934_v33  ;;  %v13413_v53 = vsub.f32 %v883_v46, %v4530_v0  ;;  %v947_v46 = vld [vmem:[#allocation7 + $0x340] sm:$0xff]  ;;  %v17726_v40 = vld [vmem:[#allocation42_spill] sm:$0xff] }
 0x345   : > { %9875 = vmatpush1.bf16.msra.mxu1 %v9874_v51  ;;  %17709 = vst [vmem:[#allocation29_spill] sm:$0xff] %v13398_v20  ;;  %17710 = vst [vmem:[#allocation55_spill] sm:$0xff] %v13400_v19  ;;  %v4540_v51 = vand.u32 4294901760, %v932_v28  ;;  %v4538_v62 = vand.u32 4294901760, %v915_v60  ;;  %v4542_v6 = vand.u32 4294901760, %v931_v5  ;;  %v13417_v16 = vpack.c.bf16 %v5389_v59, %v5385_v27 }
 0x346   : > { %10067 = vmatpush1.bf16.msra.mxu0 %v10066_v30  ;;  %9877 = vmatprep.subr.bf16.mxu1 %v9876_v38  ;;  %17711 = vst [vmem:[#allocation62_spill] sm:$0xff] %v13402_v45  ;;  %17712 = vst [vmem:[#allocation64_spill] sm:$0xff] %v13404_v7  ;;  %v917_v30 = vld [vmem:[#allocation7 + $0x250] sm:$0xff]  ;;  %v13415_v38 = vsub.f32 %v899_v13, %v4534_v63  ;;  %v13419_v50 = vsub.f32 %v885_v49, %v5385_v27  ;;  %v5397_v29 = vand.u32 4294901760, %v933_v37  ;;  %v963_v13 = vld [vmem:[#allocation7 + $0x3c0] sm:$0xff] }
 0x347   : > { %10069 = vmatprep.subr.bf16.mxu0 %v10068_v61  ;;  %17714 = vst [vmem:[#allocation66_spill] sm:$0xff] %v13407_v15  ;;  %17715 = vst [vmem:[#allocation67_spill] sm:$0xff] %v13409_v57  ;;  %v948_v61 = vld [vmem:[#allocation7 + $0x348] sm:$0xff]  ;;  %v13421_v36 = vsub.f32 %v901_v10, %v5389_v59  ;;  %v13427_v22 = vpack.c.bf16 %v4540_v51, %v4536_v11  ;;  %v13429_v18 = vsub.f32 %v932_v28, %v4540_v51  ;;  %v965_v27 = vld [vmem:[#allocation7 + $0x3d0] sm:$0xff] }
 0x348   : > { %17717 = vst [vmem:[#allocation23_spill] sm:$0xff] %v13413_v53  ;;  %17718 = vst [vmem:[#allocation101_spill] sm:$0xff] %v13415_v38  ;;  %v5393_v39 = vand.u32 4294901760, %v917_v30  ;;  %v13433_v49 = vpack.c.bf16 %v5395_v54, %v5391_v1  ;;  %v13435_v10 = vsub.f32 %v918_v26, %v5391_v1  ;;  %v4544_v0 = vand.u32 4294901760, %v948_v61  ;;  %v17730_v59 = vld [vmem:[#allocation106_spill] sm:$0xff] }
 0x349   : > { %9879 = vmatpush1.bf16.msra.mxu1 %v9878_v47  ;;  %17719 = vst [vmem:[#allocation102_spill] sm:$0xff] %v13417_v16  ;;  %17720 = vst [vmem:[#allocation103_spill] sm:$0xff] %v13419_v50  ;;  %v13423_v47 = vsub.f32 %v916_v17, %v4536_v11  ;;  %v4548_v63 = vand.u32 4294901760, %v964_v35  ;;  %v949_v17 = vld [vmem:[#allocation7 + $0x350] sm:$0xff]  ;;  %v17731_v28 = vld [vmem:[#allocation110_spill] sm:$0xff]  ;;  %v13439_v11 = vsub.f32 %v934_v33, %v5395_v54 }
 0x34a   : > { %10071 = vmatpush1.bf16.msra.mxu0 %v17713_v4  ;;  %9881 = vmatprep.subr.bf16.mxu1 %v17588_v48  ;;  %17721 = vst [vmem:[#allocation53_spill] sm:$0xff] %v13421_v36  ;;  %v966_v48 = vld [vmem:[#allocation7 + $0x3d8] sm:$0xff]  ;;  %17724 = vst [vmem:[#allocation60_spill] sm:$0xff] %v13427_v22  ;;  %v13441_v51 = vpack.c.bf16 %v4542_v6, %v4538_v62  ;;  %v5399_v4 = vand.u32 4294901760, %v950_v12  ;;  %v13445_v26 = vsub.f32 %v915_v60, %v4538_v62 }
 0x34b   : > { %10073 = vmatprep.subr.bf16.mxu0 %v17716_v56  ;;  %17722 = vst [vmem:[#allocation104_spill] sm:$0xff] %v13423_v47  ;;  %17725 = vst [vmem:[#allocation63_spill] sm:$0xff] %v13429_v18  ;;  %v5403_v56 = vand.u32 4294901760, %v966_v48  ;;  %v13447_v1 = vsub.f32 %v931_v5, %v4542_v6  ;;  %v13451_v33 = vsub.f32 %v917_v30, %v5393_v39  ;;  %v5401_v54 = vand.u32 4294901760, %v949_v17  ;;  %v17739_v18 = vld [vmem:[#allocation115_spill] sm:$0xff]  ;;  %v982_v62 = vld [vmem:[#allocation7 + $0x458] sm:$0xff] }
 0x34c   : > { %3555 = vmatmul.mubr.f32.vlgmr.msra.gmra.mrb[4].mxu1 %v17723_v8  ;;  %17728 = vst [vmem:[#allocation107_spill] sm:$0xff] %v13433_v49  ;;  %17729 = vst [vmem:[#allocation108_spill] sm:$0xff] %v13435_v10  ;;  %v13449_v10 = vpack.c.bf16 %v5397_v29, %v5393_v39  ;;  %v13457_v60 = vpack.c.bf16 %v4548_v63, %v4544_v0  ;;  %v13459_v5 = vsub.f32 %v948_v61, %v4544_v0  ;;  %v998_v6 = vld [vmem:[#allocation7 + $0x4d8] sm:$0xff] }
 0x34d   : > { %4410 = vmatmul.mubr.f32.vlgmr.msra.gmra.mrb[4].mxu0 %v17723_v8  ;;  %9883 = vmatpush1.bf16.msra.mxu1 %v17726_v40  ;;  %17732 = vst [vmem:[#allocation109_spill] sm:$0xff] %v13439_v11  ;;  %17733 = vst [vmem:[#allocation111_spill] sm:$0xff] %v13441_v51  ;;  %v4546_v40 = vand.u32 4294901760, %v947_v46  ;;  %v17738_v11 = vld [vmem:[#allocation112_spill] sm:$0xff]  ;;  %v13455_v51 = vsub.f32 %v933_v37, %v5397_v29  ;;  %v13463_v30 = vsub.f32 %v964_v35, %v4548_v63 }
 0x34e   : > { %10075 = vmatpush1.bf16.msra.mxu0 %v17727_v44  ;;  %9885 = vmatprep.subr.bf16.mxu1 %v17730_v59  ;;  %17734 = vst [vmem:[#allocation113_spill] sm:$0xff] %v13445_v26  ;;  %17735 = vst [vmem:[#allocation114_spill] sm:$0xff] %v13447_v1  ;;  %v4550_v44 = vand.u32 4294901760, %v963_v13  ;;  %v996_v59 = vld [vmem:[#allocation7 + $0x4c8] sm:$0xff]  ;;  %v17743_v1 = vld [vmem:[#allocation119_spill] sm:$0xff]  ;;  %v13465_v39 = vpack.c.bf16 %v5403_v56, %v5399_v4  ;;  %v13467_v37 = vsub.f32 %v950_v12, %v5399_v4 }
 0x34f   : > { %10077 = vmatprep.subr.bf16.mxu0 %v17731_v28  ;;  %3657 = vmatprep.mubr.f32.mxu1 %v17132_v32  ;;  %17736 = vst [vmem:[#allocation116_spill] sm:$0xff] %v13449_v10  ;;  %17737 = vst [vmem:[#allocation117_spill] sm:$0xff] %v13451_v33  ;;  %v5405_v28 = vand.u32 4294901760, %v965_v27  ;;  %v17744_v26 = vld [vmem:[#allocation16_spill] sm:$0xff]  ;;  %v4552_v33 = vand.u32 4294901760, %v980_v21  ;;  %v979_v10 = vld [vmem:[#allocation7 + $0x440] sm:$0xff]  ;;  %v13469_v29 = vsub.f32 %v966_v48, %v5403_v56 }
 0x350   : > { %4512 = vmatprep.mubr.f32.mxu0 %v17132_v32  ;;  %17740 = vst [vmem:[#allocation118_spill] sm:$0xff] %v13455_v51  ;;  %17741 = vst [vmem:[#allocation17_spill] sm:$0xff] %v13457_v60  ;;  %v13471_v61 = vpack.c.bf16 %v4550_v44, %v4546_v40  ;;  %v13473_v0 = vsub.f32 %v947_v46, %v4546_v40  ;;  %v13475_v51 = vsub.f32 %v963_v13, %v4550_v44  ;;  %v17753_v60 = vld [vmem:[#allocation26_spill] sm:$0xff]  ;;  %v17754_v12 = vld [vmem:[#allocation31_spill] sm:$0xff] }
 0x351   : > { %9887 = vmatpush1.bf16.msra.mxu1 %v17738_v11  ;;  %17742 = vst [vmem:[#allocation25_spill] sm:$0xff] %v13459_v5  ;;  %17745 = vst [vmem:[#allocation74_spill] sm:$0xff] %v13463_v30  ;;  %v4556_v11 = vand.u32 4294901760, %v996_v59  ;;  %v981_v5 = vld [vmem:[#allocation7 + $0x450] sm:$0xff]  ;;  %v13477_v35 = vpack.c.bf16 %v5405_v28, %v5401_v54  ;;  %v5407_v63 = vand.u32 4294901760, %v982_v62  ;;  %v1012_v30 = vld [vmem:[#allocation7 + $0x548] sm:$0xff]  ;;  %v13481_v48 = vsub.f32 %v949_v17, %v5401_v54 }
 0x352   : > { %10079 = vmatpush1.bf16.msra.mxu0 %v17739_v18  ;;  %9889 = vmatprep.subr.bf16.mxu1 %v17743_v1  ;;  %17746 = vst [vmem:[#allocation93_spill] sm:$0xff] %v13465_v39  ;;  %v995_v18 = vld [vmem:[#allocation7 + $0x4c0] sm:$0xff]  ;;  %17747 = vst [vmem:[#allocation77_spill] sm:$0xff] %v13467_v37  ;;  %v997_v1 = vld [vmem:[#allocation7 + $0x4d0] sm:$0xff]  ;;  %v13483_v4 = vsub.f32 %v965_v27, %v5405_v28  ;;  %v4554_v46 = vand.u32 4294901760, %v979_v10  ;;  %v5409_v37 = vand.u32 4294901760, %v981_v5 }
 0x353   : > { %10081 = vmatprep.subr.bf16.mxu0 %v17744_v26  ;;  %17748 = vst [vmem:[#allocation79_spill] sm:$0xff] %v13469_v29  ;;  %17749 = vst [vmem:[#allocation81_spill] sm:$0xff] %v13471_v61  ;;  %v5411_v26 = vand.u32 4294901760, %v998_v6  ;;  %v1028_v39 = vld [vmem:[#allocation7 + $0x5c8] sm:$0xff]  ;;  %v4558_v56 = vand.u32 4294901760, %v995_v18  ;;  %v1014_v40 = vld [vmem:[#allocation7 + $0x558] sm:$0xff]  ;;  %v13489_v29 = vsub.f32 %v980_v21, %v4552_v33  ;;  %v13493_v17 = vsub.f32 %v982_v62, %v5407_v63 }
 0x354   : > { %17750 = vst [vmem:[#allocation41_spill] sm:$0xff] %v13473_v0  ;;  %17751 = vst [vmem:[#allocation52_spill] sm:$0xff] %v13475_v51  ;;  %v1030_v0 = vld [vmem:[#allocation7 + $0x5d8] sm:$0xff]  ;;  %v17757_v13 = vld [vmem:[#allocation35_spill] sm:$0xff]  ;;  %v13487_v51 = vpack.c.bf16 %v4556_v11, %v4552_v33  ;;  %v4560_v27 = vand.u32 4294901760, %v1012_v30  ;;  %v4564_v54 = vand.u32 4294901760, %v1028_v39 }
 0x355   : > { %17752 = vst [vmem:[#allocation70_spill] sm:$0xff] %v13477_v35  ;;  %9891 = vmatpush1.bf16.msra.mxu1 %v17753_v60  ;;  %17755 = vst [vmem:[#allocation50_spill] sm:$0xff] %v13481_v48  ;;  %v17758_v44 = vld [vmem:[#allocation84_spill] sm:$0xff]  ;;  %v5413_v60 = vand.u32 4294901760, %v997_v1  ;;  %v13491_v35 = vsub.f32 %v996_v59, %v4556_v11  ;;  %v1011_v28 = vld [vmem:[#allocation7 + $0x540] sm:$0xff]  ;;  %v5415_v21 = vand.u32 4294901760, %v1014_v40  ;;  %v13504_v11 = vpack.c.bf16 %v4558_v56, %v4554_v46 }
 0x356   : > { %10083 = vmatpush1.bf16.msra.mxu0 %v17754_v12  ;;  %17756 = vst [vmem:[#allocation72_spill] sm:$0xff] %v13483_v4  ;;  %9893 = vmatprep.subr.bf16.mxu1 %v17757_v13  ;;  %17759 = vst [vmem:[#allocation86_spill] sm:$0xff] %v13487_v51  ;;  %v1027_v12 = vld [vmem:[#allocation7 + $0x5c0] sm:$0xff]  ;;  %v1099_v13 = vld [vmem:[%s16141_s5 + $0x1] sm:$0x1]  ;;  %v13498_v4 = vpack.c.bf16 %v5411_v26, %v5407_v63  ;;  %v5419_v33 = vand.u32 4294901760, %v1030_v0 }
 0x357   : > { %10085 = vmatprep.subr.bf16.mxu0 %v17758_v44  ;;  %17760 = vst [vmem:[#allocation19_spill] sm:$0xff] %v13489_v29  ;;  %17761 = vst [vmem:[#allocation21_spill] sm:$0xff] %v13491_v35  ;;  %v13500_v44 = vsub.f32 %v998_v6, %v5411_v26  ;;  %v1013_v29 = vld [vmem:[#allocation7 + $0x550] sm:$0xff]  ;;  %v17765_v59 = vld [vmem:[#allocation90_spill] sm:$0xff]  ;;  %v13508_v35 = vsub.f32 %v995_v18, %v4558_v56  ;;  %v13512_v6 = vpack.c.bf16 %v5413_v60, %v5409_v37 }
 0x358   : > { %17762 = vst [vmem:[#allocation32_spill] sm:$0xff] %v13493_v17  ;;  %17763 = vst [vmem:[#allocation33_spill] sm:$0xff] %v13498_v4  ;;  %v1029_v48 = vld [vmem:[#allocation7 + $0x5d0] sm:$0xff]  ;;  %v17766_v62 = vld [vmem:[#allocation96_spill] sm:$0xff]  ;;  %v13506_v17 = vsub.f32 %v979_v10, %v4554_v46  ;;  %v13514_v26 = vsub.f32 %v981_v5, %v5409_v37  ;;  %v13516_v61 = vsub.f32 %v997_v1, %v5413_v60  ;;  %v5417_v10 = vand.u32 4294901760, %v1013_v29 }
 0x359   : > { %17764 = vst [vmem:[#allocation36_spill] sm:$0xff] %v13500_v44  ;;  %10963 = vpush %v1099_v13  ;;  %9895 = vmatpush1.bf16.msra.mxu1 %v17765_v59  ;;  %v17770_v51 = vld [vmem:[#allocation76_spill] sm:$0xff]  ;;  %v4562_v44 = vand.u32 4294901760, %v1011_v28  ;;  %v4566_v13 = vand.u32 4294901760, %v1027_v12  ;;  %v5421_v46 = vand.u32 4294901760, %v1029_v48  ;;  %v1046_v18 = vld [vmem:[#allocation7 + $0x658] sm:$0xff]  ;;  %v13526_v5 = vsub.f32 %v1014_v40, %v5415_v21 }
 0x35a   : > { %10087 = vmatpush1.bf16.msra.mxu0 %v17766_v62  ;;  %17767 = vst [vmem:[#allocation91_spill] sm:$0xff] %v13504_v11  ;;  %17768 = vst [vmem:[#allocation95_spill] sm:$0xff] %v13506_v17  ;;  %9897 = vmatprep.subr.bf16.mxu1 %v17770_v51  ;;  %v17771_v63 = vld [vmem:[#allocation80_spill] sm:$0xff]  ;;  %v13518_v62 = vpack.c.bf16 %v4564_v54, %v4560_v27  ;;  %v1062_v56 = vld [vmem:[#allocation7 + $0x6d8] sm:$0xff]  ;;  %v13522_v51 = vsub.f32 %v1028_v39, %v4564_v54 }
 0x35b   : > { %17769 = vst [vmem:[#allocation99_spill] sm:$0xff] %v13508_v35  ;;  %10089 = vmatprep.subr.bf16.mxu0 %v17771_v63  ;;  %17772 = vst [vmem:[#allocation39_spill] sm:$0xff] %v13512_v6  ;;  %v1044_v4 = vld [vmem:[#allocation7 + $0x648] sm:$0xff]  ;;  %v13520_v35 = vsub.f32 %v1012_v30, %v4560_v27  ;;  %v13524_v63 = vpack.c.bf16 %v5419_v33, %v5415_v21  ;;  %v1043_v37 = vld [vmem:[#allocation7 + $0x640] sm:$0xff]  ;;  %v13530_v60 = vsub.f32 %v1030_v0, %v5419_v33 }
 0x35c   : > { %17773 = vst [vmem:[#allocation69_spill] sm:$0xff] %v13514_v26  ;;  %v1060_v59 = vld [vmem:[#allocation7 + $0x6c8] sm:$0xff]  ;;  %17774 = vst [vmem:[#allocation73_spill] sm:$0xff] %v13516_v61  ;;  %v1059_v26 = vld [vmem:[#allocation7 + $0x6c0] sm:$0xff]  ;;  %v13532_v61 = vsub.f32 %v1011_v28, %v4562_v44  ;;  %v13536_v40 = vpack.c.bf16 %v4566_v13, %v4562_v44  ;;  %v13538_v21 = vsub.f32 %v1027_v12, %v4566_v13  ;;  %v4570_v33 = vand.u32 4294901760, %v1043_v37 }
 0x35d   : > { %17775 = vst [vmem:[#allocation83_spill] sm:$0xff] %v13518_v62  ;;  %17776 = vst [vmem:[#allocation89_spill] sm:$0xff] %v13520_v35  ;;  %v17780_v17 = vld [vmem:[#allocation82_spill] sm:$0xff]  ;;  %v17781_v1 = vld [vmem:[#allocation97_spill] sm:$0xff]  ;;  %v4568_v62 = vand.u32 4294901760, %v1044_v4  ;;  %v4572_v6 = vand.u32 4294901760, %v1060_v59  ;;  %v13540_v0 = vpack.c.bf16 %v5421_v46, %v5417_v10  ;;  %v13542_v28 = vsub.f32 %v1013_v29, %v5417_v10 }
 0x35e   : > { %17777 = vst [vmem:[#allocation20_spill] sm:$0xff] %v13522_v51  ;;  %17778 = vst [vmem:[#allocation42_spill] sm:$0xff] %v13524_v63  ;;  %9899 = vmatpush1.bf16.msra.mxu1 %v17780_v17  ;;  %10091 = vmatpush1.bf16.msra.mxu0 %v17781_v1  ;;  %v1045_v30 = vld [vmem:[#allocation7 + $0x650] sm:$0xff]  ;;  %v17784_v39 = vld [vmem:[#allocation100_spill] sm:$0xff]  ;;  %v5427_v17 = vand.u32 4294901760, %v1062_v56 }
 0x35f   : > { %17779 = vst [vmem:[#allocation105_spill] sm:$0xff] %v13526_v5  ;;  %17782 = vst [vmem:[#allocation106_spill] sm:$0xff] %v13530_v60  ;;  %v1061_v27 = vld [vmem:[#allocation7 + $0x6d0] sm:$0xff]  ;;  %9901 = vmatprep.subr.bf16.mxu1 %v17784_v39  ;;  %v17785_v54 = vld [vmem:[#allocation22_spill] sm:$0xff]  ;;  %v5423_v5 = vand.u32 4294901760, %v1046_v18  ;;  %v13544_v60 = vsub.f32 %v1029_v48, %v5421_v46  ;;  %v13546_v35 = vsub.f32 %v1044_v4, %v4568_v62  ;;  %v5425_v39 = vand.u32 4294901760, %v1045_v30 }
 0x360   : > { %17783 = vst [vmem:[#allocation110_spill] sm:$0xff] %v13532_v61  ;;  %10093 = vmatprep.subr.bf16.mxu0 %v17785_v54  ;;  %17786 = vst [vmem:[#allocation112_spill] sm:$0xff] %v13536_v40  ;;  %v1076_v51 = vld [vmem:[#allocation7 + $0x748] sm:$0xff]  ;;  %v4574_v61 = vand.u32 4294901760, %v1059_v26  ;;  %v5429_v54 = vand.u32 4294901760, %v1061_v27  ;;  %v1078_v44 = vld [vmem:[#allocation7 + $0x758] sm:$0xff]  ;;  %v13550_v13 = vpack.c.bf16 %v4572_v6, %v4568_v62 }
 0x361   : > { %17787 = vst [vmem:[#allocation115_spill] sm:$0xff] %v13538_v21  ;;  %v1092_v1 = vld [vmem:[#allocation7 + $0x7c8] sm:$0xff]  ;;  %17788 = vst [vmem:[#allocation119_spill] sm:$0xff] %v13540_v0  ;;  %v17792_v40 = vld [vmem:[#allocation27_spill] sm:$0xff]  ;;  %v13552_v21 = vsub.f32 %v1060_v59, %v4572_v6  ;;  %v4576_v0 = vand.u32 4294901760, %v1076_v51  ;;  %v13556_v4 = vpack.c.bf16 %v5427_v17, %v5423_v5  ;;  %v13558_v46 = vsub.f32 %v1046_v18, %v5423_v5 }
 0x362   : > { %17789 = vst [vmem:[#allocation16_spill] sm:$0xff] %v13542_v28  ;;  %17790 = vst [vmem:[#allocation26_spill] sm:$0xff] %v13544_v60  ;;  %9903 = vmatpush1.bf16.msra.mxu1 %v17792_v40  ;;  %v17793_v12 = vld [vmem:[#allocation30_spill] sm:$0xff]  ;;  %v4580_v29 = vand.u32 4294901760, %v1092_v1  ;;  %v17796_v28 = vld [vmem:[#allocation40_spill] sm:$0xff]  ;;  %v13562_v40 = vpack.c.bf16 %v4574_v61, %v4570_v33  ;;  %v13566_v62 = vsub.f32 %v1059_v26, %v4574_v61  ;;  %v5431_v6 = vand.u32 4294901760, %v1078_v44 }
 0x363   : > { %17791 = vst [vmem:[#allocation31_spill] sm:$0xff] %v13546_v35  ;;  %10095 = vmatpush1.bf16.msra.mxu0 %v17793_v12  ;;  %17794 = vst [vmem:[#allocation35_spill] sm:$0xff] %v13550_v13  ;;  %v1094_v10 = vld [vmem:[#allocation7 + $0x7d8] sm:$0xff]  ;;  %9905 = vmatprep.subr.bf16.mxu1 %v17796_v28  ;;  %v17797_v48 = vld [vmem:[#allocation48_spill] sm:$0xff]  ;;  %v13560_v35 = vsub.f32 %v1062_v56, %v5427_v17  ;;  %v13564_v12 = vsub.f32 %v1043_v37, %v4570_v33  ;;  %v16616_v33 = vand.u32 4294901760, %v13378_v42 }
 0x364   : > { %17795 = vst [vmem:[#allocation84_spill] sm:$0xff] %v13552_v21  ;;  %10097 = vmatprep.subr.bf16.mxu0 %v17797_v48  ;;  %17798 = vst [vmem:[#allocation90_spill] sm:$0xff] %v13556_v4  ;;  %v1075_v59 = vld [vmem:[#allocation7 + $0x740] sm:$0xff]  ;;  %v13568_v21 = vpack.c.bf16 %v5429_v54, %v5425_v39  ;;  %v13570_v60 = vsub.f32 %v1045_v30, %v5425_v39  ;;  %v13572_v28 = vsub.f32 %v1061_v27, %v5429_v54  ;;  %v17806_v4 = vld [vmem:[#allocation58_spill] sm:$0xff] }
 0x365   : > { %17799 = vst [vmem:[#allocation96_spill] sm:$0xff] %v13560_v35  ;;  %17800 = vst [vmem:[#allocation76_spill] sm:$0xff] %v13562_v40  ;;  %v5435_v48 = vand.u32 4294901760, %v1094_v10  ;;  %v17807_v18 = vld [vmem:[#allocation65_spill] sm:$0xff]  ;;  %v13576_v56 = vpack.c.bf16 %v4580_v29, %v4576_v0  ;;  %v13578_v5 = vsub.f32 %v1076_v51, %v4576_v0  ;;  %v13580_v37 = vsub.f32 %v1092_v1, %v4580_v29  ;;  %v17811_v61 = vld [vmem:[#allocation68_spill] sm:$0xff] }
 0x366   : > { %17801 = vst [vmem:[#allocation80_spill] sm:$0xff] %v13564_v12  ;;  %17802 = vst [vmem:[#allocation82_spill] sm:$0xff] %v13566_v62  ;;  %9907 = vmatpush1.bf16.msra.mxu1 %v17806_v4  ;;  %v17812_v26 = vld [vmem:[#allocation71_spill] sm:$0xff]  ;;  %v4578_v30 = vand.u32 4294901760, %v1075_v59  ;;  %v16613_v27 = vand.u32 4294901760, %v13376_v41  ;;  %v1077_v54 = vld [vmem:[#allocation7 + $0x750] sm:$0xff]  ;;  %v13598_v39 = vsub.f32 %v1078_v44, %v5431_v6 }
 0x367   : > { %17803 = vst [vmem:[#allocation97_spill] sm:$0xff] %v13568_v21  ;;  %17804 = vst [vmem:[#allocation100_spill] sm:$0xff] %v13570_v60  ;;  %10099 = vmatpush1.bf16.msra.mxu0 %v17807_v18  ;;  %9909 = vmatprep.subr.bf16.mxu1 %v17811_v61  ;;  %v1091_v17 = vld [vmem:[#allocation7 + $0x7c0] sm:$0xff]  ;;  %v13591_v29 = vpack.c.bf16 %v5435_v48, %v5431_v6  ;;  %v13600_v4 = vsub.f32 %v1094_v10, %v5435_v48  ;;  %v1093_v0 = vld [vmem:[#allocation7 + $0x7d0] sm:$0xff]  ;;  %v5433_v18 = vand.u32 4294901760, %v1077_v54 }
 0x368   : > { %17805 = vst [vmem:[#allocation22_spill] sm:$0xff] %v13572_v28  ;;  %17808 = vst [vmem:[#allocation27_spill] sm:$0xff] %v13576_v56  ;;  %10101 = vmatprep.subr.bf16.mxu0 %v17812_v26  ;;  %v4582_v51 = vand.u32 4294901760, %v1091_v17  ;;  %v13602_v1 = vsub.f32 %v1075_v59, %v4578_v30  ;;  %v4631_v26 = vsub.f32 %v13376_v41, %v16613_v27  ;;  %v17818_v10 = vand.u32 4294901760, %v13384_v55 }
 0x369   : > { %17809 = vst [vmem:[#allocation30_spill] sm:$0xff] %v13578_v5  ;;  %17810 = vst [vmem:[#allocation40_spill] sm:$0xff] %v13580_v37  ;;  %v17819_v59 = vand.u32 4294901760, %v13386_v14  ;;  %v17820_v61 = vand.u32 4294901760, %v13388_v9 }
 0x36a   : > { %17813 = vst [vmem:[#allocation48_spill] sm:$0xff] %v13591_v29  ;;  %9911 = vmatpush1.bf16.msra.mxu1 %v17623_v23  ;;  %17814 = vst [vmem:[#allocation58_spill] sm:$0xff] %v13598_v39  ;;  %v17817_v23 = vand.u32 4294901760, %v13380_v52  ;;  %v5498_v6 = vsub.f32 %v13384_v55, %v17818_v10  ;;  %v17823_v55 = vand.u32 4294901760, %v13398_v20 }
 0x36b   : > { %10103 = vmatpush1.bf16.msra.mxu0 %v17624_v43  ;;  %17815 = vst [vmem:[#allocation65_spill] sm:$0xff] %v13600_v4  ;;  %17816 = vst [vmem:[#allocation68_spill] sm:$0xff] %v13602_v1  ;;  %10105 = vmatprep.subr.bf16.mxu1 %v13372_v31  ;;  %v4643_v43 = vsub.f32 %v13378_v42, %v16616_v33  ;;  %v4637_v48 = vsub.f32 %v13386_v14, %v17819_v59  ;;  %v17822_v31 = vand.u32 4294901760, %v13394_v3  ;;  %v17880_v42 = vld [vmem:[#allocation19_spill] sm:$0xff] }
 0x36c   : > { %10297 = vmatprep.subr.bf16.mxu0 %v13374_v24  ;;  %v5486_v44 = vsub.f32 %v13380_v52, %v17817_v23  ;;  %v4649_v27 = vsub.f32 %v13388_v9, %v17820_v61  ;;  %v17821_v24 = vand.u32 4294901760, %v13392_v58  ;;  %v5437_v23 = vand.u32 4294901760, %v1093_v0 }
 0x36d   : > { %3659 = vmatmul.mubr.f32.vlgmr.msra.gmra.mrb[4].mxu1 %v17723_v8  ;;  %v5504_v10 = vsub.f32 %v13394_v3, %v17822_v31  ;;  %v4655_v59 = vsub.f32 %v13398_v20, %v17823_v55  ;;  %v17824_v14 = vand.u32 4294901760, %v13400_v19  ;;  %v13647_v55 = vsub.f32 %v1091_v17, %v4582_v51 }
 0x36e   : > { %v5492_v33 = vsub.f32 %v13392_v58, %v17821_v24  ;;  %4514 = vmatmul.mubr.f32.vlgmr.msra.gmra.mrb[4].mxu0 %v17723_v8  ;;  %10107 = vmatpush1.bf16.msra.mxu1 %v13382_v2  ;;  %v13640_v24 = vpack.c.bf16 %v4582_v51, %v4578_v30  ;;  %v4632_v20 = vand.u32 4294901760, %v4631_v26  ;;  %v5499_v30 = vand.u32 4294901760, %v5498_v6 }
 0x36f   : > { %v4667_v61 = vsub.f32 %v13400_v19, %v17824_v14  ;;  %10299 = vmatpush1.bf16.msra.mxu0 %v13390_v25  ;;  %10109 = vmatprep.subr.bf16.mxu1 %v13396_v34  ;;  %17826 = vst [vmem:[#allocation120_spill] sm:$0xff] %v13647_v55  ;;  %v4644_v14 = vand.u32 4294901760, %v4643_v43  ;;  %v5487_v19 = vand.u32 4294901760, %v5486_v44  ;;  %v4638_v25 = vand.u32 4294901760, %v4637_v48 }
 0x370   : > { %17825 = vst [vmem:[#allocation71_spill] sm:$0xff] %v13640_v24  ;;  %10301 = vmatprep.subr.bf16.mxu0 %v13402_v45  ;;  %4616 = vmatprep.mubr.f32.mxu1 %v17132_v32  ;;  %v4650_v8 = vand.u32 4294901760, %v4649_v27  ;;  %v5493_v2 = vand.u32 4294901760, %v5492_v33  ;;  %v5505_v58 = vand.u32 4294901760, %v5504_v10  ;;  %v4656_v3 = vand.u32 4294901760, %v4655_v59  ;;  %v17834_v10 = vld [vmem:[#allocation111_spill] sm:$0xff] }
 0x371   : > { %5471 = vmatprep.mubr.f32.mxu0 %v17132_v32  ;;  %v4668_v31 = vand.u32 4294901760, %v4667_v61  ;;  %v17827_v17 = vand.u32 4294901760, %v13404_v7  ;;  %v17828_v26 = vand.u32 4294901760, %v13407_v15  ;;  %v17829_v27 = vand.u32 4294901760, %v13413_v53 }
 0x372   : > { %10111 = vmatpush1.bf16.msra.mxu1 %v13409_v57  ;;  %v13667_v44 = vpack.c.bf16 %v5437_v23, %v5433_v18  ;;  %v13669_v6 = vsub.f32 %v1077_v54, %v5433_v18  ;;  %v16642_v48 = vand.u32 4294901760, %v13419_v50  ;;  %v13673_v59 = vsub.f32 %v1093_v0, %v5437_v23  ;;  %v17835_v0 = vld [vmem:[#allocation116_spill] sm:$0xff]  ;;  %v17843_v18 = vld [vmem:[#allocation114_spill] sm:$0xff] }
 0x373   : > { %10303 = vmatpush1.bf16.msra.mxu0 %v13417_v16  ;;  %v5510_v51 = vsub.f32 %v13404_v7, %v17827_v17  ;;  %v5522_v43 = vsub.f32 %v13407_v15, %v17828_v26  ;;  %v13663_v33 = vsub.f32 %v13413_v53, %v17829_v27  ;;  %10113 = vmatprep.subr.bf16.mxu1 %v13427_v22  ;;  %v17839_v23 = vand.u32 4294901760, %v13421_v36  ;;  %v17854_v15 = vld [vmem:[#allocation86_spill] sm:$0xff] }
 0x374   : > { %10305 = vmatprep.subr.bf16.mxu0 %v13433_v49  ;;  %17830 = vst [vmem:[#allocation121_spill] sm:$0xff] %v13667_v44  ;;  %17831 = vst [vmem:[#allocation122_spill] sm:$0xff] %v13669_v6  ;;  %v13675_v61 = vpack.c.bf16 %v4644_v14, %v4632_v20  ;;  %v13677_v17 = vpack.c.bf16 %v5499_v30, %v5487_v19  ;;  %v13679_v26 = vpack.c.bf16 %v4650_v8, %v4638_v25  ;;  %v17836_v8 = vld [vmem:[#allocation63_spill] sm:$0xff]  ;;  %v17840_v14 = vld [vmem:[#allocation108_spill] sm:$0xff] }
 0x375   : > { %17832 = vst [vmem:[#allocation123_spill] sm:$0xff] %v13673_v59  ;;  %v13681_v27 = vpack.c.bf16 %v5505_v58, %v5493_v2  ;;  %v13683_v34 = vpack.c.bf16 %v4668_v31, %v4656_v3  ;;  %v17833_v49 = vand.u32 4294901760, %v13415_v38  ;;  %v5511_v20 = vand.u32 4294901760, %v5510_v51  ;;  %v17837_v58 = vld [vmem:[#allocation17_spill] sm:$0xff] }
 0x376   : > { %10115 = vmatpush1.bf16.msra.mxu1 %v17834_v10  ;;  %v5523_v19 = vand.u32 4294901760, %v5522_v43  ;;  %v4662_v25 = vand.u32 4294901760, %v13663_v33  ;;  %v17838_v3 = vld [vmem:[#allocation93_spill] sm:$0xff]  ;;  %v13705_v31 = vsub.f32 %v13421_v36, %v17839_v23  ;;  %v17845_v10 = vld [vmem:[#allocation118_spill] sm:$0xff]  ;;  %v17846_v16 = vand.u32 4294901760, %v13423_v47 }
 0x377   : > { %v13688_v54 = vsub.f32 %v13415_v38, %v17833_v49  ;;  %10307 = vmatpush1.bf16.msra.mxu0 %v17835_v0  ;;  %10117 = vmatprep.subr.bf16.mxu1 %v17837_v58  ;;  %v13700_v49 = vsub.f32 %v13419_v50, %v16642_v48  ;;  %v17841_v51 = vld [vmem:[#allocation109_spill] sm:$0xff]  ;;  %v17848_v36 = vld [vmem:[#allocation74_spill] sm:$0xff]  ;;  %v17853_v38 = vld [vmem:[#allocation79_spill] sm:$0xff] }
 0x378   : > { %10309 = vmatprep.subr.bf16.mxu0 %v17838_v3  ;;  %v17842_v33 = vld [vmem:[#allocation113_spill] sm:$0xff]  ;;  %v4679_v57 = vsub.f32 %v13423_v47, %v17846_v16  ;;  %v17850_v43 = vld [vmem:[#allocation70_spill] sm:$0xff]  ;;  %v13721_v2 = vpack.c.bf16 %v5523_v19, %v5511_v20  ;;  %v17851_v3 = vand.u32 4294901760, %v17836_v8  ;;  %v5529_v45 = vand.u32 4294901760, %v13705_v31 }
 0x379   : > { %v17844_v0 = vld [vmem:[#allocation117_spill] sm:$0xff]  ;;  %v4674_v48 = vand.u32 4294901760, %v13688_v54  ;;  %v5517_v30 = vand.u32 4294901760, %v13700_v49  ;;  %v17857_v19 = vand.u32 4294901760, %v17841_v51  ;;  %v17858_v54 = vand.u32 4294901760, %v17842_v33 }
 0x37a   : > { %v17847_v23 = vld [vmem:[#allocation25_spill] sm:$0xff]  ;;  %v4691_v22 = vsub.f32 %v17836_v8, %v17851_v3  ;;  %v17860_v49 = vand.u32 4294901760, %v17844_v0 }
 0x37b   : > { %v17849_v50 = vld [vmem:[#allocation81_spill] sm:$0xff]  ;;  %10311 = vmatpush1.bf16.msra.mxu0 %v17850_v43  ;;  %v17856_v43 = vand.u32 4294901760, %v17840_v14  ;;  %v5546_v3 = vsub.f32 %v17841_v51, %v17857_v19  ;;  %v4685_v53 = vsub.f32 %v17842_v33, %v17858_v54  ;;  %v17862_v8 = vand.u32 4294901760, %v17847_v23 }
 0x37c   : > { %10119 = vmatpush1.bf16.msra.mxu1 %v17849_v50  ;;  %v17852_v58 = vld [vmem:[#allocation77_spill] sm:$0xff]  ;;  %v5540_v31 = vsub.f32 %v17844_v0, %v17860_v49  ;;  %v17861_v50 = vand.u32 4294901760, %v17845_v10  ;;  %v17863_v51 = vand.u32 4294901760, %v17848_v36  ;;  %v4692_v49 = vand.u32 4294901760, %v4691_v22 }
 0x37d   : > { %10121 = vmatprep.subr.bf16.mxu1 %v17854_v15  ;;  %v17855_v16 = vld [vmem:[#allocation33_spill] sm:$0xff]  ;;  %v5534_v20 = vsub.f32 %v17840_v14, %v17856_v43  ;;  %v17859_v15 = vand.u32 4294901760, %v17843_v18  ;;  %v4680_v14 = vand.u32 4294901760, %v4679_v57  ;;  %v4703_v19 = vsub.f32 %v17847_v23, %v17862_v8  ;;  %v17868_v8 = vld [vmem:[#allocation52_spill] sm:$0xff] }
 0x37e   : > { %10313 = vmatprep.subr.bf16.mxu0 %v17855_v16  ;;  %v5552_v43 = vsub.f32 %v17845_v10, %v17861_v50  ;;  %v4715_v54 = vsub.f32 %v17848_v36, %v17863_v51  ;;  %v17864_v33 = vld [vmem:[#allocation41_spill] sm:$0xff]  ;;  %v17866_v0 = vand.u32 4294901760, %v17852_v58  ;;  %v17867_v57 = vand.u32 4294901760, %v17853_v38 }
 0x37f   : > { %v4697_v16 = vsub.f32 %v17843_v18, %v17859_v15  ;;  %v17865_v15 = vld [vmem:[#allocation39_spill] sm:$0xff]  ;;  %v5535_v51 = vand.u32 4294901760, %v5534_v20  ;;  %v5547_v47 = vand.u32 4294901760, %v5546_v3  ;;  %v13770_v7 = vpop.f32.mrb[2].mxu1  ;;  %v5541_v52 = vand.u32 4294901760, %v5540_v31 }
 0x380   : > { %10123 = vmatpush1.bf16.msra.mxu1 %v13504_v11  ;;  %10315 = vmatpush1.bf16.msra.mxu0 %v17865_v15  ;;  %v5558_v50 = vsub.f32 %v17852_v58, %v17866_v0  ;;  %v5570_v10 = vsub.f32 %v17853_v38, %v17867_v57  ;;  %v17869_v18 = vld [vmem:[#allocation83_spill] sm:$0xff]  ;;  %v17870_v11 = vld [vmem:[#allocation50_spill] sm:$0xff]  ;;  %v17871_v15 = vld [vmem:[#allocation72_spill] sm:$0xff]  ;;  %17872 = vst [vmem:[#allocation124_spill] sm:$0xff] %v13770_v7  ;;  %v13772_v9 = vpop.f32.mrb[2].mxu0  ;;  %v4686_v0 = vand.u32 4294901760, %v4685_v53 }
 0x381   : > { %10125 = vmatprep.subr.bf16.mxu1 %v17869_v18  ;;  %10317 = vmatprep.subr.bf16.mxu0 %v13524_v63  ;;  %17873 = vst [vmem:[#allocation125_spill] sm:$0xff] %v13772_v9  ;;  %v4698_v58 = vand.u32 4294901760, %v4697_v16  ;;  %v5553_v57 = vand.u32 4294901760, %v5552_v43  ;;  %v13774_v38 = vpop.f32.mrb[3].mxu0  ;;  %v13780_v20 = vpop.f32.mrb[3].mxu1  ;;  %v13782_v3 = vpack.c.bf16 %v4674_v48, %v4662_v25  ;;  %v4704_v22 = vand.u32 4294901760, %v4703_v19 }
 0x382   : > { %17874 = vst [vmem:[#allocation126_spill] sm:$0xff] %v13774_v38  ;;  %8051 = vrot.lane.b32.xlu0 %v13770_v7, %s11248_s19  ;;  %7970 = vrot.lane.b32.xlu1 %v13770_v7, %s11247_s16  ;;  %17875 = vst [vmem:[#allocation127_spill] sm:$0xff] %v13780_v20  ;;  %v4716_v36 = vand.u32 4294901760, %v4715_v54  ;;  %v17876_v23 = vand.u32 4294901760, %v17864_v33  ;;  %v17877_v16 = vld [vmem:[#allocation112_spill] sm:$0xff]  ;;  %v17878_v31 = vld [vmem:[#allocation119_spill] sm:$0xff]  ;;  %v13795_v25 = vpack.c.bf16 %v5529_v45, %v5517_v30 }
 0x383   : > { %v5559_v43 = vand.u32 4294901760, %v5558_v50  ;;  %v5571_v63 = vand.u32 4294901760, %v5570_v10  ;;  %v17879_v18 = vand.u32 4294901760, %v17868_v8  ;;  %v17881_v48 = vld [vmem:[#allocation90_spill] sm:$0xff]  ;;  %v17883_v54 = vand.u32 4294901760, %v17871_v15  ;;  %v17884_v30 = vld [vmem:[#allocation21_spill] sm:$0xff] }
 0x384   : > { %v4709_v53 = vsub.f32 %v17864_v33, %v17876_v23  ;;  %10127 = vmatpush1.bf16.msra.mxu1 %v17877_v16  ;;  %10319 = vmatpush1.bf16.msra.mxu0 %v17878_v31  ;;  %v17882_v23 = vand.u32 4294901760, %v17870_v11  ;;  %v13803_v50 = vpack.c.bf16 %v4692_v49, %v4680_v14  ;;  %v13805_v31 = vpack.c.bf16 %v5547_v47, %v5535_v51  ;;  %v17886_v14 = vld [vmem:[#allocation36_spill] sm:$0xff] }
 0x385   : > { %v4721_v7 = vsub.f32 %v17868_v8, %v17879_v18  ;;  %10129 = vmatprep.subr.bf16.mxu1 %v13550_v13  ;;  %10321 = vmatprep.subr.bf16.mxu0 %v17881_v48  ;;  %v5576_v10 = vsub.f32 %v17871_v15, %v17883_v54  ;;  %v13807_v18 = vpack.c.bf16 %v4698_v58, %v4686_v0  ;;  %v17885_v48 = vld [vmem:[#allocation32_spill] sm:$0xff]  ;;  %v17887_v51 = vand.u32 4294901760, %v17880_v42  ;;  %v17889_v54 = vld [vmem:[#allocation99_spill] sm:$0xff] }
 0x386   : > { %v5564_v19 = vsub.f32 %v17870_v11, %v17882_v23  ;;  %v13809_v41 = vpack.c.bf16 %v5553_v57, %v5541_v52  ;;  %7974 = vrot.lane.b32.xlu1 %v13772_v9, %s11247_s16  ;;  %7972 = vrot.lane.b32.xlu0 %v13780_v20, %s11247_s16  ;;  %v13815_v45 = vpack.c.bf16 %v4716_v36, %v4704_v22  ;;  %v4710_v47 = vand.u32 4294901760, %v4709_v53  ;;  %v17888_v57 = vld [vmem:[#allocation95_spill] sm:$0xff]  ;;  %v17892_v53 = vld [vmem:[#allocation89_spill] sm:$0xff]  ;;  %v17893_v13 = vld [vmem:[#allocation20_spill] sm:$0xff] }
 0x387   : > { %v13822_v52 = vpack.c.bf16 %v5571_v63, %v5559_v43  ;;  %v4722_v58 = vand.u32 4294901760, %v4721_v7  ;;  %v4727_v0 = vsub.f32 %v17880_v42, %v17887_v51  ;;  %v5577_v22 = vand.u32 4294901760, %v5576_v10  ;;  %v17891_v63 = vld [vmem:[#allocation73_spill] sm:$0xff] }
 0x388   : > { %10131 = vmatpush1.bf16.msra.mxu1 %v13562_v40  ;;  %10323 = vmatpush1.bf16.msra.mxu0 %v13568_v21  ;;  %v5565_v36 = vand.u32 4294901760, %v5564_v19  ;;  %v17890_v40 = vld [vmem:[#allocation69_spill] sm:$0xff]  ;;  %v17894_v19 = vand.u32 4294901760, %v17884_v30  ;;  %v17895_v51 = vand.u32 4294901760, %v17885_v48  ;;  %v17896_v43 = vand.u32 4294901760, %v17886_v14 }
 0x389   : > { %10133 = vmatprep.subr.bf16.mxu1 %v13576_v56  ;;  %10325 = vmatprep.subr.bf16.mxu0 %v13591_v29  ;;  %v17897_v23 = vld [vmem:[#allocation105_spill] sm:$0xff]  ;;  %v13851_v49 = vpack.c.bf16 %v4722_v58, %v4710_v47  ;;  %v17899_v56 = vld [vmem:[#allocation110_spill] sm:$0xff]  ;;  %v17901_v16 = vand.u32 4294901760, %v17888_v57  ;;  %v17902_v47 = vand.u32 4294901760, %v17889_v54  ;;  %v17903_v29 = vand.u32 4294901760, %v17890_v40 }
 0x38a   : > { %8055 = vrot.lane.b32.xlu1 %v13772_v9, %s11248_s19  ;;  %7976 = vrot.lane.b32.xlu0 %v13774_v38, %s11247_s16  ;;  %v4739_v10 = vsub.f32 %v17884_v30, %v17894_v19  ;;  %v5582_v21 = vsub.f32 %v17885_v48, %v17895_v51  ;;  %v5594_v7 = vsub.f32 %v17886_v14, %v17896_v43  ;;  %v17898_v9 = vld [vmem:[#allocation106_spill] sm:$0xff]  ;;  %v17900_v30 = vld [vmem:[#allocation115_spill] sm:$0xff]  ;;  %v4728_v43 = vand.u32 4294901760, %v4727_v0  ;;  %s10964_s10 = spop %10963 }
 0x38b   : > { %v13858_v51 = vpack.c.bf16 %v5577_v22, %v5565_v36  ;;  %v4745_v58 = vsub.f32 %v17889_v54, %v17902_v47  ;;  %v5588_v19 = vsub.f32 %v17890_v40, %v17903_v29  ;;  %v17904_v42 = vand.u32 4294901760, %v17891_v63  ;;  %v17907_v22 = vld [vmem:[#allocation61_spill] sm:$0xff] }
 0x38c   : > { %10135 = vmatpush1.bf16.msra.mxu1 %v13640_v24  ;;  %10327 = vmatpush1.bf16.msra.mxu0 %v13667_v44  ;;  %v4733_v24 = vsub.f32 %v17888_v57, %v17901_v16  ;;  %v17906_v36 = vand.u32 4294901760, %v17893_v13  ;;  %v4740_v47 = vand.u32 4294901760, %v4739_v10  ;;  %v5583_v44 = vand.u32 4294901760, %v5582_v21 }
 0x38d   : > { %10137 = vmatprep.subr.bf16.mxu1 %v13675_v61  ;;  %10329 = vmatprep.subr.bf16.mxu0 %v13677_v17  ;;  %v5600_v61 = vsub.f32 %v17891_v63, %v17904_v42  ;;  %v17905_v17 = vand.u32 4294901760, %v17892_v53  ;;  %v5595_v54 = vand.u32 4294901760, %v5594_v7  ;;  %v17908_v29 = vand.u32 4294901760, %v17897_v23  ;;  %v17915_v63 = vld [vmem:[#allocation84_spill] sm:$0xff] }
 0x38e   : > { %v4763_v16 = vsub.f32 %v17893_v13, %v17906_v36  ;;  %8053 = vrot.lane.b32.xlu0 %v13780_v20, %s11248_s19  ;;  %v17909_v42 = vand.u32 4294901760, %v17898_v9  ;;  %v17910_v36 = vand.u32 4294901760, %v17899_v56  ;;  %v17911_v21 = vand.u32 4294901760, %v17900_v30  ;;  %v17912_v20 = vld [vmem:[#allocation16_spill] sm:$0xff] }
 0x38f   : > { %v4751_v0 = vsub.f32 %v17892_v53, %v17905_v17  ;;  %4622 = vmatmul.mubr.f32.vlgmr.msra.gmra.mrb[6].mxu1 %v17907_v22  ;;  %5477 = vmatmul.mubr.f32.vlgmr.msra.gmra.mrb[6].mxu0 %v17907_v22  ;;  %v5606_v40 = vsub.f32 %v17897_v23, %v17908_v29  ;;  %v4734_v10 = vand.u32 4294901760, %v4733_v24  ;;  %v4746_v29 = vand.u32 4294901760, %v4745_v58  ;;  %v17913_v23 = vld [vmem:[#allocation26_spill] sm:$0xff] }
 0x390   : > { %10139 = vmatpush1.bf16.msra.mxu1 %v13679_v26  ;;  %v5618_v17 = vsub.f32 %v17898_v9, %v17909_v42  ;;  %v4757_v22 = vsub.f32 %v17899_v56, %v17910_v36  ;;  %v4769_v7 = vsub.f32 %v17900_v30, %v17911_v21  ;;  %10331 = vmatpush1.bf16.msra.mxu0 %v13681_v27  ;;  %v16735_v26 = vand.u32 4294901760, %v17912_v20  ;;  %v17914_v30 = vld [vmem:[#allocation31_spill] sm:$0xff] }
 0x391   : > { %10141 = vmatprep.subr.bf16.mxu1 %v13683_v34  ;;  %v16734_v13 = vand.u32 4294901760, %v17913_v23  ;;  %10333 = vmatprep.subr.bf16.mxu0 %v13721_v2  ;;  %v5589_v42 = vand.u32 4294901760, %v5588_v19  ;;  %v5601_v9 = vand.u32 4294901760, %v5600_v61  ;;  %v4752_v53 = vand.u32 4294901760, %v4751_v0 }
 0x392   : > { %v4764_v36 = vand.u32 4294901760, %v4763_v16  ;;  %4852 = vmatprep.mubr.f32.mxu1 %v17132_v32  ;;  %v10152_v56 = vpack.c.bf16 %v4740_v47, %v4728_v43  ;;  %v10344_v21 = vpack.c.bf16 %v5595_v54, %v5583_v44  ;;  %v16733_v27 = vand.u32 4294901760, %v17914_v30  ;;  %5707 = vmatprep.mubr.f32.mxu0 %v17132_v32 }
 0x393   : > { %v16726_v34 = vand.u32 4294901760, %v17915_v63  ;;  %8057 = vrot.lane.b32.xlu0 %v13774_v38, %s11248_s19  ;;  %v5607_v24 = vand.u32 4294901760, %v5606_v40  ;;  %v5619_v2 = vand.u32 4294901760, %v5618_v17  ;;  %v4758_v19 = vand.u32 4294901760, %v4757_v22 }
 0x394   : > { %10143 = vmatpush1.bf16.msra.mxu1 %v13782_v3  ;;  %v4770_v58 = vand.u32 4294901760, %v4769_v7  ;;  %10335 = vmatpush1.bf16.msra.mxu0 %v13795_v25  ;;  %v10154_v44 = vpack.c.bf16 %v4746_v29, %v4734_v10  ;;  %v5612_v54 = vsub.f32 %v17912_v20, %v16735_v26  ;;  %v5624_v43 = vsub.f32 %v17913_v23, %v16734_v13  ;;  %v17944_v13 = vld [vmem:[#allocation79_spill] sm:$0xff] }
 0x395   : > { %10145 = vmatprep.subr.bf16.mxu1 %v13803_v50  ;;  %10337 = vmatprep.subr.bf16.mxu0 %v13805_v31  ;;  %v10346_v3 = vpack.c.bf16 %v5601_v9, %v5589_v42  ;;  %v10156_v40 = vpack.c.bf16 %v4764_v36, %v4752_v53  ;;  %v16724_v61 = vand.u32 4294901760, %v13558_v46  ;;  %v16723_v0 = vand.u32 4294901760, %v13560_v35 }
 0x396   : > { %v4775_v25 = vsub.f32 %v17914_v30, %v16733_v27  ;;  %v4787_v50 = vsub.f32 %v17915_v63, %v16726_v34  ;;  %v16722_v16 = vand.u32 4294901760, %v13564_v12  ;;  %v16720_v22 = vand.u32 4294901760, %v13566_v62 }
 0x397   : > { %v10348_v9 = vpack.c.bf16 %v5619_v2, %v5607_v24  ;;  %v10158_v31 = vpack.c.bf16 %v4770_v58, %v4758_v19  ;;  %v16718_v53 = vand.u32 4294901760, %v13570_v60  ;;  %v16719_v47 = vand.u32 4294901760, %v13572_v28 }
 0x398   : > { %10147 = vmatpush1.bf16.msra.mxu1 %v13807_v18  ;;  %10339 = vmatpush1.bf16.msra.mxu0 %v13809_v41  ;;  %v5613_v17 = vand.u32 4294901760, %v5612_v54  ;;  %v5625_v7 = vand.u32 4294901760, %v5624_v43  ;;  %v16721_v10 = vand.u32 4294901760, %v13578_v5  ;;  %v16725_v29 = vand.u32 4294901760, %v13580_v37 }
 0x399   : > { %10149 = vmatprep.subr.bf16.mxu1 %v13815_v45  ;;  %10341 = vmatprep.subr.bf16.mxu0 %v13822_v52  ;;  %v5630_v18 = vsub.f32 %v13558_v46, %v16724_v61  ;;  %v5642_v42 = vsub.f32 %v13560_v35, %v16723_v0  ;;  %v16727_v41 = vand.u32 4294901760, %v13598_v39  ;;  %v16732_v45 = vand.u32 4294901760, %v13600_v4 }
 0x39a   : > { %v4776_v36 = vand.u32 4294901760, %v4775_v25  ;;  %v4788_v24 = vand.u32 4294901760, %v4787_v50  ;;  %v4781_v2 = vsub.f32 %v13564_v12, %v16722_v16  ;;  %v4793_v52 = vsub.f32 %v13566_v62, %v16720_v22 }
 0x39b   : > { %v5636_v19 = vsub.f32 %v13570_v60, %v16718_v53  ;;  %v5648_v58 = vsub.f32 %v13572_v28, %v16719_v47  ;;  %v16731_v54 = vand.u32 4294901760, %v13602_v1  ;;  %v16730_v43 = vand.u32 4294901760, %v13647_v55 }
 0x39c   : > { %10151 = vmatpush1.bf16.msra.mxu1 %v13851_v49  ;;  %10343 = vmatpush1.bf16.msra.mxu0 %v13858_v51  ;;  %v4799_v25 = vsub.f32 %v13578_v5, %v16721_v10  ;;  %v4811_v49 = vsub.f32 %v13580_v37, %v16725_v29  ;;  %v16728_v50 = vand.u32 4294901760, %v13669_v6  ;;  %v16729_v53 = vand.u32 4294901760, %v13673_v59 }
 0x39d   : > { %10153 = vmatprep.subr.bf16.mxu1 %v10152_v56  ;;  %10345 = vmatprep.subr.bf16.mxu0 %v10344_v21  ;;  %v5631_v47 = vand.u32 4294901760, %v5630_v18  ;;  %v5643_v22 = vand.u32 4294901760, %v5642_v42  ;;  %v5654_v51 = vsub.f32 %v13598_v39, %v16727_v41  ;;  %v5666_v56 = vsub.f32 %v13600_v4, %v16732_v45  ;;  %v17942_v45 = vld [vmem:[#allocation74_spill] sm:$0xff] }
 0x39e   : > { %v10350_v10 = vpack.c.bf16 %v5625_v7, %v5613_v17  ;;  %v10160_v16 = vpack.c.bf16 %v4788_v24, %v4776_v36  ;;  %v4782_v0 = vand.u32 4294901760, %v4781_v2  ;;  %v4794_v61 = vand.u32 4294901760, %v4793_v52 }
 0x39f   : > { %v5637_v29 = vand.u32 4294901760, %v5636_v19  ;;  %v5649_v34 = vand.u32 4294901760, %v5648_v58  ;;  %v4805_v21 = vsub.f32 %v13602_v1, %v16731_v54  ;;  %v4817_v18 = vsub.f32 %v13647_v55, %v16730_v43  ;;  %v17941_v54 = vld [vmem:[#allocation25_spill] sm:$0xff] }
 0x3a0   : > { %10155 = vmatpush1.bf16.msra.mxu1 %v10154_v44  ;;  %10347 = vmatpush1.bf16.msra.mxu0 %v10346_v3  ;;  %v4800_v42 = vand.u32 4294901760, %v4799_v25  ;;  %v4812_v41 = vand.u32 4294901760, %v4811_v49  ;;  %v5660_v17 = vsub.f32 %v13669_v6, %v16728_v50  ;;  %v5672_v44 = vsub.f32 %v13673_v59, %v16729_v53 }
 0x3a1   : > { %10157 = vmatprep.subr.bf16.mxu1 %v10156_v40  ;;  %10349 = vmatprep.subr.bf16.mxu0 %v10348_v9  ;;  %v10352_v7 = vpack.c.bf16 %v5643_v22, %v5631_v47  ;;  %v5655_v36 = vand.u32 4294901760, %v5654_v51  ;;  %v5667_v24 = vand.u32 4294901760, %v5666_v56  ;;  %v10162_v2 = vpack.c.bf16 %v4794_v61, %v4782_v0  ;;  %v17916_v22 = vld [vmem:[#allocation87_spill] sm:$0xff]  ;;  %v17917_v47 = vld [vmem:[#allocation94_spill] sm:$0xff] }
 0x3a2   : > { %v4806_v52 = vand.u32 4294901760, %v4805_v21  ;;  %v4818_v19 = vand.u32 4294901760, %v4817_v18  ;;  %v10354_v3 = vpack.c.bf16 %v5649_v34, %v5637_v29  ;;  %v10164_v40 = vpack.c.bf16 %v4812_v41, %v4800_v42  ;;  %v17918_v61 = vld [vmem:[#allocation98_spill] sm:$0xff]  ;;  %v17921_v34 = vld [vmem:[#allocation88_spill] sm:$0xff]  ;;  %v17924_v21 = vld [vmem:[#allocation29_spill] sm:$0xff] }
 0x3a3   : > { %v5661_v58 = vand.u32 4294901760, %v5660_v17  ;;  %v5673_v25 = vand.u32 4294901760, %v5672_v44  ;;  %v10356_v49 = vpack.c.bf16 %v5667_v24, %v5655_v36  ;;  %v10168_v51 = vpack.c.bf16 %v17917_v47, %v17916_v22  ;;  %v17919_v0 = vld [vmem:[#allocation78_spill] sm:$0xff]  ;;  %v17923_v41 = vld [vmem:[#allocation24_spill] sm:$0xff]  ;;  %v17925_v18 = vld [vmem:[#allocation55_spill] sm:$0xff] }
 0x3a4   : > { %10159 = vmatpush1.bf16.msra.mxu1 %v10158_v31  ;;  %10351 = vmatpush1.bf16.msra.mxu0 %v10350_v10  ;;  %v10166_v50 = vpack.c.bf16 %v4818_v19, %v4806_v52  ;;  %v10360_v31 = vpack.c.bf16 %v17919_v0, %v17918_v61  ;;  %v17922_v29 = vld [vmem:[#allocation18_spill] sm:$0xff]  ;;  %v10172_v42 = vpack.c.bf16 %v17925_v18, %v17924_v21  ;;  %v17926_v17 = vld [vmem:[#allocation64_spill] sm:$0xff]  ;;  %v17930_v24 = vld [vmem:[#allocation101_spill] sm:$0xff] }
 0x3a5   : > { %10161 = vmatprep.subr.bf16.mxu1 %v10160_v16  ;;  %10353 = vmatprep.subr.bf16.mxu0 %v10352_v7  ;;  %v10358_v9 = vpack.c.bf16 %v5673_v25, %v5661_v58  ;;  %v17920_v16 = vld [vmem:[#allocation85_spill] sm:$0xff]  ;;  %v10362_v56 = vpack.c.bf16 %v17923_v41, %v17922_v29  ;;  %v17927_v44 = vld [vmem:[#allocation66_spill] sm:$0xff]  ;;  %v17928_v36 = vld [vmem:[#allocation56_spill] sm:$0xff]  ;;  %v10180_v27 = vpack.c.bf16 %v17942_v45, %v17941_v54 }
 0x3a6   : > { %v10170_v10 = vpack.c.bf16 %v17921_v34, %v17920_v16  ;;  %v10364_v7 = vpack.c.bf16 %v17927_v44, %v17926_v17  ;;  %v17931_v52 = vld [vmem:[#allocation103_spill] sm:$0xff]  ;;  %v17932_v19 = vld [vmem:[#allocation53_spill] sm:$0xff]  ;;  %v10376_v45 = vpack.c.bf16 %v17886_v14, %v17885_v48 }
 0x3a7   : > { %v17934_v58 = vld [vmem:[#allocation63_spill] sm:$0xff] }
 0x3a8   : > { %10163 = vmatpush1.bf16.msra.mxu1 %v10162_v2  ;;  %10355 = vmatpush1.bf16.msra.mxu0 %v10354_v3  ;;  %v10366_v3 = vpack.c.bf16 %v17932_v19, %v17931_v52 }
 0x3a9   : > { %10165 = vmatprep.subr.bf16.mxu1 %v10164_v40  ;;  %10357 = vmatprep.subr.bf16.mxu0 %v10356_v49  ;;  %v17933_v40 = vld [vmem:[#allocation104_spill] sm:$0xff] }
 0x3aa   : > { %v10176_v25 = vpack.c.bf16 %v17934_v58, %v17933_v40  ;;  %v17935_v49 = vld [vmem:[#allocation108_spill] sm:$0xff] }
 0x3ac   : > { %10167 = vmatpush1.bf16.msra.mxu1 %v10166_v50  ;;  %10359 = vmatpush1.bf16.msra.mxu0 %v10358_v9  ;;  %v17929_v50 = vld [vmem:[#allocation23_spill] sm:$0xff]  ;;  %v17936_v9 = vld [vmem:[#allocation109_spill] sm:$0xff] }
 0x3ad   : > { %10169 = vmatprep.subr.bf16.mxu1 %v10168_v51  ;;  %10361 = vmatprep.subr.bf16.mxu0 %v10360_v31  ;;  %v10174_v2 = vpack.c.bf16 %v17930_v24, %v17929_v50  ;;  %v10368_v51 = vpack.c.bf16 %v17936_v9, %v17935_v49  ;;  %v17937_v31 = vld [vmem:[#allocation113_spill] sm:$0xff] }
 0x3af   : > { %4854 = vmatmul.mubr.f32.vlgmr.msra.gmra.mrb[6].mxu1 %v17928_v36  ;;  %5709 = vmatmul.mubr.f32.vlgmr.msra.gmra.mrb[6].mxu0 %v17928_v36  ;;  %v10182_v36 = vpack.c.bf16 %v17868_v8, %v17864_v33  ;;  %v17949_v8 = vld [vmem:[#allocation73_spill] sm:$0xff]  ;;  %v17951_v33 = vld [vmem:[#allocation20_spill] sm:$0xff] }
 0x3b0   : > { %10171 = vmatpush1.bf16.msra.mxu1 %v10170_v10  ;;  %10363 = vmatpush1.bf16.msra.mxu0 %v10362_v56  ;;  %v17938_v10 = vld [vmem:[#allocation114_spill] sm:$0xff]  ;;  %v17939_v56 = vld [vmem:[#allocation117_spill] sm:$0xff] }
 0x3b1   : > { %10173 = vmatprep.subr.bf16.mxu1 %v10172_v42  ;;  %10365 = vmatprep.subr.bf16.mxu0 %v10364_v7  ;;  %v10178_v53 = vpack.c.bf16 %v17938_v10, %v17937_v31  ;;  %v17940_v42 = vld [vmem:[#allocation118_spill] sm:$0xff]  ;;  %v17943_v7 = vld [vmem:[#allocation77_spill] sm:$0xff] }
 0x3b2   : > { %4988 = vmatprep.mubr.f32.mxu1 %v17132_v32  ;;  %5843 = vmatprep.mubr.f32.mxu0 %v17132_v32  ;;  %v10370_v43 = vpack.c.bf16 %v17940_v42, %v17939_v56  ;;  %v10372_v26 = vpack.c.bf16 %v17944_v13, %v17943_v7 }
 0x3b4   : > { %10175 = vmatpush1.bf16.msra.mxu1 %v10174_v2  ;;  %10367 = vmatpush1.bf16.msra.mxu0 %v10366_v3  ;;  %v10374_v2 = vpack.c.bf16 %v17871_v15, %v17870_v11  ;;  %v17945_v3 = vld [vmem:[#allocation19_spill] sm:$0xff]  ;;  %v17952_v15 = vld [vmem:[#allocation105_spill] sm:$0xff]  ;;  %v17953_v11 = vld [vmem:[#allocation106_spill] sm:$0xff] }
 0x3b5   : > { %10177 = vmatprep.subr.bf16.mxu1 %v10176_v25  ;;  %10369 = vmatprep.subr.bf16.mxu0 %v10368_v51  ;;  %v17946_v25 = vld [vmem:[#allocation21_spill] sm:$0xff]  ;;  %v17947_v51 = vld [vmem:[#allocation99_spill] sm:$0xff] }
 0x3b6   : > { %v10184_v38 = vpack.c.bf16 %v17946_v25, %v17945_v3  ;;  %v10186_v13 = vpack.c.bf16 %v17947_v51, %v17888_v57  ;;  %v10380_v25 = vpack.c.bf16 %v17953_v11, %v17952_v15  ;;  %v17955_v3 = vld [vmem:[#allocation115_spill] sm:$0xff] }
 0x3b8   : > { %10179 = vmatpush1.bf16.msra.mxu1 %v10178_v53  ;;  %10371 = vmatpush1.bf16.msra.mxu0 %v10370_v43  ;;  %v17948_v53 = vld [vmem:[#allocation69_spill] sm:$0xff] }
 0x3b9   : > { %10181 = vmatprep.subr.bf16.mxu1 %v10180_v27  ;;  %10373 = vmatprep.subr.bf16.mxu0 %v10372_v26  ;;  %v10378_v43 = vpack.c.bf16 %v17949_v8, %v17948_v53  ;;  %v17950_v27 = vld [vmem:[#allocation89_spill] sm:$0xff]  ;;  %v17954_v26 = vld [vmem:[#allocation110_spill] sm:$0xff] }
 0x3ba   : > { %v10188_v7 = vpack.c.bf16 %v17951_v33, %v17950_v27  ;;  %v10190_v14 = vpack.c.bf16 %v17955_v3, %v17954_v26 }
 0x3bc   : > { %10183 = vmatpush1.bf16.msra.mxu1 %v10182_v36  ;;  %10375 = vmatpush1.bf16.msra.mxu0 %v10374_v2  ;;  %v10382_v36 = vpack.c.bf16 %v17913_v23, %v17912_v20  ;;  %v10384_v2 = vpack.c.bf16 %v13560_v35, %v13558_v46  ;;  %v17989_v35 = vld [vmem:[#allocation90_spill] sm:$0xff] }
 0x3bd   : > { %10185 = vmatprep.subr.bf16.mxu1 %v10184_v38  ;;  %10377 = vmatprep.subr.bf16.mxu0 %v10376_v45  ;;  %v10192_v38 = vpack.c.bf16 %v17915_v63, %v17914_v30  ;;  %v10194_v45 = vpack.c.bf16 %v13566_v62, %v13564_v12  ;;  %v17987_v62 = vand.u32 4294901760, %v17918_v61  ;;  %v17988_v12 = vand.u32 4294901760, %v17919_v0 }
 0x3be   : > { %v17995_v61 = vand.u32 4294901760, %v17925_v18  ;;  %v17997_v0 = vand.u32 4294901760, %v17927_v44  ;;  %v18003_v18 = vand.u32 4294901760, %v17934_v58  ;;  %v18004_v44 = vand.u32 4294901760, %v17935_v49 }
 0x3bf   : > { %v18010_v58 = vand.u32 4294901760, %v17940_v42 }
 0x3c0   : > { %10187 = vmatpush1.bf16.msra.mxu1 %v10186_v13  ;;  %10379 = vmatpush1.bf16.msra.mxu0 %v10378_v43  ;;  %v10386_v13 = vpack.c.bf16 %v13572_v28, %v13570_v60  ;;  %v10388_v43 = vpack.c.bf16 %v13600_v4, %v13598_v39  ;;  %v17960_v4 = vld [vmem:[#allocation15_spill] sm:$0xff]  ;;  %v17985_v28 = vand.u32 4294901760, %v17916_v22  ;;  %v17992_v22 = vand.u32 4294901760, %v17922_v29 }
 0x3c1   : > { %10189 = vmatprep.subr.bf16.mxu1 %v10188_v7  ;;  %10381 = vmatprep.subr.bf16.mxu0 %v10380_v25  ;;  %v10196_v7 = vpack.c.bf16 %v13580_v37, %v13578_v5  ;;  %v10198_v25 = vpack.c.bf16 %v13647_v55, %v13602_v1  ;;  %v17981_v55 = vld [vmem:[#allocation112_spill] sm:$0xff]  ;;  %v17983_v37 = vld [vmem:[#allocation119_spill] sm:$0xff]  ;;  %v18001_v29 = vand.u32 4294901760, %v17932_v19  ;;  %v18008_v19 = vand.u32 4294901760, %v17938_v10 }
 0x3c2   : > { %v17984_v5 = vld [vmem:[#allocation35_spill] sm:$0xff] }
 0x3c4   : > { %10191 = vmatpush1.bf16.msra.mxu1 %v10190_v14  ;;  %10383 = vmatpush1.bf16.msra.mxu0 %v10382_v36  ;;  %v10390_v14 = vpack.c.bf16 %v13673_v59, %v13669_v6  ;;  %v17956_v36 = vld [vmem:[#allocation92_spill] sm:$0xff]  ;;  %v17973_v59 = vld [vmem:[#allocation86_spill] sm:$0xff] }
 0x3c5   : > { %10193 = vmatprep.subr.bf16.mxu1 %v10192_v38  ;;  %10385 = vmatprep.subr.bf16.mxu0 %v10384_v2  ;;  %v17957_v38 = vld [vmem:[#allocation37_spill] sm:$0xff] }
 0x3c6   : > { %v17958_v2 = vld [vmem:[#allocation57_spill] sm:$0xff] }
 0x3c8   : > { %10195 = vmatpush1.bf16.msra.mxu1 %v10194_v45  ;;  %10387 = vmatpush1.bf16.msra.mxu0 %v10386_v13  ;;  %v17959_v45 = vld [vmem:[#allocation75_spill] sm:$0xff]  ;;  %v17961_v13 = vld [vmem:[#allocation28_spill] sm:$0xff] }
 0x3c9   : > { %10197 = vmatprep.subr.bf16.mxu1 %v10196_v7  ;;  %10389 = vmatprep.subr.bf16.mxu0 %v10388_v43  ;;  %v17962_v7 = vld [vmem:[#allocation62_spill] sm:$0xff]  ;;  %v17963_v43 = vld [vmem:[#allocation67_spill] sm:$0xff] }
 0x3cc   : > { %10199 = vmatpush1.bf16.msra.mxu1 %v10198_v25  ;;  %10391 = vmatpush1.bf16.msra.mxu0 %v10390_v14  ;;  %v17964_v25 = vld [vmem:[#allocation102_spill] sm:$0xff]  ;;  %v17965_v14 = vld [vmem:[#allocation60_spill] sm:$0xff] }
 0x3cd   : > { %10201 = vmatprep.subr.bf16.mxu1 %v17956_v36  ;;  %10393 = vmatprep.subr.bf16.mxu0 %v17957_v38  ;;  %v17966_v38 = vld [vmem:[#allocation107_spill] sm:$0xff]  ;;  %v17972_v36 = vld [vmem:[#allocation70_spill] sm:$0xff] }
 0x3cf   : > { %4991 = vmatmul.mubr.f32.vlgmr.msra.gmra.mrb[6].mxu1 %v17958_v2  ;;  %5846 = vmatmul.mubr.f32.vlgmr.msra.gmra.mrb[6].mxu0 %v17958_v2  ;;  %v17967_v2 = vld [vmem:[#allocation111_spill] sm:$0xff] }
 0x3d0   : > { %10203 = vmatpush1.bf16.msra.mxu1 %v17959_v45  ;;  %10395 = vmatpush1.bf16.msra.mxu0 %v17960_v4  ;;  %v17968_v45 = vld [vmem:[#allocation116_spill] sm:$0xff]  ;;  %v17969_v4 = vld [vmem:[#allocation17_spill] sm:$0xff] }
 0x3d1   : > { %10205 = vmatprep.subr.bf16.mxu1 %v17961_v13  ;;  %10397 = vmatprep.subr.bf16.mxu0 %v17962_v7  ;;  %v17970_v13 = vld [vmem:[#allocation93_spill] sm:$0xff] }
 0x3d2   : > { %5093 = vmatprep.mubr.f32.mxu1 %v17132_v32  ;;  %5948 = vmatprep.mubr.f32.mxu0 %v17132_v32  ;;  %v17971_v7 = vld [vmem:[#allocation81_spill] sm:$0xff]  ;;  %v10424_v32 = vpack.c.bf16 %v17988_v12, %v17987_v62  ;;  %v17996_v62 = vand.u32 4294901760, %v17926_v17 }
 0x3d4   : > { %10207 = vmatpush1.bf16.msra.mxu1 %v17963_v43  ;;  %10399 = vmatpush1.bf16.msra.mxu0 %v17964_v25  ;;  %v17974_v43 = vld [vmem:[#allocation33_spill] sm:$0xff]  ;;  %v17975_v25 = vld [vmem:[#allocation91_spill] sm:$0xff] }
 0x3d5   : > { %10209 = vmatprep.subr.bf16.mxu1 %v17965_v14  ;;  %10401 = vmatprep.subr.bf16.mxu0 %v17966_v38  ;;  %v14075_v14 = vld [vmem:[#allocation8 + $0x8] sm:$0xff]  ;;  %v14077_v38 = vld [vmem:[#allocation8 + $0x10] sm:$0xff] }
 0x3d8   : > { %10211 = vmatpush1.bf16.msra.mxu1 %v17967_v2  ;;  %10403 = vmatpush1.bf16.msra.mxu0 %v17968_v45  ;;  %v17976_v2 = vld [vmem:[#allocation39_spill] sm:$0xff] }
 0x3d9   : > { %10213 = vmatprep.subr.bf16.mxu1 %v17969_v4  ;;  %10405 = vmatprep.subr.bf16.mxu0 %v17970_v13  ;;  %v17977_v45 = vld [vmem:[#allocation83_spill] sm:$0xff]  ;;  %v14081_v4 = vld [vmem:[#allocation8 + $0x18] sm:$0xff] }
 0x3da   : > { %v17978_v13 = vld [vmem:[#allocation42_spill] sm:$0xff] }
 0x3dc   : > { %10215 = vmatpush1.bf16.msra.mxu1 %v17971_v7  ;;  %10407 = vmatpush1.bf16.msra.mxu0 %v17972_v36  ;;  %v17979_v7 = vld [vmem:[#allocation45_spill] sm:$0xff] }
 0x3dd   : > { %10217 = vmatprep.subr.bf16.mxu1 %v17973_v59  ;;  %10409 = vmatprep.subr.bf16.mxu0 %v17974_v43  ;;  %v8234_v36 = vrot.slane %v14075_v14, %v17979_v7  ;;  %v8238_v43 = vrot.slane %v14077_v38, %v17979_v7  ;;  %v17980_v59 = vld [vmem:[#allocation51_spill] sm:$0xff]  ;;  %v8242_v1 = vrot.slane %v14081_v4, %v17979_v7 }
 0x3de   : > { %v8510_v6 = vrot.slane %v14077_v38, %v17980_v59  ;;  %v8514_v39 = vrot.slane %v14081_v4, %v17980_v59 }
 0x3e0   : > { %10219 = vmatpush1.bf16.msra.mxu1 %v17975_v25  ;;  %10411 = vmatpush1.bf16.msra.mxu0 %v17976_v2  ;;  %v8506_v25 = vrot.slane %v14075_v14, %v17980_v59  ;;  %v17982_v2 = vld [vmem:[#allocation46_spill] sm:$0xff]  ;;  %v17990_v59 = vand.u32 4294901760, %v17920_v16  ;;  %v17998_v16 = vand.u32 4294901760, %v17929_v50  ;;  %v18005_v50 = vand.u32 4294901760, %v17936_v9  ;;  %v18026_v9 = vld [vmem:[#allocation52_spill] sm:$0xff] }
 0x3e1   : > { %10221 = vmatprep.subr.bf16.mxu1 %v17977_v45  ;;  %10413 = vmatprep.subr.bf16.mxu0 %v17978_v13  ;;  %v8778_v45 = vrot.slane %v14075_v14, %v17982_v2  ;;  %v8782_v13 = vrot.slane %v14077_v38, %v17982_v2  ;;  %v8786_v7 = vrot.slane %v14081_v4, %v17982_v2  ;;  %v18027_v42 = vand.u32 4294901760, %v18026_v9  ;;  %v18033_v9 = vld [vmem:[#allocation19_spill] sm:$0xff] }
 0x3e2   : > { %v10428_v2 = vpack.c.bf16 %v17997_v0, %v17996_v62  ;;  %v18012_v62 = vld [vmem:[#allocation97_spill] sm:$0xff]  ;;  %v18013_v0 = vld [vmem:[#allocation27_spill] sm:$0xff] }
 0x3e4   : > { %10223 = vmatpush1.bf16.msra.mxu1 %v17981_v55  ;;  %10415 = vmatpush1.bf16.msra.mxu0 %v17983_v37  ;;  %v17986_v55 = vand.u32 4294901760, %v17917_v47  ;;  %v17991_v37 = vand.u32 4294901760, %v17921_v34  ;;  %v17993_v47 = vand.u32 4294901760, %v17923_v41  ;;  %v17999_v34 = vand.u32 4294901760, %v17930_v24  ;;  %v18006_v24 = vld [vmem:[#allocation76_spill] sm:$0xff] }
 0x3e5   : > { %10225 = vmatprep.subr.bf16.mxu1 %v17984_v5  ;;  %10417 = vmatprep.subr.bf16.mxu0 %v17989_v35 }
 0x3e6   : > { %v10232_v60 = vpack.c.bf16 %v17986_v55, %v17985_v28  ;;  %v10234_v5 = vpack.c.bf16 %v17991_v37, %v17990_v59  ;;  %v10426_v28 = vpack.c.bf16 %v17993_v47, %v17992_v22  ;;  %v17994_v55 = vand.u32 4294901760, %v17924_v21 }
 0x3e7   : > { %v14134_v37 = vpack.c.bf16 %v17999_v34, %v17998_v16  ;;  %v18000_v59 = vand.u32 4294901760, %v17931_v52  ;;  %v18002_v21 = vand.u32 4294901760, %v17933_v40  ;;  %v14152_v22 = vpack.c.bf16 %v18005_v50, %v18004_v44  ;;  %v18015_v16 = vld [vmem:[#allocation44_spill] sm:$0xff]  ;;  %v18020_v50 = vld [vmem:[#allocation77_spill] sm:$0xff] }
 0x3e8   : > { %v10236_v12 = vpack.c.bf16 %v17995_v61, %v17994_v55  ;;  %10227 = vmatpush1.bf16.msra.mxu1 %v18006_v24  ;;  %v18007_v52 = vand.u32 4294901760, %v17937_v31  ;;  %v18009_v40 = vand.u32 4294901760, %v17939_v56  ;;  %v18011_v61 = vld [vmem:[#allocation43_spill] sm:$0xff]  ;;  %10419 = vmatpush1.bf16.msra.mxu0 %v18012_v62  ;;  %v18016_v34 = vld [vmem:[#allocation48_spill] sm:$0xff]  ;;  %v18024_v56 = vld [vmem:[#allocation41_spill] sm:$0xff] }
 0x3e9   : > { %v14140_v41 = vpack.c.bf16 %v18001_v29, %v18000_v59  ;;  %v14146_v17 = vpack.c.bf16 %v18003_v18, %v18002_v21  ;;  %10229 = vmatprep.subr.bf16.mxu1 %v18013_v0  ;;  %v18014_v31 = vld [vmem:[#allocation47_spill] sm:$0xff]  ;;  %10421 = vmatprep.subr.bf16.mxu0 %v18016_v34  ;;  %v18017_v29 = vand.u32 4294901760, %v17941_v54  ;;  %v18018_v21 = vld [vmem:[#allocation74_spill] sm:$0xff]  ;;  %v18025_v10 = vand.u32 4294901760, %v18024_v56  ;;  %v18030_v0 = vld [vmem:[#allocation72_spill] sm:$0xff] }
 0x3ea   : > { %v14159_v47 = vpack.c.bf16 %v18008_v19, %v18007_v52  ;;  %v14165_v55 = vpack.c.bf16 %v18010_v58, %v18009_v40  ;;  %v18019_v18 = vand.u32 4294901760, %v18018_v21  ;;  %v18021_v52 = vand.u32 4294901760, %v18020_v50  ;;  %v18022_v19 = vld [vmem:[#allocation79_spill] sm:$0xff]  ;;  %v18028_v34 = vld [vmem:[#allocation50_spill] sm:$0xff]  ;;  %v18085_v24 = vld [vmem:[#allocation65_spill] sm:$0xff] }
 0x3eb   : > { %v18023_v40 = vand.u32 4294901760, %v18022_v19  ;;  %v14198_v49 = vpack.c.bf16 %v18027_v42, %v18025_v10  ;;  %v18029_v59 = vand.u32 4294901760, %v18028_v34  ;;  %v18031_v54 = vand.u32 4294901760, %v18030_v0  ;;  %v18032_v56 = vld [vmem:[#allocation71_spill] sm:$0xff]  ;;  %v18035_v42 = vld [vmem:[#allocation21_spill] sm:$0xff] }
 0x3ec   : > { %v14186_v44 = vpack.c.bf16 %v18019_v18, %v18017_v29  ;;  %10231 = vmatpush1.bf16.msra.mxu1 %v18032_v56  ;;  %v18034_v10 = vand.u32 4294901760, %v18033_v9  ;;  %v18036_v50 = vand.u32 4294901760, %v18035_v42  ;;  %v18037_v0 = vand.u32 4294901760, %v17885_v48  ;;  %v18045_v48 = vld [vmem:[#allocation125_spill] sm:$0xff]  ;;  %v18080_v56 = vld [vmem:[#allocation40_spill] sm:$0xff] }
 0x3ed   : > { %v14192_v58 = vpack.c.bf16 %v18023_v40, %v18021_v52  ;;  %v14204_v62 = vpack.c.bf16 %v18031_v54, %v18029_v59  ;;  %v18038_v59 = vld [vmem:[#allocation36_spill] sm:$0xff]  ;;  %v18040_v40 = vand.u32 4294901760, %v17888_v57  ;;  %v18041_v54 = vand.u32 4294901760, %v17947_v51  ;;  %10233 = vmatprep.subr.bf16.mxu1 %v10232_v60  ;;  %v18047_v57 = vld [vmem:[#allocation54_spill] sm:$0xff] }
 0x3ee   : > { %v14217_v34 = vpack.c.bf16 %v18036_v50, %v18034_v10  ;;  %v18039_v52 = vand.u32 4294901760, %v18038_v59  ;;  %v18042_v18 = vand.u32 4294901760, %v17948_v53  ;;  %v18043_v9 = vand.u32 4294901760, %v17949_v8  ;;  %v18044_v10 = vld [vmem:[#allocation121_spill] sm:$0xff]  ;;  %v18050_v53 = vld [vmem:[#allocation127_spill] sm:$0xff]  ;;  %v858_v51 = vld [vmem:[#allocation7 + $0x78] sm:$0xff] }
 0x3ef   : > { %v14229_v21 = vpack.c.bf16 %v18041_v54, %v18040_v40  ;;  %10423 = vmatpush1.bf16.msra.mxu0 %v18044_v10  ;;  %v14239_v42 = vmul.f32 %v8238_v43, %v18045_v48  ;;  %v18046_v50 = vld [vmem:[#allocation49_spill] sm:$0xff]  ;;  %v14246_v59 = vmul.f32 %v8510_v6, %v18045_v48  ;;  %v14249_v8 = vmul.f32 %v8782_v13, %v18045_v48  ;;  %v856_v43 = vld [vmem:[#allocation7 + $0x68] sm:$0xff]  ;;  %v18052_v40 = vld [vmem:[#allocation59_spill] sm:$0xff] }
 0x3f0   : > { %v14223_v19 = vpack.c.bf16 %v18039_v52, %v18037_v0  ;;  %v14235_v29 = vpack.c.bf16 %v18043_v9, %v18042_v18  ;;  %10425 = vmatprep.subr.bf16.mxu0 %v10424_v32  ;;  %v14252_v18 = vmul.f32 %v8234_v36, %v18050_v53  ;;  %v14255_v60 = vmul.f32 %v8506_v25, %v18050_v53  ;;  %v872_v52 = vld [vmem:[#allocation7 + $0xe8] sm:$0xff]  ;;  %v18053_v32 = vld [vmem:[#allocation126_spill] sm:$0xff] }
 0x3f1   : > { %18048 = vst [vmem:[#allocation32_spill] sm:$0xff] %v14246_v59  ;;  %18049 = vst [vmem:[#allocation95_spill] sm:$0xff] %v14249_v8  ;;  %5097 = vmatmul.mubr.f32.vlgmr.msra.gmra.mrb[6].mxu1 %v18052_v40  ;;  %v14259_v54 = vmul.f32 %v8778_v45, %v18050_v53  ;;  %v14262_v9 = vmul.f32 %v8242_v1, %v18053_v32  ;;  %v14265_v6 = vmul.f32 %v8514_v39, %v18053_v32  ;;  %v18075_v10 = vld [vmem:[#allocation22_spill] sm:$0xff]  ;;  %v904_v59 = vld [vmem:[#allocation7 + $0x1e8] sm:$0xff] }
 0x3f2   : > { %18051 = vst [vmem:[#allocation16_spill] sm:$0xff] %v14255_v60  ;;  %v14268_v13 = vmul.f32 %v8786_v7, %v18053_v32  ;;  %5952 = vmatmul.mubr.f32.vlgmr.msra.gmra.mrb[6].mxu0 %v18052_v40  ;;  %10235 = vmatpush1.bf16.msra.mxu1 %v10234_v5  ;;  %v18054_v36 = vand.u32 4294901760, %v17950_v27  ;;  %v18055_v25 = vand.u32 4294901760, %v17951_v33  ;;  %v18056_v45 = vand.u32 4294901760, %v17952_v15  ;;  %v874_v5 = vld [vmem:[#allocation7 + $0xf8] sm:$0xff]  ;;  %v887_v60 = vld [vmem:[#allocation7 + $0x160] sm:$0xff] }
 0x3f3   : > { %v18057_v1 = vand.u32 4294901760, %v17953_v11  ;;  %v18058_v39 = vand.u32 4294901760, %v17954_v26  ;;  %v18059_v7 = vand.u32 4294901760, %v17955_v3  ;;  %10427 = vmatpush1.bf16.msra.mxu0 %v10426_v28  ;;  %10237 = vmatprep.subr.bf16.mxu1 %v10236_v12  ;;  %v18060_v33 = vand.u32 4294901760, %v17912_v20  ;;  %v855_v26 = vld [vmem:[#allocation7 + $0x60] sm:$0xff]  ;;  %v18073_v3 = vld [vmem:[#allocation100_spill] sm:$0xff] }
 0x3f4   : > { %v14275_v48 = vpack.c.bf16 %v18055_v25, %v18054_v36  ;;  %v18061_v27 = vand.u32 4294901760, %v17913_v23  ;;  %v6230_v15 = vand.u32 4294901760, %v856_v43  ;;  %v6234_v25 = vand.u32 4294901760, %v872_v52  ;;  %10429 = vmatprep.subr.bf16.mxu0 %v10428_v2  ;;  %v18070_v2 = vld [vmem:[#allocation82_spill] sm:$0xff] }
 0x3f5   : > { %v14281_v53 = vpack.c.bf16 %v18057_v1, %v18056_v45  ;;  %v14287_v32 = vpack.c.bf16 %v18059_v7, %v18058_v39  ;;  %v871_v45 = vld [vmem:[#allocation7 + $0xe0] sm:$0xff]  ;;  %v18062_v28 = vand.u32 4294901760, %v17914_v30  ;;  %v18063_v12 = vand.u32 4294901760, %v17915_v63  ;;  %v18065_v1 = vld [vmem:[#allocation96_spill] sm:$0xff]  ;;  %v890_v8 = vld [vmem:[#allocation7 + $0x178] sm:$0xff] }
 0x3f6   : > { %v14293_v36 = vpack.c.bf16 %v18061_v27, %v18060_v33  ;;  %v18064_v23 = vand.u32 4294901760, %v13558_v46  ;;  %v18066_v39 = vand.u32 4294901760, %v18065_v1  ;;  %v18067_v33 = vmov 0.0   ;;  %v18068_v27 = vld [vmem:[#allocation80_spill] sm:$0xff]  ;;  %v873_v1 = vld [vmem:[#allocation7 + $0xf0] sm:$0xff]  ;;  %10239 = vmatpush1.bf16.msra.mxu1 %v14134_v37  ;;  %v14340_v37 = vpop.permute.xlu0 %8051 }
 0x3f7   : > { %v14303_v20 = vpack.c.bf16 %v18063_v12, %v18062_v28  ;;  %5263 = vmatprep.mubr.f32.mxu1 %v18067_v33  ;;  %v18069_v11 = vand.u32 4294901760, %v18068_v27  ;;  %v18071_v0 = vand.u32 4294901760, %v18070_v2  ;;  %v18074_v30 = vand.u32 4294901760, %v18073_v3  ;;  %6118 = vmatprep.mubr.f32.mxu0 %v18067_v33  ;;  %v888_v33 = vld [vmem:[#allocation7 + $0x168] sm:$0xff]  ;;  %18089 = vst [vmem:[#allocation94_spill] sm:$0xff] %v14340_v37  ;;  %v14357_v37 = vpop.permute.xlu1 %7970 }
 0x3f8   : > { %v14309_v7 = vpack.c.bf16 %v18066_v39, %v18064_v23  ;;  %v18076_v63 = vand.u32 4294901760, %v18075_v10  ;;  %v7085_v46 = vand.u32 4294901760, %v858_v51  ;;  %v7089_v12 = vand.u32 4294901760, %v874_v5  ;;  %v857_v23 = vld [vmem:[#allocation7 + $0x70] sm:$0xff]  ;;  %v18078_v39 = vld [vmem:[#allocation30_spill] sm:$0xff]  ;;  %10431 = vmatpush1.bf16.msra.mxu0 %v14140_v41  ;;  %10241 = vmatprep.subr.bf16.mxu1 %v14146_v17  ;;  %18101 = vst [vmem:[#allocation88_spill] sm:$0xff] %v14357_v37 }
 0x3f9   : > { %v14316_v40 = vpack.c.bf16 %v18071_v0, %v18069_v11  ;;  %v18079_v27 = vand.u32 4294901760, %v18078_v39  ;;  %v18081_v2 = vand.u32 4294901760, %v18080_v56  ;;  %v18083_v11 = vld [vmem:[#allocation58_spill] sm:$0xff]  ;;  %v18086_v10 = vand.u32 4294901760, %v18085_v24  ;;  %v18090_v56 = vld [vmem:[#allocation68_spill] sm:$0xff]  ;;  %10433 = vmatprep.subr.bf16.mxu0 %v14152_v22 }
 0x3fa   : > { %v14322_v28 = vpack.c.bf16 %v18076_v63, %v18074_v30  ;;  %v18084_v3 = vand.u32 4294901760, %v18083_v11  ;;  %v6232_v63 = vand.u32 4294901760, %v855_v26  ;;  %v6236_v35 = vand.u32 4294901760, %v871_v45  ;;  %v18095_v24 = vld [vmem:[#allocation122_spill] sm:$0xff]  ;;  %10243 = vmatpush1.bf16.msra.mxu1 %v14159_v47 }
 0x3fb   : > { %18072 = vst [vmem:[#allocation26_spill] sm:$0xff] %v14316_v40  ;;  %v14330_v0 = vpack.c.bf16 %v18081_v2, %v18079_v27  ;;  %v18091_v39 = vand.u32 4294901760, %v18090_v56  ;;  %v18092_v27 = vld [vmem:[#allocation120_spill] sm:$0xff]  ;;  %v14355_v40 = vpack.c.bf16 %v6234_v25, %v6230_v15  ;;  %v906_v41 = vld [vmem:[#allocation7 + $0x1f8] sm:$0xff]  ;;  %v14360_v17 = vsub.f32 %v856_v43, %v6230_v15  ;;  %v7973_v15 = vpop.permute.xlu0 %7972  ;;  %10245 = vmatprep.subr.bf16.mxu1 %v14186_v44 }
 0x3fc   : > { %18077 = vst [vmem:[#allocation31_spill] sm:$0xff] %v14322_v28  ;;  %v14336_v30 = vpack.c.bf16 %v18086_v10, %v18084_v3  ;;  %v18088_v28 = vld [vmem:[#allocation38_spill] sm:$0xff]  ;;  %v18093_v2 = vand.u32 4294901760, %v18092_v27  ;;  %v18096_v3 = vand.u32 4294901760, %v18095_v24  ;;  %v18097_v10 = vld [vmem:[#allocation123_spill] sm:$0xff]  ;;  %v14362_v56 = vsub.f32 %v872_v52, %v6234_v25  ;;  %v889_v24 = vld [vmem:[#allocation7 + $0x170] sm:$0xff]  ;;  %10435 = vmatpush1.bf16.msra.mxu0 %v14165_v55 }
 0x3fd   : > { %18082 = vst [vmem:[#allocation84_spill] sm:$0xff] %v14330_v0  ;;  %vm8002_vm7 = vcmp.lt.s32.totalorder %v18088_v28, 16  ;;  %18100 = vst [vmem:[#allocation85_spill] sm:$0xff] %v14355_v40  ;;  %v7091_v27 = vand.u32 4294901760, %v873_v1  ;;  %v6238_v40 = vand.u32 4294901760, %v888_v33  ;;  %v14371_v22 = vpack.c.bf16 %v6236_v35, %v6232_v63  ;;  %10437 = vmatprep.subr.bf16.mxu0 %v14192_v58 }
 0x3fe   : > { %18087 = vst [vmem:[#allocation87_spill] sm:$0xff] %v14336_v30  ;;  %v14347_v11 = vpack.c.bf16 %v18093_v2, %v18091_v39  ;;  %v18098_v30 = vand.u32 4294901760, %v18097_v10  ;;  %18102 = vst [vmem:[#allocation18_spill] sm:$0xff] %v14360_v17  ;;  %v7087_v39 = vand.u32 4294901760, %v857_v23  ;;  %v903_v2 = vld [vmem:[#allocation7 + $0x1e0] sm:$0xff]  ;;  %v905_v10 = vld [vmem:[#allocation7 + $0x1f0] sm:$0xff]  ;;  %v14378_v47 = vsub.f32 %v871_v45, %v6236_v35  ;;  %v7975_v17 = vpop.permute.xlu1 %7974  ;;  %10247 = vmatpush1.bf16.msra.mxu1 %v14198_v49 }
 0x3ff   : > { %18103 = vst [vmem:[#allocation24_spill] sm:$0xff] %v14362_v56  ;;  %18107 = vst [vmem:[#allocation66_spill] sm:$0xff] %v14371_v22  ;;  %v7093_v43 = vand.u32 4294901760, %v890_v8  ;;  %v7097_v52 = vand.u32 4294901760, %v906_v41  ;;  %v6240_v25 = vand.u32 4294901760, %v887_v60  ;;  %v6244_v56 = vand.u32 4294901760, %v903_v2  ;;  %10249 = vmatprep.subr.bf16.mxu1 %v14217_v34 }
 0x400   : > { %18094 = vst [vmem:[#allocation98_spill] sm:$0xff] %v14347_v11  ;;  %v14353_v0 = vpack.c.bf16 %v18098_v30, %v18096_v3  ;;  %v14364_v30 = vpack.c.bf16 %v7089_v12, %v7085_v46  ;;  %v14366_v3 = vsub.f32 %v858_v51, %v7085_v46  ;;  %v14369_v11 = vsub.f32 %v874_v5, %v7089_v12 }
 0x401   : > { %v7099_v51 = vand.u32 4294901760, %v905_v10  ;;  %v14376_v46 = vsub.f32 %v855_v26, %v6232_v63  ;;  %18109 = vst [vmem:[#allocation101_spill] sm:$0xff] %v14378_v47  ;;  %v14380_v5 = vpack.c.bf16 %v7091_v27, %v7087_v39  ;;  %v14382_v12 = vsub.f32 %v857_v23, %v7087_v39  ;;  %v936_v23 = vld [vmem:[#allocation7 + $0x2e8] sm:$0xff]  ;;  %10439 = vmatpush1.bf16.msra.mxu0 %v14204_v62  ;;  %v14422_v63 = vld [vmem:[#allocation7 + $0x278] sm:$0xff] }
 0x402   : > { %18099 = vst [vmem:[#allocation78_spill] sm:$0xff] %v14353_v0  ;;  %18104 = vst [vmem:[#allocation29_spill] sm:$0xff] %v14364_v30  ;;  %v6242_v0 = vand.u32 4294901760, %v904_v59  ;;  %v7095_v30 = vand.u32 4294901760, %v889_v24  ;;  %v14384_v22 = vsub.f32 %v873_v1, %v7091_v27  ;;  %v14393_v58 = vpack.c.bf16 %v7097_v52, %v7093_v43  ;;  %10441 = vmatprep.subr.bf16.mxu0 %v14223_v19 }
 0x403   : > { %18105 = vst [vmem:[#allocation55_spill] sm:$0xff] %v14366_v3  ;;  %18106 = vst [vmem:[#allocation64_spill] sm:$0xff] %v14369_v11  ;;  %v14388_v11 = vsub.f32 %v888_v33, %v6238_v40  ;;  %v920_v3 = vld [vmem:[#allocation7 + $0x268] sm:$0xff]  ;;  %v14395_v35 = vsub.f32 %v890_v8, %v7093_v43  ;;  %v14397_v26 = vsub.f32 %v906_v41, %v7097_v52  ;;  %10251 = vmatpush1.bf16.msra.mxu1 %v14229_v21 }
 0x404   : > { %18108 = vst [vmem:[#allocation23_spill] sm:$0xff] %v14376_v46  ;;  %18110 = vst [vmem:[#allocation103_spill] sm:$0xff] %v14380_v5  ;;  %v14386_v55 = vpack.c.bf16 %v6242_v0, %v6238_v40  ;;  %v14390_v44 = vsub.f32 %v904_v59, %v6242_v0  ;;  %v14399_v45 = vsub.f32 %v887_v60, %v6240_v25  ;;  %v14405_v59 = vpop.permute.xlu0 %7976  ;;  %v6246_v0 = vand.u32 4294901760, %v920_v3 }
 0x405   : > { %18111 = vst [vmem:[#allocation53_spill] sm:$0xff] %v14382_v12  ;;  %18112 = vst [vmem:[#allocation104_spill] sm:$0xff] %v14384_v22  ;;  %v8017_v40 = vsel %vm8002_vm7, %v14357_v37, %v7973_v15  ;;  %v14407_v33 = vpack.c.bf16 %v6244_v56, %v6240_v25  ;;  %v14409_v49 = vsub.f32 %v903_v2, %v6244_v56  ;;  %v6250_v2 = vand.u32 4294901760, %v936_v23  ;;  %v14483_v37 = vld [vmem:[#allocation7 + $0x2f0] sm:$0xff] }
 0x406   : > { %18113 = vst [vmem:[#allocation63_spill] sm:$0xff] %v14386_v55  ;;  %18114 = vst [vmem:[#allocation108_spill] sm:$0xff] %v14388_v11  ;;  %v14411_v1 = vpack.c.bf16 %v7099_v51, %v7095_v30  ;;  %v8015_v8 = vsel %vm8002_vm7, %v7975_v17, %v14405_v59  ;;  %v14418_v60 = vsub.f32 %v889_v24, %v7095_v30  ;;  %v14433_v24 = vld [vmem:[#allocation7 + $0x2f8] sm:$0xff]  ;;  %v14437_v30 = vld [vmem:[#allocation7 + $0x2e0] sm:$0xff]  ;;  %10443 = vmatpush1.bf16.msra.mxu0 %v14235_v29 }
 0x407   : > { %18115 = vst [vmem:[#allocation109_spill] sm:$0xff] %v14390_v44  ;;  %18116 = vst [vmem:[#allocation113_spill] sm:$0xff] %v14393_v58  ;;  %v14420_v62 = vsub.f32 %v905_v10, %v7099_v51  ;;  %v18122_v41 = vrot.slane %v14081_v4, %v18011_v61  ;;  %v18123_v39 = vrot.slane %v14081_v4, %v18014_v31  ;;  %v14435_v10 = vld [vmem:[#allocation7 + $0x260] sm:$0xff]  ;;  %10253 = vmatprep.subr.bf16.mxu1 %v14275_v48 }
 0x408   : > { %18117 = vst [vmem:[#allocation114_spill] sm:$0xff] %v14405_v59  ;;  %18118 = vst [vmem:[#allocation117_spill] sm:$0xff] %v14407_v33  ;;  %v18124_v34 = vrot.slane %v14081_v4, %v18015_v16  ;;  %v8016_v43 = vsel %vm8002_vm7, %v7973_v15, %v7975_v17  ;;  %v18125_v52 = vrot.slane %v14075_v14, %v18011_v61  ;;  %v9273_v15 = vld [vmem:[#allocation8 + $0x88] ss:$0 sm:$0xff]  ;;  %v14463_v21 = vpop.permute.xlu0 %8053  ;;  %10445 = vmatprep.subr.bf16.mxu0 %v14281_v53 }
 0x409   : > { %18119 = vst [vmem:[#allocation118_spill] sm:$0xff] %v14411_v1  ;;  %18120 = vst [vmem:[#allocation25_spill] sm:$0xff] %v14418_v60  ;;  %v8214_v56 = vmul.f32 %v18122_v41, %v8015_v8  ;;  %v8486_v27 = vmul.f32 %v18123_v39, %v8015_v8  ;;  %v18126_v51 = vrot.slane %v14075_v14, %v18015_v16  ;;  %10255 = vmatpush1.bf16.msra.mxu1 %v14287_v32 }
 0x40a   : > { %18121 = vst [vmem:[#allocation99_spill] sm:$0xff] %v14420_v62  ;;  %v8758_v19 = vmul.f32 %v18124_v34, %v8015_v8  ;;  %v8212_v25 = vmul.f32 %v18125_v52, %v8017_v40  ;;  %v14448_v4 = vsub.f32 %v920_v3, %v6246_v0  ;;  %v14461_v34 = vstv %s10964_s10  ;;  %v8056_v52 = vpop.permute.xlu1 %8055  ;;  %18132 = vst [vmem:[#allocation106_spill] sm:$0xff] %v14463_v21 }
 0x40b   : > { %v8756_v41 = vmul.f32 %v18126_v51, %v8017_v40  ;;  %v14451_v8 = vadd.f32 %v14262_v9, %v8214_v56  ;;  %v14454_v39 = vadd.f32 %v14265_v6, %v8486_v27  ;;  %18131 = vst [vmem:[#allocation105_spill] sm:$0xff] %v14461_v34  ;;  %v7101_v9 = vand.u32 4294901760, %v14422_v63  ;;  %v14470_v56 = vld [vmem:[#allocation7 + $0x270] sm:$0xff]  ;;  %10447 = vmatpush1.bf16.msra.mxu0 %v14293_v36 }
 0x40c   : > { %18127 = vst [vmem:[#allocation69_spill] sm:$0xff] %v14448_v4  ;;  %v14457_v17 = vadd.f32 %v14268_v13, %v8758_v19  ;;  %v7105_v6 = vand.u32 4294901760, %v14433_v24  ;;  %v6248_v3 = vand.u32 4294901760, %v14435_v10  ;;  %v6252_v13 = vand.u32 4294901760, %v14437_v30  ;;  %10257 = vmatprep.subr.bf16.mxu1 %v14303_v20  ;;  %10449 = vmatprep.subr.bf16.mxu0 %v14309_v7 }
 0x40d   : > { %18128 = vst [vmem:[#allocation73_spill] sm:$0xff] %v14451_v8  ;;  %18129 = vst [vmem:[#allocation89_spill] sm:$0xff] %v14454_v39  ;;  %v18133_v29 = vrot.slane %v14077_v38, %v18011_v61  ;;  %v18134_v27 = vrot.slane %v14075_v14, %v18014_v31  ;;  %v8096_v53 = vsel %vm770_vm3, %v14463_v21, %v8056_v52 }
 0x40e   : > { %18130 = vst [vmem:[#allocation20_spill] sm:$0xff] %v14457_v17  ;;  %v14481_v51 = vpack.c.bf16 %v6250_v2, %v6246_v0  ;;  %v8308_v39 = vadd.f32 %v14252_v18, %v8212_v25  ;;  %v18136_v17 = vrot.slane %v14077_v38, %v18015_v16  ;;  %v18139_v0 = vrot.slane %v14075_v14, %v18047_v57  ;;  %v9274_v18 = vld [vmem:[#allocation8 + $0x90] ss:$0 sm:$0xff] }
 0x40f   : > { %v8213_v48 = vmul.f32 %v18133_v29, %v8016_v43  ;;  %v8484_v19 = vmul.f32 %v18134_v27, %v8017_v40  ;;  %v18137_v29 = vrot.slane %v14075_v14, %v18046_v50  ;;  %v14493_v40 = vsub.f32 %v936_v23, %v6250_v2  ;;  %v14505_v2 = vpop.permute.xlu0 %8057 }
 0x410   : > { %18135 = vst [vmem:[#allocation110_spill] sm:$0xff] %v14481_v51  ;;  %v8757_v8 = vmul.f32 %v18136_v17, %v8016_v43  ;;  %v8852_v27 = vadd.f32 %v14259_v54, %v8756_v41  ;;  %v8660_v21 = vmul.f32 %v18139_v0, %v8096_v53  ;;  %v8932_v61 = vmul.f32 %v9273_v15, %v8096_v53  ;;  %v18143_v41 = vld [vmem:[#allocation16_spill] sm:$0xff]  ;;  %v18146_v0 = vld [vmem:[#allocation26_spill] sm:$0xff] }
 0x411   : > { %v8388_v59 = vmul.f32 %v18137_v29, %v8096_v53  ;;  %18138 = vst [vmem:[#allocation115_spill] sm:$0xff] %v14493_v40  ;;  %v7103_v25 = vand.u32 4294901760, %v14470_v56  ;;  %v18140_v17 = vrot.slane %v14077_v38, %v18014_v31  ;;  %18141 = vst [vmem:[#allocation74_spill] sm:$0xff] %v14505_v2  ;;  %v14509_v14 = vsub.f32 %v14422_v63, %v7101_v9  ;;  %v999_v31 = vld [vmem:[#allocation7 + $0x4e0] sm:$0xff] }
 0x412   : > { %v7107_v54 = vand.u32 4294901760, %v14483_v37  ;;  %v8309_v36 = vadd.f32 %v14239_v42, %v8213_v48  ;;  %v8580_v20 = vadd.f32 %v18143_v41, %v8484_v19  ;;  %v8948_v15 = vadd.f32 %v8932_v61, %v8852_v27  ;;  %10259 = vmatpush1.bf16.msra.mxu1 %v18146_v0  ;;  %v18148_v48 = vld [vmem:[#allocation31_spill] sm:$0xff]  ;;  %v18149_v19 = vld [vmem:[#allocation84_spill] sm:$0xff] }
 0x413   : > { %v8485_v32 = vmul.f32 %v18140_v17, %v8016_v43  ;;  %v8404_v23 = vadd.f32 %v8388_v59, %v8308_v39  ;;  %18142 = vst [vmem:[#allocation77_spill] sm:$0xff] %v14509_v14  ;;  %v8095_v53 = vsel %vm770_vm3, %v8056_v52, %v14505_v2  ;;  %v18144_v43 = vld [vmem:[#allocation95_spill] sm:$0xff]  ;;  %v18145_v7 = vrot.slane %v14077_v38, %v18046_v50  ;;  %v986_v2 = vld [vmem:[#allocation7 + $0x478] sm:$0xff] }
 0x414   : > { %v8853_v59 = vadd.f32 %v18144_v43, %v8757_v8  ;;  %v8933_v63 = vmul.f32 %v9274_v18, %v8095_v53  ;;  %v8676_v17 = vadd.f32 %v8660_v21, %v8580_v20  ;;  %v8996_v16 = vrot.slane %v8948_v15, 7  ;;  %10451 = vmatpush1.bf16.msra.mxu0 %v18148_v48  ;;  %10261 = vmatprep.subr.bf16.mxu1 %v18149_v19  ;;  %v18152_v18 = vld [vmem:[#allocation87_spill] sm:$0xff]  ;;  %v18154_v20 = vld [vmem:[#allocation32_spill] sm:$0xff]  ;;  %v18162_v19 = vld [vmem:[#allocation37_spill] sm:$0xff] }
 0x415   : > { %v8964_v39 = vrot.slane %v8404_v23, 1  ;;  %v8389_v29 = vmul.f32 %v18145_v7, %v8095_v53  ;;  %v18147_v42 = vrot.slane %v14077_v38, %v18047_v57  ;;  %v14527_v52 = vpack.c.bf16 %v7105_v6, %v7101_v9  ;;  %10453 = vmatprep.subr.bf16.mxu0 %v18152_v18  ;;  %v952_v9 = vld [vmem:[#allocation7 + $0x368] sm:$0xff]  ;;  %v967_v48 = vld [vmem:[#allocation7 + $0x3e0] sm:$0xff]  ;;  %v1002_v57 = vld [vmem:[#allocation7 + $0x4f8] sm:$0xff] }
 0x416   : > { %v8949_v41 = vadd.f32 %v8933_v63, %v8853_v59  ;;  %v14533_v21 = vsub.f32 %v14433_v24, %v7105_v6  ;;  %v8581_v15 = vadd.f32 %v18154_v20, %v8485_v32  ;;  %v14539_v43 = vsub.f32 %v14435_v10, %v6248_v3  ;;  %v968_v7 = vld [vmem:[#allocation7 + $0x3e8] sm:$0xff]  ;;  %v954_v6 = vld [vmem:[#allocation7 + $0x378] sm:$0xff]  ;;  %v983_v50 = vld [vmem:[#allocation7 + $0x460] sm:$0xff] }
 0x417   : > { %v8661_v61 = vmul.f32 %v18147_v42, %v8095_v53  ;;  %18150 = vst [vmem:[#allocation79_spill] sm:$0xff] %v14527_v52  ;;  %v8980_v27 = vsel %vm827_vm4, %v8964_v39, 0.0  ;;  %v8405_v23 = vadd.f32 %v8389_v29, %v8309_v36  ;;  %v14536_v53 = vpack.c.bf16 %v6252_v13, %v6248_v3  ;;  %v18157_v29 = vld [vmem:[#allocation98_spill] sm:$0xff]  ;;  %v18160_v10 = vld [vmem:[#allocation92_spill] sm:$0xff]  ;;  %v951_v42 = vld [vmem:[#allocation7 + $0x360] sm:$0xff] }
 0x418   : > { %18153 = vst [vmem:[#allocation41_spill] sm:$0xff] %v14533_v21  ;;  %v9028_v38 = vadd.f32 %v8980_v27, %v8676_v17  ;;  %18156 = vst [vmem:[#allocation50_spill] sm:$0xff] %v14539_v43  ;;  %v9012_v36 = vsel %vm830_vm5, %v8996_v16, 0.0  ;;  %v8997_v39 = vrot.slane %v8949_v41, 7  ;;  %10263 = vmatpush1.bf16.msra.mxu1 %v18157_v29  ;;  %v14545_v24 = vsub.f32 %v14437_v30, %v6252_v13  ;;  %v970_v32 = vld [vmem:[#allocation7 + $0x3f8] sm:$0xff]  ;;  %v18164_v18 = vld [vmem:[#allocation56_spill] sm:$0xff] }
 0x419   : > { %18155 = vst [vmem:[#allocation52_spill] sm:$0xff] %v14536_v53  ;;  %v8965_v59 = vrot.slane %v8405_v23, 1  ;;  %v8677_v0 = vadd.f32 %v8661_v61, %v8581_v15  ;;  %v18159_v17 = vld [vmem:[#allocation78_spill] sm:$0xff]  ;;  %10265 = vmatprep.subr.bf16.mxu1 %v18160_v10  ;;  %v14549_v3 = vpack.c.bf16 %v7107_v54, %v7103_v25  ;;  %v14556_v30 = vsub.f32 %v14470_v56, %v7103_v25  ;;  %v953_v61 = vld [vmem:[#allocation7 + $0x370] sm:$0xff]  ;;  %v18168_v10 = vld [vmem:[#allocation28_spill] sm:$0xff] }
 0x41a   : > { %18158 = vst [vmem:[#allocation72_spill] sm:$0xff] %v14545_v24  ;;  %v9044_v63 = vadd.f32 %v9028_v38, %v9012_v36  ;;  %10455 = vmatpush1.bf16.msra.mxu0 %v18159_v17  ;;  %v6254_v13 = vand.u32 4294901760, %v952_v9  ;;  %v6258_v27 = vand.u32 4294901760, %v968_v7  ;;  %v7109_v20 = vand.u32 4294901760, %v954_v6  ;;  %v969_v38 = vld [vmem:[#allocation7 + $0x3f0] sm:$0xff]  ;;  %v18167_v17 = vld [vmem:[#allocation15_spill] sm:$0xff] }
 0x41b   : > { %18161 = vst [vmem:[#allocation19_spill] sm:$0xff] %v14549_v3  ;;  %v8981_v16 = vsel %vm827_vm4, %v8965_v59, 0.0  ;;  %10457 = vmatprep.subr.bf16.mxu0 %v18162_v19  ;;  %18163 = vst [vmem:[#allocation21_spill] sm:$0xff] %v14556_v30  ;;  %5265 = vmatmul.mubr.f32.vlgmr.msra.gmra.mrb[6].mxu1 %v18164_v18  ;;  %v7113_v15 = vand.u32 4294901760, %v970_v32  ;;  %v9013_v36 = vsel %vm830_vm5, %v8997_v39, 0.0  ;;  %v18165_v59 = vld [vmem:[#allocation75_spill] sm:$0xff]  ;;  %v14565_v56 = vsub.f32 %v14483_v37, %v7107_v54 }
 0x41c   : > { %v9029_v23 = vadd.f32 %v8981_v16, %v8677_v0  ;;  %v9064_v41 = vadd.f32 %v14461_v34, %v9044_v63  ;;  %10267 = vmatpush1.bf16.msra.mxu1 %v18165_v59  ;;  %v6256_v25 = vand.u32 4294901760, %v951_v42  ;;  %v6260_v29 = vand.u32 4294901760, %v967_v48  ;;  %v18169_v19 = vld [vmem:[#allocation62_spill] sm:$0xff] }
 0x41d   : > { %6120 = vmatmul.mubr.f32.vlgmr.msra.gmra.mrb[6].mxu0 %v18164_v18  ;;  %18166 = vst [vmem:[#allocation36_spill] sm:$0xff] %v14565_v56  ;;  %10269 = vmatprep.subr.bf16.mxu1 %v18168_v10  ;;  %v7111_v16 = vand.u32 4294901760, %v953_v61  ;;  %v18170_v39 = vmov 0.0   ;;  %v14571_v8 = vpack.c.bf16 %v6258_v27, %v6254_v13  ;;  %v14573_v59 = vsub.f32 %v952_v9, %v6254_v13  ;;  %v18176_v9 = vld [vmem:[#allocation67_spill] sm:$0xff]  ;;  %v18219_v30 = vld [vmem:[#allocation42_spill] sm:$0xff] }
 0x41e   : > { %v9045_v0 = vadd.f32 %v9029_v23, %v9013_v36  ;;  %vm9080_vm8 = vcmp.ge.f32.partialorder %v9064_v41, 0.0  ;;  %v9096_v63 = vmul.f32 0.4, %v9064_v41  ;;  %10459 = vmatpush1.bf16.msra.mxu0 %v18167_v17  ;;  %5367 = vmatprep.mubr.f32.mxu1 %v18170_v39  ;;  %v14575_v37 = vsub.f32 %v968_v7, %v6258_v27  ;;  %v984_v23 = vld [vmem:[#allocation7 + $0x468] sm:$0xff] }
 0x41f   : > { %10461 = vmatprep.subr.bf16.mxu0 %v18169_v19  ;;  %18171 = vst [vmem:[#allocation125_spill] sm:$0xff] %v14571_v8  ;;  %18172 = vst [vmem:[#allocation127_spill] sm:$0xff] %v14573_v59  ;;  %v7115_v54 = vand.u32 4294901760, %v969_v38  ;;  %v1000_v36 = vld [vmem:[#allocation7 + $0x4e8] sm:$0xff]  ;;  %6222 = vmatprep.mubr.f32.mxu0 %v18170_v39  ;;  %v14579_v10 = vpack.c.bf16 %v7113_v15, %v7109_v20  ;;  %v14581_v19 = vsub.f32 %v954_v6, %v7109_v20  ;;  %v985_v6 = vld [vmem:[#allocation7 + $0x470] sm:$0xff] }
 0x420   : > { %18173 = vst [vmem:[#allocation126_spill] sm:$0xff] %v14575_v37  ;;  %v9065_v17 = vadd.f32 %v14461_v34, %v9045_v0  ;;  %v9112_v28 = vsel %vm9080_vm8, %v9064_v41, %v9096_v63  ;;  %10271 = vmatpush1.bf16.msra.mxu1 %v18176_v9  ;;  %v14589_v7 = vsub.f32 %v970_v32, %v7113_v15  ;;  %v1001_v20 = vld [vmem:[#allocation7 + $0x4f0] sm:$0xff]  ;;  %v1016_v0 = vld [vmem:[#allocation7 + $0x568] sm:$0xff]  ;;  %v18181_v34 = vld [vmem:[#allocation102_spill] sm:$0xff]  ;;  %v6266_v9 = vand.u32 4294901760, %v1000_v36 }
 0x421   : > { %18174 = vst [vmem:[#allocation96_spill] sm:$0xff] %v14579_v10  ;;  %18175 = vst [vmem:[#allocation80_spill] sm:$0xff] %v14581_v19  ;;  %v14591_v13 = vpack.c.bf16 %v6260_v29, %v6256_v25  ;;  %v14593_v27 = vsub.f32 %v951_v42, %v6256_v25  ;;  %v14595_v41 = vsub.f32 %v967_v48, %v6260_v29  ;;  %v18182_v19 = vld [vmem:[#allocation60_spill] sm:$0xff]  ;;  %v18183_v15 = vld [vmem:[#allocation107_spill] sm:$0xff]  ;;  %v7117_v48 = vand.u32 4294901760, %v986_v2 }
 0x422   : > { %9128 = vst [vmem:[%s14585_s12 + $0x8] sm:$0xff] %v9112_v28  ;;  %18177 = vst [vmem:[#allocation82_spill] sm:$0xff] %v14589_v7  ;;  %vm9081_vm9 = vcmp.ge.f32.partialorder %v9065_v17, 0.0  ;;  %v9097_v63 = vmul.f32 0.4, %v9065_v17  ;;  %10463 = vmatpush1.bf16.msra.mxu0 %v18181_v34  ;;  %10273 = vmatprep.subr.bf16.mxu1 %v18182_v19  ;;  %v6262_v28 = vand.u32 4294901760, %v984_v23  ;;  %v14602_v42 = vsub.f32 %v953_v61, %v7111_v16 }
 0x423   : > { %18178 = vst [vmem:[#allocation100_spill] sm:$0xff] %v14591_v13  ;;  %18179 = vst [vmem:[#allocation22_spill] sm:$0xff] %v14593_v27  ;;  %v1032_v32 = vld [vmem:[#allocation7 + $0x5e8] sm:$0xff]  ;;  %10465 = vmatprep.subr.bf16.mxu0 %v18183_v15  ;;  %v14600_v13 = vpack.c.bf16 %v7115_v54, %v7111_v16  ;;  %v7121_v25 = vand.u32 4294901760, %v1002_v57  ;;  %v6264_v27 = vand.u32 4294901760, %v983_v50  ;;  %v6268_v7 = vand.u32 4294901760, %v999_v31 }
 0x424   : > { %18180 = vst [vmem:[#allocation30_spill] sm:$0xff] %v14595_v41  ;;  %18185 = vst [vmem:[#allocation58_spill] sm:$0xff] %v14602_v42  ;;  %v9113_v29 = vsel %vm9081_vm9, %v9065_v17, %v9097_v63  ;;  %v14604_v41 = vsub.f32 %v969_v38, %v7115_v54  ;;  %v1018_v34 = vld [vmem:[#allocation7 + $0x578] sm:$0xff]  ;;  %v18187_v19 = vld [vmem:[#allocation111_spill] sm:$0xff]  ;;  %v7119_v8 = vand.u32 4294901760, %v985_v6  ;;  %v7123_v3 = vand.u32 4294901760, %v1001_v20 }
 0x425   : > { %18184 = vst [vmem:[#allocation40_spill] sm:$0xff] %v14600_v13  ;;  %v1034_v10 = vld [vmem:[#allocation7 + $0x5f8] sm:$0xff]  ;;  %9129 = vst [vmem:[%s14585_s12 + $0x10] sm:$0xff] %v9113_v29  ;;  %10275 = vmatpush1.bf16.msra.mxu1 %v18187_v19  ;;  %v6270_v37 = vand.u32 4294901760, %v1016_v0  ;;  %v6274_v15 = vand.u32 4294901760, %v1032_v32  ;;  %v18188_v59 = vld [vmem:[#allocation116_spill] sm:$0xff]  ;;  %v14610_v16 = vpack.c.bf16 %v6266_v9, %v6262_v28  ;;  %v14612_v17 = vsub.f32 %v984_v23, %v6262_v28 }
 0x426   : > { %18186 = vst [vmem:[#allocation65_spill] sm:$0xff] %v14604_v41  ;;  %10467 = vmatpush1.bf16.msra.mxu0 %v18188_v59  ;;  %v18189_v61 = vld [vmem:[#allocation17_spill] sm:$0xff]  ;;  %v14614_v38 = vsub.f32 %v1000_v36, %v6266_v9  ;;  %v14617_v63 = vpack.c.bf16 %v7121_v25, %v7117_v48  ;;  %v14619_v29 = vsub.f32 %v986_v2, %v7117_v48  ;;  %v7125_v19 = vand.u32 4294901760, %v1018_v34  ;;  %v1015_v42 = vld [vmem:[#allocation7 + $0x560] sm:$0xff]  ;;  %v1048_v9 = vld [vmem:[#allocation7 + $0x668] sm:$0xff] }
 0x427   : > { %10277 = vmatprep.subr.bf16.mxu1 %v18189_v61  ;;  %18190 = vst [vmem:[#allocation68_spill] sm:$0xff] %v14610_v16  ;;  %18191 = vst [vmem:[#allocation120_spill] sm:$0xff] %v14612_v17  ;;  %v18193_v54 = vld [vmem:[#allocation93_spill] sm:$0xff]  ;;  %v7129_v41 = vand.u32 4294901760, %v1034_v10  ;;  %v1031_v13 = vld [vmem:[#allocation7 + $0x5e0] sm:$0xff]  ;;  %v14621_v56 = vsub.f32 %v1002_v57, %v7121_v25  ;;  %v14623_v59 = vpack.c.bf16 %v6268_v7, %v6264_v27 }
 0x428   : > { %18192 = vst [vmem:[#allocation122_spill] sm:$0xff] %v14614_v38  ;;  %10469 = vmatprep.subr.bf16.mxu0 %v18193_v54  ;;  %18194 = vst [vmem:[#allocation123_spill] sm:$0xff] %v14617_v63  ;;  %v14625_v61 = vsub.f32 %v983_v50, %v6264_v27  ;;  %v14627_v23 = vsub.f32 %v999_v31, %v6268_v7  ;;  %v1017_v36 = vld [vmem:[#allocation7 + $0x570] sm:$0xff]  ;;  %v14630_v38 = vpack.c.bf16 %v7123_v3, %v7119_v8  ;;  %v1064_v57 = vld [vmem:[#allocation7 + $0x6e8] sm:$0xff] }
 0x429   : > { %18195 = vst [vmem:[#allocation16_spill] sm:$0xff] %v14619_v29  ;;  %18196 = vst [vmem:[#allocation95_spill] sm:$0xff] %v14621_v56  ;;  %v1033_v28 = vld [vmem:[#allocation7 + $0x5f0] sm:$0xff]  ;;  %v14632_v2 = vsub.f32 %v985_v6, %v7119_v8  ;;  %v14634_v48 = vsub.f32 %v1001_v20, %v7123_v3  ;;  %v14636_v29 = vpack.c.bf16 %v6274_v15, %v6270_v37  ;;  %v1050_v25 = vld [vmem:[#allocation7 + $0x678] sm:$0xff] }
 0x42a   : > { %18197 = vst [vmem:[#allocation26_spill] sm:$0xff] %v14623_v59  ;;  %18198 = vst [vmem:[#allocation31_spill] sm:$0xff] %v14625_v61  ;;  %v18200_v54 = vld [vmem:[#allocation81_spill] sm:$0xff]  ;;  %v1066_v56 = vld [vmem:[#allocation7 + $0x6f8] sm:$0xff]  ;;  %v14640_v7 = vsub.f32 %v1016_v0, %v6270_v37  ;;  %v14642_v27 = vsub.f32 %v1032_v32, %v6274_v15  ;;  %v14645_v3 = vpack.c.bf16 %v7129_v41, %v7125_v19  ;;  %v7133_v37 = vand.u32 4294901760, %v1050_v25 }
 0x42b   : > { %18199 = vst [vmem:[#allocation84_spill] sm:$0xff] %v14627_v23  ;;  %10279 = vmatpush1.bf16.msra.mxu1 %v18200_v54  ;;  %18201 = vst [vmem:[#allocation87_spill] sm:$0xff] %v14630_v38  ;;  %v18205_v50 = vld [vmem:[#allocation70_spill] sm:$0xff]  ;;  %v6272_v54 = vand.u32 4294901760, %v1015_v42  ;;  %v6276_v23 = vand.u32 4294901760, %v1031_v13  ;;  %v1047_v61 = vld [vmem:[#allocation7 + $0x660] sm:$0xff]  ;;  %v14647_v20 = vsub.f32 %v1018_v34, %v7125_v19  ;;  %v14650_v15 = vsub.f32 %v1034_v10, %v7129_v41 }
 0x42c   : > { %18202 = vst [vmem:[#allocation32_spill] sm:$0xff] %v14632_v2  ;;  %18203 = vst [vmem:[#allocation98_spill] sm:$0xff] %v14634_v48  ;;  %10471 = vmatpush1.bf16.msra.mxu0 %v18205_v50  ;;  %v18206_v31 = vld [vmem:[#allocation86_spill] sm:$0xff]  ;;  %v1063_v8 = vld [vmem:[#allocation7 + $0x6e0] sm:$0xff]  ;;  %v7127_v48 = vand.u32 4294901760, %v1017_v36  ;;  %v7131_v2 = vand.u32 4294901760, %v1033_v28 }
 0x42d   : > { %18204 = vst [vmem:[#allocation78_spill] sm:$0xff] %v14636_v29  ;;  %10281 = vmatprep.subr.bf16.mxu1 %v18206_v31  ;;  %18207 = vst [vmem:[#allocation92_spill] sm:$0xff] %v14640_v7  ;;  %v18209_v6 = vld [vmem:[#allocation33_spill] sm:$0xff]  ;;  %v6278_v29 = vand.u32 4294901760, %v1048_v9  ;;  %v6282_v31 = vand.u32 4294901760, %v1064_v57  ;;  %v7137_v0 = vand.u32 4294901760, %v1066_v56  ;;  %v14656_v19 = vpack.c.bf16 %v6276_v23, %v6272_v54 }
 0x42e   : > { %18208 = vst [vmem:[#allocation37_spill] sm:$0xff] %v14642_v27  ;;  %10473 = vmatprep.subr.bf16.mxu0 %v18209_v6  ;;  %18210 = vst [vmem:[#allocation75_spill] sm:$0xff] %v14645_v3  ;;  %v1049_v17 = vld [vmem:[#allocation7 + $0x670] sm:$0xff]  ;;  %v18212_v32 = vld [vmem:[#allocation91_spill] sm:$0xff]  ;;  %v14652_v27 = vsub.f32 %v1015_v42, %v6272_v54  ;;  %v6280_v7 = vand.u32 4294901760, %v1047_v61  ;;  %v6284_v6 = vand.u32 4294901760, %v1063_v8  ;;  %v14661_v10 = vpack.c.bf16 %v7131_v2, %v7127_v48 }
 0x42f   : > { %18211 = vst [vmem:[#allocation15_spill] sm:$0xff] %v14647_v20  ;;  %v1065_v50 = vld [vmem:[#allocation7 + $0x6f0] sm:$0xff]  ;;  %10283 = vmatpush1.bf16.msra.mxu1 %v18212_v32  ;;  %18213 = vst [vmem:[#allocation28_spill] sm:$0xff] %v14650_v15  ;;  %v18215_v38 = vld [vmem:[#allocation39_spill] sm:$0xff]  ;;  %v14658_v20 = vsub.f32 %v1031_v13, %v6276_v23  ;;  %v7135_v3 = vand.u32 4294901760, %v1049_v17  ;;  %v14663_v41 = vsub.f32 %v1017_v36, %v7127_v48 }
 0x430   : > { %18214 = vst [vmem:[#allocation62_spill] sm:$0xff] %v14652_v27  ;;  %10475 = vmatpush1.bf16.msra.mxu0 %v18215_v38  ;;  %v18216_v34 = vld [vmem:[#allocation83_spill] sm:$0xff]  ;;  %18217 = vst [vmem:[#allocation67_spill] sm:$0xff] %v14656_v19  ;;  %v7139_v59 = vand.u32 4294901760, %v1065_v50  ;;  %v1080_v63 = vld [vmem:[#allocation7 + $0x768] sm:$0xff]  ;;  %v14665_v42 = vsub.f32 %v1033_v28, %v7131_v2  ;;  %v14667_v32 = vsub.f32 %v1048_v9, %v6278_v29 }
 0x431   : > { %10285 = vmatprep.subr.bf16.mxu1 %v18216_v34  ;;  %18218 = vst [vmem:[#allocation102_spill] sm:$0xff] %v14658_v20  ;;  %v1096_v16 = vld [vmem:[#allocation7 + $0x7e8] sm:$0xff]  ;;  %10477 = vmatprep.subr.bf16.mxu0 %v18219_v30  ;;  %18220 = vst [vmem:[#allocation60_spill] sm:$0xff] %v14661_v10  ;;  %v1082_v38 = vld [vmem:[#allocation7 + $0x778] sm:$0xff]  ;;  %v14669_v34 = vpack.c.bf16 %v6282_v31, %v6278_v29  ;;  %v14671_v54 = vsub.f32 %v1064_v57, %v6282_v31  ;;  %v6286_v28 = vand.u32 4294901760, %v1080_v63 }
 0x432   : > { %18221 = vst [vmem:[#allocation107_spill] sm:$0xff] %v14663_v41  ;;  %18222 = vst [vmem:[#allocation111_spill] sm:$0xff] %v14665_v42  ;;  %v14673_v13 = vpack.c.bf16 %v7137_v0, %v7133_v37  ;;  %v14675_v23 = vsub.f32 %v1050_v25, %v7133_v37  ;;  %v1098_v20 = vld [vmem:[#allocation7 + $0x7f8] sm:$0xff]  ;;  %v18225_v27 = vld [vmem:[#allocation112_spill] sm:$0xff]  ;;  %v14678_v30 = vsub.f32 %v1066_v56, %v7137_v0  ;;  %v6290_v2 = vand.u32 4294901760, %v1096_v16 }
 0x433   : > { %18223 = vst [vmem:[#allocation116_spill] sm:$0xff] %v14669_v34  ;;  %10287 = vmatpush1.bf16.msra.mxu1 %v18225_v27  ;;  %v14680_v36 = vpack.c.bf16 %v6284_v6, %v6280_v7  ;;  %v18227_v9 = vld [vmem:[#allocation119_spill] sm:$0xff]  ;;  %v14684_v29 = vsub.f32 %v1047_v61, %v6280_v7  ;;  %v14686_v57 = vsub.f32 %v1063_v8, %v6284_v6  ;;  %v7141_v25 = vand.u32 4294901760, %v1082_v38  ;;  %v18231_v37 = vld [vmem:[#allocation90_spill] sm:$0xff]  ;;  %v18235_v7 = vld [vmem:[#allocation64_spill] sm:$0xff] }
 0x434   : > { %18224 = vst [vmem:[#allocation17_spill] sm:$0xff] %v14673_v13  ;;  %10479 = vmatpush1.bf16.msra.mxu0 %v18227_v9  ;;  %v18228_v48 = vld [vmem:[#allocation35_spill] sm:$0xff]  ;;  %v14688_v31 = vpack.c.bf16 %v7139_v59, %v7135_v3  ;;  %v14691_v27 = vsub.f32 %v1049_v17, %v7135_v3  ;;  %v14693_v56 = vsub.f32 %v1065_v50, %v7139_v59  ;;  %v7145_v0 = vand.u32 4294901760, %v1098_v20  ;;  %v18232_v42 = vld [vmem:[#allocation18_spill] sm:$0xff]  ;;  %v18233_v9 = vld [vmem:[#allocation24_spill] sm:$0xff] }
 0x435   : > { %18226 = vst [vmem:[#allocation93_spill] sm:$0xff] %v14680_v36  ;;  %10289 = vmatprep.subr.bf16.mxu1 %v18228_v48  ;;  %18229 = vst [vmem:[#allocation81_spill] sm:$0xff] %v14686_v57  ;;  %10481 = vmatprep.subr.bf16.mxu0 %v18231_v37  ;;  %v1079_v15 = vld [vmem:[#allocation7 + $0x760] sm:$0xff]  ;;  %v14701_v57 = vpack.c.bf16 %v6290_v2, %v6286_v28  ;;  %v18238_v50 = vld [vmem:[#allocation97_spill] sm:$0xff]  ;;  %v14708_v36 = vsub.f32 %v1080_v63, %v6286_v28 }
 0x436   : > { %18230 = vst [vmem:[#allocation70_spill] sm:$0xff] %v14688_v31  ;;  %v18234_v48 = vld [vmem:[#allocation55_spill] sm:$0xff]  ;;  %v18236_v31 = vld [vmem:[#allocation76_spill] sm:$0xff]  ;;  %v14710_v61 = vsub.f32 %v1096_v16, %v6290_v2  ;;  %v14715_v41 = vpack.c.bf16 %v7145_v0, %v7141_v25  ;;  %v14717_v17 = vsub.f32 %v1082_v38, %v7141_v25  ;;  %v6288_v3 = vand.u32 4294901760, %v1079_v15  ;;  %v1097_v28 = vld [vmem:[#allocation7 + $0x7f0] sm:$0xff] }
 0x437   : > { %10291 = vmatpush1.bf16.msra.mxu1 %v18236_v31  ;;  %18237 = vst [vmem:[#allocation86_spill] sm:$0xff] %v14701_v57  ;;  %v18239_v37 = vld [vmem:[#allocation27_spill] sm:$0xff]  ;;  %18240 = vst [vmem:[#allocation33_spill] sm:$0xff] %v14708_v36  ;;  %v18242_v8 = vld [vmem:[#allocation48_spill] sm:$0xff]  ;;  %v18246_v16 = vand.u32 4294901760, %v18233_v9  ;;  %v18248_v31 = vand.u32 4294901760, %v18235_v7 }
 0x438   : > { %10483 = vmatpush1.bf16.msra.mxu0 %v18238_v50  ;;  %10293 = vmatprep.subr.bf16.mxu1 %v18239_v37  ;;  %18241 = vst [vmem:[#allocation91_spill] sm:$0xff] %v14710_v61  ;;  %18243 = vst [vmem:[#allocation39_spill] sm:$0xff] %v14715_v41  ;;  %v1095_v59 = vld [vmem:[#allocation7 + $0x7e0] sm:$0xff]  ;;  %v1081_v57 = vld [vmem:[#allocation7 + $0x770] sm:$0xff]  ;;  %v18245_v50 = vand.u32 4294901760, %v18232_v42  ;;  %v18247_v37 = vand.u32 4294901760, %v18234_v48 }
 0x439   : > { %10485 = vmatprep.subr.bf16.mxu0 %v18242_v8  ;;  %18244 = vst [vmem:[#allocation83_spill] sm:$0xff] %v14717_v17  ;;  %v6353_v2 = vsub.f32 %v18233_v9, %v18246_v16  ;;  %v7208_v38 = vsub.f32 %v18235_v7, %v18248_v31  ;;  %v18249_v25 = vand.u32 4294901760, %v14376_v46  ;;  %v18250_v17 = vld [vmem:[#allocation71_spill] sm:$0xff]  ;;  %v18253_v9 = vand.u32 4294901760, %v14382_v12  ;;  %v18255_v7 = vld [vmem:[#allocation121_spill] sm:$0xff] }
 0x43a   : > { %v6341_v63 = vsub.f32 %v18232_v42, %v18245_v50  ;;  %v7196_v8 = vsub.f32 %v18234_v48, %v18247_v37  ;;  %v14735_v50 = vsub.f32 %v1098_v20, %v7145_v0  ;;  %v18252_v42 = vand.u32 4294901760, %v14378_v47  ;;  %v18256_v61 = vld [vmem:[#allocation85_spill] sm:$0xff] }
 0x43b   : > { %v6347_v6 = vsub.f32 %v14376_v46, %v18249_v25  ;;  %10295 = vmatpush1.bf16.msra.mxu1 %v18250_v17  ;;  %v7202_v37 = vsub.f32 %v14382_v12, %v18253_v9  ;;  %v18254_v48 = vand.u32 4294901760, %v14384_v22  ;;  %v6292_v25 = vand.u32 4294901760, %v1095_v59  ;;  %v18259_v46 = vld [vmem:[#allocation29_spill] sm:$0xff] }
 0x43c   : > { %18251 = vst [vmem:[#allocation42_spill] sm:$0xff] %v14735_v50  ;;  %v6359_v16 = vsub.f32 %v14378_v47, %v18252_v42  ;;  %10487 = vmatpush1.bf16.msra.mxu0 %v18255_v7  ;;  %10489 = vmatprep.subr.bf16.mxu1 %v18256_v61  ;;  %v7143_v17 = vand.u32 4294901760, %v1081_v57  ;;  %v18257_v20 = vand.u32 4294901760, %v14388_v11  ;;  %v18258_v42 = vand.u32 4294901760, %v14390_v44 }
 0x43d   : > { %v7214_v31 = vsub.f32 %v14384_v22, %v18254_v48  ;;  %10681 = vmatprep.subr.bf16.mxu0 %v18259_v46  ;;  %v7147_v9 = vand.u32 4294901760, %v1097_v28  ;;  %v6342_v12 = vand.u32 4294901760, %v6341_v63  ;;  %v16846_v48 = vand.u32 4294901760, %v14395_v35 }
 0x43e   : > { %v6365_v0 = vsub.f32 %v14388_v11, %v18257_v20  ;;  %v6377_v47 = vsub.f32 %v14390_v44, %v18258_v42  ;;  %5369 = vmatmul.mubr.f32.vlgmr.msra.gmra.mrb[6].mxu1 %v18164_v18  ;;  %v6354_v61 = vand.u32 4294901760, %v6353_v2  ;;  %v7197_v22 = vand.u32 4294901760, %v7196_v8  ;;  %v18260_v20 = vld [vmem:[#allocation66_spill] sm:$0xff] }
 0x43f   : > { %v7209_v50 = vand.u32 4294901760, %v7208_v38  ;;  %v6348_v36 = vand.u32 4294901760, %v6347_v6  ;;  %6224 = vmatmul.mubr.f32.vlgmr.msra.gmra.mrb[6].mxu0 %v18164_v18  ;;  %10491 = vmatpush1.bf16.msra.mxu1 %v18260_v20  ;;  %v6360_v11 = vand.u32 4294901760, %v6359_v16  ;;  %v7203_v42 = vand.u32 4294901760, %v7202_v37 }
 0x440   : > { %v7215_v44 = vand.u32 4294901760, %v7214_v31  ;;  %v16847_v46 = vand.u32 4294901760, %v14399_v45  ;;  %10683 = vmatpush1.bf16.msra.mxu0 %v14380_v5  ;;  %10493 = vmatprep.subr.bf16.mxu1 %v14386_v55  ;;  %v14763_v63 = vpack.c.bf16 %v6292_v25, %v6288_v3  ;;  %v14765_v7 = vsub.f32 %v1079_v15, %v6288_v3  ;;  %v18281_v55 = vld [vmem:[#allocation100_spill] sm:$0xff] }
 0x441   : > { %v6366_v2 = vand.u32 4294901760, %v6365_v0  ;;  %v6378_v8 = vand.u32 4294901760, %v6377_v47  ;;  %10685 = vmatprep.subr.bf16.mxu0 %v14393_v58  ;;  %v14768_v6 = vsub.f32 %v1095_v59, %v6292_v25  ;;  %6326 = vmatprep.mubr.f32.mxu1 %v18170_v39  ;;  %v14774_v38 = vsub.f32 %v14395_v35, %v16846_v48 }
 0x442   : > { %18261 = vst [vmem:[#allocation112_spill] sm:$0xff] %v14763_v63  ;;  %v18262_v16 = vand.u32 4294901760, %v14397_v26  ;;  %v16848_v15 = vand.u32 4294901760, %v14409_v49  ;;  %v14782_v3 = vpack.c.bf16 %v7147_v9, %v7143_v17  ;;  %v14784_v47 = vsub.f32 %v1081_v57, %v7143_v17  ;;  %7181 = vmatprep.mubr.f32.mxu0 %v18170_v39 }
 0x443   : > { %v14786_v59 = vsub.f32 %v1097_v28, %v7147_v9  ;;  %v14789_v31 = vpack.c.bf16 %v6354_v61, %v6342_v12  ;;  %10495 = vmatpush1.bf16.msra.mxu1 %v14407_v33  ;;  %v14792_v25 = vpack.c.bf16 %v7209_v50, %v7197_v22  ;;  %v14794_v0 = vpack.c.bf16 %v6360_v11, %v6348_v36  ;;  %v18268_v12 = vld [vmem:[#allocation19_spill] sm:$0xff]  ;;  %v18269_v28 = vld [vmem:[#allocation125_spill] sm:$0xff] }
 0x444   : > { %v14779_v37 = vsub.f32 %v14397_v26, %v18262_v16  ;;  %18263 = vst [vmem:[#allocation119_spill] sm:$0xff] %v14782_v3  ;;  %v14796_v16 = vpack.c.bf16 %v7215_v44, %v7203_v42  ;;  %v14801_v48 = vsub.f32 %v14399_v45, %v16847_v46  ;;  %10687 = vmatpush1.bf16.msra.mxu0 %v14411_v1  ;;  %v7221_v44 = vand.u32 4294901760, %v14774_v38  ;;  %v18265_v38 = vld [vmem:[#allocation36_spill] sm:$0xff]  ;;  %v18266_v46 = vld [vmem:[#allocation127_spill] sm:$0xff] }
 0x445   : > { %10497 = vmatprep.subr.bf16.mxu1 %v14481_v51  ;;  %v14805_v57 = vpack.c.bf16 %v6378_v8, %v6366_v2  ;;  %10689 = vmatprep.subr.bf16.mxu0 %v14527_v52  ;;  %v14816_v61 = vsub.f32 %v14409_v49, %v16848_v15  ;;  %v18264_v2 = vld [vmem:[#allocation21_spill] sm:$0xff]  ;;  %v18267_v15 = vld [vmem:[#allocation126_spill] sm:$0xff]  ;;  %v18270_v9 = vand.u32 4294901760, %v14418_v60  ;;  %v18271_v50 = vand.u32 4294901760, %v14420_v62 }
 0x446   : > { %v7233_v36 = vand.u32 4294901760, %v14779_v37  ;;  %v6372_v17 = vand.u32 4294901760, %v14801_v48  ;;  %v18272_v37 = vand.u32 4294901760, %v14448_v4  ;;  %v18276_v51 = vld [vmem:[#allocation82_spill] sm:$0xff]  ;;  %v18277_v1 = vand.u32 4294901760, %v14509_v14 }
 0x447   : > { %10499 = vmatpush1.bf16.msra.mxu1 %v14536_v53  ;;  %v7226_v42 = vsub.f32 %v14418_v60, %v18270_v9  ;;  %v7238_v8 = vsub.f32 %v14420_v62, %v18271_v50  ;;  %v18273_v53 = vld [vmem:[#allocation96_spill] sm:$0xff]  ;;  %v6384_v22 = vand.u32 4294901760, %v14816_v61  ;;  %v18278_v33 = vand.u32 4294901760, %v14533_v21  ;;  %v18293_v62 = vld [vmem:[#allocation26_spill] sm:$0xff] }
 0x448   : > { %10691 = vmatpush1.bf16.msra.mxu0 %v18268_v12  ;;  %10501 = vmatprep.subr.bf16.mxu1 %v18269_v28  ;;  %v6389_v11 = vsub.f32 %v14448_v4, %v18272_v37  ;;  %v18274_v28 = vand.u32 4294901760, %v14493_v40  ;;  %v18275_v12 = vld [vmem:[#allocation80_spill] sm:$0xff]  ;;  %v7244_v50 = vsub.f32 %v14509_v14, %v18277_v1  ;;  %v18280_v58 = vand.u32 4294901760, %v14545_v24  ;;  %v18288_v14 = vld [vmem:[#allocation22_spill] sm:$0xff]  ;;  %v18290_v4 = vld [vmem:[#allocation123_spill] sm:$0xff] }
 0x449   : > { %10693 = vmatprep.subr.bf16.mxu0 %v18273_v53  ;;  %v7256_v37 = vsub.f32 %v14533_v21, %v18278_v33  ;;  %v18279_v53 = vand.u32 4294901760, %v14539_v43  ;;  %v18282_v9 = vand.u32 4294901760, %v18264_v2  ;;  %v18283_v1 = vand.u32 4294901760, %v18265_v38  ;;  %v18286_v21 = vld [vmem:[#allocation40_spill] sm:$0xff] }
 0x44a   : > { %v6401_v48 = vsub.f32 %v14493_v40, %v18274_v28  ;;  %v6407_v28 = vsub.f32 %v14545_v24, %v18280_v58  ;;  %v18284_v33 = vand.u32 4294901760, %v18266_v46  ;;  %v18287_v58 = vld [vmem:[#allocation68_spill] sm:$0xff]  ;;  %v7239_v24 = vand.u32 4294901760, %v7238_v8 }
 0x44b   : > { %v6395_v61 = vsub.f32 %v14539_v43, %v18279_v53  ;;  %10503 = vmatpush1.bf16.msra.mxu1 %v18281_v55  ;;  %v7250_v52 = vsub.f32 %v18264_v2, %v18282_v9  ;;  %v7262_v5 = vsub.f32 %v18265_v38, %v18283_v1  ;;  %v18285_v53 = vand.u32 4294901760, %v18267_v15  ;;  %v18289_v2 = vld [vmem:[#allocation30_spill] sm:$0xff] }
 0x44c   : > { %v6413_v20 = vsub.f32 %v18266_v46, %v18284_v33  ;;  %10695 = vmatpush1.bf16.msra.mxu0 %v18286_v21  ;;  %10505 = vmatprep.subr.bf16.mxu1 %v18287_v58  ;;  %v7227_v55 = vand.u32 4294901760, %v7226_v42  ;;  %v6390_v1 = vand.u32 4294901760, %v6389_v11  ;;  %v6402_v38 = vand.u32 4294901760, %v6401_v48  ;;  %v18294_v11 = vld [vmem:[#allocation87_spill] sm:$0xff]  ;;  %v18295_v48 = vld [vmem:[#allocation78_spill] sm:$0xff] }
 0x44d   : > { %v6425_v43 = vsub.f32 %v18267_v15, %v18285_v53  ;;  %10697 = vmatprep.subr.bf16.mxu0 %v18290_v4  ;;  %v18291_v33 = vand.u32 4294901760, %v18275_v12  ;;  %v18292_v53 = vand.u32 4294901760, %v18276_v51  ;;  %v7245_v15 = vand.u32 4294901760, %v7244_v50 }
 0x44e   : > { %v7257_v58 = vand.u32 4294901760, %v7256_v37  ;;  %v6396_v42 = vand.u32 4294901760, %v6395_v61  ;;  %v6408_v8 = vand.u32 4294901760, %v6407_v28  ;;  %v7251_v9 = vand.u32 4294901760, %v7250_v52  ;;  %v18298_v61 = vld [vmem:[#allocation58_spill] sm:$0xff]  ;;  %v18299_v52 = vld [vmem:[#allocation65_spill] sm:$0xff] }
 0x44f   : > { %v7268_v46 = vsub.f32 %v18275_v12, %v18291_v33  ;;  %v7280_v21 = vsub.f32 %v18276_v51, %v18292_v53  ;;  %10507 = vmatpush1.bf16.msra.mxu1 %v18293_v62  ;;  %v7263_v40 = vand.u32 4294901760, %v7262_v5  ;;  %v6414_v60 = vand.u32 4294901760, %v6413_v20  ;;  %v14898_v20 = vpop.f32.mrb[4].mxu1  ;;  %v18302_v53 = vld [vmem:[#allocation75_spill] sm:$0xff]  ;;  %v18303_v62 = vld [vmem:[#allocation120_spill] sm:$0xff] }
 0x450   : > { %v6426_v4 = vand.u32 4294901760, %v6425_v43  ;;  %10699 = vmatpush1.bf16.msra.mxu0 %v18294_v11  ;;  %10509 = vmatprep.subr.bf16.mxu1 %v18295_v48  ;;  %v18296_v33 = vand.u32 4294901760, %v18288_v14  ;;  %v18297_v50 = vand.u32 4294901760, %v18289_v2  ;;  %18300 = vst [vmem:[#allocation35_spill] sm:$0xff] %v14898_v20  ;;  %v14900_v43 = vpop.f32.mrb[4].mxu0  ;;  %v14903_v48 = vpack.c.bf16 %v7233_v36, %v7221_v44 }
 0x451   : > { %18301 = vst [vmem:[#allocation90_spill] sm:$0xff] %v14900_v43  ;;  %10701 = vmatprep.subr.bf16.mxu0 %v18302_v53  ;;  %v7269_v11 = vand.u32 4294901760, %v7268_v46  ;;  %v14906_v51 = vpop.f32.mrb[5].mxu0  ;;  %7978 = vrot.lane.b32.xlu1 %v14898_v20, %s11247_s16  ;;  %v14912_v5 = vpack.c.bf16 %v6384_v22, %v6372_v17  ;;  %v14914_v28 = vpack.c.bf16 %v7239_v24, %v7227_v55  ;;  %v18307_v36 = vand.u32 4294901760, %v18299_v52  ;;  %v18308_v17 = vld [vmem:[#allocation122_spill] sm:$0xff]  ;;  %v18320_v55 = vld [vmem:[#allocation31_spill] sm:$0xff] }
 0x452   : > { %v14889_v12 = vsub.f32 %v18288_v14, %v18296_v33  ;;  %v14894_v37 = vsub.f32 %v18289_v2, %v18297_v50  ;;  %v7281_v33 = vand.u32 4294901760, %v7280_v21  ;;  %v16889_v14 = vand.u32 4294901760, %v18303_v62  ;;  %18304 = vst [vmem:[#allocation76_spill] sm:$0xff] %v14906_v51  ;;  %v14910_v50 = vpop.f32.mrb[5].mxu1 }
 0x453   : > { %18305 = vst [vmem:[#allocation97_spill] sm:$0xff] %v14910_v50  ;;  %v14916_v2 = vpack.c.bf16 %v6402_v38, %v6390_v1  ;;  %v14918_v53 = vpack.c.bf16 %v7257_v58, %v7245_v15  ;;  %10511 = vmatpush1.bf16.msra.mxu1 %v14656_v19  ;;  %7980 = vrot.lane.b32.xlu0 %v14910_v50, %s11247_s16  ;;  %v18306_v15 = vand.u32 4294901760, %v18298_v61  ;;  %v18309_v58 = vld [vmem:[#allocation16_spill] sm:$0xff]  ;;  %v16896_v1 = vand.u32 4294901760, %v14667_v32  ;;  %v18313_v38 = vld [vmem:[#allocation86_spill] sm:$0xff] }
 0x454   : > { %v14923_v46 = vpack.c.bf16 %v6408_v8, %v6396_v42  ;;  %v14925_v21 = vpack.c.bf16 %v7263_v40, %v7251_v9  ;;  %v14927_v44 = vpack.c.bf16 %v6426_v4, %v6414_v60  ;;  %10703 = vmatpush1.bf16.msra.mxu0 %v14661_v10  ;;  %10513 = vmatprep.subr.bf16.mxu1 %v14669_v34  ;;  %v18312_v9 = vld [vmem:[#allocation70_spill] sm:$0xff]  ;;  %v18318_v24 = vand.u32 4294901760, %v14678_v30  ;;  %v18330_v8 = vld [vmem:[#allocation83_spill] sm:$0xff] }
 0x455   : > { %v14936_v22 = vsub.f32 %v18298_v61, %v18306_v15  ;;  %v14941_v40 = vsub.f32 %v18299_v52, %v18307_v36  ;;  %10705 = vmatprep.subr.bf16.mxu0 %v14673_v13  ;;  %v14944_v60 = vpack.c.bf16 %v7281_v33, %v7269_v11  ;;  %v14949_v4 = vsub.f32 %v18303_v62, %v16889_v14  ;;  %v18310_v33 = vld [vmem:[#allocation93_spill] sm:$0xff]  ;;  %v18314_v11 = vld [vmem:[#allocation95_spill] sm:$0xff]  ;;  %v18331_v19 = vld [vmem:[#allocation42_spill] sm:$0xff] }
 0x456   : > { %7982 = vrot.lane.b32.xlu1 %v14900_v43, %s11247_s16  ;;  %v18311_v36 = vld [vmem:[#allocation81_spill] sm:$0xff]  ;;  %v18317_v14 = vand.u32 4294901760, %v14675_v23  ;;  %v18322_v42 = vand.u32 4294901760, %v14684_v29  ;;  %v18333_v62 = vld [vmem:[#allocation98_spill] sm:$0xff] }
 0x457   : > { %10515 = vmatpush1.bf16.msra.mxu1 %v18310_v33  ;;  %7984 = vrot.lane.b32.xlu0 %v14906_v51, %s11247_s16  ;;  %v18315_v33 = vand.u32 4294901760, %v14671_v54  ;;  %v18323_v34 = vand.u32 4294901760, %v18311_v36 }
 0x458   : > { %10707 = vmatpush1.bf16.msra.mxu0 %v18312_v9  ;;  %10517 = vmatprep.subr.bf16.mxu1 %v18313_v38  ;;  %v14980_v15 = vpack.c.bf16 %v18318_v24, %v18317_v14  ;;  %v18321_v9 = vld [vmem:[#allocation84_spill] sm:$0xff]  ;;  %v18328_v14 = vld [vmem:[#allocation33_spill] sm:$0xff]  ;;  %v18329_v38 = vld [vmem:[#allocation91_spill] sm:$0xff]  ;;  %v18341_v24 = vand.u32 4294901760, %v18309_v58 }
 0x459   : > { %v14974_v13 = vpack.c.bf16 %v18315_v33, %v16896_v1  ;;  %10709 = vmatprep.subr.bf16.mxu0 %v14715_v41  ;;  %v14989_v10 = vpack.c.bf16 %v18323_v34, %v18322_v42  ;;  %v18325_v33 = vand.u32 4294901760, %v14691_v27  ;;  %v18326_v1 = vand.u32 4294901760, %v14693_v56  ;;  %v18332_v41 = vld [vmem:[#allocation32_spill] sm:$0xff] }
 0x45a   : > { %18319 = vst [vmem:[#allocation48_spill] sm:$0xff] %v14980_v15  ;;  %8059 = vrot.lane.b32.xlu1 %v14898_v20, %s11248_s19  ;;  %v18338_v42 = vand.u32 4294901760, %v18331_v19  ;;  %v18342_v20 = vand.u32 4294901760, %v14765_v7 }
 0x45b   : > { %18316 = vst [vmem:[#allocation27_spill] sm:$0xff] %v14974_v13  ;;  %18324 = vst [vmem:[#allocation71_spill] sm:$0xff] %v14989_v10  ;;  %v14995_v13 = vpack.c.bf16 %v18326_v1, %v18325_v33  ;;  %10519 = vmatpush1.bf16.msra.mxu1 %v14763_v63  ;;  %8061 = vrot.lane.b32.xlu0 %v14910_v50, %s11248_s19  ;;  %v18335_v10 = vand.u32 4294901760, %v18329_v38  ;;  %v18337_v1 = vand.u32 4294901760, %v18330_v8  ;;  %v18360_v63 = vld [vmem:[#allocation107_spill] sm:$0xff] }
 0x45c   : > { %10711 = vmatpush1.bf16.msra.mxu0 %v14782_v3  ;;  %10521 = vmatprep.subr.bf16.mxu1 %v14789_v31  ;;  %v18340_v31 = vand.u32 4294901760, %v18308_v17  ;;  %v7292_v33 = vsub.f32 %v18309_v58, %v18341_v24  ;;  %v18349_v24 = vand.u32 4294901760, %v18314_v11  ;;  %v18354_v3 = vld [vmem:[#allocation15_spill] sm:$0xff]  ;;  %v18355_v58 = vld [vmem:[#allocation28_spill] sm:$0xff] }
 0x45d   : > { %18327 = vst [vmem:[#allocation121_spill] sm:$0xff] %v14995_v13  ;;  %v18334_v13 = vand.u32 4294901760, %v18328_v14  ;;  %v15024_v34 = vpack.c.bf16 %v18338_v42, %v18337_v1  ;;  %10713 = vmatprep.subr.bf16.mxu0 %v14792_v25  ;;  %v18346_v1 = vand.u32 4294901760, %v14786_v59  ;;  %v18348_v25 = vld [vmem:[#allocation61_spill] sm:$0xff] }
 0x45e   : > { %v6449_v15 = vsub.f32 %v18308_v17, %v18340_v31  ;;  %6332 = vmatmul.mubr.f32.vlgmr.msra.gmra.mrb[8].mxu1 %v18348_v25  ;;  %8063 = vrot.lane.b32.xlu1 %v14900_v43, %s11248_s19  ;;  %v7287_v31 = vand.u32 4294901760, %v14941_v40  ;;  %v18353_v43 = vld [vmem:[#allocation37_spill] sm:$0xff]  ;;  %v18359_v40 = vld [vmem:[#allocation102_spill] sm:$0xff] }
 0x45f   : > { %v15018_v50 = vpack.c.bf16 %v18335_v10, %v18334_v13  ;;  %18339 = vst [vmem:[#allocation33_spill] sm:$0xff] %v15024_v34  ;;  %v18343_v10 = vand.u32 4294901760, %v14768_v6  ;;  %v7304_v34 = vsub.f32 %v18314_v11, %v18349_v24  ;;  %7187 = vmatmul.mubr.f32.vlgmr.msra.gmra.mrb[8].mxu0 %v18348_v25  ;;  %10523 = vmatpush1.bf16.msra.mxu1 %v14794_v0  ;;  %v18357_v25 = vand.u32 4294901760, %v18333_v62  ;;  %v18361_v11 = vld [vmem:[#allocation111_spill] sm:$0xff] }
 0x460   : > { %10715 = vmatpush1.bf16.msra.mxu0 %v14796_v16  ;;  %8065 = vrot.lane.b32.xlu0 %v14906_v51, %s11248_s19  ;;  %v6438_v16 = vand.u32 4294901760, %v14949_v4  ;;  %v6450_v24 = vand.u32 4294901760, %v6449_v15  ;;  %v16925_v51 = vand.u32 4294901760, %v18360_v63  ;;  %v18363_v4 = vand.u32 4294901760, %v18353_v43 }
 0x461   : > { %18336 = vst [vmem:[#allocation81_spill] sm:$0xff] %v15018_v50  ;;  %v15037_v13 = vpack.c.bf16 %v18343_v10, %v18342_v20  ;;  %v18345_v50 = vand.u32 4294901760, %v14784_v47  ;;  %v18350_v20 = vand.u32 4294901760, %v18320_v55  ;;  %v7310_v0 = vsub.f32 %v18333_v62, %v18357_v25  ;;  %10525 = vmatprep.subr.bf16.mxu1 %v14805_v57  ;;  %10717 = vmatprep.subr.bf16.mxu0 %v14903_v48 }
 0x462   : > { %6562 = vmatprep.mubr.f32.mxu1 %v18170_v39  ;;  %7417 = vmatprep.mubr.f32.mxu0 %v18170_v39  ;;  %v6473_v15 = vsub.f32 %v18353_v43, %v18363_v4  ;;  %v18364_v25 = vand.u32 4294901760, %v18354_v3 }
 0x463   : > { %18344 = vst [vmem:[#allocation91_spill] sm:$0xff] %v15037_v13  ;;  %v15043_v42 = vpack.c.bf16 %v18346_v1, %v18345_v50  ;;  %v6443_v10 = vsub.f32 %v18320_v55, %v18350_v20  ;;  %v18351_v13 = vand.u32 4294901760, %v18321_v9  ;;  %v18352_v1 = vld [vmem:[#allocation92_spill] sm:$0xff]  ;;  %v18356_v20 = vand.u32 4294901760, %v18332_v41  ;;  %10527 = vmatpush1.bf16.msra.mxu1 %v14912_v5 }
 0x464   : > { %v16924_v55 = vand.u32 4294901760, %v18359_v40  ;;  %v18362_v57 = vand.u32 4294901760, %v18352_v1  ;;  %10719 = vmatpush1.bf16.msra.mxu0 %v14914_v28  ;;  %10529 = vmatprep.subr.bf16.mxu1 %v14916_v2  ;;  %v18368_v28 = vand.u32 4294901760, %v14936_v22 }
 0x465   : > { %18347 = vst [vmem:[#allocation83_spill] sm:$0xff] %v15043_v42  ;;  %v6455_v50 = vsub.f32 %v18321_v9, %v18351_v13  ;;  %v7298_v13 = vsub.f32 %v18332_v41, %v18356_v20  ;;  %v18358_v42 = vld [vmem:[#allocation62_spill] sm:$0xff]  ;;  %v7293_v20 = vand.u32 4294901760, %v7292_v33  ;;  %v7305_v41 = vand.u32 4294901760, %v7304_v34  ;;  %10721 = vmatprep.subr.bf16.mxu0 %v14918_v53 }
 0x466   : > { %v16922_v9 = vand.u32 4294901760, %v18358_v42  ;;  %v6444_v52 = vand.u32 4294901760, %v6443_v10  ;;  %v6461_v48 = vsub.f32 %v18352_v1, %v18362_v57  ;;  %v7316_v34 = vsub.f32 %v18354_v3, %v18364_v25 }
 0x467   : > { %v6456_v61 = vand.u32 4294901760, %v6455_v50  ;;  %v18365_v33 = vand.u32 4294901760, %v18355_v58  ;;  %v7299_v5 = vand.u32 4294901760, %v7298_v13  ;;  %v7311_v50 = vand.u32 4294901760, %v7310_v0  ;;  %10531 = vmatpush1.bf16.msra.mxu1 %v14923_v46 }
 0x468   : > { %v6467_v57 = vsub.f32 %v18358_v42, %v16922_v9  ;;  %v6479_v4 = vsub.f32 %v18359_v40, %v16924_v55  ;;  %v18366_v25 = vand.u32 4294901760, %v14889_v12  ;;  %v10726_v2 = vpack.c.bf16 %v7287_v31, %v18368_v28  ;;  %10723 = vmatpush1.bf16.msra.mxu0 %v14925_v21  ;;  %10533 = vmatprep.subr.bf16.mxu1 %v14927_v44 }
 0x469   : > { %v7328_v10 = vsub.f32 %v18355_v58, %v18365_v33  ;;  %v18367_v33 = vand.u32 4294901760, %v14894_v37  ;;  %v7322_v13 = vsub.f32 %v18360_v63, %v16925_v51  ;;  %v18369_v0 = vand.u32 4294901760, %v18361_v11  ;;  %10725 = vmatprep.subr.bf16.mxu0 %v14944_v60  ;;  %v18411_v51 = vld [vmem:[#allocation30_spill] sm:$0xff] }
 0x46a   : > { %v10536_v42 = vpack.c.bf16 %v6450_v24, %v6438_v16  ;;  %v10728_v55 = vpack.c.bf16 %v7305_v41, %v7293_v20  ;;  %v18370_v53 = vand.u32 4294901760, %v14667_v32  ;;  %v18371_v37 = vand.u32 4294901760, %v14671_v54 }
 0x46b   : > { %v10534_v17 = vpack.c.bf16 %v18367_v33, %v18366_v25  ;;  %v7334_v9 = vsub.f32 %v18361_v11, %v18369_v0  ;;  %v6462_v22 = vand.u32 4294901760, %v6461_v48  ;;  %v6474_v31 = vand.u32 4294901760, %v6473_v15 }
 0x46c   : > { %v6485_v12 = vsub.f32 %v14667_v32, %v18370_v53  ;;  %v6497_v25 = vsub.f32 %v14671_v54, %v18371_v37  ;;  %v7317_v33 = vand.u32 4294901760, %v7316_v34  ;;  %v7329_v28 = vand.u32 4294901760, %v7328_v10  ;;  %10727 = vmatpush1.bf16.msra.mxu0 %v10726_v2 }
 0x46d   : > { %v10538_v24 = vpack.c.bf16 %v6456_v61, %v6444_v52  ;;  %v10730_v41 = vpack.c.bf16 %v7311_v50, %v7299_v5  ;;  %v6468_v16 = vand.u32 4294901760, %v6467_v57  ;;  %v6480_v20 = vand.u32 4294901760, %v6479_v4  ;;  %10535 = vmatpush1.bf16.msra.mxu1 %v10534_v17  ;;  %10729 = vmatprep.subr.bf16.mxu0 %v10728_v55 }
 0x46e   : > { %v7323_v0 = vand.u32 4294901760, %v7322_v13  ;;  %v7335_v53 = vand.u32 4294901760, %v7334_v9  ;;  %v18372_v37 = vand.u32 4294901760, %v14675_v23  ;;  %v18373_v48 = vand.u32 4294901760, %v14678_v30  ;;  %10537 = vmatprep.subr.bf16.mxu1 %v10536_v42 }
 0x46f   : > { %v6486_v34 = vand.u32 4294901760, %v6485_v12  ;;  %v6498_v21 = vand.u32 4294901760, %v6497_v25  ;;  %v18374_v44 = vand.u32 4294901760, %v14684_v29  ;;  %v18375_v52 = vand.u32 4294901760, %v18311_v36 }
 0x470   : > { %v7340_v46 = vsub.f32 %v14675_v23, %v18372_v37  ;;  %v7352_v15 = vsub.f32 %v14678_v30, %v18373_v48  ;;  %v10540_v9 = vpack.c.bf16 %v6474_v31, %v6462_v22  ;;  %v10732_v10 = vpack.c.bf16 %v7329_v28, %v7317_v33  ;;  %10731 = vmatpush1.bf16.msra.mxu0 %v10730_v41 }
 0x471   : > { %v6491_v61 = vsub.f32 %v14684_v29, %v18374_v44  ;;  %v6503_v60 = vsub.f32 %v18311_v36, %v18375_v52  ;;  %v18376_v5 = vand.u32 4294901760, %v14691_v27  ;;  %v18377_v57 = vand.u32 4294901760, %v14693_v56  ;;  %10539 = vmatpush1.bf16.msra.mxu1 %v10538_v24 }
 0x472   : > { %v10542_v13 = vpack.c.bf16 %v6480_v20, %v6468_v16  ;;  %v18378_v12 = vand.u32 4294901760, %v18328_v14  ;;  %v18379_v37 = vand.u32 4294901760, %v18329_v38  ;;  %v7341_v22 = vand.u32 4294901760, %v7340_v46  ;;  %10541 = vmatprep.subr.bf16.mxu1 %v10540_v9  ;;  %10733 = vmatprep.subr.bf16.mxu0 %v10732_v10 }
 0x473   : > { %v7346_v50 = vsub.f32 %v14691_v27, %v18376_v5  ;;  %v7358_v4 = vsub.f32 %v14693_v56, %v18377_v57  ;;  %v7353_v31 = vand.u32 4294901760, %v7352_v15  ;;  %v18380_v33 = vand.u32 4294901760, %v18330_v8 }
 0x474   : > { %v6509_v25 = vsub.f32 %v18328_v14, %v18378_v12  ;;  %v6521_v17 = vsub.f32 %v18329_v38, %v18379_v37  ;;  %v18381_v48 = vand.u32 4294901760, %v18331_v19  ;;  %v10734_v2 = vpack.c.bf16 %v7335_v53, %v7323_v0 }
 0x475   : > { %v7364_v28 = vsub.f32 %v18330_v8, %v18380_v33  ;;  %v10544_v16 = vpack.c.bf16 %v6498_v21, %v6486_v34  ;;  %v6492_v20 = vand.u32 4294901760, %v6491_v61  ;;  %v6504_v44 = vand.u32 4294901760, %v6503_v60  ;;  %10543 = vmatpush1.bf16.msra.mxu1 %v10542_v13  ;;  %v18388_v13 = vld [vmem:[#allocation55_spill] sm:$0xff] }
 0x476   : > { %v7376_v42 = vsub.f32 %v18331_v19, %v18381_v48  ;;  %v7347_v52 = vand.u32 4294901760, %v7346_v50  ;;  %v7359_v5 = vand.u32 4294901760, %v7358_v4  ;;  %v18382_v57 = vand.u32 4294901760, %v14765_v7  ;;  %10735 = vmatpush1.bf16.msra.mxu0 %v10734_v2  ;;  %v18390_v2 = vld [vmem:[#allocation23_spill] sm:$0xff] }
 0x477   : > { %v18383_v46 = vand.u32 4294901760, %v14768_v6  ;;  %v6510_v12 = vand.u32 4294901760, %v6509_v25  ;;  %v6522_v37 = vand.u32 4294901760, %v6521_v17  ;;  %v18384_v0 = vand.u32 4294901760, %v14784_v47  ;;  %10545 = vmatprep.subr.bf16.mxu1 %v10544_v16  ;;  %v18391_v16 = vld [vmem:[#allocation101_spill] sm:$0xff] }
 0x478   : > { %v6515_v55 = vsub.f32 %v14765_v7, %v18382_v57  ;;  %v18385_v24 = vand.u32 4294901760, %v14786_v59  ;;  %v10736_v21 = vpack.c.bf16 %v7353_v31, %v7341_v22  ;;  %v7365_v61 = vand.u32 4294901760, %v7364_v28  ;;  %v18386_v22 = vld [vmem:[#allocation18_spill] sm:$0xff]  ;;  %v18387_v31 = vld [vmem:[#allocation24_spill] sm:$0xff] }
 0x479   : > { %v6527_v15 = vsub.f32 %v14768_v6, %v18383_v46  ;;  %v7370_v53 = vsub.f32 %v14784_v47, %v18384_v0  ;;  %v7377_v60 = vand.u32 4294901760, %v7376_v42  ;;  %v10546_v50 = vpack.c.bf16 %v6504_v44, %v6492_v20  ;;  %v18389_v42 = vld [vmem:[#allocation64_spill] sm:$0xff] }
 0x47a   : > { %v7382_v34 = vsub.f32 %v14786_v59, %v18385_v24  ;;  %v6516_v4 = vand.u32 4294901760, %v6515_v55  ;;  %v10738_v41 = vpack.c.bf16 %v7359_v5, %v7347_v52  ;;  %v10548_v9 = vpack.c.bf16 %v6522_v37, %v6510_v12  ;;  %10737 = vmatprep.subr.bf16.mxu0 %v10736_v21  ;;  %v18392_v52 = vld [vmem:[#allocation53_spill] sm:$0xff]  ;;  %v18393_v5 = vld [vmem:[#allocation104_spill] sm:$0xff]  ;;  %v18397_v24 = vld [vmem:[#allocation99_spill] sm:$0xff] }
 0x47b   : > { %v6528_v33 = vand.u32 4294901760, %v6527_v15  ;;  %v7371_v25 = vand.u32 4294901760, %v7370_v53  ;;  %v10740_v48 = vpack.c.bf16 %v7377_v60, %v7365_v61  ;;  %10547 = vmatpush1.bf16.msra.mxu1 %v10546_v50  ;;  %v10552_v28 = vpack.c.bf16 %v18387_v31, %v18386_v22  ;;  %v18394_v46 = vld [vmem:[#allocation108_spill] sm:$0xff]  ;;  %v18395_v15 = vld [vmem:[#allocation109_spill] sm:$0xff]  ;;  %v18399_v61 = vld [vmem:[#allocation115_spill] sm:$0xff] }
 0x47c   : > { %v7383_v17 = vand.u32 4294901760, %v7382_v34  ;;  %10739 = vmatpush1.bf16.msra.mxu0 %v10738_v41  ;;  %10549 = vmatprep.subr.bf16.mxu1 %v10548_v9  ;;  %v10744_v20 = vpack.c.bf16 %v18389_v42, %v18388_v13  ;;  %v10554_v44 = vpack.c.bf16 %v18391_v16, %v18390_v2  ;;  %v10746_v55 = vpack.c.bf16 %v18393_v5, %v18392_v52  ;;  %v18396_v53 = vld [vmem:[#allocation25_spill] sm:$0xff]  ;;  %v18402_v41 = vld [vmem:[#allocation50_spill] sm:$0xff]  ;;  %v18403_v9 = vld [vmem:[#allocation72_spill] sm:$0xff] }
 0x47d   : > { %v10550_v57 = vpack.c.bf16 %v6528_v33, %v6516_v4  ;;  %10741 = vmatprep.subr.bf16.mxu0 %v10740_v48  ;;  %v10556_v12 = vpack.c.bf16 %v18395_v15, %v18394_v46  ;;  %v10748_v37 = vpack.c.bf16 %v14397_v26, %v14395_v35  ;;  %v10558_v0 = vpack.c.bf16 %v14409_v49, %v14399_v45  ;;  %v18398_v21 = vld [vmem:[#allocation69_spill] sm:$0xff]  ;;  %v18405_v48 = vld [vmem:[#allocation36_spill] sm:$0xff] }
 0x47e   : > { %v10742_v10 = vpack.c.bf16 %v7383_v17, %v7371_v25  ;;  %v10750_v34 = vpack.c.bf16 %v18397_v24, %v18396_v53  ;;  %v10560_v60 = vpack.c.bf16 %v18399_v61, %v18398_v21  ;;  %v18400_v50 = vld [vmem:[#allocation77_spill] sm:$0xff]  ;;  %v10562_v25 = vpack.c.bf16 %v18403_v9, %v18402_v41  ;;  %v18415_v41 = vld [vmem:[#allocation122_spill] sm:$0xff] }
 0x47f   : > { %10551 = vmatpush1.bf16.msra.mxu1 %v10550_v57  ;;  %v18401_v4 = vld [vmem:[#allocation41_spill] sm:$0xff] }
 0x480   : > { %10743 = vmatpush1.bf16.msra.mxu0 %v10742_v10  ;;  %10553 = vmatprep.subr.bf16.mxu1 %v10552_v28  ;;  %v10752_v33 = vpack.c.bf16 %v18401_v4, %v18400_v50  ;;  %v18404_v17 = vld [vmem:[#allocation21_spill] sm:$0xff]  ;;  %v18406_v10 = vld [vmem:[#allocation127_spill] sm:$0xff]  ;;  %v18407_v28 = vld [vmem:[#allocation126_spill] sm:$0xff] }
 0x481   : > { %10745 = vmatprep.subr.bf16.mxu0 %v10744_v20  ;;  %v10754_v57 = vpack.c.bf16 %v18405_v48, %v18404_v17  ;;  %v10564_v20 = vpack.c.bf16 %v18407_v28, %v18406_v10  ;;  %v18413_v9 = vld [vmem:[#allocation65_spill] sm:$0xff]  ;;  %v18416_v48 = vld [vmem:[#allocation16_spill] sm:$0xff]  ;;  %v18417_v17 = vld [vmem:[#allocation95_spill] sm:$0xff] }
 0x482   : > { %6564 = vmatmul.mubr.f32.vlgmr.msra.gmra.mrb[8].mxu1 %v18164_v18  ;;  %v10760_v28 = vpack.c.bf16 %v18417_v17, %v18416_v48  ;;  %v18419_v10 = vld [vmem:[#allocation84_spill] sm:$0xff] }
 0x483   : > { %7419 = vmatmul.mubr.f32.vlgmr.msra.gmra.mrb[8].mxu0 %v18164_v18  ;;  %10555 = vmatpush1.bf16.msra.mxu1 %v10554_v44  ;;  %v18408_v44 = vld [vmem:[#allocation80_spill] sm:$0xff] }
 0x484   : > { %10747 = vmatpush1.bf16.msra.mxu0 %v10746_v55  ;;  %10557 = vmatprep.subr.bf16.mxu1 %v10556_v12  ;;  %v18409_v55 = vld [vmem:[#allocation82_spill] sm:$0xff] }
 0x485   : > { %10749 = vmatprep.subr.bf16.mxu0 %v10748_v37  ;;  %6698 = vmatprep.mubr.f32.mxu1 %v18170_v39  ;;  %v10756_v12 = vpack.c.bf16 %v18409_v55, %v18408_v44  ;;  %v18410_v37 = vld [vmem:[#allocation22_spill] sm:$0xff] }
 0x486   : > { %7553 = vmatprep.mubr.f32.mxu0 %v18170_v39  ;;  %v10566_v18 = vpack.c.bf16 %v18411_v51, %v18410_v37 }
 0x487   : > { %10559 = vmatpush1.bf16.msra.mxu1 %v10558_v0  ;;  %v18412_v0 = vld [vmem:[#allocation58_spill] sm:$0xff] }
 0x488   : > { %10751 = vmatpush1.bf16.msra.mxu0 %v10750_v34  ;;  %10561 = vmatprep.subr.bf16.mxu1 %v10560_v60  ;;  %v10758_v34 = vpack.c.bf16 %v18413_v9, %v18412_v0  ;;  %v18414_v60 = vld [vmem:[#allocation120_spill] sm:$0xff] }
 0x489   : > { %10753 = vmatprep.subr.bf16.mxu0 %v10752_v33  ;;  %v10568_v4 = vpack.c.bf16 %v18415_v41, %v18414_v60  ;;  %v18418_v33 = vld [vmem:[#allocation31_spill] sm:$0xff]  ;;  %v10764_v41 = vpack.c.bf16 %v18355_v58, %v18354_v3 }
 0x48a   : > { %v10570_v55 = vpack.c.bf16 %v18419_v10, %v18418_v33 }
 0x48b   : > { %10563 = vmatpush1.bf16.msra.mxu1 %v10562_v25  ;;  %v18420_v25 = vld [vmem:[#allocation32_spill] sm:$0xff] }
 0x48c   : > { %10755 = vmatpush1.bf16.msra.mxu0 %v10754_v57  ;;  %10565 = vmatprep.subr.bf16.mxu1 %v10564_v20  ;;  %v10762_v57 = vpack.c.bf16 %v18333_v62, %v18420_v25  ;;  %v10572_v20 = vpack.c.bf16 %v18353_v43, %v18352_v1 }
 0x48d   : > { %10757 = vmatprep.subr.bf16.mxu0 %v10756_v12  ;;  %v18421_v12 = vld [vmem:[#allocation62_spill] sm:$0xff] }
 0x48e   : > { %v10574_v17 = vpack.c.bf16 %v18359_v40, %v18421_v12 }
 0x48f   : > { %10567 = vmatpush1.bf16.msra.mxu1 %v10566_v18  ;;  %v10766_v18 = vpack.c.bf16 %v18361_v11, %v18360_v63 }
 0x490   : > { %10759 = vmatpush1.bf16.msra.mxu0 %v10758_v34  ;;  %10569 = vmatprep.subr.bf16.mxu1 %v10568_v4  ;;  %v10576_v4 = vpack.c.bf16 %v14671_v54, %v14667_v32  ;;  %v10768_v34 = vpack.c.bf16 %v14678_v30, %v14675_v23  ;;  %v10772_v32 = vpack.c.bf16 %v18331_v19, %v18330_v8  ;;  %v18422_v30 = vld [vmem:[#allocation85_spill] sm:$0xff]  ;;  %v18425_v19 = vld [vmem:[#allocation66_spill] sm:$0xff]  ;;  %v18432_v8 = vld [vmem:[#allocation79_spill] sm:$0xff] }
 0x491   : > { %10761 = vmatprep.subr.bf16.mxu0 %v10760_v28  ;;  %v10578_v28 = vpack.c.bf16 %v18311_v36, %v14684_v29  ;;  %v10582_v54 = vpack.c.bf16 %v14768_v6, %v14765_v7  ;;  %v10774_v23 = vpack.c.bf16 %v14786_v59, %v14784_v47  ;;  %v18423_v29 = vld [vmem:[#allocation29_spill] sm:$0xff]  ;;  %v18427_v7 = vld [vmem:[#allocation63_spill] sm:$0xff]  ;;  %v18430_v59 = vld [vmem:[#allocation118_spill] sm:$0xff] }
 0x492   : > { %v18428_v6 = vld [vmem:[#allocation113_spill] sm:$0xff]  ;;  %v18433_v36 = vld [vmem:[#allocation52_spill] sm:$0xff] }
 0x493   : > { %10571 = vmatpush1.bf16.msra.mxu1 %v10570_v55  ;;  %v10770_v55 = vpack.c.bf16 %v14693_v56, %v14691_v27  ;;  %v18424_v27 = vld [vmem:[#allocation57_spill] sm:$0xff]  ;;  %v18426_v56 = vld [vmem:[#allocation103_spill] sm:$0xff] }
 0x494   : > { %10763 = vmatpush1.bf16.msra.mxu0 %v10762_v57  ;;  %10573 = vmatprep.subr.bf16.mxu1 %v10572_v20  ;;  %v10580_v57 = vpack.c.bf16 %v18329_v38, %v18328_v14  ;;  %v18429_v47 = vld [vmem:[#allocation117_spill] sm:$0xff]  ;;  %v18431_v38 = vld [vmem:[#allocation110_spill] sm:$0xff]  ;;  %v18434_v14 = vld [vmem:[#allocation19_spill] sm:$0xff] }
 0x495   : > { %10765 = vmatprep.subr.bf16.mxu0 %v10764_v41  ;;  %v18435_v41 = vld [vmem:[#allocation125_spill] sm:$0xff]  ;;  %v18437_v20 = vld [vmem:[#allocation100_spill] sm:$0xff] }
 0x497   : > { %10575 = vmatpush1.bf16.msra.mxu1 %v10574_v17  ;;  %v18436_v17 = vld [vmem:[#allocation96_spill] sm:$0xff] }
 0x498   : > { %10767 = vmatpush1.bf16.msra.mxu0 %v10766_v18  ;;  %10577 = vmatprep.subr.bf16.mxu1 %v10576_v4  ;;  %v18438_v18 = vld [vmem:[#allocation40_spill] sm:$0xff] }
 0x499   : > { %10769 = vmatprep.subr.bf16.mxu0 %v10768_v34  ;;  %v18439_v4 = vld [vmem:[#allocation68_spill] sm:$0xff]  ;;  %v18440_v34 = vld [vmem:[#allocation123_spill] sm:$0xff] }
 0x49b   : > { %10579 = vmatpush1.bf16.msra.mxu1 %v10578_v28  ;;  %v18441_v28 = vld [vmem:[#allocation26_spill] sm:$0xff] }
 0x49c   : > { %10771 = vmatpush1.bf16.msra.mxu0 %v10770_v55  ;;  %10581 = vmatprep.subr.bf16.mxu1 %v10580_v57  ;;  %v18442_v55 = vld [vmem:[#allocation87_spill] sm:$0xff]  ;;  %v18443_v57 = vld [vmem:[#allocation78_spill] sm:$0xff] }
 0x49d   : > { %10773 = vmatprep.subr.bf16.mxu0 %v10772_v32  ;;  %v18444_v32 = vld [vmem:[#allocation75_spill] sm:$0xff] }
 0x49f   : > { %10583 = vmatpush1.bf16.msra.mxu1 %v10582_v54  ;;  %v15262_v54 = vld [vmem:[#allocation8 + $0x20] sm:$0xff] }
 0x4a0   : > { %10775 = vmatpush1.bf16.msra.mxu0 %v10774_v23  ;;  %10585 = vmatprep.subr.bf16.mxu1 %v18422_v30  ;;  %v15264_v23 = vld [vmem:[#allocation8 + $0x28] sm:$0xff] }
 0x4a1   : > { %10777 = vmatprep.subr.bf16.mxu0 %v18423_v29 }
 0x4a2   : > { %6701 = vmatmul.mubr.f32.vlgmr.msra.gmra.mrb[8].mxu1 %v18424_v27 }
 0x4a3   : > { %7556 = vmatmul.mubr.f32.vlgmr.msra.gmra.mrb[8].mxu0 %v18424_v27  ;;  %10587 = vmatpush1.bf16.msra.mxu1 %v18425_v19  ;;  %v18445_v27 = vld [vmem:[#allocation67_spill] sm:$0xff] }
 0x4a4   : > { %10779 = vmatpush1.bf16.msra.mxu0 %v18426_v56  ;;  %10589 = vmatprep.subr.bf16.mxu1 %v18427_v7 }
 0x4a5   : > { %10781 = vmatprep.subr.bf16.mxu0 %v18428_v6  ;;  %6803 = vmatprep.mubr.f32.mxu1 %v18170_v39  ;;  %v18457_v6 = vld [vmem:[#allocation70_spill] sm:$0xff] }
 0x4a6   : > { %7658 = vmatprep.mubr.f32.mxu0 %v18170_v39 }
 0x4a7   : > { %10591 = vmatpush1.bf16.msra.mxu1 %v18429_v47 }
 0x4a8   : > { %10783 = vmatpush1.bf16.msra.mxu0 %v18430_v59  ;;  %10593 = vmatprep.subr.bf16.mxu1 %v18431_v38  ;;  %v18456_v59 = vand.u32 4294901760, %v18389_v42  ;;  %v18462_v42 = vand.u32 4294901760, %v18393_v5  ;;  %v18470_v5 = vand.u32 4294901760, %v18396_v53  ;;  %v18478_v53 = vld [vmem:[#allocation41_spill] sm:$0xff] }
 0x4a9   : > { %10785 = vmatprep.subr.bf16.mxu0 %v18432_v8  ;;  %v18452_v8 = vld [vmem:[#allocation93_spill] sm:$0xff] }
 0x4ab   : > { %10595 = vmatpush1.bf16.msra.mxu1 %v18433_v36  ;;  %v18454_v36 = vand.u32 4294901760, %v18387_v31  ;;  %v18460_v31 = vand.u32 4294901760, %v18391_v16  ;;  %v18468_v16 = vand.u32 4294901760, %v14399_v45  ;;  %v18476_v45 = vand.u32 4294901760, %v18399_v61  ;;  %v18483_v61 = vld [vmem:[#allocation72_spill] sm:$0xff] }
 0x4ac   : > { %10787 = vmatpush1.bf16.msra.mxu0 %v18434_v14  ;;  %10597 = vmatprep.subr.bf16.mxu1 %v18435_v41  ;;  %v18451_v41 = vld [vmem:[#allocation46_spill] sm:$0xff] }
 0x4ad   : > { %10789 = vmatprep.subr.bf16.mxu0 %v18436_v17  ;;  %v18450_v17 = vld [vmem:[#allocation17_spill] sm:$0xff]  ;;  %v18458_v14 = vld [vmem:[#allocation86_spill] sm:$0xff] }
 0x4af   : > { %10599 = vmatpush1.bf16.msra.mxu1 %v18437_v20  ;;  %v15267_v20 = vld [vmem:[#allocation8 + $0x30] sm:$0xff] }
 0x4b0   : > { %10791 = vmatpush1.bf16.msra.mxu0 %v18438_v18  ;;  %10601 = vmatprep.subr.bf16.mxu1 %v18439_v4  ;;  %v15269_v18 = vld [vmem:[#allocation8 + $0x38] sm:$0xff]  ;;  %v18446_v4 = vld [vmem:[#allocation60_spill] sm:$0xff] }
 0x4b1   : > { %10793 = vmatprep.subr.bf16.mxu0 %v18440_v34  ;;  %v18447_v34 = vld [vmem:[#allocation116_spill] sm:$0xff] }
 0x4b3   : > { %10603 = vmatpush1.bf16.msra.mxu1 %v18441_v28  ;;  %v18448_v28 = vld [vmem:[#allocation45_spill] sm:$0xff] }
 0x4b4   : > { %10795 = vmatpush1.bf16.msra.mxu0 %v18442_v55  ;;  %10605 = vmatprep.subr.bf16.mxu1 %v18443_v57  ;;  %v8246_v55 = vrot.slane %v15262_v54, %v18448_v28  ;;  %v18449_v57 = vld [vmem:[#allocation51_spill] sm:$0xff] }
 0x4b5   : > { %10797 = vmatprep.subr.bf16.mxu0 %v18444_v32 }
 0x4b7   : > { %10607 = vmatpush1.bf16.msra.mxu1 %v18445_v27  ;;  %v18453_v27 = vand.u32 4294901760, %v18386_v22  ;;  %v18459_v22 = vand.u32 4294901760, %v18390_v2 }
 0x4b8   : > { %10799 = vmatpush1.bf16.msra.mxu0 %v18446_v4  ;;  %10609 = vmatprep.subr.bf16.mxu1 %v18447_v34  ;;  %v8254_v4 = vrot.slane %v15267_v20, %v18448_v28  ;;  %v18455_v34 = vand.u32 4294901760, %v18388_v13  ;;  %v18461_v13 = vand.u32 4294901760, %v18392_v52 }
 0x4b9   : > { %10801 = vmatprep.subr.bf16.mxu0 %v18450_v17  ;;  %v10616_v38 = vpack.c.bf16 %v18454_v36, %v18453_v27  ;;  %v10618_v36 = vpack.c.bf16 %v18460_v31, %v18459_v22  ;;  %v18464_v27 = vand.u32 4294901760, %v18395_v15  ;;  %v18465_v17 = vld [vmem:[#allocation39_spill] sm:$0xff]  ;;  %v18469_v22 = vand.u32 4294901760, %v14409_v49 }
 0x4ba   : > { %v10808_v47 = vpack.c.bf16 %v18456_v59, %v18455_v34  ;;  %v10810_v59 = vpack.c.bf16 %v18462_v42, %v18461_v13  ;;  %v18463_v34 = vand.u32 4294901760, %v18394_v46  ;;  %v18471_v31 = vand.u32 4294901760, %v18397_v24  ;;  %v18472_v13 = vld [vmem:[#allocation43_spill] sm:$0xff] }
 0x4bb   : > { %10611 = vmatpush1.bf16.msra.mxu1 %v18452_v8  ;;  %v10622_v52 = vpack.c.bf16 %v18469_v22, %v18468_v16  ;;  %v18473_v42 = vld [vmem:[#allocation47_spill] sm:$0xff]  ;;  %v18480_v16 = vld [vmem:[#allocation112_spill] sm:$0xff]  ;;  %v8170_v22 = vrot.slane %v15264_v23, %v18472_v13 }
 0x4bc   : > { %10803 = vmatpush1.bf16.msra.mxu0 %v18457_v6  ;;  %10613 = vmatprep.subr.bf16.mxu1 %v18458_v14  ;;  %v10620_v32 = vpack.c.bf16 %v18464_v27, %v18463_v34  ;;  %v18466_v6 = vand.u32 4294901760, %v14395_v35  ;;  %v18467_v14 = vand.u32 4294901760, %v14397_v26  ;;  %v10814_v46 = vpack.c.bf16 %v18471_v31, %v18470_v5  ;;  %v18474_v35 = vld [vmem:[#allocation44_spill] sm:$0xff]  ;;  %v18503_v5 = vld [vmem:[#allocation54_spill] sm:$0xff] }
 0x4bd   : > { %10805 = vmatprep.subr.bf16.mxu0 %v18465_v17  ;;  %v18479_v27 = vand.u32 4294901760, %v18478_v53  ;;  %v18535_v17 = vand.u32 4294901760, %v18354_v3 }
 0x4be   : > { %v10812_v2 = vpack.c.bf16 %v18467_v14, %v18466_v6  ;;  %v18475_v6 = vand.u32 4294901760, %v18398_v21  ;;  %v18477_v14 = vand.u32 4294901760, %v18400_v50  ;;  %v18481_v21 = vld [vmem:[#allocation50_spill] sm:$0xff]  ;;  %v18485_v50 = vld [vmem:[#allocation119_spill] sm:$0xff] }
 0x4bf   : > { %10615 = vmatpush1.bf16.msra.mxu1 %v18480_v16  ;;  %v18482_v26 = vand.u32 4294901760, %v18481_v21  ;;  %v18530_v21 = vrot.slane %v15262_v54, %v18472_v13 }
 0x4c0   : > { %v10624_v49 = vpack.c.bf16 %v18476_v45, %v18475_v6  ;;  %v10816_v24 = vpack.c.bf16 %v18479_v27, %v18477_v14  ;;  %v18484_v6 = vand.u32 4294901760, %v18483_v61  ;;  %10807 = vmatpush1.bf16.msra.mxu0 %v18485_v50  ;;  %10617 = vmatprep.subr.bf16.mxu1 %v10616_v38  ;;  %v18486_v14 = vld [vmem:[#allocation21_spill] sm:$0xff]  ;;  %v18488_v27 = vld [vmem:[#allocation36_spill] sm:$0xff]  ;;  %v18490_v61 = vld [vmem:[#allocation127_spill] sm:$0xff] }
 0x4c1   : > { %v18487_v53 = vand.u32 4294901760, %v18486_v14  ;;  %v18489_v34 = vand.u32 4294901760, %v18488_v27  ;;  %10809 = vmatprep.subr.bf16.mxu0 %v10808_v47  ;;  %v18491_v38 = vand.u32 4294901760, %v18490_v61  ;;  %v18497_v50 = vld [vmem:[#allocation59_spill] sm:$0xff]  ;;  %v18499_v61 = vand.u32 4294901760, %v18411_v51  ;;  %v18528_v47 = vld [vmem:[#allocation114_spill] sm:$0xff] }
 0x4c2   : > { %v10626_v45 = vpack.c.bf16 %v18484_v6, %v18482_v26  ;;  %v18492_v6 = vld [vmem:[#allocation126_spill] sm:$0xff]  ;;  %6807 = vmatmul.mubr.f32.vlgmr.msra.gmra.mrb[8].mxu1 %v18497_v50  ;;  %v18498_v26 = vand.u32 4294901760, %v18410_v37  ;;  %v18504_v51 = vand.u32 4294901760, %v18414_v60  ;;  %v18510_v60 = vld [vmem:[#allocation35_spill] sm:$0xff] }
 0x4c3   : > { %v10818_v15 = vpack.c.bf16 %v18489_v34, %v18487_v53  ;;  %v18493_v14 = vand.u32 4294901760, %v18492_v6  ;;  %v18494_v34 = vand.u32 4294901760, %v18408_v44  ;;  %v18495_v53 = vld [vmem:[#allocation82_spill] sm:$0xff]  ;;  %v18500_v44 = vand.u32 4294901760, %v18412_v0  ;;  %7662 = vmatmul.mubr.f32.vlgmr.msra.gmra.mrb[8].mxu0 %v18497_v50  ;;  %10619 = vmatpush1.bf16.msra.mxu1 %v10618_v36 }
 0x4c4   : > { %v18496_v27 = vand.u32 4294901760, %v18495_v53  ;;  %v15391_v6 = vpack.c.bf16 %v18499_v61, %v18498_v26  ;;  %v18502_v53 = vld [vmem:[#allocation49_spill] sm:$0xff]  ;;  %v18505_v26 = vld [vmem:[#allocation122_spill] sm:$0xff]  ;;  %10811 = vmatpush1.bf16.msra.mxu0 %v10810_v59  ;;  %10621 = vmatprep.subr.bf16.mxu1 %v10620_v32  ;;  %v18507_v50 = vand.u32 4294901760, %v18416_v48  ;;  %v8295_v37 = vmul.f32 %v8246_v55, %v18510_v60 }
 0x4c5   : > { %v10628_v31 = vpack.c.bf16 %v18493_v14, %v18491_v38  ;;  %v18501_v38 = vand.u32 4294901760, %v18413_v9  ;;  %v18506_v61 = vand.u32 4294901760, %v18505_v26  ;;  %10813 = vmatprep.subr.bf16.mxu0 %v10812_v2  ;;  %v18512_v59 = vand.u32 4294901760, %v18419_v10  ;;  %6973 = vmatprep.mubr.f32.mxu1 %v18170_v39  ;;  %v18517_v55 = vld [vmem:[#allocation97_spill] sm:$0xff] }
 0x4c6   : > { %v15380_v16 = vpack.c.bf16 %v18496_v27, %v18494_v34  ;;  %v15400_v34 = vld [vmem:[#allocation8 + $0x18] sm:$0xff]  ;;  %v18513_v26 = vand.u32 4294901760, %v18420_v25  ;;  %v18515_v48 = vrot.slane %v15262_v54, %v18449_v57  ;;  %v18518_v25 = vrot.slane %v15264_v23, %v18448_v28  ;;  %7828 = vmatprep.mubr.f32.mxu0 %v18170_v39 }
 0x4c7   : > { %v15397_v14 = vpack.c.bf16 %v18501_v38, %v18500_v44  ;;  %v15410_v0 = vpack.c.bf16 %v18506_v61, %v18504_v51  ;;  %v18508_v44 = vld [vmem:[#allocation95_spill] sm:$0xff]  ;;  %v18511_v51 = vand.u32 4294901760, %v18418_v33  ;;  %v18514_v61 = vand.u32 4294901760, %v18333_v62  ;;  %v18519_v62 = vld [vmem:[#allocation90_spill] sm:$0xff]  ;;  %10623 = vmatpush1.bf16.msra.mxu1 %v10622_v52 }
 0x4c8   : > { %v18509_v38 = vand.u32 4294901760, %v18508_v44  ;;  %v8567_v2 = vmul.f32 %v18515_v48, %v18510_v60  ;;  %v18516_v33 = vrot.slane %v15262_v54, %v18451_v41  ;;  %v15449_v44 = vmul.f32 %v8254_v4, %v18519_v62  ;;  %10815 = vmatpush1.bf16.msra.mxu0 %v10814_v46  ;;  %v7979_v48 = vpop.permute.xlu1 %7978  ;;  %10625 = vmatprep.subr.bf16.mxu1 %v10624_v49  ;;  %v7981_v49 = vpop.permute.xlu0 %7980 }
 0x4c9   : > { %v15427_v32 = vpack.c.bf16 %v18512_v59, %v18511_v51  ;;  %v15433_v36 = vpack.c.bf16 %v18514_v61, %v18513_v26  ;;  %v18522_v26 = vrot.slane %v15267_v20, %v18449_v57  ;;  %v18523_v4 = vrot.slane %v15267_v20, %v18451_v41  ;;  %10817 = vmatprep.subr.bf16.mxu0 %v10816_v24 }
 0x4ca   : > { %v15420_v27 = vpack.c.bf16 %v18509_v38, %v18507_v50  ;;  %v8839_v10 = vmul.f32 %v18516_v33, %v18510_v60  ;;  %v8296_v50 = vmul.f32 %v18518_v25, %v18517_v55  ;;  %v18520_v38 = vrot.slane %v15264_v23, %v18449_v57  ;;  %v18524_v33 = vld [vmem:[#allocation76_spill] sm:$0xff] }
 0x4cb   : > { %v18521_v60 = vrot.slane %v15264_v23, %v18451_v41  ;;  %v15464_v61 = vmul.f32 %v18522_v26, %v18519_v62  ;;  %v8841_v52 = vmul.f32 %v18523_v4, %v18519_v62  ;;  %v18525_v25 = vrot.slane %v15269_v18, %v18448_v28  ;;  %v18529_v62 = vld [vmem:[#allocation38_spill] sm:$0xff]  ;;  %10627 = vmatpush1.bf16.msra.mxu1 %v10626_v45 }
 0x4cc   : > { %v8568_v51 = vmul.f32 %v18520_v38, %v18517_v55  ;;  %v18527_v26 = vrot.slane %v15269_v18, %v18451_v41  ;;  %v8014_v46 = vsel %vm8002_vm7, %v18528_v47, %v7979_v48  ;;  %v18532_v24 = vrot.slane %v15262_v54, %v18474_v35  ;;  %10819 = vmatpush1.bf16.msra.mxu0 %v10818_v15 }
 0x4cd   : > { %v8840_v59 = vmul.f32 %v18521_v60, %v18517_v55  ;;  %v8298_v38 = vmul.f32 %v18525_v25, %v18524_v33  ;;  %v18526_v55 = vrot.slane %v15269_v18, %v18449_v57  ;;  %v8215_v41 = vmul.f32 %v18530_v21, %v8014_v46  ;;  %10629 = vmatprep.subr.bf16.mxu1 %v10628_v31 }
 0x4ce   : > { %v8842_v9 = vmul.f32 %v18527_v26, %v18524_v33  ;;  %v8759_v47 = vmul.f32 %v18532_v24, %v8014_v46  ;;  %v8013_v4 = vsel %vm8002_vm7, %v7979_v48, %v7981_v49  ;;  %v18533_v25 = vand.u32 4294901760, %v18352_v1  ;;  %v7983_v48 = vpop.permute.xlu1 %7982  ;;  %10821 = vmatprep.subr.bf16.mxu0 %v15380_v16 }
 0x4cf   : > { %v8570_v60 = vmul.f32 %v18526_v55, %v18524_v33  ;;  %v18531_v33 = vrot.slane %v15262_v54, %v18473_v42  ;;  %v8216_v57 = vmul.f32 %v8170_v22, %v8013_v4  ;;  %v8622_v55 = vrot.slane %v15267_v20, %v18503_v5  ;;  %10631 = vmatpush1.bf16.msra.mxu1 %v15391_v6  ;;  %v18549_v6 = vld [vmem:[#allocation74_spill] sm:$0xff] }
 0x4d0   : > { %v18534_v21 = vand.u32 4294901760, %v18353_v43  ;;  %v18538_v22 = vrot.slane %v15264_v23, %v18474_v35  ;;  %v18539_v1 = vand.u32 4294901760, %v18421_v12  ;;  %v18540_v43 = vand.u32 4294901760, %v18359_v40  ;;  %10823 = vmatpush1.bf16.msra.mxu0 %v15397_v14  ;;  %10633 = vmatprep.subr.bf16.mxu1 %v15410_v0 }
 0x4d1   : > { %v8487_v26 = vmul.f32 %v18531_v33, %v8014_v46  ;;  %v18536_v33 = vand.u32 4294901760, %v18355_v58  ;;  %v18537_v46 = vrot.slane %v15264_v23, %v18473_v42  ;;  %v8311_v3 = vadd.f32 %v8295_v37, %v8215_v41  ;;  %10825 = vmatprep.subr.bf16.mxu0 %v15420_v27 }
 0x4d2   : > { %v10636_v28 = vpack.c.bf16 %v18534_v21, %v18533_v25  ;;  %v8760_v45 = vmul.f32 %v18538_v22, %v8013_v4  ;;  %v10638_v25 = vpack.c.bf16 %v18540_v43, %v18539_v1  ;;  %v8012_v58 = vsel %vm8002_vm7, %v7981_v49, %v7983_v48  ;;  %v9275_v49 = vld [vmem:[#allocation8 + $0x98] ss:$0 sm:$0xff]  ;;  %v8060_v1 = vpop.permute.xlu1 %8059  ;;  %v9276_v43 = vld [vmem:[#allocation8 + $0xa0] ss:$0 sm:$0xff] }
 0x4d3   : > { %v10828_v8 = vpack.c.bf16 %v18536_v33, %v18535_v17  ;;  %v8488_v24 = vmul.f32 %v18537_v46, %v8013_v4  ;;  %v8583_v21 = vadd.f32 %v8567_v2, %v8487_v26  ;;  %v15524_v17 = vpop.permute.xlu0 %7984  ;;  %v18541_v33 = vand.u32 4294901760, %v18360_v63  ;;  %10635 = vmatpush1.bf16.msra.mxu1 %v15427_v32 }
 0x4d4   : > { %v18542_v15 = vand.u32 4294901760, %v18361_v11  ;;  %v8855_v31 = vadd.f32 %v8839_v10, %v8759_v47  ;;  %v8312_v46 = vadd.f32 %v8296_v50, %v8216_v57  ;;  %v18543_v40 = vrot.slane %v15267_v20, %v18472_v13  ;;  %10827 = vmatpush1.bf16.msra.mxu0 %v15433_v36  ;;  %10637 = vmatprep.subr.bf16.mxu1 %v10636_v28 }
 0x4d5   : > { %v8011_v41 = vsel %vm8002_vm7, %v7983_v48, %v15524_v17  ;;  %v18544_v37 = vrot.slane %v15267_v20, %v18474_v35  ;;  %v18545_v63 = vrot.slane %v15269_v18, %v18472_v13  ;;  %v18546_v11 = vrot.slane %v15269_v18, %v18473_v42  ;;  %10829 = vmatprep.subr.bf16.mxu0 %v10828_v8 }
 0x4d6   : > { %v10830_v4 = vpack.c.bf16 %v18542_v15, %v18541_v33  ;;  %v8217_v12 = vmul.f32 %v18543_v40, %v8012_v58  ;;  %v18547_v10 = vrot.slane %v15269_v18, %v18474_v35  ;;  %v8584_v26 = vadd.f32 %v8568_v51, %v8488_v24 }
 0x4d7   : > { %v8761_v2 = vmul.f32 %v18544_v37, %v8012_v58  ;;  %v8218_v16 = vmul.f32 %v18545_v63, %v8011_v41  ;;  %v8490_v57 = vmul.f32 %v18546_v11, %v8011_v41  ;;  %v8856_v47 = vadd.f32 %v8840_v59, %v8760_v45  ;;  %v8062_v59 = vpop.permute.xlu0 %8061  ;;  %v18553_v63 = vld [vmem:[#allocation73_spill] sm:$0xff]  ;;  %v18554_v11 = vld [vmem:[#allocation20_spill] sm:$0xff]  ;;  %10639 = vmatpush1.bf16.msra.mxu1 %v10638_v25 }
 0x4d8   : > { %v8762_v50 = vmul.f32 %v18547_v10, %v8011_v41  ;;  %v18548_v22 = vrot.slane %v15267_v20, %v18473_v42  ;;  %v8094_v51 = vsel %vm770_vm3, %v18549_v6, %v8060_v1  ;;  %v18550_v14 = vrot.slane %v15400_v34, %v18502_v53  ;;  %10831 = vmatpush1.bf16.msra.mxu0 %v10830_v4 }
 0x4d9   : > { %v15557_v33 = vadd.f32 %v8298_v38, %v8218_v16  ;;  %v15559_v15 = vadd.f32 %v8570_v60, %v8490_v57  ;;  %v18551_v0 = vrot.slane %v15400_v34, %v18503_v5  ;;  %v8934_v45 = vmul.f32 %v9275_v49, %v8094_v51 }
 0x4da   : > { %v15553_v48 = vmul.f32 %v18548_v22, %v8012_v58  ;;  %v15561_v40 = vadd.f32 %v8842_v9, %v8762_v50  ;;  %v8390_v24 = vmul.f32 %v18550_v14, %v8094_v51  ;;  %v8093_v9 = vsel %vm770_vm3, %v8060_v1, %v8062_v59  ;;  %v9277_v50 = vld [vmem:[#allocation8 + $0xa8] ss:$0 sm:$0xff] }
 0x4db   : > { %v8662_v38 = vmul.f32 %v18551_v0, %v8094_v51  ;;  %v8313_v60 = vadd.f32 %v15449_v44, %v8217_v12  ;;  %v8857_v58 = vadd.f32 %v8841_v52, %v8761_v2  ;;  %v18552_v41 = vrot.slane %v15262_v54, %v18502_v53  ;;  %v8064_v44 = vpop.permute.xlu1 %8063  ;;  %v18556_v52 = vld [vmem:[#allocation89_spill] sm:$0xff]  ;;  %v15595_v51 = vpop.permute.xlu0 %8065 }
 0x4dc   : > { %v8935_v27 = vmul.f32 %v9276_v43, %v8093_v9  ;;  %v8406_v16 = vadd.f32 %v8390_v24, %v18553_v63  ;;  %v8950_v57 = vadd.f32 %v8934_v45, %v18554_v11  ;;  %v18555_v34 = vrot.slane %v15262_v54, %v18503_v5  ;;  %v18560_v45 = vld [vmem:[#allocation27_spill] sm:$0xff]  ;;  %v18561_v63 = vld [vmem:[#allocation48_spill] sm:$0xff] }
 0x4dd   : > { %v8391_v37 = vmul.f32 %v18552_v41, %v8093_v9  ;;  %v8678_v12 = vadd.f32 %v8662_v38, %v18556_v52  ;;  %v8092_v32 = vsel %vm770_vm3, %v8062_v59, %v8064_v44  ;;  %v18557_v43 = vrot.slane %v15264_v23, %v18502_v53  ;;  %10641 = vmatprep.subr.bf16.mxu1 %v18560_v45 }
 0x4de   : > { %v8663_v10 = vmul.f32 %v18555_v34, %v8093_v9  ;;  %v8951_v49 = vadd.f32 %v8935_v27, %v8855_v31  ;;  %v8966_v22 = vrot.slane %v8406_v16, 1  ;;  %v8998_v1 = vrot.slane %v8950_v57, 7  ;;  %10833 = vmatprep.subr.bf16.mxu0 %v18561_v63  ;;  %v18576_v63 = vld [vmem:[#allocation52_spill] sm:$0xff] }
 0x4df   : > { %v8407_v2 = vadd.f32 %v8391_v37, %v8311_v3  ;;  %v8392_v54 = vmul.f32 %v18557_v43, %v8092_v32  ;;  %v18558_v36 = vrot.slane %v15264_v23, %v18503_v5  ;;  %v8936_v3 = vmul.f32 %v9277_v50, %v8092_v32  ;;  %v9278_v23 = vld [vmem:[#allocation8 + $0xb0] ss:$0 sm:$0xff] }
 0x4e0   : > { %v8999_v14 = vrot.slane %v8951_v49, 7  ;;  %v8091_v31 = vsel %vm770_vm3, %v8064_v44, %v15595_v51  ;;  %v8982_v59 = vsel %vm827_vm4, %v8966_v22, 0.0  ;;  %v9014_v24 = vsel %vm830_vm5, %v8998_v1, 0.0  ;;  %v18567_v22 = vld [vmem:[#allocation33_spill] sm:$0xff] }
 0x4e1   : > { %v8664_v6 = vmul.f32 %v18558_v36, %v8092_v32  ;;  %v8967_v28 = vrot.slane %v8407_v2, 1  ;;  %v8679_v0 = vadd.f32 %v8663_v10, %v8583_v21  ;;  %v8408_v38 = vadd.f32 %v8392_v54, %v8312_v46 }
 0x4e2   : > { %v9030_v9 = vadd.f32 %v8982_v59, %v8678_v12  ;;  %v8952_v27 = vadd.f32 %v8936_v3, %v8856_v47  ;;  %v18562_v11 = vrot.slane %v15267_v20, %v18502_v53  ;;  %v8665_v21 = vmul.f32 %v8622_v55, %v8091_v31  ;;  %v18564_v12 = vld [vmem:[#allocation121_spill] sm:$0xff] }
 0x4e3   : > { %v8983_v41 = vsel %vm827_vm4, %v8967_v28, 0.0  ;;  %v8680_v37 = vadd.f32 %v8664_v6, %v8584_v26  ;;  %v8968_v16 = vrot.slane %v8408_v38, 1  ;;  %v9015_v46 = vsel %vm830_vm5, %v8999_v14, 0.0  ;;  %v18563_v26 = vld [vmem:[#allocation71_spill] sm:$0xff]  ;;  %10835 = vmatpush1.bf16.msra.mxu0 %v18564_v12  ;;  %v18565_v20 = vld [vmem:[#allocation81_spill] sm:$0xff]  ;;  %v18570_v38 = vld [vmem:[#allocation56_spill] sm:$0xff] }
 0x4e4   : > { %v9031_v25 = vadd.f32 %v8983_v41, %v8679_v0  ;;  %v8393_v57 = vmul.f32 %v18562_v11, %v8091_v31  ;;  %v9046_v4 = vadd.f32 %v9030_v9, %v9014_v24  ;;  %v9000_v34 = vrot.slane %v8952_v27, 7  ;;  %10643 = vmatpush1.bf16.msra.mxu1 %v18563_v26  ;;  %v18566_v55 = vld [vmem:[#allocation105_spill] sm:$0xff]  ;;  %10837 = vmatprep.subr.bf16.mxu0 %v18567_v22  ;;  %v18568_v6 = vld [vmem:[#allocation91_spill] sm:$0xff]  ;;  %v18574_v27 = vld [vmem:[#allocation110_spill] sm:$0xff] }
 0x4e5   : > { %v8937_v10 = vmul.f32 %v9278_v23, %v8091_v31  ;;  %v8585_v47 = vadd.f32 %v15464_v61, %v15553_v48  ;;  %v8984_v44 = vsel %vm827_vm4, %v8968_v16, 0.0  ;;  %10645 = vmatprep.subr.bf16.mxu1 %v18565_v20  ;;  %v18569_v14 = vld [vmem:[#allocation83_spill] sm:$0xff]  ;;  %v18571_v9 = vld [vmem:[#allocation113_spill] sm:$0xff]  ;;  %v18579_v11 = vld [vmem:[#allocation96_spill] sm:$0xff] }
 0x4e6   : > { %v9047_v50 = vadd.f32 %v9031_v25, %v9015_v46  ;;  %v8409_v52 = vadd.f32 %v8393_v57, %v8313_v60  ;;  %v9066_v2 = vadd.f32 %v18566_v55, %v9046_v4  ;;  %v9032_v49 = vadd.f32 %v8984_v44, %v8680_v37  ;;  %v18572_v37 = vld [vmem:[#allocation117_spill] sm:$0xff]  ;;  %v18577_v25 = vld [vmem:[#allocation19_spill] sm:$0xff]  ;;  %v18581_v57 = vld [vmem:[#allocation40_spill] sm:$0xff] }
 0x4e7   : > { %v8953_v32 = vadd.f32 %v8937_v10, %v8857_v58  ;;  %v9016_v61 = vsel %vm830_vm5, %v9000_v34, 0.0  ;;  %v8681_v48 = vadd.f32 %v8665_v21, %v8585_v47  ;;  %10839 = vmatpush1.bf16.msra.mxu0 %v18569_v14  ;;  %v18578_v16 = vld [vmem:[#allocation125_spill] sm:$0xff]  ;;  %v18582_v21 = vld [vmem:[#allocation68_spill] sm:$0xff]  ;;  %v18583_v4 = vld [vmem:[#allocation123_spill] sm:$0xff] }
 0x4e8   : > { %v9067_v1 = vadd.f32 %v18566_v55, %v9047_v50  ;;  %v8969_v43 = vrot.slane %v8409_v52, 1  ;;  %vm9082_vm10 = vcmp.ge.f32.partialorder %v9066_v2, 0.0  ;;  %v9098_v60 = vmul.f32 0.4, %v9066_v2  ;;  %10647 = vmatpush1.bf16.msra.mxu1 %v18568_v6  ;;  %10841 = vmatprep.subr.bf16.mxu0 %v18423_v29  ;;  %v18584_v46 = vld [vmem:[#allocation26_spill] sm:$0xff]  ;;  %v18585_v34 = vld [vmem:[#allocation87_spill] sm:$0xff] }
 0x4e9   : > { %v9048_v54 = vadd.f32 %v9032_v49, %v9016_v61  ;;  %v9001_v36 = vrot.slane %v8953_v32, 7  ;;  %10649 = vmatprep.subr.bf16.mxu1 %v18422_v30  ;;  %v18586_v10 = vld [vmem:[#allocation78_spill] sm:$0xff]  ;;  %v18587_v26 = vld [vmem:[#allocation75_spill] sm:$0xff]  ;;  %v18589_v50 = vld [vmem:[#allocation60_spill] sm:$0xff] }
 0x4ea   : > { %vm9083_vm11 = vcmp.ge.f32.partialorder %v9067_v1, 0.0  ;;  %v9099_v28 = vmul.f32 0.4, %v9067_v1  ;;  %v8985_v58 = vsel %vm827_vm4, %v8969_v43, 0.0  ;;  %v9114_v3 = vsel %vm9082_vm10, %v9066_v2, %v9098_v60  ;;  %7830 = vmatmul.mubr.f32.vlgmr.msra.gmra.mrb[8].mxu0 %v18570_v38  ;;  %v18588_v47 = vld [vmem:[#allocation67_spill] sm:$0xff]  ;;  %v18590_v44 = vld [vmem:[#allocation116_spill] sm:$0xff] }
 0x4eb   : > { %v9068_v31 = vadd.f32 %v18566_v55, %v9048_v54  ;;  %v9033_v59 = vadd.f32 %v8985_v58, %v8681_v48  ;;  %9130 = vst [vmem:[%s14585_s12 + $0x18] sm:$0xff] %v9114_v3  ;;  %v9017_v0 = vsel %vm830_vm5, %v9001_v36, 0.0  ;;  %6975 = vmatmul.mubr.f32.vlgmr.msra.gmra.mrb[8].mxu1 %v18570_v38  ;;  %10843 = vmatpush1.bf16.msra.mxu0 %v18426_v56  ;;  %v18591_v52 = vld [vmem:[#allocation17_spill] sm:$0xff]  ;;  %v18593_v20 = vld [vmem:[#allocation70_spill] sm:$0xff]  ;;  %v18595_v49 = vld [vmem:[#allocation39_spill] sm:$0xff] }
 0x4ec   : > { %v9115_v24 = vsel %vm9083_vm11, %v9067_v1, %v9099_v28  ;;  %10651 = vmatpush1.bf16.msra.mxu1 %v18425_v19  ;;  %10845 = vmatprep.subr.bf16.mxu0 %v18571_v9  ;;  %v18573_v19 = vld [vmem:[#allocation118_spill] sm:$0xff]  ;;  %v18592_v12 = vld [vmem:[#allocation93_spill] sm:$0xff]  ;;  %v18596_v32 = vld [vmem:[#allocation112_spill] sm:$0xff] }
 0x4ed   : > { %9131 = vst [vmem:[%s14585_s12 + $0x20] sm:$0xff] %v9115_v24  ;;  %vm9084_vm12 = vcmp.ge.f32.partialorder %v9068_v31, 0.0  ;;  %v9100_v23 = vmul.f32 0.4, %v9068_v31  ;;  %v9049_v45 = vadd.f32 %v9033_v59, %v9017_v0  ;;  %10653 = vmatprep.subr.bf16.mxu1 %v18427_v7  ;;  %7077 = vmatprep.mubr.f32.mxu1 %v18170_v39  ;;  %v18575_v7 = vld [vmem:[#allocation79_spill] sm:$0xff]  ;;  %v18594_v2 = vld [vmem:[#allocation86_spill] sm:$0xff] }
 0x4ee   : > { %7932 = vmatprep.mubr.f32.mxu0 %v18170_v39  ;;  %v18580_v39 = vld [vmem:[#allocation100_spill] sm:$0xff]  ;;  %v18597_v22 = vld [vmem:[#allocation119_spill] sm:$0xff]  ;;  %v15690_v36 = vld [vmem:[#allocation8 + $0x50] sm:$0xff] }
 0x4ef   : > { %v9116_v30 = vsel %vm9084_vm12, %v9068_v31, %v9100_v23  ;;  %v9069_v29 = vadd.f32 %v18566_v55, %v9049_v45  ;;  %10847 = vmatpush1.bf16.msra.mxu0 %v18573_v19  ;;  %v15686_v60 = vld [vmem:[#allocation8 + $0x40] sm:$0xff]  ;;  %v15688_v54 = vld [vmem:[#allocation8 + $0x48] sm:$0xff]  ;;  %v18598_v6 = vld [vmem:[#allocation45_spill] sm:$0xff] }
 0x4f0   : > { %9132 = vst [vmem:[%s14585_s12 + $0x28] sm:$0xff] %v9116_v30  ;;  %10655 = vmatpush1.bf16.msra.mxu1 %v18572_v37  ;;  %10849 = vmatprep.subr.bf16.mxu0 %v18575_v7  ;;  %v8262_v28 = vrot.slane %v15686_v60, %v18598_v6  ;;  %v15694_v58 = vld [vmem:[#allocation8 + $0x58] sm:$0xff]  ;;  %v18600_v14 = vld [vmem:[#allocation51_spill] sm:$0xff]  ;;  %v8266_v24 = vrot.slane %v15688_v54, %v18598_v6 }
 0x4f1   : > { %vm9085_vm13 = vcmp.ge.f32.partialorder %v9069_v29, 0.0  ;;  %v9101_v41 = vmul.f32 0.4, %v9069_v29  ;;  %10657 = vmatprep.subr.bf16.mxu1 %v18574_v27  ;;  %18599 = vst [vmem:[#allocation42_spill] sm:$0xff] %v15694_v58  ;;  %v8534_v3 = vrot.slane %v15686_v60, %v18600_v14  ;;  %v18601_v31 = vld [vmem:[#allocation46_spill] sm:$0xff]  ;;  %v8538_v0 = vrot.slane %v15688_v54, %v18600_v14 }
 0x4f2   : > { %v8806_v59 = vrot.slane %v15686_v60, %v18601_v31  ;;  %v8270_v23 = vrot.slane %v15690_v36, %v18598_v6  ;;  %v8542_v45 = vrot.slane %v15690_v36, %v18600_v14  ;;  %v8814_v30 = vrot.slane %v15690_v36, %v18601_v31 }
 0x4f3   : > { %v9117_v56 = vsel %vm9085_vm13, %v9069_v29, %v9101_v41  ;;  %10851 = vmatpush1.bf16.msra.mxu0 %v18577_v25  ;;  %v8182_v29 = vrot.slane %v15686_v60, %v18472_v13  ;;  %v8274_v9 = vrot.slane %v15694_v58, %v18598_v6  ;;  %v8546_v41 = vrot.slane %v15694_v58, %v18600_v14 }
 0x4f4   : > { %9133 = vst [vmem:[%s14585_s12 + $0x30] sm:$0xff] %v9117_v56  ;;  %10659 = vmatpush1.bf16.msra.mxu1 %v18576_v63  ;;  %10853 = vmatprep.subr.bf16.mxu0 %v18579_v11  ;;  %v8818_v37 = vrot.slane %v15694_v58, %v18601_v31  ;;  %v8454_v19 = vrot.slane %v15686_v60, %v18473_v42 }
 0x4f5   : > { %10661 = vmatprep.subr.bf16.mxu1 %v18578_v16  ;;  %v8726_v27 = vrot.slane %v15686_v60, %v18474_v35  ;;  %v8186_v56 = vrot.slane %v15688_v54, %v18472_v13  ;;  %v8458_v7 = vrot.slane %v15688_v54, %v18473_v42  ;;  %v8730_v63 = vrot.slane %v15688_v54, %v18474_v35 }
 0x4f6   : > { %v8190_v25 = vrot.slane %v15690_v36, %v18472_v13  ;;  %v8734_v11 = vrot.slane %v15690_v36, %v18474_v35 }
 0x4f7   : > { %10855 = vmatpush1.bf16.msra.mxu0 %v18581_v57  ;;  %v8466_v57 = vrot.slane %v15694_v58, %v18473_v42 }
 0x4f8   : > { %10663 = vmatpush1.bf16.msra.mxu1 %v18580_v39  ;;  %10857 = vmatprep.subr.bf16.mxu0 %v18583_v4  ;;  %v8194_v39 = vrot.slane %v15694_v58, %v18472_v13  ;;  %v8354_v4 = vrot.slane %v15269_v18, %v18502_v53 }
 0x4f9   : > { %10665 = vmatprep.subr.bf16.mxu1 %v18582_v21  ;;  %v8738_v21 = vrot.slane %v15694_v58, %v18474_v35 }
 0x4fb   : > { %10859 = vmatpush1.bf16.msra.mxu0 %v18585_v34  ;;  %v8626_v34 = vrot.slane %v15269_v18, %v18503_v5 }
 0x4fc   : > { %10667 = vmatpush1.bf16.msra.mxu1 %v18584_v46  ;;  %10861 = vmatprep.subr.bf16.mxu0 %v18587_v26  ;;  %v8630_v26 = vrot.slane %v15686_v60, %v18503_v5 }
 0x4fd   : > { %10669 = vmatprep.subr.bf16.mxu1 %v18586_v10  ;;  %v8358_v10 = vrot.slane %v15686_v60, %v18502_v53 }
 0x4ff   : > { %10863 = vmatpush1.bf16.msra.mxu0 %v18589_v50 }
 0x500   : > { %10671 = vmatpush1.bf16.msra.mxu1 %v18588_v47  ;;  %10865 = vmatprep.subr.bf16.mxu0 %v18591_v52 }
 0x501   : > { %10673 = vmatprep.subr.bf16.mxu1 %v18590_v44 }
 0x503   : > { %10867 = vmatpush1.bf16.msra.mxu0 %v18593_v20 }
 0x504   : > { %10675 = vmatpush1.bf16.msra.mxu1 %v18592_v12  ;;  %10869 = vmatprep.subr.bf16.mxu0 %v18595_v49 }
 0x505   : > { %10677 = vmatprep.subr.bf16.mxu1 %v18594_v2 }
 0x507   : > { %10871 = vmatpush1.bf16.msra.mxu0 %v18597_v22 }
 0x508   : > { %10679 = vmatpush1.bf16.msra.mxu1 %v18596_v32 }
 0x50a   : > { %7934 = vmatmul.mubr.f32.vlgmr.msra.gmra.mrb[8].mxu0 %v18570_v38 }
 0x50b   : > { %7079 = vmatmul.mubr.f32.vlgmr.msra.gmra.mrb[8].mxu1 %v18570_v38  ;;  %v8810_v38 = vrot.slane %v15688_v54, %v18601_v31 }
 0x511   : > { %v5370_v1 = vpop.f32.mrb[6].mxu1 }
 0x512   : > { %v6225_v61 = vpop.f32.mrb[6].mxu0  ;;  %7986 = vrot.lane.b32.xlu1 %v5370_v1, %s11247_s16  ;;  %v5372_v48 = vpop.f32.mrb[7].mxu1  ;;  %v8299_v46 = vmul.f32 %v8262_v28, %v5370_v1  ;;  %v8571_v50 = vmul.f32 %v8534_v3, %v5370_v1  ;;  %v8843_v44 = vmul.f32 %v8806_v59, %v5370_v1 }
 0x513   : > { %v6227_v43 = vpop.f32.mrb[7].mxu0  ;;  %7988 = vrot.lane.b32.xlu0 %v5372_v48, %s11247_s16  ;;  %v8300_v52 = vmul.f32 %v8266_v24, %v5372_v48  ;;  %v8572_v12 = vmul.f32 %v8538_v0, %v5372_v48  ;;  %v8844_v49 = vmul.f32 %v8810_v38, %v5372_v48  ;;  %v8301_v32 = vmul.f32 %v8270_v23, %v6225_v61 }
 0x514   : > { %v15753_v22 = vmul.f32 %v8542_v45, %v6225_v61  ;;  %v8845_v58 = vmul.f32 %v8814_v30, %v6225_v61  ;;  %v8302_v3 = vmul.f32 %v8274_v9, %v6227_v43  ;;  %v8846_v59 = vmul.f32 %v8818_v37, %v6227_v43 }
 0x515   : > { %v8634_v23 = vrot.slane %v15688_v54, %v18503_v5 }
 0x516   : > { %7990 = vrot.lane.b32.xlu1 %v6225_v61, %s11247_s16 }
 0x517   : > { %7992 = vrot.lane.b32.xlu0 %v6227_v43, %s11247_s16 }
 0x51a   : > { %8067 = vrot.lane.b32.xlu1 %v5370_v1, %s11248_s19  ;;  %v8574_v1 = vmul.f32 %v8546_v41, %v6227_v43 }
 0x51b   : > { %8069 = vrot.lane.b32.xlu0 %v5372_v48, %s11248_s19 }
 0x51e   : > { %8071 = vrot.lane.b32.xlu1 %v6225_v61, %s11248_s19  ;;  %v8366_v61 = vrot.slane %v15690_v36, %v18502_v53 }
 0x51f   : > { %8073 = vrot.lane.b32.xlu0 %v6227_v43, %s11248_s19  ;;  %v8638_v43 = vrot.slane %v15690_v36, %v18503_v5 }
 0x584   : > { %v7987_v47 = vpop.permute.xlu1 %7986 }
 0x585   : > { %v8010_v20 = vsel %vm8002_vm7, %v15524_v17, %v7987_v47  ;;  %v7989_v2 = vpop.permute.xlu0 %7988  ;;  %v8362_v17 = vrot.slane %v15688_v54, %v18502_v53 }
 0x586   : > { %v8219_v18 = vmul.f32 %v8182_v29, %v8010_v20  ;;  %v8491_v28 = vmul.f32 %v8454_v19, %v8010_v20  ;;  %v8763_v16 = vmul.f32 %v8726_v27, %v8010_v20  ;;  %v8009_v60 = vsel %vm8002_vm7, %v7987_v47, %v7989_v2 }
 0x587   : > { %v8220_v24 = vmul.f32 %v8186_v56, %v8009_v60  ;;  %v8492_v0 = vmul.f32 %v8458_v7, %v8009_v60  ;;  %v8764_v35 = vmul.f32 %v8730_v63, %v8009_v60  ;;  %v9279_v56 = vld [vmem:[#allocation8 + $0xb8] ss:$0 sm:$0xff] }
 0x588   : > { %v7991_v13 = vpop.permute.xlu1 %7990  ;;  %v8315_v45 = vadd.f32 %v8299_v46, %v8219_v18  ;;  %v8587_v30 = vadd.f32 %v8571_v50, %v8491_v28  ;;  %v8859_v29 = vadd.f32 %v8843_v44, %v8763_v16  ;;  %v18602_v50 = vrot.slane %v15690_v36, %v18473_v42 }
 0x589   : > { %v8008_v48 = vsel %vm8002_vm7, %v7989_v2, %v7991_v13  ;;  %v15761_v38 = vpop.permute.xlu0 %7992  ;;  %v8316_v7 = vadd.f32 %v8300_v52, %v8220_v24  ;;  %v8588_v54 = vadd.f32 %v8572_v12, %v8492_v0  ;;  %v8860_v63 = vadd.f32 %v8844_v49, %v8764_v35  ;;  %v9280_v2 = vld [vmem:[#allocation8 + $0xc0] ss:$0 sm:$0xff] }
 0x58a   : > { %v8007_v9 = vsel %vm8002_vm7, %v7991_v13, %v15761_v38  ;;  %v8221_v41 = vmul.f32 %v8190_v25, %v8008_v48  ;;  %v8765_v47 = vmul.f32 %v8734_v11, %v8008_v48  ;;  %v8493_v44 = vmul.f32 %v18602_v50, %v8008_v48 }
 0x58b   : > { %v8222_v37 = vmul.f32 %v8194_v39, %v8007_v9  ;;  %v8494_v19 = vmul.f32 %v8466_v57, %v8007_v9  ;;  %v8766_v27 = vmul.f32 %v8738_v21, %v8007_v9 }
 0x58c   : > { %v8068_v20 = vpop.permute.xlu1 %8067  ;;  %v8317_v11 = vadd.f32 %v8301_v32, %v8221_v41  ;;  %v8861_v49 = vadd.f32 %v8845_v58, %v8765_v47  ;;  %v9282_v41 = vld [vmem:[#allocation8 + $0xd0] ss:$0 sm:$0xff] }
 0x58d   : > { %v15772_v60 = vadd.f32 %v8302_v3, %v8222_v37  ;;  %v15774_v46 = vadd.f32 %v8574_v1, %v8494_v19  ;;  %v15776_v16 = vadd.f32 %v8846_v59, %v8766_v27  ;;  %v8090_v13 = vsel %vm770_vm3, %v15595_v51, %v8068_v20  ;;  %v8070_v25 = vpop.permute.xlu0 %8069  ;;  %v9281_v3 = vld [vmem:[#allocation8 + $0xc8] ss:$0 sm:$0xff] }
 0x58e   : > { %v8394_v39 = vmul.f32 %v8354_v4, %v8090_v13  ;;  %v8666_v57 = vmul.f32 %v8626_v34, %v8090_v13  ;;  %v8938_v21 = vmul.f32 %v9279_v56, %v8090_v13  ;;  %v8089_v35 = vsel %vm770_vm3, %v8068_v20, %v8070_v25 }
 0x58f   : > { %v8395_v52 = vmul.f32 %v8358_v10, %v8089_v35  ;;  %v8939_v12 = vmul.f32 %v9280_v2, %v8089_v35  ;;  %v8667_v51 = vmul.f32 %v8630_v26, %v8089_v35 }
 0x590   : > { %v8410_v18 = vadd.f32 %v8394_v39, %v15557_v33  ;;  %v8954_v28 = vadd.f32 %v8938_v21, %v15561_v40  ;;  %v8072_v4 = vpop.permute.xlu1 %8071  ;;  %v8682_v34 = vadd.f32 %v8666_v57, %v15559_v15 }
 0x591   : > { %v8411_v1 = vadd.f32 %v8395_v52, %v8315_v45  ;;  %v8955_v59 = vadd.f32 %v8939_v12, %v8859_v29  ;;  %v8088_v32 = vsel %vm770_vm3, %v8070_v25, %v8072_v4  ;;  %v15791_v24 = vpop.permute.xlu0 %8073  ;;  %v8683_v45 = vadd.f32 %v8667_v51, %v8587_v30 }
 0x592   : > { %v8970_v36 = vrot.slane %v8410_v18, 1  ;;  %v9002_v10 = vrot.slane %v8954_v28, 7  ;;  %v8396_v0 = vmul.f32 %v8362_v17, %v8088_v32  ;;  %v8668_v58 = vmul.f32 %v8634_v23, %v8088_v32 }
 0x593   : > { %v8971_v48 = vrot.slane %v8411_v1, 1  ;;  %v9003_v33 = vrot.slane %v8955_v59, 7  ;;  %v8940_v9 = vmul.f32 %v9281_v3, %v8088_v32  ;;  %v8087_v40 = vsel %vm770_vm3, %v8072_v4, %v15791_v24 }
 0x594   : > { %v8986_v15 = vsel %vm827_vm4, %v8970_v36, 0.0  ;;  %v9018_v26 = vsel %vm830_vm5, %v9002_v10, 0.0  ;;  %v8412_v29 = vadd.f32 %v8396_v0, %v8316_v7  ;;  %v8684_v23 = vadd.f32 %v8668_v58, %v8588_v54 }
 0x595   : > { %v9034_v37 = vadd.f32 %v8986_v15, %v8682_v34  ;;  %v8987_v17 = vsel %vm827_vm4, %v8971_v48, 0.0  ;;  %v8956_v19 = vadd.f32 %v8940_v9, %v8860_v63  ;;  %v8397_v47 = vmul.f32 %v8366_v61, %v8087_v40  ;;  %v15833_v9 = vld [vmem:[#allocation8] sm:$0xff] }
 0x596   : > { %v9035_v27 = vadd.f32 %v8987_v17, %v8683_v45  ;;  %v8972_v56 = vrot.slane %v8412_v29, 1  ;;  %v8669_v20 = vmul.f32 %v8638_v43, %v8087_v40  ;;  %v9019_v13 = vsel %vm830_vm5, %v9003_v33, 0.0  ;;  %v18604_v17 = vld [vmem:[#allocation94_spill] sm:$0xff] }
 0x597   : > { %v9050_v2 = vadd.f32 %v9034_v37, %v9018_v26  ;;  %v9004_v25 = vrot.slane %v8956_v19, 7  ;;  %v8941_v39 = vmul.f32 %v9282_v41, %v8087_v40  ;;  %v8589_v30 = vadd.f32 %v15753_v22, %v8493_v44  ;;  %v9272_v41 = vld [vmem:[#allocation8 + $0x80] ss:$0 sm:$0xff]  ;;  %v18603_v37 = vld [vmem:[#allocation106_spill] sm:$0xff] }
 0x598   : > { %v9051_v7 = vadd.f32 %v9035_v27, %v9019_v13  ;;  %v8988_v57 = vsel %vm827_vm4, %v8972_v56, 0.0  ;;  %v8413_v21 = vadd.f32 %v8397_v47, %v8317_v11  ;;  %v8230_v40 = vrot.slane %v15833_v9, %v18598_v6  ;;  %v15849_v19 = vld [vmem:[#allocation8 + $0x78] sm:$0xff]  ;;  %v15851_v27 = vld [vmem:[#allocation8 + $0x60] sm:$0xff]  ;;  %v18605_v56 = vld [vmem:[#allocation124_spill] sm:$0xff] }
 0x599   : > { %v9070_v54 = vadd.f32 %v18566_v55, %v9050_v2  ;;  %v9036_v63 = vadd.f32 %v8988_v57, %v8684_v23  ;;  %v8957_v35 = vadd.f32 %v8941_v39, %v8861_v49  ;;  %v9020_v43 = vsel %vm830_vm5, %v9004_v25, 0.0  ;;  %v15859_v2 = vld [vmem:[#allocation8 + $0x68] sm:$0xff] }
 0x59a   : > { %v9071_v61 = vadd.f32 %v18566_v55, %v9051_v7  ;;  %v8685_v50 = vadd.f32 %v8669_v20, %v8589_v30  ;;  %v8973_v52 = vrot.slane %v8413_v21, 1  ;;  %v8502_v15 = vrot.slane %v15833_v9, %v18600_v14  ;;  %v15870_v7 = vld [vmem:[#allocation8 + $0x70] sm:$0xff] }
 0x59b   : > { %vm9086_vm14 = vcmp.ge.f32.partialorder %v9070_v54, 0.0  ;;  %v9102_v22 = vmul.f32 0.4, %v9070_v54  ;;  %v9052_v44 = vadd.f32 %v9036_v63, %v9020_v43  ;;  %v9005_v12 = vrot.slane %v8957_v35, 7 }
 0x59c   : > { %vm9087_vm15 = vcmp.ge.f32.partialorder %v9071_v61, 0.0  ;;  %v9103_v11 = vmul.f32 0.4, %v9071_v61  ;;  %v8989_v18 = vsel %vm827_vm4, %v8973_v52, 0.0  ;;  %v8774_v26 = vrot.slane %v15833_v9, %v18601_v31 }
 0x59d   : > { %v9118_v28 = vsel %vm9086_vm14, %v9070_v54, %v9102_v22  ;;  %v9072_v49 = vadd.f32 %v18566_v55, %v9052_v44  ;;  %v9037_v51 = vadd.f32 %v8989_v18, %v8685_v50  ;;  %v9021_v4 = vsel %vm830_vm5, %v9005_v12, 0.0 }
 0x59e   : > { %9134 = vst [vmem:[%s14585_s12 + $0x38] sm:$0xff] %v9118_v28  ;;  %v9119_v3 = vsel %vm9087_vm15, %v9071_v61, %v9103_v11  ;;  %v8326_v45 = vrot.slane %v15833_v9, %v18502_v53  ;;  %v8598_v29 = vrot.slane %v15833_v9, %v18503_v5  ;;  %v8097_v23 = vsel %vm770_vm3, %v18604_v17, %v18603_v37  ;;  %v18607_v11 = vld [vmem:[#allocation43_spill] sm:$0xff] }
 0x59f   : > { %9135 = vst [vmem:[%s14585_s12 + $0x40] sm:$0xff] %v9119_v3  ;;  %vm9088_vm0 = vcmp.ge.f32.partialorder %v9072_v49, 0.0  ;;  %v9104_v34 = vmul.f32 0.4, %v9072_v49  ;;  %v9053_v1 = vadd.f32 %v9037_v51, %v9021_v4  ;;  %v15854_v47 = vmul.f32 %v8230_v40, %v18605_v56 }
 0x5a0   : > { %v15857_v20 = vmul.f32 %v8502_v15, %v18605_v56  ;;  %v15862_v13 = vmul.f32 %v8774_v26, %v18605_v56  ;;  %v15864_v25 = vmul.f32 %v8326_v45, %v8097_v23  ;;  %v15866_v39 = vmul.f32 %v8598_v29, %v8097_v23 }
 0x5a1   : > { %v9120_v59 = vsel %vm9088_vm0, %v9072_v49, %v9104_v34  ;;  %v9073_v32 = vadd.f32 %v18566_v55, %v9053_v1  ;;  %v15868_v30 = vmul.f32 %v9272_v41, %v8097_v23  ;;  %v8290_v57 = vrot.slane %v15849_v19, %v18598_v6  ;;  %v18608_v49 = vld [vmem:[#allocation44_spill] sm:$0xff]  ;;  %v18609_v1 = vld [vmem:[#allocation42_spill] sm:$0xff] }
 0x5a2   : > { %9136 = vst [vmem:[%s14585_s12 + $0x48] sm:$0xff] %v9120_v59  ;;  %v8562_v21 = vrot.slane %v15849_v19, %v18600_v14  ;;  %v8834_v54 = vrot.slane %v15849_v19, %v18601_v31  ;;  %v8278_v63 = vrot.slane %v15851_v27, %v18598_v6  ;;  %v8282_v35 = vrot.slane %v15859_v2, %v18598_v6 }
 0x5a3   : > { %vm9089_vm1 = vcmp.ge.f32.partialorder %v9073_v32, 0.0  ;;  %v9105_v36 = vmul.f32 0.4, %v9073_v32  ;;  %18606 = vst [vmem:[#allocation98_spill] sm:$0xff] %v15868_v30  ;;  %v8554_v61 = vrot.slane %v15859_v2, %v18600_v14  ;;  %v8826_v43 = vrot.slane %v15859_v2, %v18601_v31 }
 0x5a4   : > { %v8550_v50 = vrot.slane %v15851_v27, %v18600_v14  ;;  %v8822_v52 = vrot.slane %v15851_v27, %v18601_v31  ;;  %v8286_v22 = vrot.slane %v15870_v7, %v18598_v6  ;;  %v8558_v44 = vrot.slane %v15870_v7, %v18600_v14 }
 0x5a5   : > { %v9121_v10 = vsel %vm9089_vm1, %v9073_v32, %v9105_v36  ;;  %v8830_v12 = vrot.slane %v15870_v7, %v18601_v31  ;;  %v8198_v18 = vrot.slane %v15851_v27, %v18607_v11  ;;  %v8470_v28 = vrot.slane %v15851_v27, %v18473_v42 }
 0x5a6   : > { %9137 = vst [vmem:[%s14585_s12 + $0x50] sm:$0xff] %v9121_v10  ;;  %v8742_v51 = vrot.slane %v15851_v27, %v18608_v49  ;;  %v8202_v3 = vrot.slane %v15859_v2, %v18607_v11  ;;  %v8474_v6 = vrot.slane %v15859_v2, %v18473_v42  ;;  %v8746_v14 = vrot.slane %v15859_v2, %v18608_v49 }
 0x5a7   : > { %v8206_v31 = vrot.slane %v15870_v7, %v18607_v11  ;;  %v8478_v4 = vrot.slane %v15870_v7, %v18473_v42  ;;  %v8750_v34 = vrot.slane %v15870_v7, %v18608_v49  ;;  %v8370_v59 = vrot.slane %v18609_v1, %v18502_v53 }
 0x5a8   : > { %v8374_v32 = vrot.slane %v15851_v27, %v18502_v53  ;;  %v8642_v36 = vrot.slane %v18609_v1, %v18503_v5  ;;  %v8646_v26 = vrot.slane %v15851_v27, %v18503_v5 }
 0x5dd   : > { %v15821_v58 = vpop.f32.mrb[8].mxu0 }
 0x5de   : > { %v7080_v0 = vpop.f32.mrb[8].mxu1  ;;  %v7937_v33 = vpop.f32.mrb[9].mxu0  ;;  %v15923_v23 = vmul.f32 %v8286_v22, %v15821_v58 }
 0x5df   : > { %7994 = vrot.lane.b32.xlu1 %v7080_v0, %s11247_s16  ;;  %v7082_v48 = vpop.f32.mrb[9].mxu1  ;;  %v8303_v10 = vmul.f32 %v8278_v63, %v7080_v0  ;;  %v8575_v40 = vmul.f32 %v8550_v50, %v7080_v0  ;;  %v8847_v15 = vmul.f32 %v8822_v52, %v7080_v0  ;;  %v15925_v56 = vmul.f32 %v8290_v57, %v7937_v33 }
 0x5e0   : > { %7996 = vrot.lane.b32.xlu0 %v7082_v48, %s11247_s16  ;;  %v8304_v45 = vmul.f32 %v8282_v35, %v7082_v48  ;;  %v8576_v29 = vmul.f32 %v8554_v61, %v7082_v48  ;;  %v8848_v41 = vmul.f32 %v8826_v43, %v7082_v48  ;;  %v15927_v30 = vmul.f32 %v8562_v21, %v7937_v33 }
 0x5e1   : > { %v15929_v55 = vmul.f32 %v8834_v54, %v7937_v33  ;;  %v15940_v35 = vmul.f32 %v8830_v12, %v15821_v58  ;;  %v8150_v57 = vrot.slane %v15833_v9, %v18607_v11  ;;  %v8482_v54 = vrot.slane %v15849_v19, %v18473_v42 }
 0x5e3   : > { %7998 = vrot.lane.b32.xlu1 %v15821_v58, %s11247_s16 }
 0x5e4   : > { %8077 = vrot.lane.b32.xlu0 %v7082_v48, %s11248_s19  ;;  %v15937_v48 = vmul.f32 %v8558_v44, %v15821_v58  ;;  %v8694_v44 = vrot.slane %v15833_v9, %v18608_v49 }
 0x5e7   : > { %8075 = vrot.lane.b32.xlu1 %v7080_v0, %s11248_s19 }
 0x5eb   : > { %8000 = vrot.lane.b32.xlu1 %v7937_v33, %s11247_s16 }
 0x5ef   : > { %8081 = vrot.lane.b32.xlu1 %v7937_v33, %s11248_s19  ;;  %v8210_v33 = vrot.slane %v15849_v19, %v18607_v11  ;;  %v15955_v11 = vadd.s32 1920, %v18529_v62 }
 0x5f1   : > { %vm8050_vm6 = vcmp.lt.s32.totalorder %v15955_v11, 2032 }
 0x5f3   : > { %8079 = vrot.lane.b32.xlu1 %v15821_v58, %s11248_s19 }
 0x651   : > { %v7995_v37 = vpop.permute.xlu1 %7994 }
 0x652   : > { %v8006_v0 = vsel %vm8002_vm7, %v15761_v38, %v7995_v37  ;;  %v7997_v63 = vpop.permute.xlu0 %7996  ;;  %v8422_v38 = vrot.slane %v15833_v9, %v18473_v42 }
 0x653   : > { %v8005_v27 = vsel %vm8002_vm7, %v7995_v37, %v7997_v63  ;;  %v8223_v21 = vmul.f32 %v8198_v18, %v8006_v0  ;;  %v8495_v61 = vmul.f32 %v8470_v28, %v8006_v0  ;;  %v8767_v43 = vmul.f32 %v8742_v51, %v8006_v0  ;;  %v9283_v28 = vld [vmem:[#allocation8 + $0xd8] ss:$0 sm:$0xff]  ;;  %v9284_v51 = vld [vmem:[#allocation8 + $0xe0] ss:$0 sm:$0xff] }
 0x654   : > { %v8224_v50 = vmul.f32 %v8202_v3, %v8005_v27  ;;  %v8496_v52 = vmul.f32 %v8474_v6, %v8005_v27  ;;  %v8768_v58 = vmul.f32 %v8746_v14, %v8005_v27 }
 0x655   : > { %v7999_v22 = vpop.permute.xlu1 %7998  ;;  %v8319_v3 = vadd.f32 %v8303_v10, %v8223_v21  ;;  %v8591_v1 = vadd.f32 %v8575_v40, %v8495_v61  ;;  %v8863_v37 = vadd.f32 %v8847_v15, %v8767_v43 }
 0x656   : > { %v8004_v18 = vsel %vm8002_vm7, %v7997_v63, %v7999_v22  ;;  %v15971_v0 = vadd.f32 %v8304_v45, %v8224_v50  ;;  %v15973_v63 = vadd.f32 %v8576_v29, %v8496_v52  ;;  %v15975_v27 = vpop.permute.xlu0 %8077  ;;  %v15977_v21 = vadd.f32 %v8848_v41, %v8768_v58 }
 0x657   : > { %v15979_v9 = vmul.f32 %v8206_v31, %v8004_v18  ;;  %v15988_v43 = vmul.f32 %v8478_v4, %v8004_v18  ;;  %v15990_v41 = vmul.f32 %v8750_v34, %v8004_v18 }
 0x659   : > { %v8076_v10 = vpop.permute.xlu1 %8075 }
 0x65a   : > { %v8085_v6 = vsel %vm770_vm3, %v8076_v10, %v15975_v27  ;;  %v8086_v40 = vsel %vm770_vm3, %v15791_v24, %v8076_v10 }
 0x65b   : > { %v8398_v15 = vmul.f32 %v8370_v59, %v8086_v40  ;;  %v8399_v45 = vmul.f32 %v8374_v32, %v8085_v6  ;;  %v8670_v29 = vmul.f32 %v8642_v36, %v8086_v40  ;;  %v8671_v61 = vmul.f32 %v8646_v26, %v8085_v6  ;;  %v18610_v32 = vld [vmem:[#allocation88_spill] sm:$0xff] }
 0x65c   : > { %v8942_v31 = vmul.f32 %v9283_v28, %v8086_v40  ;;  %v8943_v50 = vmul.f32 %v9284_v51, %v8085_v6 }
 0x65d   : > { %v8414_v52 = vadd.f32 %v8398_v15, %v15772_v60  ;;  %v8415_v58 = vadd.f32 %v8399_v45, %v8319_v3  ;;  %v8686_v14 = vadd.f32 %v8670_v29, %v15774_v46  ;;  %v8687_v42 = vadd.f32 %v8671_v61, %v8591_v1  ;;  %v8001_v12 = vpop.permute.xlu1 %8000 }
 0x65e   : > { %v8958_v24 = vadd.f32 %v8942_v31, %v15776_v16  ;;  %v8959_v10 = vadd.f32 %v8943_v50, %v8863_v37  ;;  %v8003_v59 = vsel %vm8002_vm7, %v7999_v22, %v8001_v12  ;;  %v8018_v4 = vsel %vm8002_vm7, %v8001_v12, %v18610_v32  ;;  %v9287_v31 = vld [vmem:[#allocation8 + $0xf8] ss:$0 sm:$0xff] }
 0x65f   : > { %v8974_v34 = vrot.slane %v8414_v52, 1  ;;  %v8975_v36 = vrot.slane %v8415_v58, 1  ;;  %v8019_v60 = vsel %vm766_vm2, %v8018_v4, 0.0  ;;  %v8226_v26 = vmul.f32 %v8210_v33, %v8003_v59 }
 0x660   : > { %v9006_v18 = vrot.slane %v8958_v24, 7  ;;  %v9007_v46 = vrot.slane %v8959_v10, 7  ;;  %v8211_v28 = vmul.f32 %v8150_v57, %v8019_v60  ;;  %v8483_v51 = vmul.f32 %v8422_v38, %v8019_v60 }
 0x661   : > { %v8990_v16 = vsel %vm827_vm4, %v8974_v34, 0.0  ;;  %v8991_v22 = vsel %vm827_vm4, %v8975_v36, 0.0  ;;  %v8322_v3 = vadd.f32 %v15925_v56, %v8226_v26  ;;  %v8498_v6 = vmul.f32 %v8482_v54, %v8003_v59  ;;  %v8082_v12 = vpop.permute.xlu1 %8081 }
 0x662   : > { %v9022_v1 = vsel %vm830_vm5, %v9006_v18, 0.0  ;;  %v9023_v33 = vsel %vm830_vm5, %v9007_v46, 0.0  ;;  %v9038_v37 = vadd.f32 %v8990_v16, %v8686_v14  ;;  %v9039_v40 = vadd.f32 %v8991_v22, %v8687_v42 }
 0x663   : > { %v8307_v57 = vadd.f32 %v15854_v47, %v8211_v28  ;;  %v8579_v38 = vadd.f32 %v15857_v20, %v8483_v51  ;;  %v8594_v15 = vadd.f32 %v15927_v30, %v8498_v6  ;;  %v8755_v45 = vmul.f32 %v8694_v44, %v8019_v60  ;;  %v18612_v44 = vld [vmem:[#allocation105_spill] sm:$0xff] }
 0x664   : > { %v9054_v29 = vadd.f32 %v9038_v37, %v9022_v1  ;;  %v9055_v61 = vadd.f32 %v9039_v40, %v9023_v33  ;;  %v18611_v56 = vrot.slane %v15849_v19, %v18608_v49  ;;  %v8098_v50 = vsel %vm770_vm3, %v8082_v12, %v18604_v17  ;;  %v18614_v17 = vld [vmem:[#allocation98_spill] sm:$0xff]  ;;  %v9286_v33 = vld [vmem:[#allocation8 + $0xf0] ss:$0 sm:$0xff] }
 0x665   : > { %v8403_v42 = vadd.f32 %v15864_v25, %v8307_v57  ;;  %v8675_v47 = vadd.f32 %v15866_v39, %v8579_v38  ;;  %v8851_v20 = vadd.f32 %v15862_v13, %v8755_v45  ;;  %v8114_v30 = vsel %vm8050_vm6, %v8098_v50, 0.0  ;;  %v8080_v4 = vpop.permute.xlu1 %8079 }
 0x666   : > { %v8770_v54 = vmul.f32 %v18611_v56, %v8003_v59  ;;  %v9074_v14 = vadd.f32 %v18612_v44, %v9054_v29  ;;  %v9075_v52 = vadd.f32 %v18612_v44, %v9055_v61  ;;  %v18613_v58 = vrot.slane %v15849_v19, %v18502_v53 }
 0x667   : > { %v8947_v10 = vadd.f32 %v18614_v17, %v8851_v20  ;;  %v8963_v25 = vrot.slane %v8403_v42, 1  ;;  %v18615_v39 = vrot.slane %v15849_v19, %v18503_v5  ;;  %v8946_v11 = vmul.f32 %v9287_v31, %v8114_v30  ;;  %v9285_v19 = vld [vmem:[#allocation8 + $0xe8] ss:$0 sm:$0xff] }
 0x668   : > { %v8866_v49 = vadd.f32 %v15929_v55, %v8770_v54  ;;  %v8402_v24 = vmul.f32 %v18613_v58, %v8114_v30  ;;  %vm9090_vm2 = vcmp.ge.f32.partialorder %v9074_v14, 0.0  ;;  %vm9091_vm7 = vcmp.ge.f32.partialorder %v9075_v52, 0.0 }
 0x669   : > { %v8674_v13 = vmul.f32 %v18615_v39, %v8114_v30  ;;  %v9106_v59 = vmul.f32 0.4, %v9074_v14  ;;  %v9107_v32 = vmul.f32 0.4, %v9075_v52  ;;  %v8979_v55 = vsel %vm827_vm4, %v8963_v25, 0.0 }
 0x66a   : > { %v8995_v34 = vrot.slane %v8947_v10, 7  ;;  %v8418_v36 = vadd.f32 %v8402_v24, %v8322_v3  ;;  %v9027_v46 = vadd.f32 %v8979_v55, %v8675_v47  ;;  %v8962_v28 = vadd.f32 %v8946_v11, %v8866_v49 }
 0x66b   : > { %v8690_v60 = vadd.f32 %v8674_v13, %v8594_v15  ;;  %v9122_v26 = vsel %vm9090_vm2, %v9074_v14, %v9106_v59  ;;  %v9123_v18 = vsel %vm9091_vm7, %v9075_v52, %v9107_v32  ;;  %v8083_v22 = vsel %vm770_vm3, %v8080_v4, %v8082_v12 }
 0x66c   : > { %9138 = vst [vmem:[%s14585_s12 + $0x58] sm:$0xff] %v9122_v26  ;;  %9139 = vst [vmem:[%s14585_s12 + $0x60] sm:$0xff] %v9123_v18  ;;  %v9011_v51 = vsel %vm830_vm5, %v8995_v34, 0.0  ;;  %v8978_v16 = vrot.slane %v8418_v36, 1  ;;  %v8084_v6 = vsel %vm770_vm3, %v15975_v27, %v8080_v4  ;;  %v9010_v1 = vrot.slane %v8962_v28, 7 }
 0x66d   : > { %v9043_v3 = vadd.f32 %v9027_v46, %v9011_v51  ;;  %v18616_v37 = vrot.slane %v15859_v2, %v18502_v53  ;;  %v18617_v57 = vrot.slane %v15870_v7, %v18502_v53  ;;  %v8321_v15 = vadd.f32 %v15923_v23, %v15979_v9 }
 0x66e   : > { %v8865_v12 = vadd.f32 %v15940_v35, %v15990_v41  ;;  %v8994_v62 = vsel %vm827_vm4, %v8978_v16, 0.0  ;;  %v8944_v27 = vmul.f32 %v9285_v19, %v8084_v6  ;;  %v18618_v56 = vrot.slane %v15859_v2, %v18503_v5 }
 0x66f   : > { %v8400_v40 = vmul.f32 %v18616_v37, %v8084_v6  ;;  %v8401_v38 = vmul.f32 %v18617_v57, %v8083_v22  ;;  %v9063_v45 = vadd.f32 %v18612_v44, %v9043_v3  ;;  %v9042_v29 = vadd.f32 %v8994_v62, %v8690_v60 }
 0x670   : > { %v8672_v53 = vmul.f32 %v18618_v56, %v8084_v6  ;;  %v9026_v54 = vsel %vm830_vm5, %v9010_v1, 0.0  ;;  %v18619_v35 = vrot.slane %v15870_v7, %v18503_v5  ;;  %v8945_v41 = vmul.f32 %v9286_v33, %v8083_v22 }
 0x671   : > { %v8416_v61 = vadd.f32 %v8400_v40, %v15971_v0  ;;  %v8417_v23 = vadd.f32 %v8401_v38, %v8321_v15  ;;  %vm9079_vm3 = vcmp.ge.f32.partialorder %v9063_v45, 0.0  ;;  %v9095_v31 = vmul.f32 0.4, %v9063_v45 }
 0x672   : > { %v8673_v9 = vmul.f32 %v18619_v35, %v8083_v22  ;;  %v9058_v50 = vadd.f32 %v9042_v29, %v9026_v54  ;;  %v8960_v42 = vadd.f32 %v8944_v27, %v15977_v21  ;;  %v8593_v0 = vadd.f32 %v15937_v48, %v15988_v43 }
 0x673   : > { %v8961_v2 = vadd.f32 %v8945_v41, %v8865_v12  ;;  %v8976_v47 = vrot.slane %v8416_v61, 1  ;;  %v8977_v20 = vrot.slane %v8417_v23, 1  ;;  %v9111_v30 = vsel %vm9079_vm3, %v9063_v45, %v9095_v31 }
 0x674   : > { %v9078_v14 = vadd.f32 %v18612_v44, %v9058_v50  ;;  %v8688_v52 = vadd.f32 %v8672_v53, %v15973_v63  ;;  %v9008_v5 = vrot.slane %v8960_v42, 7  ;;  %9127 = vst [vmem:[%s14585_s12] sm:$0xff] %v9111_v30  ;;  %v8689_v7 = vadd.f32 %v8673_v9, %v8593_v0 }
 0x675   : > { %v8992_v49 = vsel %vm827_vm4, %v8976_v47, 0.0  ;;  %v8993_v48 = vsel %vm827_vm4, %v8977_v20, 0.0  ;;  %v9009_v21 = vrot.slane %v8961_v2, 7 }
 0x676   : > { %vm9094_vm8 = vcmp.ge.f32.partialorder %v9078_v14, 0.0  ;;  %v9110_v43 = vmul.f32 0.4, %v9078_v14  ;;  %v9040_v58 = vadd.f32 %v8992_v49, %v8688_v52  ;;  %v9024_v24 = vsel %vm830_vm5, %v9008_v5, 0.0 }
 0x677   : > { %v9041_v17 = vadd.f32 %v8993_v48, %v8689_v7  ;;  %v9025_v10 = vsel %vm830_vm5, %v9009_v21, 0.0 }
 0x678   : > { %v9126_v63 = vsel %vm9094_vm8, %v9078_v14, %v9110_v43  ;;  %v9056_v25 = vadd.f32 %v9040_v58, %v9024_v24 }
 0x679   : > { %9142 = vst [vmem:[%s14585_s12 + $0x78] sm:$0xff] %v9126_v63  ;;  %v9057_v39 = vadd.f32 %v9041_v17, %v9025_v10 }
 0x67a   : > { %v9076_v13 = vadd.f32 %v18612_v44, %v9056_v25 }
 0x67b   : > { %v9077_v11 = vadd.f32 %v18612_v44, %v9057_v39 }
 0x67c   : > { %vm9092_vm4 = vcmp.ge.f32.partialorder %v9076_v13, 0.0  ;;  %v9108_v59 = vmul.f32 0.4, %v9076_v13 }
 0x67d   : > { %vm9093_vm9 = vcmp.ge.f32.partialorder %v9077_v11, 0.0  ;;  %v9109_v32 = vmul.f32 0.4, %v9077_v11 }
 0x67e   : > { %v9124_v4 = vsel %vm9092_vm4, %v9076_v13, %v9108_v59 }
 0x67f   : > { %v9125_v8 = vsel %vm9093_vm9, %v9077_v11, %v9109_v32  ;;  %9140 = vst [vmem:[%s14585_s12 + $0x68] sm:$0xff] %v9124_v4 }
 0x680   : > { %9141 = vst [vmem:[%s14585_s12 + $0x70] sm:$0xff] %v9125_v8 }
 0x681   : > { %11176 = shalt.err (!%p11173_p13)
}
 0x682   : > { %s11177_s30 = scalar_lea.hbm %s16090_s7, 2048  ;;  %s11181_s10 = scalar_lea.hbm %s16142_s6, 4096 }
 0x683   : > { %p11178_p5 = scmp.ne.s32.totalorder %s16090_s7, %s11177_s30  ;;  %p11182_p11 = scmp.lt.u32.totalorder %s16090_s7, %s16142_s6 }
 0x684   : > { %p11183_p12 = scmp.lt.u32.totalorder %s11181_s10, %s11177_s30  ;;  %p11185_p1 = scmp.lt.u32.totalorder %s11177_s30, %s16090_s7 }
 0x685   : > { %p11179_p0 = pnand %p11178_p5, %p11423_p6 }
 0x686   : > { %p11184_p2 = por %p11183_p12, %p11182_p11 }
 0x687   : > { %p11180_p9 = pneg %p11179_p0 }
 0x688   : > { %p11186_p4 = por %p11185_p1, %p11184_p2 }
 0x68a   : > { %p11187_p8 = pnand %p11186_p4, %p11180_p9 }
 0x68c   : > { %11190 = shalt.err (!%p11187_p8)
}
 0x68d   : > { %10979 = dma.vmem_to_hbm [thread:$0]  (%p11423_p6), %s16092_s29, 2048, %s16090_s7, %s9144_s25  }
 0x68e PF: > { %s9170_s27 = sand.u32 1, %s11225_s21   ;;  %p18620_p3 = scmp.ne.s32.totalorder %s16936_s28, 0 }
 0x68f   : > { %p18621_p7 = scmp.ge.s32.totalorder %s11237_s24, 2  ;;  %s9171_s16 = scalar_lea.sflag [#allocation4], %s9170_s27 }
 0x691   : > { %p10996_p10 = pnand %p18621_p7, %p18620_p3 }
 0x693   : > { %11220 = dma.done.wait (!%p10996_p10), %s9171_s16, 2048  }
 0x694   : > { %11222 = vsyncadd (!%p10996_p10), %s9171_s16, 4294965248  ;;  %p21_p13 = scmp.ge.s32.totalorder %s11409_s18, 4   ;;  %s18622_s21 = smov %s11229_s22 }
 0x695   : > { %s18623_s22 = smov %s11233_s23  ;;  %s18624_s23 = smov %s11419_s11 }
 0x696   : > { %s18625_s24 = smov %s11409_s18  ;;  %23 = sbr.rel (!%p21_p13) target bundleno = 7 (0x7), region = 101 }
 0x69d   :  { %9176 = vsyncpa [#allocation3], 1 }
 0x69e   :  { %9178 = vsyncpa [#allocation3 + $0x1], 1 }
 0x69f   :  { %9179 = vsyncpa [#allocation6], 1 }
 0x6a0   :  { %9180 = vsyncpa [#allocation9], 1 }
 0x6a1   :  { %9181 = vsyncpa [#allocation4], 1 }
 0x6a2   :  { %9183 = vsyncpa [#allocation4 + $0x1], 1 }

</bundles_post_ra>
